<compile_context>
chip_gen: v7x
topology: tpu7x:2x2x1
jax: 0.10.0
libtpu: 0.0.40
codegen_flags: <defaults>
</compile_context>

<pallas_src>
import functools

import jax
import jax.numpy as jnp
from jax.experimental import pallas as pl
from jax.experimental.pallas import tpu as pltpu


LANE = 128
BN_EPS = 1e-3


def _round_up(x, m):
    return (x + m - 1) // m * m


# ----------------------------------------------------------------------------
# Pallas kernel: fused GEMM (bf16 x bf16 -> f32) + folded-BN bias + ReLU + mask
# ----------------------------------------------------------------------------
def _gemm_bias_relu_mask_kernel(x_ref, w_ref, b_ref, m_ref, o_ref):
    acc = jnp.dot(x_ref[...], w_ref[...], preferred_element_type=jnp.float32)
    out = jnp.maximum(acc + b_ref[...], 0.0) * m_ref[...]
    o_ref[...] = out.astype(o_ref.dtype)


def _choose_tm(M, tm_max):
    """Largest row tile (multiple of 8) <= tm_max that divides M exactly.

    Prefers an even block count (v7x has 2 TensorCores sharing a "parallel"
    grid axis) as long as that does not shrink the tile by more than 2x.
    Returns None when no exact divisor exists (caller handles the ragged
    tail without padding the patches in HBM).
    """
    first = None        # smallest valid block count (=> largest tile)
    first_even = None   # smallest valid even block count
    nb = 2
    while nb * 8 <= M:
        if M % nb == 0:
            tm = M // nb
            if tm <= tm_max and tm % 8 == 0:
                if first is None:
                    first = nb
                if nb % 2 == 0 and first_even is None:
                    first_even = nb
        if first is not None and (first_even is not None or nb >= 2 * first):
            break
        nb += 1
    if first is None:
        return None
    if first_even is not None and first_even <= 2 * first:
        return M // first_even
    return M // first


def _pallas_gemm(patches, w2d, bias, mask, tm, cout):
    """Exact-tiling Pallas call (tm divides patches.shape[0])."""
    M, K = patches.shape
    Cp = w2d.shape[1]
    cost = pl.CostEstimate(
        flops=2 * M * K * Cp,
        transcendentals=0,
        bytes_accessed=M * K * 2 + K * Cp * 2 + Cp * 4 + M * 4 + M * Cp * 2,
    )
    out = pl.pallas_call(
        _gemm_bias_relu_mask_kernel,
        out_shape=jax.ShapeDtypeStruct((M, Cp), jnp.bfloat16),
        grid=(M // tm,),
        in_specs=[
            pl.BlockSpec((tm, K), lambda i: (i, 0)),   # patches tile
            pl.BlockSpec((K, Cp), lambda i: (0, 0)),   # folded weights (resident)
            pl.BlockSpec((1, Cp), lambda i: (0, 0)),   # folded BN bias (resident)
            pl.BlockSpec((tm, 1), lambda i: (i, 0)),   # active-voxel mask
        ],
        out_specs=pl.BlockSpec((tm, Cp), lambda i: (i, 0)),
        compiler_params=pltpu.CompilerParams(
            dimension_semantics=("parallel",)),
        cost_estimate=cost,
    )(patches, w2d, bias, mask)
    return out[:, :cout]


def conv_bn_relu(patches, w2d, bias, mask, cout, *, tm_max=1792,
                 min_pallas_rows=256):
    """Fused (im2col) conv + folded BN + ReLU + active-site mask.

    patches: (M, K)  bf16  im2col rows (K = kd*kh*kw*Cin, tap-major).
    w2d:     (K, Cp) bf16  weights with BN scale folded, Cp = Cout padded to 128.
    bias:    (1, Cp) f32   folded BN bias (beta - mean*scale), zeros in padding.
    mask:    (M, 1)  f32   1.0 at active output voxels, 0.0 elsewhere.
    Returns  (M, cout) bf16.
    """
    M, _ = patches.shape

    def xla_path(p, m):
        acc = jnp.dot(p, w2d, preferred_element_type=jnp.float32)
        return (jnp.maximum(acc + bias, 0.0) * m)[:, :cout].astype(jnp.bfloat16)

    if M < min_pallas_rows:
        # Tiny late layers: one XLA dot beats Pallas launch/pipeline overhead.
        return xla_path(patches, mask)

    tm = _choose_tm(M, tm_max)
    if tm is not None:
        return _pallas_gemm(patches, w2d, bias, mask, tm, cout)

    # No exact divisor: Pallas on the largest whole-tile prefix, ragged tail
    # (< one tile) through the XLA-dot path.  Never pads/copies the patches
    # (the kernel's dominant HBM traffic) just to round up M.
    tm = max(8, min(tm_max, (M // 2) // 8 * 8))
    main = (M // tm) * tm
    out_main = _pallas_gemm(patches[:main], w2d, bias, mask[:main], tm, cout)
    if main == M:
        return out_main
    out_tail = xla_path(patches[main:], mask[main:])
    return jnp.concatenate([out_main, out_tail], axis=0)


# ----------------------------------------------------------------------------
# JAX glue: im2col patch extraction for a (strided) 3D conv, channels-last.
# ----------------------------------------------------------------------------
def extract_patches(x, ksize, stride, padding):
    """Returns ((N*Do*Ho*Wo, kd*kh*kw*C) patches, (N, Do, Ho, Wo)).

    Column order is tap-major / channel-minor, matching
    w.reshape(kd*kh*kw*Cin, Cout) for a weight of layout (kd, kh, kw, Cin, Cout).
    """
    kd, kh, kw = ksize
    sd, sh, sw = stride
    pd, ph, pw = padding
    N, D, H, W, C = x.shape
    Do = (D + 2 * pd - kd) // sd + 1
    Ho = (H + 2 * ph - kh) // sh + 1
    Wo = (W + 2 * pw - kw) // sw + 1
    xp = jnp.pad(x, ((0, 0), (pd, pd), (ph, ph), (pw, pw), (0, 0)))
    pieces = []
    for a in range(kd):
        for b in range(kh):
            for c in range(kw):
                pieces.append(
                    xp[:,
                       a:a + sd * (Do - 1) + 1:sd,
                       b:b + sh * (Ho - 1) + 1:sh,
                       c:c + sw * (Wo - 1) + 1:sw, :])
    patches = jnp.stack(pieces, axis=-2)          # (N, Do, Ho, Wo, taps, C)
    return patches.reshape(N * Do * Ho * Wo, kd * kh * kw * C), (N, Do, Ho, Wo)


# ----------------------------------------------------------------------------
# SpMiddleFHDPeople.middle_conv layer stack: (kind, Cout, kernel, stride, pad)
# ----------------------------------------------------------------------------
LAYERS = [
    ("subm",   16, (3, 3, 3), (1, 1, 1), (1, 1, 1)),   # SubMConv3d(Cin,16)  subm0
    ("subm",   16, (3, 3, 3), (1, 1, 1), (1, 1, 1)),   # SubMConv3d(16,16)   subm0
    ("spconv", 32, (3, 3, 3), (2, 2, 2), (1, 1, 1)),   # SpConv3d(16,32,3,2,p=1)
    ("subm",   32, (3, 3, 3), (1, 1, 1), (1, 1, 1)),   # SubMConv3d(32,32)   subm1
    ("subm",   32, (3, 3, 3), (1, 1, 1), (1, 1, 1)),   # SubMConv3d(32,32)   subm1
    ("spconv", 64, (3, 3, 3), (2, 2, 2), (0, 1, 1)),   # SpConv3d(32,64,3,2,p=[0,1,1])
    ("subm",   64, (3, 3, 3), (1, 1, 1), (1, 1, 1)),   # SubMConv3d(64,64)   subm2
    ("subm",   64, (3, 3, 3), (1, 1, 1), (1, 1, 1)),   # SubMConv3d(64,64)   subm2
    ("subm",   64, (3, 3, 3), (1, 1, 1), (1, 1, 1)),   # SubMConv3d(64,64)   subm2
    ("spconv", 64, (3, 1, 1), (2, 1, 1), (0, 0, 0)),   # SpConv3d(64,64,(3,1,1),(2,1,1))
]


def init_params(key, num_input_features):
    """Deterministic weights + eval-mode BN, folded for the kernel.

    Conv weight layout (kd, kh, kw, Cin, Cout) == torch weight.permute(2,3,4,1,0).
    BN (gamma, beta, running_mean, running_var, eps=1e-3) is folded into a
    per-channel scale (multiplied into the weights once) and a bias
    (= beta - mean*scale).  Weights/bias are zero-padded to 128 output lanes so
    the kernel's stores are unmasked; the wrapper slices the real Cout back.
    """
    params = []
    cin = num_input_features
    for _, cout, ks, _, _ in LAYERS:
        key, kw_, kg_, kb_, km_, kv_ = jax.random.split(key, 6)
        kd, kh, kw = ks
        w = 0.05 * jax.random.normal(kw_, (kd, kh, kw, cin, cout), jnp.float32)
        gamma = jax.random.uniform(kg_, (cout,), jnp.float32, 0.5, 1.5)
        beta = 0.1 * jax.random.normal(kb_, (cout,), jnp.float32)
        mean = 0.1 * jax.random.normal(km_, (cout,), jnp.float32)
        var = jax.random.uniform(kv_, (cout,), jnp.float32, 0.5, 1.5)
        scale = gamma / jnp.sqrt(var + BN_EPS)
        bias = beta - mean * scale
        w2d = (w * scale).reshape(kd * kh * kw * cin, cout)
        cp = _round_up(cout, LANE)
        w2d_p = jnp.zeros((w2d.shape[0], cp), jnp.float32)
        w2d_p = w2d_p.at[:, :cout].set(w2d).astype(jnp.bfloat16)
        bias_p = jnp.zeros((1, cp), jnp.float32).at[:, :cout].set(bias)
        params.append((w2d_p, bias_p))
        cin = cout
    return params


def sp_middle_fhd_people_forward(voxel_features, coors, batch_size, params,
                                 sparse_shape):
    D, H, W = sparse_shape
    c_in = voxel_features.shape[1]
    coors = coors.astype(jnp.int32)

    # SparseConvTensor scatter to dense, channels-last.  Duplicate coordinates
    # have undefined ordering (demo coords are unique; spconv keeps one copy).
    x = jnp.zeros((batch_size, D, H, W, c_in), jnp.bfloat16)
    x = x.at[coors[:, 0], coors[:, 1], coors[:, 2], coors[:, 3]].set(
        voxel_features.astype(jnp.bfloat16))
    # Active-voxel occupancy mask (drives SubMConv3d / sparse-output semantics).
    mask = jnp.zeros((batch_size, D, H, W, 1), jnp.float32)
    mask = mask.at[coors[:, 0], coors[:, 1], coors[:, 2], coors[:, 3], 0].set(1.0)

    for (w2d, bias), (kind, cout, ks, st, pad) in zip(params, LAYERS):
        patches, (N, Do, Ho, Wo) = extract_patches(x, ks, st, pad)
        if kind == "spconv":
            # New active set: an output site is active iff its receptive field
            # touches an active input (strided max-pool of the mask).
            mpatch, _ = extract_patches(mask, ks, st, pad)
            mask = jnp.max(mpatch, axis=1).reshape(N, Do, Ho, Wo, 1)
        out = conv_bn_relu(patches, w2d, bias, mask.reshape(-1, 1), cout)
        x = out.reshape(N, Do, Ho, Wo, cout)

    # .dense() is NCDHW; then ret.view(N, C*D, H, W).
    N, Df, Hf, Wf, Cf = x.shape
    ret = jnp.transpose(x, (0, 4, 1, 2, 3)).reshape(N, Cf * Df, Hf, Wf)
    return ret.astype(jnp.float32)


# ----------------------------------------------------------------------------
if __name__ == "__main__":
    key = jax.random.PRNGKey(0)

    # Small config consistent with the module: voxel_output_shape =
    # [batch, 20, 16, 16, C] -> sparse_shape = [21, 16, 16];
    # num_input_features = 16 (module default is 128; kept small for the demo).
    batch_size = 2
    num_input_features = 16
    sparse_shape = (21, 16, 16)
    num_voxels = 512

    key, k_feat, k_coor, k_param = jax.random.split(key, 4)
    voxel_features = jax.random.normal(
        k_feat, (num_voxels, num_input_features), jnp.float32)

    # Unique voxel coordinates (batch, z, y, x).
    total = batch_size * sparse_shape[0] * sparse_shape[1] * sparse_shape[2]
    flat = jax.random.permutation(k_coor, total)[:num_voxels]
    b, rem = jnp.divmod(flat, sparse_shape[0] * sparse_shape[1] * sparse_shape[2])
    z, rem = jnp.divmod(rem, sparse_shape[1] * sparse_shape[2])
    y, xw = jnp.divmod(rem, sparse_shape[2])
    coors = jnp.stack([b, z, y, xw], axis=1).astype(jnp.int32)

    params = init_params(k_param, num_input_features)

    fwd = jax.jit(functools.partial(
        sp_middle_fhd_people_forward, batch_size=batch_size, params=params,
        sparse_shape=sparse_shape))
    out = jax.block_until_ready(fwd(voxel_features, coors))

    # D: 21 -> 21 -> 21 -> 11 -> 11 -> 11 -> 5 -> 5 -> 5 -> 5 -> 2
    # H/W: 16 -> 8 -> 4 -> 4 ; C = 64  =>  ret = (N, 64*2, 4, 4)
    assert out.shape == (batch_size, 64 * 2, 4, 4), out.shape
    assert bool(jnp.all(jnp.isfinite(out)))
    print("KERNEL_OK")
</pallas_src>

<mosaic_0001>
module attributes {stable_mosaic.version = 11 : i64} {
  func.func @_gemm_bias_relu_mask_kernel(%arg0: i32, %arg1: memref<1792x432xbf16, #tpu.memory_space<vmem>>, %arg2: memref<432x128xbf16, #tpu.memory_space<vmem>>, %arg3: memref<1x128xf32, #tpu.memory_space<vmem>>, %arg4: memref<1792x1xf32, #tpu.memory_space<vmem>>, %arg5: memref<1792x128xbf16, #tpu.memory_space<vmem>>) attributes {dimension_semantics = [#tpu.dimension_semantics<parallel>], iteration_bounds = array<i64: 6>, scalar_prefetch = 0 : i64, scratch_operands = 0 : i64, tpu.core_type = #tpu.core_type<tc>, window_params = [{transform_indices = @transform_0, window_bounds = array<i64: 1792, 432>}, {pipeline_mode = #tpu.pipeline_mode<synchronous>, transform_indices = @transform_1, window_bounds = array<i64: 432, 128>}, {pipeline_mode = #tpu.pipeline_mode<synchronous>, transform_indices = @transform_2, window_bounds = array<i64: 1, 128>}, {transform_indices = @transform_3, window_bounds = array<i64: 1792, 1>}, {transform_indices = @transform_4, window_bounds = array<i64: 1792, 128>}]} {
    %c0 = arith.constant 0 : index
    %c0_0 = arith.constant 0 : index
    %0 = vector.load %arg1[%c0, %c0_0] : memref<1792x432xbf16, #tpu.memory_space<vmem>>, vector<1792x432xbf16>
    %c0_1 = arith.constant 0 : index
    %c0_2 = arith.constant 0 : index
    %1 = vector.load %arg2[%c0_1, %c0_2] : memref<432x128xbf16, #tpu.memory_space<vmem>>, vector<432x128xbf16>
    %cst = arith.constant dense<0.000000e+00> : vector<1792x128xf32>
    %2 = tpu.matmul %0, %1, %cst {dimension_numbers = #tpu.dot_dimension_numbers<[1], [0], [0], [1], [0, 0, 1, 1], [], []>} : vector<1792x432xbf16>, vector<432x128xbf16>, vector<1792x128xf32> -> vector<1792x128xf32>
    %c0_3 = arith.constant 0 : index
    %c0_4 = arith.constant 0 : index
    %3 = vector.load %arg3[%c0_3, %c0_4] : memref<1x128xf32, #tpu.memory_space<vmem>>, vector<1x128xf32>
    %4 = vector.broadcast %3 : vector<1x128xf32> to vector<1792x128xf32>
    %5 = arith.addf %2, %4 : vector<1792x128xf32>
    %cst_5 = arith.constant 0.000000e+00 : f32
    %6 = vector.broadcast %cst_5 : f32 to vector<1792x128xf32>
    %7 = arith.maximumf %5, %6 : vector<1792x128xf32>
    %c0_6 = arith.constant 0 : index
    %c0_7 = arith.constant 0 : index
    %8 = vector.load %arg4[%c0_6, %c0_7] : memref<1792x1xf32, #tpu.memory_space<vmem>>, vector<1792x1xf32>
    %9 = vector.broadcast %8 : vector<1792x1xf32> to vector<1792x128xf32>
    %10 = arith.mulf %7, %9 : vector<1792x128xf32>
    %11 = arith.truncf %10 : vector<1792x128xf32> to vector<1792x128xbf16>
    %c0_8 = arith.constant 0 : index
    %c0_9 = arith.constant 0 : index
    %12 = vector.load %arg5[%c0_8, %c0_9] : memref<1792x128xbf16, #tpu.memory_space<vmem>>, vector<1792x128xbf16>
    tpu.vector_store %arg5[%c0_8, %c0_9], %11 {strides = array<i32>} : memref<1792x128xbf16, #tpu.memory_space<vmem>>, vector<1792x128xbf16>,
    return
  }
  func.func @transform_0(%arg0: i32) -> (i32, i32) {
    %c0_i32 = arith.constant 0 : i32
    %c0_i32_0 = arith.constant 0 : i32
    return %arg0, %c0_i32 : i32, i32
  }
  func.func @transform_1(%arg0: i32) -> (i32, i32) {
    %c0_i32 = arith.constant 0 : i32
    %c0_i32_0 = arith.constant 0 : i32
    %c0_i32_1 = arith.constant 0 : i32
    return %c0_i32, %c0_i32_0 : i32, i32
  }
  func.func @transform_2(%arg0: i32) -> (i32, i32) {
    %c0_i32 = arith.constant 0 : i32
    %c0_i32_0 = arith.constant 0 : i32
    %c0_i32_1 = arith.constant 0 : i32
    return %c0_i32, %c0_i32_0 : i32, i32
  }
  func.func @transform_3(%arg0: i32) -> (i32, i32) {
    %c0_i32 = arith.constant 0 : i32
    %c0_i32_0 = arith.constant 0 : i32
    return %arg0, %c0_i32 : i32, i32
  }
  func.func @transform_4(%arg0: i32) -> (i32, i32) {
    %c0_i32 = arith.constant 0 : i32
    %c0_i32_0 = arith.constant 0 : i32
    return %arg0, %c0_i32 : i32, i32
  }
}

module attributes {stable_mosaic.version = 11 : i64} {
  func.func @_gemm_bias_relu_mask_kernel(%arg0: i32, %arg1: memref<704x432xbf16, #tpu.memory_space<vmem>>, %arg2: memref<432x128xbf16, #tpu.memory_space<vmem>>, %arg3: memref<1x128xf32, #tpu.memory_space<vmem>>, %arg4: memref<704x1xf32, #tpu.memory_space<vmem>>, %arg5: memref<704x128xbf16, #tpu.memory_space<vmem>>) attributes {dimension_semantics = [#tpu.dimension_semantics<parallel>], iteration_bounds = array<i64: 2>, scalar_prefetch = 0 : i64, scratch_operands = 0 : i64, tpu.core_type = #tpu.core_type<tc>, window_params = [{transform_indices = @transform_0, window_bounds = array<i64: 704, 432>}, {pipeline_mode = #tpu.pipeline_mode<synchronous>, transform_indices = @transform_1, window_bounds = array<i64: 432, 128>}, {pipeline_mode = #tpu.pipeline_mode<synchronous>, transform_indices = @transform_2, window_bounds = array<i64: 1, 128>}, {transform_indices = @transform_3, window_bounds = array<i64: 704, 1>}, {transform_indices = @transform_4, window_bounds = array<i64: 704, 128>}]} {
    %c0 = arith.constant 0 : index
    %c0_0 = arith.constant 0 : index
    %0 = vector.load %arg1[%c0, %c0_0] : memref<704x432xbf16, #tpu.memory_space<vmem>>, vector<704x432xbf16>
    %c0_1 = arith.constant 0 : index
    %c0_2 = arith.constant 0 : index
    %1 = vector.load %arg2[%c0_1, %c0_2] : memref<432x128xbf16, #tpu.memory_space<vmem>>, vector<432x128xbf16>
    %cst = arith.constant dense<0.000000e+00> : vector<704x128xf32>
    %2 = tpu.matmul %0, %1, %cst {dimension_numbers = #tpu.dot_dimension_numbers<[1], [0], [0], [1], [0, 0, 1, 1], [], []>} : vector<704x432xbf16>, vector<432x128xbf16>, vector<704x128xf32> -> vector<704x128xf32>
    %c0_3 = arith.constant 0 : index
    %c0_4 = arith.constant 0 : index
    %3 = vector.load %arg3[%c0_3, %c0_4] : memref<1x128xf32, #tpu.memory_space<vmem>>, vector<1x128xf32>
    %4 = vector.broadcast %3 : vector<1x128xf32> to vector<704x128xf32>
    %5 = arith.addf %2, %4 : vector<704x128xf32>
    %cst_5 = arith.constant 0.000000e+00 : f32
    %6 = vector.broadcast %cst_5 : f32 to vector<704x128xf32>
    %7 = arith.maximumf %5, %6 : vector<704x128xf32>
    %c0_6 = arith.constant 0 : index
    %c0_7 = arith.constant 0 : index
    %8 = vector.load %arg4[%c0_6, %c0_7] : memref<704x1xf32, #tpu.memory_space<vmem>>, vector<704x1xf32>
    %9 = vector.broadcast %8 : vector<704x1xf32> to vector<704x128xf32>
    %10 = arith.mulf %7, %9 : vector<704x128xf32>
    %11 = arith.truncf %10 : vector<704x128xf32> to vector<704x128xbf16>
    %c0_8 = arith.constant 0 : index
    %c0_9 = arith.constant 0 : index
    %12 = vector.load %arg5[%c0_8, %c0_9] : memref<704x128xbf16, #tpu.memory_space<vmem>>, vector<704x128xbf16>
    tpu.vector_store %arg5[%c0_8, %c0_9], %11 {strides = array<i32>} : memref<704x128xbf16, #tpu.memory_space<vmem>>, vector<704x128xbf16>,
    return
  }
  func.func @transform_0(%arg0: i32) -> (i32, i32) {
    %c0_i32 = arith.constant 0 : i32
    %c0_i32_0 = arith.constant 0 : i32
    return %arg0, %c0_i32 : i32, i32
  }
  func.func @transform_1(%arg0: i32) -> (i32, i32) {
    %c0_i32 = arith.constant 0 : i32
    %c0_i32_0 = arith.constant 0 : i32
    %c0_i32_1 = arith.constant 0 : i32
    return %c0_i32, %c0_i32_0 : i32, i32
  }
  func.func @transform_2(%arg0: i32) -> (i32, i32) {
    %c0_i32 = arith.constant 0 : i32
    %c0_i32_0 = arith.constant 0 : i32
    %c0_i32_1 = arith.constant 0 : i32
    return %c0_i32, %c0_i32_0 : i32, i32
  }
  func.func @transform_3(%arg0: i32) -> (i32, i32) {
    %c0_i32 = arith.constant 0 : i32
    %c0_i32_0 = arith.constant 0 : i32
    return %arg0, %c0_i32 : i32, i32
  }
  func.func @transform_4(%arg0: i32) -> (i32, i32) {
    %c0_i32 = arith.constant 0 : i32
    %c0_i32_0 = arith.constant 0 : i32
    return %arg0, %c0_i32 : i32, i32
  }
}

module attributes {stable_mosaic.version = 11 : i64} {
  func.func @_gemm_bias_relu_mask_kernel(%arg0: i32, %arg1: memref<704x864xbf16, #tpu.memory_space<vmem>>, %arg2: memref<864x128xbf16, #tpu.memory_space<vmem>>, %arg3: memref<1x128xf32, #tpu.memory_space<vmem>>, %arg4: memref<704x1xf32, #tpu.memory_space<vmem>>, %arg5: memref<704x128xbf16, #tpu.memory_space<vmem>>) attributes {dimension_semantics = [#tpu.dimension_semantics<parallel>], iteration_bounds = array<i64: 2>, scalar_prefetch = 0 : i64, scratch_operands = 0 : i64, tpu.core_type = #tpu.core_type<tc>, window_params = [{transform_indices = @transform_0, window_bounds = array<i64: 704, 864>}, {pipeline_mode = #tpu.pipeline_mode<synchronous>, transform_indices = @transform_1, window_bounds = array<i64: 864, 128>}, {pipeline_mode = #tpu.pipeline_mode<synchronous>, transform_indices = @transform_2, window_bounds = array<i64: 1, 128>}, {transform_indices = @transform_3, window_bounds = array<i64: 704, 1>}, {transform_indices = @transform_4, window_bounds = array<i64: 704, 128>}]} {
    %c0 = arith.constant 0 : index
    %c0_0 = arith.constant 0 : index
    %0 = vector.load %arg1[%c0, %c0_0] : memref<704x864xbf16, #tpu.memory_space<vmem>>, vector<704x864xbf16>
    %c0_1 = arith.constant 0 : index
    %c0_2 = arith.constant 0 : index
    %1 = vector.load %arg2[%c0_1, %c0_2] : memref<864x128xbf16, #tpu.memory_space<vmem>>, vector<864x128xbf16>
    %cst = arith.constant dense<0.000000e+00> : vector<704x128xf32>
    %2 = tpu.matmul %0, %1, %cst {dimension_numbers = #tpu.dot_dimension_numbers<[1], [0], [0], [1], [0, 0, 1, 1], [], []>} : vector<704x864xbf16>, vector<864x128xbf16>, vector<704x128xf32> -> vector<704x128xf32>
    %c0_3 = arith.constant 0 : index
    %c0_4 = arith.constant 0 : index
    %3 = vector.load %arg3[%c0_3, %c0_4] : memref<1x128xf32, #tpu.memory_space<vmem>>, vector<1x128xf32>
    %4 = vector.broadcast %3 : vector<1x128xf32> to vector<704x128xf32>
    %5 = arith.addf %2, %4 : vector<704x128xf32>
    %cst_5 = arith.constant 0.000000e+00 : f32
    %6 = vector.broadcast %cst_5 : f32 to vector<704x128xf32>
    %7 = arith.maximumf %5, %6 : vector<704x128xf32>
    %c0_6 = arith.constant 0 : index
    %c0_7 = arith.constant 0 : index
    %8 = vector.load %arg4[%c0_6, %c0_7] : memref<704x1xf32, #tpu.memory_space<vmem>>, vector<704x1xf32>
    %9 = vector.broadcast %8 : vector<704x1xf32> to vector<704x128xf32>
    %10 = arith.mulf %7, %9 : vector<704x128xf32>
    %11 = arith.truncf %10 : vector<704x128xf32> to vector<704x128xbf16>
    %c0_8 = arith.constant 0 : index
    %c0_9 = arith.constant 0 : index
    %12 = vector.load %arg5[%c0_8, %c0_9] : memref<704x128xbf16, #tpu.memory_space<vmem>>, vector<704x128xbf16>
    tpu.vector_store %arg5[%c0_8, %c0_9], %11 {strides = array<i32>} : memref<704x128xbf16, #tpu.memory_space<vmem>>, vector<704x128xbf16>,
    return
  }
  func.func @transform_0(%arg0: i32) -> (i32, i32) {
    %c0_i32 = arith.constant 0 : i32
    %c0_i32_0 = arith.constant 0 : i32
    return %arg0, %c0_i32 : i32, i32
  }
  func.func @transform_1(%arg0: i32) -> (i32, i32) {
    %c0_i32 = arith.constant 0 : i32
    %c0_i32_0 = arith.constant 0 : i32
    %c0_i32_1 = arith.constant 0 : i32
    return %c0_i32, %c0_i32_0 : i32, i32
  }
  func.func @transform_2(%arg0: i32) -> (i32, i32) {
    %c0_i32 = arith.constant 0 : i32
    %c0_i32_0 = arith.constant 0 : i32
    %c0_i32_1 = arith.constant 0 : i32
    return %c0_i32, %c0_i32_0 : i32, i32
  }
  func.func @transform_3(%arg0: i32) -> (i32, i32) {
    %c0_i32 = arith.constant 0 : i32
    %c0_i32_0 = arith.constant 0 : i32
    return %arg0, %c0_i32 : i32, i32
  }
  func.func @transform_4(%arg0: i32) -> (i32, i32) {
    %c0_i32 = arith.constant 0 : i32
    %c0_i32_0 = arith.constant 0 : i32
    return %arg0, %c0_i32 : i32, i32
  }
}

</mosaic_0001>

<bundles_post_ra>
// kernel: sp_middle_fhd_people_forward.5
= control target key start
LH: loop header
LB: loop body
LE: loop exit
PB: predicated region body
PF: predicated region fallthrough
CT: control target
= control target key end

     0   :  { %s11117_s15 = smov 0   ;;  %s12972_s0 = inlined_call_operand.vmem [shape: bf16[10752,432], index: 0, kind: input, shape index: {}]   ;;  %s12973_s1 = inlined_call_operand.vmem [shape: bf16[432,128], index: 1, kind: input, shape index: {}]   ;;  %s12974_s2 = inlined_call_operand.vmem [shape: f32[1,128], index: 2, kind: input, shape index: {}]   ;;  %s12975_s3 = inlined_call_operand.vmem [shape: f32[10752,1], index: 3, kind: input, shape index: {}]   ;;  %s12976_s4 = inlined_call_operand.vmem [shape: bf16[10752,128], index: 4, kind: output, shape index: {}]  }
   0x1 LB: > { %s8201_s16 = sadd.s32 4294967295, %s11089_s15   ;;  %p8205_p0 = scmp.ge.s32.totalorder %s11089_s15, 1  ;;  %s11089_s15 = sphi %s11117_s15, %s14_s15  }
   0x2   : > { %p175_p1 = scmp.lt.s32.totalorder %s11089_s15, 7 }
   0x4   : > { %p176_p2 = pnand %p8205_p0, %p175_p1 }
   0x6   : > { %179 = sbr.rel (%p176_p2) target bundleno = 1191 (0x4a7), region = 36 }
   0xd   : > { %v10379_v0 = vld [vmem:[%s12973_s1] sm:$0xff]   ;;  %v11091_v1 = vmov 0   ;;  %v10380_v2 = vld [vmem:[%s12973_s1 + $0x8] sm:$0xff]   ;;  %v10381_v4 = vld [vmem:[%s12973_s1 + $0x10] sm:$0xff]   ;;  %s207_s29 = smul.u32 224, %s8201_s16  ;;  %vm3026_vm0 = vcmask 392192  }
   0xe   : > { %3363 = vmatprep.subr.bf16.mxu1 %v11091_v1  ;;  %4292 = vmatprep.subr.bf16.mxu0 %v11091_v1  ;;  %v10384_v3 = vld [vmem:[%s12973_s1 + $0x80] sm:$0xff]   ;;  %v10386_v5 = vld [vmem:[%s12973_s1 + $0x88] sm:$0xff]   ;;  %v10382_v6 = vld [vmem:[%s12973_s1 + $0x18] sm:$0xff]  }
   0xf   : > { %3364 = vmatpush1.bf16.msra.mxu1 %v10379_v0  ;;  %10377 = vset.pattern.permute.xlu0 %v11091_v1  ;;  %v10388_v7 = vld [vmem:[%s12973_s1 + $0x90] sm:$0xff]   ;;  %v10383_v8 = vld [vmem:[%s12973_s1 + $0x20] sm:$0xff]   ;;  %p208_p3 = scmp.lt.s32.totalorder %s207_s29, 1343  ;;  %v10390_v9 = vld [vmem:[%s12973_s1 + $0x98] sm:$0xff]  }
  0x10   : > { %3365 = vmatprep.subr.bf16.mxu1 %v11091_v1  ;;  %10378 = vset.pattern.permute.xlu1 %v11091_v1  ;;  %v10385_v10 = vld [vmem:[%s12973_s1 + $0x28] sm:$0xff]   ;;  %v10392_v11 = vld [vmem:[%s12973_s1 + $0xa0] sm:$0xff]   ;;  %v10387_v12 = vld [vmem:[%s12973_s1 + $0x30] sm:$0xff]  }
  0x11   : > { %4293 = vmatpush1.bf16.msra.mxu0 %v10384_v3  ;;  %s13058_s29 = smov (!%p208_p3, %s207_s29), 1343  ;;  %v10394_v13 = vld [vmem:[%s12973_s1 + $0xa8] sm:$0xff]   ;;  %v10389_v14 = vld [vmem:[%s12973_s1 + $0x38] sm:$0xff]   ;;  %v10396_v15 = vld [vmem:[%s12973_s1 + $0xb0] sm:$0xff]  }
  0x12   : > { %4294 = vmatprep.subr.bf16.mxu0 %v11091_v1  ;;  %s9024_s17 = sshll.u32 %s13058_s29, 4  ;;  %v10391_v18 = vld [vmem:[%s12973_s1 + $0x40] sm:$0xff]   ;;  %v10398_v19 = vld [vmem:[%s12973_s1 + $0xb8] sm:$0xff]   ;;  %v10393_v20 = vld [vmem:[%s12973_s1 + $0x48] sm:$0xff]   ;;  %s8208_s24 = sshll.u32 %s13058_s29, 3 }
  0x13   : > { %3366 = vmatpush1.bf16.msra.mxu1 %v10380_v2  ;;  %s11185_s22 = scalar_lea.vmem %s12972_s0, %s9024_s17  ;;  %v10400_v21 = vld [vmem:[%s12973_s1 + $0xc0] sm:$0xff]   ;;  %v10395_v22 = vld [vmem:[%s12973_s1 + $0x50] sm:$0xff]   ;;  %v10402_v23 = vld [vmem:[%s12973_s1 + $0xc8] sm:$0xff]   ;;  %s11251_s30 = scalar_lea.vmem %s12975_s3, %s8208_s24 }
  0x14   : > { %3367 = vmatprep.subr.bf16.mxu1 %v11091_v1  ;;  %v10408_v16 = vld [vmem:[%s11185_s22 + $0xc] ss:$16 sps:$4 sm:$0xff]   ;;  %v10411_v17 = vld [vmem:[%s11185_s22 + $0x4] ss:$16 sps:$4 sm:$0xff]   ;;  %v10406_v27 = vld [vmem:[%s11185_s22 + $0x8] ss:$16 sps:$4 sm:$0xff]  }
  0x15   : > { %4295 = vmatpush1.bf16.msra.mxu0 %v10386_v5  ;;  %8686 = vmatprep.mubr.msk.bf16.mxu0 %vm3026_vm0, %v10408_v16  ;;  %v10397_v24 = vld [vmem:[%s12973_s1 + $0x58] sm:$0xff]   ;;  %v10404_v25 = vld [vmem:[%s12973_s1 + $0xd0] sm:$0xff]   ;;  %v10399_v26 = vld [vmem:[%s12973_s1 + $0x60] sm:$0xff]   ;;  %s8209_s9 = sshll.u32 %s13058_s29, 2 }
  0x16   : > { %4296 = vmatprep.subr.bf16.mxu0 %v11091_v1  ;;  %3395 = vmatprep.mubr.bf16.mxu1 %v10411_v17  ;;  %v10412_v28 = vld [vmem:[%s11185_s22 + $0x2c] ss:$16 sps:$4 sm:$0xff]   ;;  %v10403_v30 = vld [vmem:[%s12973_s1 + $0x70] sm:$0xff]   ;;  %v10416_v31 = vld [vmem:[%s11185_s22 + $0x28] ss:$16 sps:$4 sm:$0xff]   ;;  %s11640_s11 = scalar_lea.vmem %s12976_s4, %s8209_s9 }
  0x17   : > { %3368 = vmatpush1.bf16.msra.mxu1 %v10381_v4  ;;  %v10401_v29 = vld [vmem:[%s12973_s1 + $0x68] sm:$0xff]   ;;  %v10405_v33 = vld [vmem:[%s12973_s1 + $0x78] sm:$0xff]   ;;  %v5445_v34 = vld [vmem:[%s11251_s30] sm:$0xff] }
  0x18   : > { %3369 = vmatprep.subr.bf16.mxu1 %v11091_v1  ;;  %v10418_v32 = vld [vmem:[%s11185_s22 + $0x4c] ss:$16 sps:$4 sm:$0xff]   ;;  %v5447_v35 = vld [vmem:[%s11251_s30 + $0x10] sm:$0xff]  ;;  %5671 = vperm.xlu0 %10377, %v5445_v34   ;;  %v10422_v39 = vld [vmem:[%s11185_s22 + $0x48] ss:$16 sps:$4 sm:$0xff]  }
  0x19   : > { %4297 = vmatpush1.bf16.msra.mxu0 %v10388_v7  ;;  %v10409_v36 = vld [vmem:[%s11185_s22] ss:$16 sps:$4 sm:$0xff]   ;;  %5681 = vperm.xlu1 %10378, %v5447_v35   ;;  %v5446_v37 = vld [vmem:[%s11251_s30 + $0x8] sm:$0xff]  ;;  %v10414_v38 = vld [vmem:[%s11185_s22 + $0x24] ss:$16 sps:$4 sm:$0xff]  }
  0x1a   : > { %4298 = vmatprep.subr.bf16.mxu0 %v11091_v1  ;;  %v5448_v40 = vld [vmem:[%s11251_s30 + $0x18] sm:$0xff]  ;;  %v5450_v42 = vld [vmem:[%s11251_s30 + $0x28] sm:$0xff]  ;;  %v5449_v43 = vld [vmem:[%s11251_s30 + $0x20] sm:$0xff] }
  0x1b   : > { %3370 = vmatpush1.bf16.msra.mxu1 %v10382_v6  ;;  %v10424_v41 = vld [vmem:[%s11185_s22 + $0x6c] ss:$16 sps:$4 sm:$0xff]   ;;  %v10417_v44 = vld [vmem:[%s11185_s22 + $0x20] ss:$16 sps:$4 sm:$0xff]   ;;  %v10420_v47 = vld [vmem:[%s11185_s22 + $0x44] ss:$16 sps:$4 sm:$0xff]  }
  0x1c   : > { %3371 = vmatprep.subr.bf16.mxu1 %v11091_v1  ;;  %5676 = vperm.xlu0 %10377, %v5446_v37   ;;  %v5452_v45 = vld [vmem:[%s11251_s30 + $0x38] sm:$0xff]  ;;  %v5451_v46 = vld [vmem:[%s11251_s30 + $0x30] sm:$0xff]  ;;  %v5454_v50 = vld [vmem:[%s11251_s30 + $0x48] sm:$0xff] }
  0x1d   : > { %4299 = vmatpush1.bf16.msra.mxu0 %v10390_v9  ;;  %5686 = vperm.xlu1 %10378, %v5448_v40   ;;  %v10428_v48 = vld [vmem:[%s11185_s22 + $0x68] ss:$16 sps:$4 sm:$0xff]   ;;  %v10430_v49 = vld [vmem:[%s11185_s22 + $0x8c] ss:$16 sps:$4 sm:$0xff]   ;;  %v5453_v51 = vld [vmem:[%s11251_s30 + $0x40] sm:$0xff] }
  0x1e   : > { %4300 = vmatprep.subr.bf16.mxu0 %v11091_v1  ;;  %v10423_v52 = vld [vmem:[%s11185_s22 + $0x40] ss:$16 sps:$4 sm:$0xff]   ;;  %v5456_v53 = vld [vmem:[%s11251_s30 + $0x58] sm:$0xff]  ;;  %v10426_v55 = vld [vmem:[%s11185_s22 + $0x64] ss:$16 sps:$4 sm:$0xff]  }
  0x1f   : > { %3372 = vmatpush1.bf16.msra.mxu1 %v10383_v8  ;;  %v5455_v54 = vld [vmem:[%s11251_s30 + $0x50] sm:$0xff]  ;;  %v10434_v56 = vld [vmem:[%s11185_s22 + $0x88] ss:$16 sps:$4 sm:$0xff]   ;;  %v10436_v57 = vld [vmem:[%s11185_s22 + $0xac] ss:$16 sps:$4 sm:$0xff]  }
  0x20   : > { %3373 = vmatprep.subr.bf16.mxu1 %v11091_v1  ;;  %5691 = vperm.xlu0 %10377, %v5449_v43   ;;  %v5458_v58 = vld [vmem:[%s11251_s30 + $0x68] sm:$0xff]  ;;  %v5457_v59 = vld [vmem:[%s11251_s30 + $0x60] sm:$0xff]  ;;  %v5460_v61 = vld [vmem:[%s11251_s30 + $0x78] sm:$0xff] }
  0x21   : > { %4301 = vmatpush1.bf16.msra.mxu0 %v10392_v11  ;;  %5696 = vperm.xlu1 %10378, %v5450_v42   ;;  %v10429_v60 = vld [vmem:[%s11185_s22 + $0x60] ss:$16 sps:$4 sm:$0xff]   ;;  %v10432_v63 = vld [vmem:[%s11185_s22 + $0x84] ss:$16 sps:$4 sm:$0xff]   ;;  %v10440_v0 = vld [vmem:[%s11185_s22 + $0xa8] ss:$16 sps:$4 sm:$0xff]  }
  0x22   : > { %4302 = vmatprep.subr.bf16.mxu0 %v11091_v1  ;;  %v5459_v62 = vld [vmem:[%s11251_s30 + $0x70] sm:$0xff]  ;;  %v5462_v2 = vld [vmem:[%s11251_s30 + $0x88] sm:$0xff]  ;;  %v5461_v3 = vld [vmem:[%s11251_s30 + $0x80] sm:$0xff] }
  0x23   : > { %3374 = vmatpush1.bf16.msra.mxu1 %v10385_v10  ;;  %v10435_v4 = vld [vmem:[%s11185_s22 + $0x80] ss:$16 sps:$4 sm:$0xff]   ;;  %v5464_v5 = vld [vmem:[%s11251_s30 + $0x98] sm:$0xff]  ;;  %v10438_v7 = vld [vmem:[%s11185_s22 + $0xa4] ss:$16 sps:$4 sm:$0xff]  }
  0x24   : > { %3375 = vmatprep.subr.bf16.mxu1 %v11091_v1  ;;  %5701 = vperm.xlu0 %10377, %v5451_v46   ;;  %v5463_v6 = vld [vmem:[%s11251_s30 + $0x90] sm:$0xff]  ;;  %v10446_v8 = vld [vmem:[%s11185_s22 + $0xc8] ss:$16 sps:$4 sm:$0xff]   ;;  %v10448_v9 = vld [vmem:[%s11185_s22 + $0xec] ss:$16 sps:$4 sm:$0xff]  }
  0x25   : > { %4303 = vmatpush1.bf16.msra.mxu0 %v10394_v13  ;;  %5706 = vperm.xlu1 %10378, %v5452_v45   ;;  %v5466_v10 = vld [vmem:[%s11251_s30 + $0xa8] sm:$0xff]  ;;  %v5465_v11 = vld [vmem:[%s11251_s30 + $0xa0] sm:$0xff]  ;;  %v5468_v13 = vld [vmem:[%s11251_s30 + $0xb8] sm:$0xff] }
  0x26   : > { %4304 = vmatprep.subr.bf16.mxu0 %v11091_v1  ;;  %v10452_v16 = vld [vmem:[%s11185_s22 + $0xe8] ss:$16 sps:$4 sm:$0xff]   ;;  %v10454_v17 = vld [vmem:[%s11185_s22 + $0x10c] ss:$16 sps:$4 sm:$0xff]   ;;  %v5477_v35 = vld [vmem:[%s11251_s30 + $0x100] sm:$0xff] }
  0x27   : > { %3376 = vmatpush1.bf16.msra.mxu1 %v10387_v12  ;;  %v10441_v12 = vld [vmem:[%s11185_s22 + $0xa0] ss:$16 sps:$4 sm:$0xff]   ;;  %v5478_v34 = vld [vmem:[%s11251_s30 + $0x108] sm:$0xff]  ;;  %v5480_v37 = vld [vmem:[%s11251_s30 + $0x118] sm:$0xff] }
  0x28   : > { %3377 = vmatprep.subr.bf16.mxu1 %v11091_v1  ;;  %5711 = vperm.xlu0 %10377, %v5453_v51   ;;  %v10470_v40 = vld [vmem:[%s11185_s22 + $0x148] ss:$16 sps:$4 sm:$0xff]   ;;  %v5481_v43 = vld [vmem:[%s11251_s30 + $0x120] sm:$0xff]  ;;  %v5483_v46 = vld [vmem:[%s11251_s30 + $0x130] sm:$0xff] }
  0x29   : > { %4305 = vmatpush1.bf16.msra.mxu0 %v10396_v15  ;;  %5716 = vperm.xlu1 %10378, %v5454_v50   ;;  %v10444_v15 = vld [vmem:[%s11185_s22 + $0xc4] ss:$16 sps:$4 sm:$0xff]   ;;  %v5482_v42 = vld [vmem:[%s11251_s30 + $0x128] sm:$0xff]  ;;  %v5484_v45 = vld [vmem:[%s11251_s30 + $0x138] sm:$0xff] }
  0x2a   : > { %4306 = vmatprep.subr.bf16.mxu0 %v11091_v1  ;;  %v5486_v50 = vld [vmem:[%s11251_s30 + $0x148] sm:$0xff]  ;;  %v5485_v51 = vld [vmem:[%s11251_s30 + $0x140] sm:$0xff] }
  0x2b   : > { %3378 = vmatpush1.bf16.msra.mxu1 %v10389_v14  ;;  %v5467_v14 = vld [vmem:[%s11251_s30 + $0xb0] sm:$0xff] }
  0x2c   : > { %3379 = vmatprep.subr.bf16.mxu1 %v11091_v1  ;;  %5721 = vperm.xlu0 %10377, %v5455_v54   ;;  %v5487_v54 = vld [vmem:[%s11251_s30 + $0x150] sm:$0xff] }
  0x2d   : > { %4307 = vmatpush1.bf16.msra.mxu0 %v10398_v19  ;;  %5726 = vperm.xlu1 %10378, %v5456_v53   ;;  %v5469_v19 = vld [vmem:[%s11251_s30 + $0xc0] sm:$0xff]  ;;  %v5488_v53 = vld [vmem:[%s11251_s30 + $0x158] sm:$0xff] }
  0x2e   : > { %4308 = vmatprep.subr.bf16.mxu0 %v11091_v1 }
  0x2f   : > { %3380 = vmatpush1.bf16.msra.mxu1 %v10391_v18  ;;  %v5470_v18 = vld [vmem:[%s11251_s30 + $0xc8] sm:$0xff] }
  0x30   : > { %3381 = vmatprep.subr.bf16.mxu1 %v11091_v1  ;;  %5731 = vperm.xlu0 %10377, %v5457_v59   ;;  %v5489_v59 = vld [vmem:[%s11251_s30 + $0x160] sm:$0xff] }
  0x31   : > { %4309 = vmatpush1.bf16.msra.mxu0 %v10400_v21  ;;  %5736 = vperm.xlu1 %10378, %v5458_v58   ;;  %v5472_v21 = vld [vmem:[%s11251_s30 + $0xd8] sm:$0xff]  ;;  %v5490_v58 = vld [vmem:[%s11251_s30 + $0x168] sm:$0xff] }
  0x32   : > { %4310 = vmatprep.subr.bf16.mxu0 %v11091_v1 }
  0x33   : > { %3382 = vmatpush1.bf16.msra.mxu1 %v10393_v20  ;;  %v10447_v20 = vld [vmem:[%s11185_s22 + $0xc0] ss:$16 sps:$4 sm:$0xff]  }
  0x34   : > { %3383 = vmatprep.subr.bf16.mxu1 %v11091_v1  ;;  %5741 = vperm.xlu0 %10377, %v5459_v62   ;;  %v5491_v62 = vld [vmem:[%s11251_s30 + $0x170] sm:$0xff] }
  0x35   : > { %4311 = vmatpush1.bf16.msra.mxu0 %v10402_v23  ;;  %5746 = vperm.xlu1 %10378, %v5460_v61   ;;  %v10450_v23 = vld [vmem:[%s11185_s22 + $0xe4] ss:$16 sps:$4 sm:$0xff]   ;;  %v5492_v61 = vld [vmem:[%s11251_s30 + $0x178] sm:$0xff] }
  0x36   : > { %4312 = vmatprep.subr.bf16.mxu0 %v11091_v1 }
  0x37   : > { %3384 = vmatpush1.bf16.msra.mxu1 %v10395_v22  ;;  %v5471_v22 = vld [vmem:[%s11251_s30 + $0xd0] sm:$0xff] }
  0x38   : > { %3385 = vmatprep.subr.bf16.mxu1 %v11091_v1  ;;  %5751 = vperm.xlu0 %10377, %v5461_v3   ;;  %v5493_v3 = vld [vmem:[%s11251_s30 + $0x180] sm:$0xff] }
  0x39   : > { %4313 = vmatpush1.bf16.msra.mxu0 %v10404_v25  ;;  %5756 = vperm.xlu1 %10378, %v5462_v2   ;;  %v10460_v25 = vld [vmem:[%s11185_s22 + $0x12c] ss:$16 sps:$4 sm:$0xff]  }
  0x3a   : > { %v5494_v2 = vld [vmem:[%s11251_s30 + $0x188] sm:$0xff] }
  0x3b   : > { %3386 = vmatpush1.bf16.msra.mxu1 %v10397_v24  ;;  %v10458_v24 = vld [vmem:[%s11185_s22 + $0x108] ss:$16 sps:$4 sm:$0xff]  }
  0x3c   : > { %3387 = vmatprep.subr.bf16.mxu1 %v11091_v1  ;;  %4325 = vmatmul.mubr.bf16.vlgmr.msra.gmra.mrb[0].mxu0 %v10406_v27  ;;  %v5473_v27 = vld [vmem:[%s11251_s30 + $0xe0] sm:$0xff] }
  0x3d   : > { %8687 = vmatprep.mubr.msk.bf16.mxu0 %vm3026_vm0, %v10412_v28  ;;  %5766 = vperm.xlu1 %10378, %v5464_v5   ;;  %v10453_v28 = vld [vmem:[%s11185_s22 + $0xe0] ss:$16 sps:$4 sm:$0xff]   ;;  %v5496_v5 = vld [vmem:[%s11251_s30 + $0x198] sm:$0xff] }
  0x3e   : > { %5761 = vperm.xlu0 %10377, %v5463_v6   ;;  %v5495_v6 = vld [vmem:[%s11251_s30 + $0x190] sm:$0xff] }
  0x3f   : > { %3388 = vmatpush1.bf16.msra.mxu1 %v10399_v26  ;;  %v5474_v26 = vld [vmem:[%s11251_s30 + $0xe8] sm:$0xff] }
  0x40   : > { %3389 = vmatprep.subr.bf16.mxu1 %v11091_v1 }
  0x41   : > { %5776 = vperm.xlu1 %10378, %v5466_v10   ;;  %v5498_v10 = vld [vmem:[%s11251_s30 + $0x1a8] sm:$0xff] }
  0x42   : > { %5771 = vperm.xlu0 %10377, %v5465_v11   ;;  %v5497_v11 = vld [vmem:[%s11251_s30 + $0x1a0] sm:$0xff] }
  0x43   : > { %3390 = vmatpush1.bf16.msra.mxu1 %v10401_v29  ;;  %v5476_v29 = vld [vmem:[%s11251_s30 + $0xf8] sm:$0xff] }
  0x44   : > { %3391 = vmatprep.subr.bf16.mxu1 %v11091_v1  ;;  %4333 = vmatmul.mubr.bf16.gmra.mrb[4].mxu0 %v10416_v31  ;;  %v10456_v31 = vld [vmem:[%s11185_s22 + $0x104] ss:$16 sps:$4 sm:$0xff]  }
  0x45   : > { %8688 = vmatprep.mubr.msk.bf16.mxu0 %vm3026_vm0, %v10418_v32  ;;  %5786 = vperm.xlu1 %10378, %v5468_v13   ;;  %v10464_v32 = vld [vmem:[%s11185_s22 + $0x128] ss:$16 sps:$4 sm:$0xff]  }
  0x46   : > { %5781 = vperm.xlu0 %10377, %v5467_v14   ;;  %v5500_v13 = vld [vmem:[%s11251_s30 + $0x1b8] sm:$0xff]  ;;  %v5499_v14 = vld [vmem:[%s11251_s30 + $0x1b0] sm:$0xff] }
  0x47   : > { %3392 = vmatpush1.bf16.msra.mxu1 %v10403_v30  ;;  %v5475_v30 = vld [vmem:[%s11251_s30 + $0xf0] sm:$0xff] }
  0x48   : > { %3393 = vmatprep.subr.bf16.mxu1 %v11091_v1  ;;  %v10442_v1 = vld [vmem:[%s11185_s22 + $0xcc] ss:$16 sps:$4 sm:$0xff]  }
  0x49   : > { %5796 = vperm.xlu1 %10378, %v5470_v18   ;;  %v5502_v18 = vld [vmem:[%s11251_s30 + $0x1c8] sm:$0xff] }
  0x4a   : > { %5791 = vperm.xlu0 %10377, %v5469_v19   ;;  %v5501_v19 = vld [vmem:[%s11251_s30 + $0x1c0] sm:$0xff] }
  0x4b   : > { %3394 = vmatpush1.bf16.msra.mxu1 %v10405_v33  ;;  %v10466_v33 = vld [vmem:[%s11185_s22 + $0x14c] ss:$16 sps:$4 sm:$0xff]  }
  0x4c   : > { %4341 = vmatmul.mubr.bf16.gmra.mrb[8].mxu0 %v10422_v39  ;;  %v10462_v39 = vld [vmem:[%s11185_s22 + $0x124] ss:$16 sps:$4 sm:$0xff]  }
  0x4d   : > { %8689 = vmatprep.mubr.msk.bf16.mxu0 %vm3026_vm0, %v10424_v41  ;;  %5806 = vperm.xlu1 %10378, %v5472_v21   ;;  %v10472_v41 = vld [vmem:[%s11185_s22 + $0x16c] ss:$16 sps:$4 sm:$0xff]  }
  0x4e   : > { %3396 = vmatmul.mubr.bf16.vlgmr.msra.gmra.mrb[0].mxu1 %v10409_v36  ;;  %5801 = vperm.xlu0 %10377, %v5471_v22   ;;  %v10459_v36 = vld [vmem:[%s11185_s22 + $0x100] ss:$16 sps:$4 sm:$0xff]   ;;  %v5504_v21 = vld [vmem:[%s11251_s30 + $0x1d8] sm:$0xff] }
  0x4f   : > { %3403 = vmatprep.mubr.bf16.mxu1 %v10414_v38  ;;  %v5479_v38 = vld [vmem:[%s11251_s30 + $0x110] sm:$0xff] }
  0x50   : > { %v5503_v22 = vld [vmem:[%s11251_s30 + $0x1d0] sm:$0xff] }
  0x51   : > { %5816 = vperm.xlu1 %10378, %v5474_v26   ;;  %v5506_v26 = vld [vmem:[%s11251_s30 + $0x1e8] sm:$0xff] }
  0x52   : > { %5811 = vperm.xlu0 %10377, %v5473_v27   ;;  %v5505_v27 = vld [vmem:[%s11251_s30 + $0x1e0] sm:$0xff] }
  0x54   : > { %4349 = vmatmul.mubr.bf16.gmra.mrb[12].mxu0 %v10428_v48  ;;  %v10476_v48 = vld [vmem:[%s11185_s22 + $0x168] ss:$16 sps:$4 sm:$0xff]  }
  0x55   : > { %8690 = vmatprep.mubr.msk.bf16.mxu0 %vm3026_vm0, %v10430_v49  ;;  %5826 = vperm.xlu1 %10378, %v5476_v29   ;;  %v10478_v49 = vld [vmem:[%s11185_s22 + $0x18c] ss:$16 sps:$4 sm:$0xff]  }
  0x56   : > { %3404 = vmatmul.mubr.bf16.gmra.mrb[4].mxu1 %v10417_v44  ;;  %5821 = vperm.xlu0 %10377, %v5475_v30   ;;  %v10465_v44 = vld [vmem:[%s11185_s22 + $0x120] ss:$16 sps:$4 sm:$0xff]   ;;  %v5508_v29 = vld [vmem:[%s11251_s30 + $0x1f8] sm:$0xff] }
  0x57   : > { %3411 = vmatprep.mubr.bf16.mxu1 %v10420_v47  ;;  %v10468_v47 = vld [vmem:[%s11185_s22 + $0x144] ss:$16 sps:$4 sm:$0xff]  }
  0x58   : > { %v5507_v30 = vld [vmem:[%s11251_s30 + $0x1f0] sm:$0xff] }
  0x59   : > { %5836 = vperm.xlu1 %10378, %v5478_v34   ;;  %v5510_v34 = vld [vmem:[%s11251_s30 + $0x208] sm:$0xff] }
  0x5a   : > { %5831 = vperm.xlu0 %10377, %v5477_v35   ;;  %v5509_v35 = vld [vmem:[%s11251_s30 + $0x200] sm:$0xff] }
  0x5c   : > { %4357 = vmatmul.mubr.bf16.gmra.mrb[16].mxu0 %v10434_v56  ;;  %v10482_v56 = vld [vmem:[%s11185_s22 + $0x188] ss:$16 sps:$4 sm:$0xff]  }
  0x5d   : > { %8691 = vmatprep.mubr.msk.bf16.mxu0 %vm3026_vm0, %v10436_v57  ;;  %5846 = vperm.xlu1 %10378, %v5480_v37   ;;  %v10484_v57 = vld [vmem:[%s11185_s22 + $0x1ac] ss:$16 sps:$4 sm:$0xff]  }
  0x5e   : > { %3412 = vmatmul.mubr.bf16.gmra.mrb[8].mxu1 %v10423_v52  ;;  %5841 = vperm.xlu0 %10377, %v5479_v38   ;;  %v10471_v52 = vld [vmem:[%s11185_s22 + $0x140] ss:$16 sps:$4 sm:$0xff]  }
  0x5f   : > { %3419 = vmatprep.mubr.bf16.mxu1 %v10426_v55  ;;  %v10474_v55 = vld [vmem:[%s11185_s22 + $0x164] ss:$16 sps:$4 sm:$0xff]   ;;  %v10507_v38 = vld [vmem:[%s11185_s22 + $0x200] ss:$16 sps:$4 sm:$0xff]  }
  0x61   : > { %5856 = vperm.xlu1 %10378, %v5482_v42   ;;  %v10518_v42 = vld [vmem:[%s11185_s22 + $0x248] ss:$16 sps:$4 sm:$0xff]  }
  0x62   : > { %5851 = vperm.xlu0 %10377, %v5481_v43   ;;  %v10520_v43 = vld [vmem:[%s11185_s22 + $0x26c] ss:$16 sps:$4 sm:$0xff]  }
  0x64   : > { %4365 = vmatmul.mubr.bf16.gmra.mrb[20].mxu0 %v10440_v0  ;;  %v10488_v0 = vld [vmem:[%s11185_s22 + $0x1a8] ss:$16 sps:$4 sm:$0xff]  }
  0x65   : > { %8692 = vmatprep.mubr.msk.bf16.mxu0 %vm3026_vm0, %v10442_v1  ;;  %5866 = vperm.xlu1 %10378, %v5484_v45   ;;  %v10490_v1 = vld [vmem:[%s11185_s22 + $0x1cc] ss:$16 sps:$4 sm:$0xff]  }
  0x66   : > { %3420 = vmatmul.mubr.bf16.gmra.mrb[12].mxu1 %v10429_v60  ;;  %5861 = vperm.xlu0 %10377, %v5483_v46   ;;  %v10477_v60 = vld [vmem:[%s11185_s22 + $0x160] ss:$16 sps:$4 sm:$0xff]   ;;  %v5514_v46 = vld [vmem:[%s11251_s30 + $0x228] sm:$0xff] }
  0x67   : > { %3427 = vmatprep.mubr.bf16.mxu1 %v10432_v63  ;;  %v10480_v63 = vld [vmem:[%s11185_s22 + $0x184] ss:$16 sps:$4 sm:$0xff]  }
  0x69   : > { %5876 = vperm.xlu1 %10378, %v5486_v50   ;;  %v10513_v50 = vld [vmem:[%s11185_s22 + $0x220] ss:$16 sps:$4 sm:$0xff]  }
  0x6a   : > { %5871 = vperm.xlu0 %10377, %v5485_v51   ;;  %v5516_v51 = vld [vmem:[%s11251_s30 + $0x238] sm:$0xff] }
  0x6c   : > { %4373 = vmatmul.mubr.bf16.gmra.mrb[24].mxu0 %v10446_v8  ;;  %v10494_v8 = vld [vmem:[%s11185_s22 + $0x1c8] ss:$16 sps:$4 sm:$0xff]  }
  0x6d   : > { %8693 = vmatprep.mubr.msk.bf16.mxu0 %vm3026_vm0, %v10448_v9  ;;  %5886 = vperm.xlu1 %10378, %v5488_v53   ;;  %v10496_v9 = vld [vmem:[%s11185_s22 + $0x1ec] ss:$16 sps:$4 sm:$0xff]   ;;  %v10516_v53 = vld [vmem:[%s11185_s22 + $0x244] ss:$16 sps:$4 sm:$0xff]  }
  0x6e   : > { %3428 = vmatmul.mubr.bf16.gmra.mrb[16].mxu1 %v10435_v4  ;;  %5881 = vperm.xlu0 %10377, %v5487_v54   ;;  %v10483_v4 = vld [vmem:[%s11185_s22 + $0x180] ss:$16 sps:$4 sm:$0xff]   ;;  %v10524_v54 = vld [vmem:[%s11185_s22 + $0x268] ss:$16 sps:$4 sm:$0xff]  }
  0x6f   : > { %3435 = vmatprep.mubr.bf16.mxu1 %v10438_v7  ;;  %v10486_v7 = vld [vmem:[%s11185_s22 + $0x1a4] ss:$16 sps:$4 sm:$0xff]  }
  0x71   : > { %5896 = vperm.xlu1 %10378, %v5490_v58   ;;  %v5518_v58 = vld [vmem:[%s11251_s30 + $0x248] sm:$0xff] }
  0x72   : > { %5891 = vperm.xlu0 %10377, %v5489_v59   ;;  %v5517_v59 = vld [vmem:[%s11251_s30 + $0x240] sm:$0xff] }
  0x74   : > { %4381 = vmatmul.mubr.bf16.gmra.mrb[28].mxu0 %v10452_v16  ;;  %v10500_v16 = vld [vmem:[%s11185_s22 + $0x1e8] ss:$16 sps:$4 sm:$0xff]  }
  0x75   : > { %8694 = vmatprep.mubr.msk.bf16.mxu0 %vm3026_vm0, %v10454_v17  ;;  %5906 = vperm.xlu1 %10378, %v5492_v61   ;;  %v10502_v17 = vld [vmem:[%s11185_s22 + $0x20c] ss:$16 sps:$4 sm:$0xff]  }
  0x76   : > { %3436 = vmatmul.mubr.bf16.gmra.mrb[20].mxu1 %v10441_v12  ;;  %5901 = vperm.xlu0 %10377, %v5491_v62   ;;  %v10489_v12 = vld [vmem:[%s11185_s22 + $0x1a0] ss:$16 sps:$4 sm:$0xff]  }
  0x77   : > { %3443 = vmatprep.mubr.bf16.mxu1 %v10444_v15  ;;  %v10492_v15 = vld [vmem:[%s11185_s22 + $0x1c4] ss:$16 sps:$4 sm:$0xff]   ;;  %v10519_v62 = vld [vmem:[%s11185_s22 + $0x240] ss:$16 sps:$4 sm:$0xff]  }
  0x79   : > { %5916 = vperm.xlu1 %10378, %v5494_v2   ;;  %v10530_v2 = vld [vmem:[%s11185_s22 + $0x288] ss:$16 sps:$4 sm:$0xff]  }
  0x7a   : > { %5911 = vperm.xlu0 %10377, %v5493_v3   ;;  %v10532_v3 = vld [vmem:[%s11185_s22 + $0x2ac] ss:$16 sps:$4 sm:$0xff]  }
  0x7c   : > { %4389 = vmatmul.mubr.bf16.gmra.mrb[32].mxu0 %v10458_v24  ;;  %v10506_v24 = vld [vmem:[%s11185_s22 + $0x208] ss:$16 sps:$4 sm:$0xff]  }
  0x7d   : > { %8695 = vmatprep.mubr.msk.bf16.mxu0 %vm3026_vm0, %v10460_v25  ;;  %5926 = vperm.xlu1 %10378, %v5496_v5   ;;  %v10508_v25 = vld [vmem:[%s11185_s22 + $0x22c] ss:$16 sps:$4 sm:$0xff]  }
  0x7e   : > { %3444 = vmatmul.mubr.bf16.gmra.mrb[24].mxu1 %v10447_v20  ;;  %5921 = vperm.xlu0 %10377, %v5495_v6   ;;  %v10495_v20 = vld [vmem:[%s11185_s22 + $0x1c0] ss:$16 sps:$4 sm:$0xff]   ;;  %v5522_v6 = vld [vmem:[%s11251_s30 + $0x268] sm:$0xff] }
  0x7f   : > { %3451 = vmatprep.mubr.bf16.mxu1 %v10450_v23  ;;  %v10498_v23 = vld [vmem:[%s11185_s22 + $0x1e4] ss:$16 sps:$4 sm:$0xff]  }
  0x81   : > { %5936 = vperm.xlu1 %10378, %v5498_v10   ;;  %v10525_v10 = vld [vmem:[%s11185_s22 + $0x260] ss:$16 sps:$4 sm:$0xff]  }
  0x82   : > { %5931 = vperm.xlu0 %10377, %v5497_v11   ;;  %v5524_v11 = vld [vmem:[%s11251_s30 + $0x278] sm:$0xff] }
  0x84   : > { %4397 = vmatmul.mubr.bf16.gmra.mrb[36].mxu0 %v10464_v32  ;;  %v10512_v32 = vld [vmem:[%s11185_s22 + $0x228] ss:$16 sps:$4 sm:$0xff]  }
  0x85   : > { %8696 = vmatprep.mubr.msk.bf16.mxu0 %vm3026_vm0, %v10466_v33  ;;  %5946 = vperm.xlu1 %10378, %v5500_v13   ;;  %v10514_v33 = vld [vmem:[%s11185_s22 + $0x24c] ss:$16 sps:$4 sm:$0xff]   ;;  %v10528_v13 = vld [vmem:[%s11185_s22 + $0x284] ss:$16 sps:$4 sm:$0xff]  }
  0x86   : > { %3452 = vmatmul.mubr.bf16.gmra.mrb[28].mxu1 %v10453_v28  ;;  %5941 = vperm.xlu0 %10377, %v5499_v14   ;;  %v10501_v28 = vld [vmem:[%s11185_s22 + $0x1e0] ss:$16 sps:$4 sm:$0xff]   ;;  %v10536_v14 = vld [vmem:[%s11185_s22 + $0x2a8] ss:$16 sps:$4 sm:$0xff]  }
  0x87   : > { %3459 = vmatprep.mubr.bf16.mxu1 %v10456_v31  ;;  %v10504_v31 = vld [vmem:[%s11185_s22 + $0x204] ss:$16 sps:$4 sm:$0xff]  }
  0x89   : > { %5956 = vperm.xlu1 %10378, %v5502_v18   ;;  %v5526_v18 = vld [vmem:[%s11251_s30 + $0x288] sm:$0xff] }
  0x8a   : > { %5951 = vperm.xlu0 %10377, %v5501_v19   ;;  %v5525_v19 = vld [vmem:[%s11251_s30 + $0x280] sm:$0xff] }
  0x8c   : > { %4405 = vmatmul.mubr.bf16.gmra.mrb[40].mxu0 %v10470_v40  ;;  %v5511_v40 = vld [vmem:[%s11251_s30 + $0x210] sm:$0xff] }
  0x8d   : > { %8697 = vmatprep.mubr.msk.bf16.mxu0 %vm3026_vm0, %v10472_v41  ;;  %5966 = vperm.xlu1 %10378, %v5504_v21   ;;  %v10510_v41 = vld [vmem:[%s11185_s22 + $0x224] ss:$16 sps:$4 sm:$0xff]  }
  0x8e   : > { %3460 = vmatmul.mubr.bf16.gmra.mrb[32].mxu1 %v10459_v36  ;;  %5961 = vperm.xlu0 %10377, %v5503_v22   ;;  %v10531_v22 = vld [vmem:[%s11185_s22 + $0x280] ss:$16 sps:$4 sm:$0xff]  }
  0x8f   : > { %3467 = vmatprep.mubr.bf16.mxu1 %v10462_v39  ;;  %v5512_v39 = vld [vmem:[%s11251_s30 + $0x218] sm:$0xff] }
  0x91   : > { %5976 = vperm.xlu1 %10378, %v5506_v26   ;;  %v10542_v26 = vld [vmem:[%s11185_s22 + $0x2c8] ss:$16 sps:$4 sm:$0xff]  }
  0x92   : > { %5971 = vperm.xlu0 %10377, %v5505_v27   ;;  %v10544_v27 = vld [vmem:[%s11185_s22 + $0x2ec] ss:$16 sps:$4 sm:$0xff]  }
  0x94   : > { %4413 = vmatmul.mubr.bf16.gmra.mrb[44].mxu0 %v10476_v48 }
  0x95   : > { %8698 = vmatprep.mubr.msk.bf16.mxu0 %vm3026_vm0, %v10478_v49  ;;  %5986 = vperm.xlu1 %10378, %v5508_v29  }
  0x96   : > { %3468 = vmatmul.mubr.bf16.gmra.mrb[36].mxu1 %v10465_v44  ;;  %5981 = vperm.xlu0 %10377, %v5507_v30   ;;  %v5530_v30 = vld [vmem:[%s11251_s30 + $0x2a8] sm:$0xff] }
  0x97   : > { %3475 = vmatprep.mubr.bf16.mxu1 %v10468_v47  ;;  %v11404_v36 = vpop.permute.xlu0 %5671  ;;  %v5513_v47 = vld [vmem:[%s11251_s30 + $0x220] sm:$0xff] }
  0x98   : > { %v11406_v37 = vpop.permute.xlu1 %5681 }
  0x99   : > { %5996 = vperm.xlu1 %10378, %v5510_v34   ;;  %v10537_v34 = vld [vmem:[%s11185_s22 + $0x2a0] ss:$16 sps:$4 sm:$0xff]  }
  0x9a   : > { %5991 = vperm.xlu0 %10377, %v5509_v35   ;;  %v5532_v35 = vld [vmem:[%s11251_s30 + $0x2b8] sm:$0xff] }
  0x9b   : > { %v11414_v44 = vpop.permute.xlu0 %5676 }
  0x9c   : > { %4421 = vmatmul.mubr.bf16.gmra.mrb[48].mxu0 %v10482_v56  ;;  %v11416_v45 = vpop.permute.xlu1 %5686 }
  0x9d   : > { %8699 = vmatprep.mubr.msk.bf16.mxu0 %vm3026_vm0, %v10484_v57  ;;  %6006 = vperm.xlu1 %10378, %v5512_v39   ;;  %v10540_v39 = vld [vmem:[%s11185_s22 + $0x2c4] ss:$16 sps:$4 sm:$0xff]  }
  0x9e   : > { %3476 = vmatmul.mubr.bf16.gmra.mrb[40].mxu1 %v10471_v52  ;;  %6001 = vperm.xlu0 %10377, %v5511_v40   ;;  %v5515_v52 = vld [vmem:[%s11251_s30 + $0x230] sm:$0xff]  ;;  %v10548_v40 = vld [vmem:[%s11185_s22 + $0x2e8] ss:$16 sps:$4 sm:$0xff]  }
  0x9f   : > { %3483 = vmatprep.mubr.bf16.mxu1 %v10474_v55  ;;  %v11423_v49 = vpop.permute.xlu0 %5691  ;;  %v10526_v55 = vld [vmem:[%s11185_s22 + $0x28c] ss:$16 sps:$4 sm:$0xff]  }
  0xa0   : > { %v11421_v48 = vpop.permute.xlu1 %5696 }
  0xa1   : > { %6016 = vperm.xlu1 %10378, %v5514_v46   ;;  %v5534_v46 = vld [vmem:[%s11251_s30 + $0x2c8] sm:$0xff] }
  0xa2   : > { %6011 = vperm.xlu0 %10377, %v5513_v47   ;;  %v5533_v47 = vld [vmem:[%s11251_s30 + $0x2c0] sm:$0xff] }
  0xa3   : > { %v11433_v57 = vpop.permute.xlu0 %5701 }
  0xa4   : > { %4429 = vmatmul.mubr.bf16.gmra.mrb[52].mxu0 %v10488_v0  ;;  %v11431_v56 = vpop.permute.xlu1 %5706  ;;  %v5519_v0 = vld [vmem:[%s11251_s30 + $0x250] sm:$0xff] }
  0xa5   : > { %8700 = vmatprep.mubr.msk.bf16.mxu0 %vm3026_vm0, %v10490_v1  ;;  %6026 = vperm.xlu1 %10378, %v5516_v51   ;;  %v10522_v1 = vld [vmem:[%s11185_s22 + $0x264] ss:$16 sps:$4 sm:$0xff]  }
  0xa6   : > { %3484 = vmatmul.mubr.bf16.gmra.mrb[44].mxu1 %v10477_v60  ;;  %6021 = vperm.xlu0 %10377, %v5515_v52   ;;  %v10543_v52 = vld [vmem:[%s11185_s22 + $0x2c0] ss:$16 sps:$4 sm:$0xff]  }
  0xa7   : > { %3491 = vmatprep.mubr.bf16.mxu1 %v10480_v63  ;;  %v11440_v61 = vpop.permute.xlu0 %5711  ;;  %v5520_v63 = vld [vmem:[%s11251_s30 + $0x258] sm:$0xff] }
  0xa8   : > { %v11438_v60 = vpop.permute.xlu1 %5716 }
  0xa9   : > { %6036 = vperm.xlu1 %10378, %v5518_v58   ;;  %v10554_v58 = vld [vmem:[%s11185_s22 + $0x308] ss:$16 sps:$4 sm:$0xff]  }
  0xaa   : > { %6031 = vperm.xlu0 %10377, %v5517_v59   ;;  %v10556_v59 = vld [vmem:[%s11185_s22 + $0x32c] ss:$16 sps:$4 sm:$0xff]  }
  0xab   : > { %v11450_v5 = vpop.permute.xlu0 %5721 }
  0xac   : > { %4437 = vmatmul.mubr.bf16.gmra.mrb[56].mxu0 %v10494_v8 }
  0xad   : > { %8701 = vmatprep.mubr.msk.bf16.mxu0 %vm3026_vm0, %v10496_v9  ;;  %6046 = vperm.xlu1 %10378, %v5520_v63  }
  0xae   : > { %3492 = vmatmul.mubr.bf16.gmra.mrb[48].mxu1 %v10483_v4  ;;  %v11448_v4 = vpop.permute.xlu1 %5726  ;;  %6041 = vperm.xlu0 %10377, %v5519_v0   ;;  %v5538_v0 = vld [vmem:[%s11251_s30 + $0x2e8] sm:$0xff] }
  0xaf   : > { %3499 = vmatprep.mubr.bf16.mxu1 %v10486_v7  ;;  %v5521_v7 = vld [vmem:[%s11251_s30 + $0x260] sm:$0xff]  ;;  %v11457_v9 = vpop.permute.xlu0 %5731 }
  0xb1   : > { %6056 = vperm.xlu1 %10378, %v5522_v6   ;;  %v10549_v6 = vld [vmem:[%s11185_s22 + $0x2e0] ss:$16 sps:$4 sm:$0xff]  }
  0xb2   : > { %v11455_v8 = vpop.permute.xlu1 %5736  ;;  %6051 = vperm.xlu0 %10377, %v5521_v7   ;;  %v5540_v7 = vld [vmem:[%s11251_s30 + $0x2f8] sm:$0xff] }
  0xb4   : > { %4445 = vmatmul.mubr.bf16.gmra.mrb[60].mxu0 %v10500_v16 }
  0xb5   : > { %8702 = vmatprep.mubr.msk.bf16.mxu0 %vm3026_vm0, %v10502_v17  ;;  %v11467_v17 = vpop.permute.xlu0 %5741  ;;  %6066 = vperm.xlu1 %10378, %v5524_v11   ;;  %v10552_v11 = vld [vmem:[%s11185_s22 + $0x304] ss:$16 sps:$4 sm:$0xff]  }
  0xb6   : > { %3500 = vmatmul.mubr.bf16.gmra.mrb[52].mxu1 %v10489_v12  ;;  %v5523_v12 = vld [vmem:[%s11251_s30 + $0x270] sm:$0xff]  ;;  %v11465_v16 = vpop.permute.xlu1 %5746 }
  0xb7   : > { %3507 = vmatprep.mubr.bf16.mxu1 %v10492_v15  ;;  %v10538_v15 = vld [vmem:[%s11185_s22 + $0x2cc] ss:$16 sps:$4 sm:$0xff]   ;;  %6061 = vperm.xlu0 %10377, %v5523_v12   ;;  %v10560_v12 = vld [vmem:[%s11185_s22 + $0x328] ss:$16 sps:$4 sm:$0xff]  }
  0xb9   : > { %v11474_v21 = vpop.permute.xlu0 %5751  ;;  %6076 = vperm.xlu1 %10378, %v5526_v18   ;;  %v5542_v18 = vld [vmem:[%s11251_s30 + $0x308] sm:$0xff] }
  0xbb   : > { %6071 = vperm.xlu0 %10377, %v5525_v19   ;;  %v5541_v19 = vld [vmem:[%s11251_s30 + $0x300] sm:$0xff] }
  0xbc   : > { %4453 = vmatmul.mubr.bf16.gmra.mrb[64].mxu0 %v10506_v24  ;;  %v5527_v24 = vld [vmem:[%s11251_s30 + $0x290] sm:$0xff] }
  0xbd   : > { %8703 = vmatprep.mubr.msk.bf16.mxu0 %vm3026_vm0, %v10508_v25  ;;  %v10534_v25 = vld [vmem:[%s11185_s22 + $0x2a4] ss:$16 sps:$4 sm:$0xff]   ;;  %v11484_v29 = vpop.permute.xlu0 %5761 }
  0xbe   : > { %3508 = vmatmul.mubr.bf16.gmra.mrb[56].mxu1 %v10495_v20  ;;  %v11472_v20 = vpop.permute.xlu1 %5756 }
  0xbf   : > { %3515 = vmatprep.mubr.bf16.mxu1 %v10498_v23  ;;  %v5528_v23 = vld [vmem:[%s11251_s30 + $0x298] sm:$0xff]  ;;  %6081 = vperm.xlu0 %10377, %v5527_v24   ;;  %v10555_v24 = vld [vmem:[%s11185_s22 + $0x300] ss:$16 sps:$4 sm:$0xff]  }
  0xc0   : > { %6086 = vperm.xlu1 %10378, %v5528_v23  }
  0xc4   : > { %4461 = vmatmul.mubr.bf16.gmra.mrb[68].mxu0 %v10512_v32  ;;  %6096 = vperm.xlu1 %10378, %v5530_v30   ;;  %v10566_v30 = vld [vmem:[%s11185_s22 + $0x348] ss:$16 sps:$4 sm:$0xff]  }
  0xc5   : > { %8704 = vmatprep.mubr.msk.bf16.mxu0 %vm3026_vm0, %v10514_v33  ;;  %v11491_v33 = vpop.permute.xlu0 %5771 }
  0xc6   : > { %3516 = vmatmul.mubr.bf16.gmra.mrb[60].mxu1 %v10501_v28  ;;  %v11482_v28 = vpop.permute.xlu1 %5766 }
  0xc7   : > { %3523 = vmatprep.mubr.bf16.mxu1 %v10504_v31  ;;  %v5529_v31 = vld [vmem:[%s11251_s30 + $0x2a0] sm:$0xff] }
  0xc8   : > { %6091 = vperm.xlu0 %10377, %v5529_v31   ;;  %6106 = vperm.xlu1 %10378, %v5532_v35   ;;  %v10568_v31 = vld [vmem:[%s11185_s22 + $0x36c] ss:$16 sps:$4 sm:$0xff]  }
  0xca   : > { %v11489_v32 = vpop.permute.xlu1 %5776 }
  0xcc   : > { %4469 = vmatmul.mubr.bf16.gmra.mrb[72].mxu0 %v10518_v42  ;;  %6116 = vperm.xlu1 %10378, %v5534_v46   ;;  %v10561_v46 = vld [vmem:[%s11185_s22 + $0x320] ss:$16 sps:$4 sm:$0xff]  }
  0xcd   : > { %8705 = vmatprep.mubr.msk.bf16.mxu0 %vm3026_vm0, %v10520_v43  ;;  %v11501_v43 = vpop.permute.xlu0 %5781 }
  0xce   : > { %3524 = vmatmul.mubr.bf16.gmra.mrb[64].mxu1 %v10507_v38  ;;  %v5531_v38 = vld [vmem:[%s11251_s30 + $0x2b0] sm:$0xff]  ;;  %v11499_v42 = vpop.permute.xlu1 %5786 }
  0xcf   : > { %3531 = vmatprep.mubr.bf16.mxu1 %v10510_v41  ;;  %v10550_v41 = vld [vmem:[%s11185_s22 + $0x30c] ss:$16 sps:$4 sm:$0xff]   ;;  %6101 = vperm.xlu0 %10377, %v5531_v38  }
  0xd0   : > { %v5546_v38 = vld [vmem:[%s11251_s30 + $0x328] sm:$0xff] }
  0xd1   : > { %v11508_v51 = vpop.permute.xlu0 %5791 }
  0xd3   : > { %6111 = vperm.xlu0 %10377, %v5533_v47   ;;  %v5548_v47 = vld [vmem:[%s11251_s30 + $0x338] sm:$0xff] }
  0xd4   : > { %4477 = vmatmul.mubr.bf16.gmra.mrb[76].mxu0 %v10524_v54  ;;  %v5535_v54 = vld [vmem:[%s11251_s30 + $0x2d0] sm:$0xff] }
  0xd5   : > { %8706 = vmatprep.mubr.msk.bf16.mxu0 %vm3026_vm0, %v10526_v55  ;;  %v10546_v55 = vld [vmem:[%s11185_s22 + $0x2e4] ss:$16 sps:$4 sm:$0xff]   ;;  %v11518_v63 = vpop.permute.xlu0 %5801 }
  0xd6   : > { %3532 = vmatmul.mubr.bf16.gmra.mrb[68].mxu1 %v10513_v50  ;;  %v11506_v50 = vpop.permute.xlu1 %5796 }
  0xd7   : > { %3539 = vmatprep.mubr.bf16.mxu1 %v10516_v53  ;;  %v5536_v53 = vld [vmem:[%s11251_s30 + $0x2d8] sm:$0xff]  ;;  %6121 = vperm.xlu0 %10377, %v5535_v54   ;;  %v10564_v54 = vld [vmem:[%s11185_s22 + $0x344] ss:$16 sps:$4 sm:$0xff]  }
  0xd8   : > { %6126 = vperm.xlu1 %10378, %v5536_v53   ;;  %v5547_v53 = vld [vmem:[%s11251_s30 + $0x330] sm:$0xff] }
  0xdc   : > { %4485 = vmatmul.mubr.bf16.gmra.mrb[80].mxu0 %v10530_v2  ;;  %6136 = vperm.xlu1 %10378, %v5538_v0   ;;  %v10574_v0 = vld [vmem:[%s11185_s22 + $0x38c] ss:$16 sps:$4 sm:$0xff]  }
  0xdd   : > { %8707 = vmatprep.mubr.msk.bf16.mxu0 %vm3026_vm0, %v10532_v3  ;;  %v11525_v3 = vpop.permute.xlu0 %5811 }
  0xde   : > { %3540 = vmatmul.mubr.bf16.gmra.mrb[72].mxu1 %v10519_v62  ;;  %v11516_v62 = vpop.permute.xlu1 %5806 }
  0xdf   : > { %3547 = vmatprep.mubr.bf16.mxu1 %v10522_v1  ;;  %v5537_v1 = vld [vmem:[%s11251_s30 + $0x2e0] sm:$0xff] }
  0xe0   : > { %6131 = vperm.xlu0 %10377, %v5537_v1   ;;  %6146 = vperm.xlu1 %10378, %v5540_v7  }
  0xe2   : > { %v11523_v2 = vpop.permute.xlu1 %5816 }
  0xe4   : > { %4493 = vmatmul.mubr.bf16.gmra.mrb[84].mxu0 %v10536_v14  ;;  %6156 = vperm.xlu1 %10378, %v5542_v18  }
  0xe5   : > { %8708 = vmatprep.mubr.msk.bf16.mxu0 %vm3026_vm0, %v10538_v15  ;;  %v11535_v15 = vpop.permute.xlu0 %5821 }
  0xe6   : > { %3548 = vmatmul.mubr.bf16.gmra.mrb[76].mxu1 %v10525_v10  ;;  %v5539_v10 = vld [vmem:[%s11251_s30 + $0x2f0] sm:$0xff]  ;;  %v11533_v14 = vpop.permute.xlu1 %5826 }
  0xe7   : > { %3555 = vmatprep.mubr.bf16.mxu1 %v10528_v13  ;;  %v10562_v13 = vld [vmem:[%s11185_s22 + $0x34c] ss:$16 sps:$4 sm:$0xff]   ;;  %6141 = vperm.xlu0 %10377, %v5539_v10  }
  0xe8   : > { %v5550_v10 = vld [vmem:[%s11251_s30 + $0x348] sm:$0xff] }
  0xe9   : > { %v11542_v23 = vpop.permute.xlu0 %5831 }
  0xeb   : > { %6151 = vperm.xlu0 %10377, %v5541_v19   ;;  %v5552_v19 = vld [vmem:[%s11251_s30 + $0x358] sm:$0xff] }
  0xec   : > { %4501 = vmatmul.mubr.bf16.gmra.mrb[88].mxu0 %v10542_v26  ;;  %v5543_v26 = vld [vmem:[%s11251_s30 + $0x310] sm:$0xff] }
  0xed   : > { %8709 = vmatprep.mubr.msk.bf16.mxu0 %vm3026_vm0, %v10544_v27  ;;  %v10558_v27 = vld [vmem:[%s11185_s22 + $0x324] ss:$16 sps:$4 sm:$0xff]   ;;  %v11552_v35 = vpop.permute.xlu0 %5841 }
  0xee   : > { %3556 = vmatmul.mubr.bf16.gmra.mrb[80].mxu1 %v10531_v22  ;;  %v11540_v22 = vpop.permute.xlu1 %5836 }
  0xef   : > { %3563 = vmatprep.mubr.bf16.mxu1 %v10534_v25  ;;  %v5544_v25 = vld [vmem:[%s11251_s30 + $0x318] sm:$0xff]  ;;  %6161 = vperm.xlu0 %10377, %v5543_v26   ;;  %v10570_v26 = vld [vmem:[%s11185_s22 + $0x364] ss:$16 sps:$4 sm:$0xff]  }
  0xf0   : > { %6166 = vperm.xlu1 %10378, %v5544_v25   ;;  %v5551_v25 = vld [vmem:[%s11251_s30 + $0x350] sm:$0xff] }
  0xf4   : > { %4509 = vmatmul.mubr.bf16.gmra.mrb[92].mxu0 %v10548_v40  ;;  %6176 = vperm.xlu1 %10378, %v5546_v38   ;;  %v10580_v38 = vld [vmem:[%s11185_s22 + $0x3ac] ss:$16 sps:$4 sm:$0xff]  }
  0xf5   : > { %8710 = vmatprep.mubr.msk.bf16.mxu0 %vm3026_vm0, %v10550_v41  ;;  %v11559_v41 = vpop.permute.xlu0 %5851 }
  0xf6   : > { %3564 = vmatmul.mubr.bf16.gmra.mrb[84].mxu1 %v10537_v34  ;;  %v11550_v34 = vpop.permute.xlu1 %5846 }
  0xf7   : > { %3571 = vmatprep.mubr.bf16.mxu1 %v10540_v39  ;;  %v5545_v39 = vld [vmem:[%s11251_s30 + $0x320] sm:$0xff] }
  0xf8   : > { %6171 = vperm.xlu0 %10377, %v5545_v39   ;;  %6186 = vperm.xlu1 %10378, %v5548_v47  }
  0xf9   : > { %v11571_v7 = vpop.permute.xlu0 %5861 }
  0xfa   : > { %v11557_v40 = vpop.permute.xlu1 %5856 }
  0xfc   : > { %4517 = vmatmul.mubr.bf16.gmra.mrb[96].mxu0 %v10554_v58  ;;  %v10572_v58 = vld [vmem:[%s11185_s22 + $0x368] ss:$16 sps:$4 sm:$0xff]   ;;  %6181 = vperm.xlu0 %10377, %v5547_v53  }
  0xfd   : > { %8711 = vmatprep.mubr.msk.bf16.mxu0 %vm3026_vm0, %v10556_v59  ;;  %v11579_v18 = vpop.permute.xlu0 %5871  ;;  %6196 = vperm.xlu1 %10378, %v5550_v10  }
  0xfe   : > { %3572 = vmatmul.mubr.bf16.gmra.mrb[88].mxu1 %v10543_v52  ;;  %v11569_v1 = vpop.permute.xlu1 %5866  ;;  %12978 = vst [vmem:[#allocation3_spill] sm:$0xff] %v11579_v18  ;;  %v5558_v18 = vld [vmem:[%s11251_s30 + $0x388] sm:$0xff] }
  0xff   : > { %3579 = vmatprep.mubr.bf16.mxu1 %v10546_v55 }
 0x101   : > { %v11597_v53 = vpop.permute.xlu0 %5881  ;;  %6206 = vperm.xlu1 %10378, %v5552_v19   ;;  %v10573_v19 = vld [vmem:[%s11185_s22 + $0x360] ss:$16 sps:$4 sm:$0xff]  }
 0x102   : > { %12980 = vst [vmem:[#allocation5_spill] sm:$0xff] %v11597_v53 }
 0x104   : > { %4525 = vmatmul.mubr.bf16.gmra.mrb[100].mxu0 %v10560_v12  ;;  %v11576_v12 = vpop.permute.xlu1 %5876 }
 0x105   : > { %8712 = vmatprep.mubr.msk.bf16.mxu0 %vm3026_vm0, %v10562_v13  ;;  %12977 = vst [vmem:[#allocation2_spill] sm:$0xff] %v11576_v12  ;;  %v10567_v13 = vld [vmem:[%s11185_s22 + $0x340] ss:$16 sps:$4 sm:$0xff]  }
 0x106   : > { %3580 = vmatmul.mubr.bf16.gmra.mrb[92].mxu1 %v10549_v6 }
 0x107   : > { %3587 = vmatprep.mubr.bf16.mxu1 %v10552_v11  ;;  %v5549_v11 = vld [vmem:[%s11251_s30 + $0x340] sm:$0xff] }
 0x108   : > { %6191 = vperm.xlu0 %10377, %v5549_v11   ;;  %v11590_v39 = vpop.permute.xlu1 %5886 }
 0x109   : > { %12979 = vst [vmem:[#allocation4_spill] sm:$0xff] %v11590_v39 }
 0x10c   : > { %4533 = vmatmul.mubr.bf16.gmra.mrb[104].mxu0 %v10566_v30  ;;  %v10578_v30 = vld [vmem:[%s11185_s22 + $0x388] ss:$16 sps:$4 sm:$0xff]   ;;  %6201 = vperm.xlu0 %10377, %v5551_v25  }
 0x10d   : > { %8713 = vmatprep.mubr.msk.bf16.mxu0 %vm3026_vm0, %v10568_v31 }
 0x10e   : > { %3588 = vmatmul.mubr.bf16.gmra.mrb[96].mxu1 %v10555_v24 }
 0x10f   : > { %3595 = vmatprep.mubr.bf16.mxu1 %v10558_v27  ;;  %v4326_v52 = vpop.f32.mrb[0].mxu0 }
 0x110   : > { %v4328_v55 = vpop.f32.mrb[1].mxu0 }
 0x111   : > { %v11566_v59 = vpop.f32.mrb[2].mxu0  ;;  %v5553_v55 = vld [vmem:[%s11251_s30 + $0x360] sm:$0xff] }
 0x112   : > { %v4331_v6 = vpop.f32.mrb[3].mxu0  ;;  %6211 = vperm.xlu0 %10377, %v5553_v55  }
 0x113   : > { %v11604_v6 = vpop.permute.xlu0 %5891 }
 0x114   : > { %4541 = vmatmul.mubr.bf16.gmra.mrb[108].mxu0 %v10572_v58  ;;  %v11602_v58 = vpop.permute.xlu1 %5896  ;;  %12982 = vst [vmem:[#allocation7_spill] sm:$0xff] %v11604_v6 }
 0x115   : > { %8714 = vmatprep.mubr.msk.bf16.mxu0 %vm3026_vm0, %v10574_v0  ;;  %12981 = vst [vmem:[#allocation6_spill] sm:$0xff] %v11602_v58 }
 0x116   : > { %3596 = vmatmul.mubr.bf16.gmra.mrb[100].mxu1 %v10561_v46  ;;  %v11595_v46 = vld [vmem:[%s12974_s2] ss:$0 sm:$0xff] }
 0x117   : > { %3603 = vmatprep.mubr.bf16.mxu1 %v10564_v54  ;;  %v11582_v24 = vpop.f32.mrb[4].mxu0  ;;  %v5554_v54 = vld [vmem:[%s11251_s30 + $0x368] sm:$0xff] }
 0x118   : > { %v4336_v27 = vpop.f32.mrb[5].mxu0  ;;  %6216 = vperm.xlu1 %10378, %v5554_v54   ;;  %v11618_v39 = vpop.permute.xlu1 %5906 }
 0x119   : > { %v11587_v31 = vpop.f32.mrb[6].mxu0  ;;  %12983 = vst [vmem:[#allocation8_spill] sm:$0xff] %v11618_v39 }
 0x11a   : > { %v4339_v47 = vpop.f32.mrb[7].mxu0 }
 0x11b   : > { %v10584_v47 = vld [vmem:[%s11185_s22 + $0x3a8] ss:$16 sps:$4 sm:$0xff]  }
 0x11c   : > { %4549 = vmatmul.mubr.bf16.gmra.mrb[112].mxu0 %v10578_v30  ;;  %v10576_v30 = vld [vmem:[%s11185_s22 + $0x384] ss:$16 sps:$4 sm:$0xff]  }
 0x11d   : > { %8715 = vmatprep.mubr.msk.bf16.mxu0 %vm3026_vm0, %v10580_v38 }
 0x11e   : > { %3604 = vmatmul.mubr.bf16.gmra.mrb[104].mxu1 %v10567_v13  ;;  %v5556_v13 = vld [vmem:[%s11251_s30 + $0x378] sm:$0xff] }
 0x11f   : > { %3611 = vmatprep.mubr.bf16.mxu1 %v10570_v26  ;;  %v11608_v25 = vpop.f32.mrb[8].mxu0  ;;  %v5555_v26 = vld [vmem:[%s11251_s30 + $0x370] sm:$0xff]  ;;  %6226 = vperm.xlu1 %10378, %v5556_v13  }
 0x120   : > { %v4344_v38 = vpop.f32.mrb[9].mxu0  ;;  %6221 = vperm.xlu0 %10377, %v5555_v26  }
 0x121   : > { %v3397_v0 = vpop.f32.mrb[0].mxu1  ;;  %v11615_v55 = vpop.f32.mrb[10].mxu0  ;;  %v5557_v38 = vld [vmem:[%s11251_s30 + $0x380] sm:$0xff] }
 0x122   : > { %v3398_v10 = vadd.f32 %v11595_v46, %v3397_v0  ;;  %v3399_v11 = vpop.f32.mrb[1].mxu1  ;;  %v10586_v0 = vld [vmem:[%s11185_s22 + $0x3cc] ss:$16 sps:$4 sm:$0xff]  }
 0x123   : > { %v3400_v27 = vpop.f32.mrb[2].mxu1  ;;  %v4347_v11 = vpop.f32.mrb[11].mxu0  ;;  %6236 = vperm.xlu1 %10378, %v5558_v18  }
 0x124   : > { %v4327_v58 = vadd.f32 %v4326_v52, %v3398_v10  ;;  %v3401_v6 = vadd.f32 %v11595_v46, %v3400_v27  ;;  %v3402_v54 = vpop.f32.mrb[3].mxu1  ;;  %4557 = vmatmul.mubr.bf16.gmra.mrb[116].mxu0 %v10584_v47  ;;  %v11623_v52 = vpop.permute.xlu0 %5901  ;;  %6231 = vperm.xlu0 %10377, %v5557_v38   ;;  %v10579_v27 = vld [vmem:[%s11185_s22 + $0x380] ss:$16 sps:$4 sm:$0xff]  }
 0x125   : > { %8716 = vmatprep.mubr.msk.bf16.mxu0 %vm3026_vm0, %v10586_v0  ;;  %v5559_v47 = vld [vmem:[%s11251_s30 + $0x390] sm:$0xff] }
 0x126   : > { %v5221_v53 = vmax.f32 %v4327_v58, 0.0  ;;  %v4330_v12 = vadd.f32 %v11566_v59, %v3401_v6  ;;  %3612 = vmatmul.mubr.bf16.gmra.mrb[108].mxu1 %v10573_v19  ;;  %v11627_v58 = vpop.permute.xlu1 %5916  ;;  %v10582_v54 = vld [vmem:[%s11185_s22 + $0x3a4] ss:$16 sps:$4 sm:$0xff]  }
 0x127   : > { %3619 = vmatprep.mubr.bf16.mxu1 %v10576_v30  ;;  %12984 = vst [vmem:[#allocation9_spill] sm:$0xff] %v11627_v58  ;;  %v5560_v30 = vld [vmem:[%s11251_s30 + $0x398] sm:$0xff] }
 0x128   : > { %v5222_v10 = vmax.f32 %v4330_v12, 0.0  ;;  %v6789_v59 = vmul.f32 %v11404_v36, %v5221_v53  ;;  %v11633_v12 = vpop.f32.mrb[12].mxu0  ;;  %v11649_v58 = vpop.permute.xlu0 %5911  ;;  %6246 = vperm.xlu1 %10378, %v5560_v30   ;;  %6241 = vperm.xlu0 %10377, %v5559_v47  }
 0x129   : > { %v3405_v13 = vpop.f32.mrb[4].mxu1  ;;  %v4352_v36 = vpop.f32.mrb[13].mxu0 }
 0x12a   : > { %v6790_v6 = vmul.f32 %v11414_v44, %v5222_v10  ;;  %v3406_v19 = vadd.f32 %v11595_v46, %v3405_v13  ;;  %v3407_v26 = vpop.f32.mrb[5].mxu1  ;;  %v10590_v44 = vld [vmem:[%s11185_s22 + $0x3c8] ss:$16 sps:$4 sm:$0xff]   ;;  %v11646_v10 = vpop.f32.mrb[14].mxu0  ;;  %v10592_v13 = vld [vmem:[%s11185_s22 + $0x3ec] ss:$16 sps:$4 sm:$0xff]  }
 0x12b   : > { %v3408_v18 = vpop.f32.mrb[6].mxu1  ;;  %v4355_v26 = vpop.f32.mrb[15].mxu0 }
 0x12c   : > { %v9252_v53 = vpack.c.bf16 %v6790_v6, %v6789_v59  ;;  %v4335_v0 = vadd.f32 %v11582_v24, %v3406_v19  ;;  %v3409_v11 = vadd.f32 %v11595_v46, %v3408_v18  ;;  %v3410_v38 = vpop.f32.mrb[7].mxu1  ;;  %v5562_v59 = vld [vmem:[%s11251_s30 + $0x3a8] sm:$0xff]  ;;  %v5561_v6 = vld [vmem:[%s11251_s30 + $0x3a0] sm:$0xff]  ;;  %4565 = vmatmul.mubr.bf16.gmra.mrb[120].mxu0 %v10590_v44  ;;  %v11655_v24 = vpop.permute.xlu1 %5926 }
 0x12d   : > { %12985 = vst [vmem:[#allocation10_spill] sm:$0xff] %v11655_v24  ;;  %8717 = vmatprep.mubr.msk.bf16.mxu0 %vm3026_vm0, %v10592_v13  ;;  %v11658_v47 = vpop.permute.xlu0 %5921  ;;  %6256 = vperm.xlu1 %10378, %v5562_v59   ;;  %v10585_v44 = vld [vmem:[%s11185_s22 + $0x3a0] ss:$16 sps:$4 sm:$0xff]   ;;  %v10588_v13 = vld [vmem:[%s11185_s22 + $0x3c4] ss:$16 sps:$4 sm:$0xff]  }
 0x12e   : > { %9253 = vst [vmem:[%s11640_s11] sm:$0xff] %v9252_v53   ;;  %v5223_v39 = vmax.f32 %v4335_v0, 0.0  ;;  %v4338_v36 = vadd.f32 %v11587_v31, %v3409_v11  ;;  %3620 = vmatmul.mubr.bf16.gmra.mrb[112].mxu1 %v10579_v27  ;;  %6251 = vperm.xlu0 %10377, %v5561_v6   ;;  %v5564_v0 = vld [vmem:[%s11251_s30 + $0x3b8] sm:$0xff]  ;;  %v5563_v11 = vld [vmem:[%s11251_s30 + $0x3b0] sm:$0xff] }
 0x12f   : > { %3627 = vmatprep.mubr.bf16.mxu1 %v10582_v54  ;;  %v11664_v53 = vpop.f32.mrb[16].mxu0 }
 0x130   : > { %v5224_v19 = vmax.f32 %v4338_v36, 0.0  ;;  %v6791_v31 = vmul.f32 %v11406_v37, %v5223_v39  ;;  %v4360_v26 = vpop.f32.mrb[17].mxu0  ;;  %v10596_v36 = vld [vmem:[%s11185_s22 + $0x3e8] ss:$16 sps:$4 sm:$0xff]  }
 0x131   : > { %v3413_v30 = vpop.f32.mrb[8].mxu1  ;;  %v11672_v6 = vpop.f32.mrb[18].mxu0  ;;  %6266 = vperm.xlu1 %10378, %v5564_v0  }
 0x132   : > { %v6792_v27 = vmul.f32 %v11416_v45, %v5224_v19  ;;  %v3414_v18 = vadd.f32 %v11595_v46, %v3413_v30  ;;  %v3415_v54 = vpop.f32.mrb[9].mxu1  ;;  %v10598_v19 = vld [vmem:[%s11185_s22 + $0x40c] ss:$16 sps:$4 sm:$0xff]   ;;  %v4363_v30 = vpop.f32.mrb[19].mxu0  ;;  %6261 = vperm.xlu0 %10377, %v5563_v11  }
 0x133   : > { %v3416_v38 = vpop.f32.mrb[10].mxu1  ;;  %v11675_v54 = vpop.permute.xlu1 %5936 }
 0x134   : > { %v9257_v59 = vpack.c.bf16 %v6792_v27, %v6791_v31  ;;  %v4343_v37 = vadd.f32 %v11608_v25, %v3414_v18  ;;  %v3417_v45 = vadd.f32 %v11595_v46, %v3416_v38  ;;  %v3418_v39 = vpop.f32.mrb[11].mxu1  ;;  %v5566_v31 = vld [vmem:[%s11251_s30 + $0x3c8] sm:$0xff]  ;;  %v5565_v27 = vld [vmem:[%s11251_s30 + $0x3c0] sm:$0xff]  ;;  %4573 = vmatmul.mubr.bf16.gmra.mrb[124].mxu0 %v10596_v36  ;;  %v11681_v25 = vpop.permute.xlu0 %5931 }
 0x135   : > { %8718 = vmatprep.mubr.msk.bf16.mxu0 %vm3026_vm0, %v10598_v19  ;;  %6276 = vperm.xlu1 %10378, %v5566_v31   ;;  %v10591_v36 = vld [vmem:[%s11185_s22 + $0x3c0] ss:$16 sps:$4 sm:$0xff]   ;;  %v10594_v19 = vld [vmem:[%s11185_s22 + $0x3e4] ss:$16 sps:$4 sm:$0xff]  }
 0x136   : > { %9809 = vst [vmem:[%s11640_s11 + $0x8] sm:$0xff] %v9257_v59   ;;  %v5225_v24 = vmax.f32 %v4343_v37, 0.0  ;;  %v4346_v26 = vadd.f32 %v11615_v55, %v3417_v45  ;;  %3628 = vmatmul.mubr.bf16.gmra.mrb[116].mxu1 %v10585_v44  ;;  %6271 = vperm.xlu0 %10377, %v5565_v27   ;;  %v5568_v37 = vld [vmem:[%s11251_s30 + $0x3d8] sm:$0xff]  ;;  %v5567_v45 = vld [vmem:[%s11251_s30 + $0x3d0] sm:$0xff] }
 0x137   : > { %3635 = vmatprep.mubr.bf16.mxu1 %v10588_v13  ;;  %v11684_v11 = vpop.permute.xlu1 %5946  ;;  %v11690_v59 = vpop.f32.mrb[20].mxu0 }
 0x138   : > { %v5226_v18 = vmax.f32 %v4346_v26, 0.0  ;;  %12986 = vst [vmem:[#allocation11_spill] sm:$0xff] %v11684_v11  ;;  %v6793_v55 = vmul.f32 %v11423_v49, %v5225_v24  ;;  %v4368_v30 = vpop.f32.mrb[21].mxu0  ;;  %v10602_v26 = vld [vmem:[%s11185_s22 + $0x408] ss:$16 sps:$4 sm:$0xff]  }
 0x139   : > { %v3421_v0 = vpop.f32.mrb[12].mxu1  ;;  %v11698_v27 = vpop.f32.mrb[22].mxu0  ;;  %6286 = vperm.xlu1 %10378, %v5568_v37  }
 0x13a   : > { %v6794_v44 = vmul.f32 %v11421_v48, %v5226_v18  ;;  %v3422_v38 = vadd.f32 %v11595_v46, %v3421_v0  ;;  %v3423_v13 = vpop.f32.mrb[13].mxu1  ;;  %v10604_v18 = vld [vmem:[%s11185_s22 + $0x42c] ss:$16 sps:$4 sm:$0xff]   ;;  %v4371_v0 = vpop.f32.mrb[23].mxu0  ;;  %6281 = vperm.xlu0 %10377, %v5567_v45  }
 0x13b   : > { %v3424_v39 = vpop.f32.mrb[14].mxu1  ;;  %v11701_v13 = vpop.permute.xlu0 %5941 }
 0x13c   : > { %v9262_v31 = vpack.c.bf16 %v6794_v44, %v6793_v55  ;;  %v4351_v49 = vadd.f32 %v11633_v12, %v3422_v38  ;;  %v3425_v48 = vadd.f32 %v11595_v46, %v3424_v39  ;;  %v3426_v24 = vpop.f32.mrb[15].mxu1  ;;  %v5570_v55 = vld [vmem:[%s11251_s30 + $0x3e8] sm:$0xff]  ;;  %v5569_v44 = vld [vmem:[%s11251_s30 + $0x3e0] sm:$0xff]  ;;  %4581 = vmatmul.mubr.bf16.gmra.mrb[128].mxu0 %v10602_v26  ;;  %v11707_v12 = vpop.permute.xlu1 %5956 }
 0x13d   : > { %12987 = vst [vmem:[#allocation12_spill] sm:$0xff] %v11707_v12  ;;  %8719 = vmatprep.mubr.msk.bf16.mxu0 %vm3026_vm0, %v10604_v18  ;;  %6296 = vperm.xlu1 %10378, %v5570_v55   ;;  %v10597_v26 = vld [vmem:[%s11185_s22 + $0x3e0] ss:$16 sps:$4 sm:$0xff]   ;;  %v10600_v18 = vld [vmem:[%s11185_s22 + $0x404] ss:$16 sps:$4 sm:$0xff]  }
 0x13e   : > { %9810 = vst [vmem:[%s11640_s11 + $0x10] sm:$0xff] %v9262_v31   ;;  %v5227_v11 = vmax.f32 %v4351_v49, 0.0  ;;  %v4354_v30 = vadd.f32 %v11646_v10, %v3425_v48  ;;  %3636 = vmatmul.mubr.bf16.gmra.mrb[120].mxu1 %v10591_v36  ;;  %6291 = vperm.xlu0 %10377, %v5569_v44   ;;  %v5572_v49 = vld [vmem:[%s11251_s30 + $0x3f8] sm:$0xff]  ;;  %v5571_v48 = vld [vmem:[%s11251_s30 + $0x3f0] sm:$0xff] }
 0x13f   : > { %3643 = vmatprep.mubr.bf16.mxu1 %v10594_v19  ;;  %v11710_v45 = vpop.permute.xlu0 %5951  ;;  %v11716_v31 = vpop.f32.mrb[24].mxu0 }
 0x140   : > { %v5228_v38 = vmax.f32 %v4354_v30, 0.0  ;;  %v6795_v10 = vmul.f32 %v11433_v57, %v5227_v11  ;;  %v4376_v0 = vpop.f32.mrb[25].mxu0  ;;  %v10608_v30 = vld [vmem:[%s11185_s22 + $0x428] ss:$16 sps:$4 sm:$0xff]  }
 0x141   : > { %v3429_v37 = vpop.f32.mrb[16].mxu1  ;;  %v11724_v44 = vpop.f32.mrb[26].mxu0  ;;  %6306 = vperm.xlu1 %10378, %v5572_v49  }
 0x142   : > { %v6796_v36 = vmul.f32 %v11431_v56, %v5228_v38  ;;  %v3430_v39 = vadd.f32 %v11595_v46, %v3429_v37  ;;  %v3431_v19 = vpop.f32.mrb[17].mxu1  ;;  %v10610_v38 = vld [vmem:[%s11185_s22 + $0x44c] ss:$16 sps:$4 sm:$0xff]   ;;  %v4379_v37 = vpop.f32.mrb[27].mxu0  ;;  %6301 = vperm.xlu0 %10377, %v5571_v48  }
 0x143   : > { %v3432_v24 = vpop.f32.mrb[18].mxu1  ;;  %v11727_v19 = vpop.permute.xlu1 %5966 }
 0x144   : > { %v9267_v55 = vpack.c.bf16 %v6796_v36, %v6795_v10  ;;  %v4359_v57 = vadd.f32 %v11664_v53, %v3430_v39  ;;  %v3433_v56 = vadd.f32 %v11595_v46, %v3432_v24  ;;  %v3434_v11 = vpop.f32.mrb[19].mxu1  ;;  %v5574_v10 = vld [vmem:[%s11251_s30 + $0x408] sm:$0xff]  ;;  %v5573_v36 = vld [vmem:[%s11251_s30 + $0x400] sm:$0xff]  ;;  %4589 = vmatmul.mubr.bf16.gmra.mrb[132].mxu0 %v10608_v30  ;;  %v11733_v53 = vpop.permute.xlu0 %5961 }
 0x145   : > { %8720 = vmatprep.mubr.msk.bf16.mxu0 %vm3026_vm0, %v10610_v38  ;;  %6316 = vperm.xlu1 %10378, %v5574_v10   ;;  %v10603_v30 = vld [vmem:[%s11185_s22 + $0x400] ss:$16 sps:$4 sm:$0xff]   ;;  %v10606_v38 = vld [vmem:[%s11185_s22 + $0x424] ss:$16 sps:$4 sm:$0xff]  }
 0x146   : > { %9811 = vst [vmem:[%s11640_s11 + $0x18] sm:$0xff] %v9267_v55   ;;  %v5229_v12 = vmax.f32 %v4359_v57, 0.0  ;;  %v4362_v0 = vadd.f32 %v11672_v6, %v3433_v56  ;;  %3644 = vmatmul.mubr.bf16.gmra.mrb[124].mxu1 %v10597_v26  ;;  %6311 = vperm.xlu0 %10377, %v5573_v36   ;;  %v5576_v57 = vld [vmem:[%s11251_s30 + $0x418] sm:$0xff]  ;;  %v5575_v56 = vld [vmem:[%s11251_s30 + $0x410] sm:$0xff] }
 0x147   : > { %3651 = vmatprep.mubr.bf16.mxu1 %v10600_v18  ;;  %v11736_v48 = vpop.permute.xlu1 %5976  ;;  %v11742_v55 = vpop.f32.mrb[28].mxu0 }
 0x148   : > { %v5230_v39 = vmax.f32 %v4362_v0, 0.0  ;;  %12988 = vst [vmem:[#allocation13_spill] sm:$0xff] %v11736_v48  ;;  %v6797_v6 = vmul.f32 %v11440_v61, %v5229_v12  ;;  %v4384_v37 = vpop.f32.mrb[29].mxu0  ;;  %v10614_v0 = vld [vmem:[%s11185_s22 + $0x448] ss:$16 sps:$4 sm:$0xff]  }
 0x149   : > { %v3437_v49 = vpop.f32.mrb[20].mxu1  ;;  %v11750_v36 = vpop.f32.mrb[30].mxu0  ;;  %6326 = vperm.xlu1 %10378, %v5576_v57  }
 0x14a   : > { %v6798_v26 = vmul.f32 %v11438_v60, %v5230_v39  ;;  %v3438_v24 = vadd.f32 %v11595_v46, %v3437_v49  ;;  %v3439_v18 = vpop.f32.mrb[21].mxu1  ;;  %v10616_v39 = vld [vmem:[%s11185_s22 + $0x46c] ss:$16 sps:$4 sm:$0xff]   ;;  %v4387_v49 = vpop.f32.mrb[31].mxu0  ;;  %6321 = vperm.xlu0 %10377, %v5575_v56  }
 0x14b   : > { %v3440_v11 = vpop.f32.mrb[22].mxu1  ;;  %v11753_v18 = vpop.permute.xlu0 %5971 }
 0x14c   : > { %v9272_v10 = vpack.c.bf16 %v6798_v26, %v6797_v6  ;;  %v4367_v61 = vadd.f32 %v11690_v59, %v3438_v24  ;;  %v3441_v60 = vadd.f32 %v11595_v46, %v3440_v11  ;;  %v3442_v12 = vpop.f32.mrb[23].mxu1  ;;  %v5578_v6 = vld [vmem:[%s11251_s30 + $0x428] sm:$0xff]  ;;  %v5577_v26 = vld [vmem:[%s11251_s30 + $0x420] sm:$0xff]  ;;  %4597 = vmatmul.mubr.bf16.gmra.mrb[136].mxu0 %v10614_v0  ;;  %v11759_v59 = vpop.permute.xlu1 %5986 }
 0x14d   : > { %12989 = vst [vmem:[#allocation14_spill] sm:$0xff] %v11759_v59  ;;  %8721 = vmatprep.mubr.msk.bf16.mxu0 %vm3026_vm0, %v10616_v39  ;;  %6336 = vperm.xlu1 %10378, %v5578_v6   ;;  %v10609_v0 = vld [vmem:[%s11185_s22 + $0x420] ss:$16 sps:$4 sm:$0xff]   ;;  %v10612_v39 = vld [vmem:[%s11185_s22 + $0x444] ss:$16 sps:$4 sm:$0xff]  }
 0x14e   : > { %9812 = vst [vmem:[%s11640_s11 + $0x20] sm:$0xff] %v9272_v10   ;;  %v5231_v48 = vmax.f32 %v4367_v61, 0.0  ;;  %v4370_v37 = vadd.f32 %v11698_v27, %v3441_v60  ;;  %3652 = vmatmul.mubr.bf16.gmra.mrb[128].mxu1 %v10603_v30  ;;  %6331 = vperm.xlu0 %10377, %v5577_v26   ;;  %v5580_v61 = vld [vmem:[%s11251_s30 + $0x438] sm:$0xff]  ;;  %v5579_v60 = vld [vmem:[%s11251_s30 + $0x430] sm:$0xff] }
 0x14f   : > { %3659 = vmatprep.mubr.bf16.mxu1 %v10606_v38  ;;  %v11762_v56 = vpop.permute.xlu0 %5981  ;;  %v11768_v10 = vpop.f32.mrb[32].mxu0 }
 0x150   : > { %v5232_v24 = vmax.f32 %v4370_v37, 0.0  ;;  %v6799_v27 = vmul.f32 %v11450_v5, %v5231_v48  ;;  %v4392_v49 = vpop.f32.mrb[33].mxu0  ;;  %v10620_v37 = vld [vmem:[%s11185_s22 + $0x468] ss:$16 sps:$4 sm:$0xff]  }
 0x151   : > { %v3445_v57 = vpop.f32.mrb[24].mxu1  ;;  %v11776_v26 = vpop.f32.mrb[34].mxu0  ;;  %6346 = vperm.xlu1 %10378, %v5580_v61  }
 0x152   : > { %v6800_v30 = vmul.f32 %v11448_v4, %v5232_v24  ;;  %v3446_v11 = vadd.f32 %v11595_v46, %v3445_v57  ;;  %v3447_v38 = vpop.f32.mrb[25].mxu1  ;;  %v10622_v24 = vld [vmem:[%s11185_s22 + $0x48c] ss:$16 sps:$4 sm:$0xff]   ;;  %v4395_v57 = vpop.f32.mrb[35].mxu0  ;;  %6341 = vperm.xlu0 %10377, %v5579_v60  }
 0x153   : > { %v3448_v12 = vpop.f32.mrb[26].mxu1  ;;  %v11779_v38 = vpop.permute.xlu1 %5996 }
 0x154   : > { %v9277_v6 = vpack.c.bf16 %v6800_v30, %v6799_v27  ;;  %v4375_v5 = vadd.f32 %v11716_v31, %v3446_v11  ;;  %v3449_v4 = vadd.f32 %v11595_v46, %v3448_v12  ;;  %v3450_v48 = vpop.f32.mrb[27].mxu1  ;;  %v5582_v27 = vld [vmem:[%s11251_s30 + $0x448] sm:$0xff]  ;;  %v5581_v30 = vld [vmem:[%s11251_s30 + $0x440] sm:$0xff]  ;;  %4605 = vmatmul.mubr.bf16.gmra.mrb[140].mxu0 %v10620_v37  ;;  %v11785_v31 = vpop.permute.xlu0 %5991 }
 0x155   : > { %8722 = vmatprep.mubr.msk.bf16.mxu0 %vm3026_vm0, %v10622_v24  ;;  %6356 = vperm.xlu1 %10378, %v5582_v27   ;;  %v10615_v37 = vld [vmem:[%s11185_s22 + $0x440] ss:$16 sps:$4 sm:$0xff]   ;;  %v10618_v24 = vld [vmem:[%s11185_s22 + $0x464] ss:$16 sps:$4 sm:$0xff]  }
 0x156   : > { %9813 = vst [vmem:[%s11640_s11 + $0x28] sm:$0xff] %v9277_v6   ;;  %v5233_v59 = vmax.f32 %v4375_v5, 0.0  ;;  %v4378_v49 = vadd.f32 %v11724_v44, %v3449_v4  ;;  %3660 = vmatmul.mubr.bf16.gmra.mrb[132].mxu1 %v10609_v0  ;;  %6351 = vperm.xlu0 %10377, %v5581_v30   ;;  %v5584_v5 = vld [vmem:[%s11251_s30 + $0x458] sm:$0xff]  ;;  %v5583_v4 = vld [vmem:[%s11251_s30 + $0x450] sm:$0xff] }
 0x157   : > { %3667 = vmatprep.mubr.bf16.mxu1 %v10612_v39  ;;  %v11788_v60 = vpop.permute.xlu1 %6006  ;;  %v11794_v6 = vpop.f32.mrb[36].mxu0 }
 0x158   : > { %v5234_v11 = vmax.f32 %v4378_v49, 0.0  ;;  %12990 = vst [vmem:[#allocation15_spill] sm:$0xff] %v11788_v60  ;;  %v6801_v44 = vmul.f32 %v11457_v9, %v5233_v59  ;;  %v4400_v57 = vpop.f32.mrb[37].mxu0  ;;  %v10626_v49 = vld [vmem:[%s11185_s22 + $0x488] ss:$16 sps:$4 sm:$0xff]  }
 0x159   : > { %v3453_v61 = vpop.f32.mrb[28].mxu1  ;;  %v11802_v30 = vpop.f32.mrb[38].mxu0  ;;  %6366 = vperm.xlu1 %10378, %v5584_v5  }
 0x15a   : > { %v6802_v0 = vmul.f32 %v11455_v8, %v5234_v11  ;;  %v3454_v12 = vadd.f32 %v11595_v46, %v3453_v61  ;;  %v3455_v39 = vpop.f32.mrb[29].mxu1  ;;  %v10628_v11 = vld [vmem:[%s11185_s22 + $0x4ac] ss:$16 sps:$4 sm:$0xff]   ;;  %v4403_v61 = vpop.f32.mrb[39].mxu0  ;;  %6361 = vperm.xlu0 %10377, %v5583_v4  }
 0x15b   : > { %v3456_v48 = vpop.f32.mrb[30].mxu1  ;;  %v11805_v39 = vpop.permute.xlu0 %6001 }
 0x15c   : > { %v9282_v27 = vpack.c.bf16 %v6802_v0, %v6801_v44  ;;  %v4383_v9 = vadd.f32 %v11742_v55, %v3454_v12  ;;  %v3457_v8 = vadd.f32 %v11595_v46, %v3456_v48  ;;  %v3458_v59 = vpop.f32.mrb[31].mxu1  ;;  %v5586_v44 = vld [vmem:[%s11251_s30 + $0x468] sm:$0xff]  ;;  %v5585_v0 = vld [vmem:[%s11251_s30 + $0x460] sm:$0xff]  ;;  %4613 = vmatmul.mubr.bf16.gmra.mrb[144].mxu0 %v10626_v49  ;;  %v11811_v55 = vpop.permute.xlu1 %6016 }
 0x15d   : > { %12991 = vst [vmem:[#allocation16_spill] sm:$0xff] %v11811_v55  ;;  %8723 = vmatprep.mubr.msk.bf16.mxu0 %vm3026_vm0, %v10628_v11  ;;  %6376 = vperm.xlu1 %10378, %v5586_v44   ;;  %v10621_v49 = vld [vmem:[%s11185_s22 + $0x460] ss:$16 sps:$4 sm:$0xff]   ;;  %v10624_v11 = vld [vmem:[%s11185_s22 + $0x484] ss:$16 sps:$4 sm:$0xff]  }
 0x15e   : > { %9814 = vst [vmem:[%s11640_s11 + $0x30] sm:$0xff] %v9282_v27   ;;  %v5235_v60 = vmax.f32 %v4383_v9, 0.0  ;;  %v4386_v57 = vadd.f32 %v11750_v36, %v3457_v8  ;;  %3668 = vmatmul.mubr.bf16.gmra.mrb[136].mxu1 %v10615_v37  ;;  %6371 = vperm.xlu0 %10377, %v5585_v0   ;;  %v5588_v9 = vld [vmem:[%s11251_s30 + $0x478] sm:$0xff]  ;;  %v5587_v8 = vld [vmem:[%s11251_s30 + $0x470] sm:$0xff] }
 0x15f   : > { %3675 = vmatprep.mubr.bf16.mxu1 %v10618_v24  ;;  %v11814_v4 = vpop.permute.xlu0 %6011  ;;  %v11820_v27 = vpop.f32.mrb[40].mxu0 }
 0x160   : > { %v5236_v12 = vmax.f32 %v4386_v57, 0.0  ;;  %v6803_v36 = vmul.f32 %v11467_v17, %v5235_v60  ;;  %v4408_v61 = vpop.f32.mrb[41].mxu0  ;;  %v10632_v57 = vld [vmem:[%s11185_s22 + $0x4a8] ss:$16 sps:$4 sm:$0xff]  }
 0x161   : > { %v3461_v5 = vpop.f32.mrb[32].mxu1  ;;  %v11828_v0 = vpop.f32.mrb[42].mxu0  ;;  %6386 = vperm.xlu1 %10378, %v5588_v9  }
 0x162   : > { %v6804_v37 = vmul.f32 %v11465_v16, %v5236_v12  ;;  %v3462_v48 = vadd.f32 %v11595_v46, %v3461_v5  ;;  %v3463_v24 = vpop.f32.mrb[33].mxu1  ;;  %v10634_v12 = vld [vmem:[%s11185_s22 + $0x4cc] ss:$16 sps:$4 sm:$0xff]   ;;  %v4411_v5 = vpop.f32.mrb[43].mxu0  ;;  %6381 = vperm.xlu0 %10377, %v5587_v8  }
 0x163   : > { %v3464_v59 = vpop.f32.mrb[34].mxu1  ;;  %v11831_v24 = vpop.permute.xlu1 %6026 }
 0x164   : > { %v9287_v44 = vpack.c.bf16 %v6804_v37, %v6803_v36  ;;  %v4391_v17 = vadd.f32 %v11768_v10, %v3462_v48  ;;  %v3465_v16 = vadd.f32 %v11595_v46, %v3464_v59  ;;  %v3466_v60 = vpop.f32.mrb[35].mxu1  ;;  %v5590_v36 = vld [vmem:[%s11251_s30 + $0x488] sm:$0xff]  ;;  %v5589_v37 = vld [vmem:[%s11251_s30 + $0x480] sm:$0xff]  ;;  %4621 = vmatmul.mubr.bf16.gmra.mrb[148].mxu0 %v10632_v57  ;;  %v11837_v10 = vpop.permute.xlu0 %6021 }
 0x165   : > { %8724 = vmatprep.mubr.msk.bf16.mxu0 %vm3026_vm0, %v10634_v12  ;;  %6396 = vperm.xlu1 %10378, %v5590_v36   ;;  %v10627_v57 = vld [vmem:[%s11185_s22 + $0x480] ss:$16 sps:$4 sm:$0xff]   ;;  %v10630_v12 = vld [vmem:[%s11185_s22 + $0x4a4] ss:$16 sps:$4 sm:$0xff]  }
 0x166   : > { %9815 = vst [vmem:[%s11640_s11 + $0x38] sm:$0xff] %v9287_v44   ;;  %v5237_v55 = vmax.f32 %v4391_v17, 0.0  ;;  %v4394_v61 = vadd.f32 %v11776_v26, %v3465_v16  ;;  %3676 = vmatmul.mubr.bf16.gmra.mrb[140].mxu1 %v10621_v49  ;;  %6391 = vperm.xlu0 %10377, %v5589_v37   ;;  %v5592_v17 = vld [vmem:[%s11251_s30 + $0x498] sm:$0xff]  ;;  %v5591_v16 = vld [vmem:[%s11251_s30 + $0x490] sm:$0xff] }
 0x167   : > { %3683 = vmatprep.mubr.bf16.mxu1 %v10624_v11  ;;  %v11840_v8 = vpop.permute.xlu1 %6036  ;;  %v11846_v44 = vpop.f32.mrb[44].mxu0 }
 0x168   : > { %v5238_v48 = vmax.f32 %v4394_v61, 0.0  ;;  %12992 = vst [vmem:[#allocation17_spill] sm:$0xff] %v11840_v8  ;;  %v6805_v26 = vmul.f32 %v11474_v21, %v5237_v55  ;;  %v4416_v5 = vpop.f32.mrb[45].mxu0  ;;  %v10638_v61 = vld [vmem:[%s11185_s22 + $0x4c8] ss:$16 sps:$4 sm:$0xff]  }
 0x169   : > { %v3469_v9 = vpop.f32.mrb[36].mxu1  ;;  %v11854_v37 = vpop.f32.mrb[46].mxu0  ;;  %6406 = vperm.xlu1 %10378, %v5592_v17  }
 0x16a   : > { %v6806_v49 = vmul.f32 %v11472_v20, %v5238_v48  ;;  %v3470_v59 = vadd.f32 %v11595_v46, %v3469_v9  ;;  %v3471_v11 = vpop.f32.mrb[37].mxu1  ;;  %v10640_v48 = vld [vmem:[%s11185_s22 + $0x4ec] ss:$16 sps:$4 sm:$0xff]   ;;  %v4419_v9 = vpop.f32.mrb[47].mxu0  ;;  %6401 = vperm.xlu0 %10377, %v5591_v16  }
 0x16b   : > { %v3472_v60 = vpop.f32.mrb[38].mxu1  ;;  %v11857_v11 = vpop.permute.xlu0 %6031 }
 0x16c   : > { %v9292_v36 = vpack.c.bf16 %v6806_v49, %v6805_v26  ;;  %v4399_v21 = vadd.f32 %v11794_v6, %v3470_v59  ;;  %v3473_v20 = vadd.f32 %v11595_v46, %v3472_v60  ;;  %v3474_v55 = vpop.f32.mrb[39].mxu1  ;;  %v5594_v26 = vld [vmem:[%s11251_s30 + $0x4a8] sm:$0xff]  ;;  %v5593_v49 = vld [vmem:[%s11251_s30 + $0x4a0] sm:$0xff]  ;;  %4629 = vmatmul.mubr.bf16.gmra.mrb[152].mxu0 %v10638_v61  ;;  %v11863_v6 = vpop.permute.xlu1 %6046 }
 0x16d   : > { %12993 = vst [vmem:[#allocation18_spill] sm:$0xff] %v11863_v6  ;;  %8725 = vmatprep.mubr.msk.bf16.mxu0 %vm3026_vm0, %v10640_v48  ;;  %6416 = vperm.xlu1 %10378, %v5594_v26   ;;  %v10633_v61 = vld [vmem:[%s11185_s22 + $0x4a0] ss:$16 sps:$4 sm:$0xff]   ;;  %v10636_v48 = vld [vmem:[%s11185_s22 + $0x4c4] ss:$16 sps:$4 sm:$0xff]  }
 0x16e   : > { %9816 = vst [vmem:[%s11640_s11 + $0x40] sm:$0xff] %v9292_v36   ;;  %v5239_v8 = vmax.f32 %v4399_v21, 0.0  ;;  %v4402_v5 = vadd.f32 %v11802_v30, %v3473_v20  ;;  %3684 = vmatmul.mubr.bf16.gmra.mrb[144].mxu1 %v10627_v57  ;;  %6411 = vperm.xlu0 %10377, %v5593_v49   ;;  %v5596_v21 = vld [vmem:[%s11251_s30 + $0x4b8] sm:$0xff]  ;;  %v5595_v20 = vld [vmem:[%s11251_s30 + $0x4b0] sm:$0xff] }
 0x16f   : > { %3691 = vmatprep.mubr.bf16.mxu1 %v10630_v12  ;;  %v11866_v16 = vpop.permute.xlu0 %6041  ;;  %v11872_v36 = vpop.f32.mrb[48].mxu0 }
 0x170   : > { %v5240_v59 = vmax.f32 %v4402_v5, 0.0  ;;  %v6807_v30 = vmul.f32 %v11484_v29, %v5239_v8  ;;  %v4424_v9 = vpop.f32.mrb[49].mxu0  ;;  %v10644_v5 = vld [vmem:[%s11185_s22 + $0x4e8] ss:$16 sps:$4 sm:$0xff]  }
 0x171   : > { %v3477_v17 = vpop.f32.mrb[40].mxu1  ;;  %v11880_v49 = vpop.f32.mrb[50].mxu0  ;;  %6426 = vperm.xlu1 %10378, %v5596_v21  }
 0x172   : > { %v6808_v57 = vmul.f32 %v11482_v28, %v5240_v59  ;;  %v3478_v60 = vadd.f32 %v11595_v46, %v3477_v17  ;;  %v3479_v12 = vpop.f32.mrb[41].mxu1  ;;  %v10646_v59 = vld [vmem:[%s11185_s22 + $0x50c] ss:$16 sps:$4 sm:$0xff]   ;;  %v4427_v17 = vpop.f32.mrb[51].mxu0  ;;  %6421 = vperm.xlu0 %10377, %v5595_v20  }
 0x173   : > { %v3480_v55 = vpop.f32.mrb[42].mxu1  ;;  %v11883_v12 = vpop.permute.xlu1 %6056 }
 0x174   : > { %v9297_v26 = vpack.c.bf16 %v6808_v57, %v6807_v30  ;;  %v4407_v29 = vadd.f32 %v11820_v27, %v3478_v60  ;;  %v3481_v28 = vadd.f32 %v11595_v46, %v3480_v55  ;;  %v3482_v8 = vpop.f32.mrb[43].mxu1  ;;  %v5598_v30 = vld [vmem:[%s11251_s30 + $0x4c8] sm:$0xff]  ;;  %v5597_v57 = vld [vmem:[%s11251_s30 + $0x4c0] sm:$0xff]  ;;  %4637 = vmatmul.mubr.bf16.gmra.mrb[156].mxu0 %v10644_v5  ;;  %v11889_v27 = vpop.permute.xlu0 %6051 }
 0x175   : > { %8726 = vmatprep.mubr.msk.bf16.mxu0 %vm3026_vm0, %v10646_v59  ;;  %6436 = vperm.xlu1 %10378, %v5598_v30   ;;  %v10639_v5 = vld [vmem:[%s11185_s22 + $0x4c0] ss:$16 sps:$4 sm:$0xff]   ;;  %v10642_v59 = vld [vmem:[%s11185_s22 + $0x4e4] ss:$16 sps:$4 sm:$0xff]  }
 0x176   : > { %9817 = vst [vmem:[%s11640_s11 + $0x48] sm:$0xff] %v9297_v26   ;;  %v5241_v6 = vmax.f32 %v4407_v29, 0.0  ;;  %v4410_v9 = vadd.f32 %v11828_v0, %v3481_v28  ;;  %3692 = vmatmul.mubr.bf16.gmra.mrb[148].mxu1 %v10633_v61  ;;  %6431 = vperm.xlu0 %10377, %v5597_v57   ;;  %v5600_v29 = vld [vmem:[%s11251_s30 + $0x4d8] sm:$0xff]  ;;  %v5599_v28 = vld [vmem:[%s11251_s30 + $0x4d0] sm:$0xff] }
 0x177   : > { %3699 = vmatprep.mubr.bf16.mxu1 %v10636_v48  ;;  %v11892_v20 = vpop.permute.xlu1 %6066  ;;  %v11898_v26 = vpop.f32.mrb[52].mxu0 }
 0x178   : > { %v5242_v60 = vmax.f32 %v4410_v9, 0.0  ;;  %12994 = vst [vmem:[#allocation19_spill] sm:$0xff] %v11892_v20  ;;  %v6809_v0 = vmul.f32 %v11491_v33, %v5241_v6  ;;  %v4432_v17 = vpop.f32.mrb[53].mxu0  ;;  %v10650_v9 = vld [vmem:[%s11185_s22 + $0x508] ss:$16 sps:$4 sm:$0xff]  }
 0x179   : > { %v3485_v21 = vpop.f32.mrb[44].mxu1  ;;  %v11906_v57 = vpop.f32.mrb[54].mxu0  ;;  %6446 = vperm.xlu1 %10378, %v5600_v29  }
 0x17a   : > { %v6810_v61 = vmul.f32 %v11489_v32, %v5242_v60  ;;  %v3486_v55 = vadd.f32 %v11595_v46, %v3485_v21  ;;  %v3487_v48 = vpop.f32.mrb[45].mxu1  ;;  %v10652_v60 = vld [vmem:[%s11185_s22 + $0x52c] ss:$16 sps:$4 sm:$0xff]   ;;  %v4435_v21 = vpop.f32.mrb[55].mxu0  ;;  %6441 = vperm.xlu0 %10377, %v5599_v28  }
 0x17b   : > { %v3488_v8 = vpop.f32.mrb[46].mxu1  ;;  %v11909_v48 = vpop.permute.xlu0 %6061 }
 0x17c   : > { %v9302_v30 = vpack.c.bf16 %v6810_v61, %v6809_v0  ;;  %v4415_v33 = vadd.f32 %v11846_v44, %v3486_v55  ;;  %v3489_v32 = vadd.f32 %v11595_v46, %v3488_v8  ;;  %v3490_v6 = vpop.f32.mrb[47].mxu1  ;;  %v5602_v0 = vld [vmem:[%s11251_s30 + $0x4e8] sm:$0xff]  ;;  %v5601_v61 = vld [vmem:[%s11251_s30 + $0x4e0] sm:$0xff]  ;;  %4645 = vmatmul.mubr.bf16.gmra.mrb[160].mxu0 %v10650_v9  ;;  %v11915_v44 = vpop.permute.xlu1 %6076 }
 0x17d   : > { %12995 = vst [vmem:[#allocation20_spill] sm:$0xff] %v11915_v44  ;;  %8727 = vmatprep.mubr.msk.bf16.mxu0 %vm3026_vm0, %v10652_v60  ;;  %6456 = vperm.xlu1 %10378, %v5602_v0   ;;  %v10645_v9 = vld [vmem:[%s11185_s22 + $0x4e0] ss:$16 sps:$4 sm:$0xff]   ;;  %v10648_v60 = vld [vmem:[%s11185_s22 + $0x504] ss:$16 sps:$4 sm:$0xff]  }
 0x17e   : > { %9818 = vst [vmem:[%s11640_s11 + $0x50] sm:$0xff] %v9302_v30   ;;  %v5243_v20 = vmax.f32 %v4415_v33, 0.0  ;;  %v4418_v17 = vadd.f32 %v11854_v37, %v3489_v32  ;;  %3700 = vmatmul.mubr.bf16.gmra.mrb[152].mxu1 %v10639_v5  ;;  %6451 = vperm.xlu0 %10377, %v5601_v61   ;;  %v5604_v33 = vld [vmem:[%s11251_s30 + $0x4f8] sm:$0xff]  ;;  %v5603_v32 = vld [vmem:[%s11251_s30 + $0x4f0] sm:$0xff] }
 0x17f   : > { %3707 = vmatprep.mubr.bf16.mxu1 %v10642_v59  ;;  %v11918_v28 = vpop.permute.xlu0 %6071  ;;  %v11924_v30 = vpop.f32.mrb[56].mxu0 }
 0x180   : > { %v5244_v55 = vmax.f32 %v4418_v17, 0.0  ;;  %v6811_v37 = vmul.f32 %v11501_v43, %v5243_v20  ;;  %v4440_v21 = vpop.f32.mrb[57].mxu0  ;;  %v10656_v17 = vld [vmem:[%s11185_s22 + $0x528] ss:$16 sps:$4 sm:$0xff]  }
 0x181   : > { %v3493_v29 = vpop.f32.mrb[48].mxu1  ;;  %v11932_v61 = vpop.f32.mrb[58].mxu0  ;;  %6466 = vperm.xlu1 %10378, %v5604_v33  }
 0x182   : > { %v6812_v5 = vmul.f32 %v11499_v42, %v5244_v55  ;;  %v3494_v8 = vadd.f32 %v11595_v46, %v3493_v29  ;;  %v3495_v59 = vpop.f32.mrb[49].mxu1  ;;  %v10658_v55 = vld [vmem:[%s11185_s22 + $0x54c] ss:$16 sps:$4 sm:$0xff]   ;;  %v4443_v29 = vpop.f32.mrb[59].mxu0  ;;  %6461 = vperm.xlu0 %10377, %v5603_v32  }
 0x183   : > { %v3496_v6 = vpop.f32.mrb[50].mxu1  ;;  %v11935_v59 = vpop.permute.xlu1 %6086 }
 0x184   : > { %v9307_v0 = vpack.c.bf16 %v6812_v5, %v6811_v37  ;;  %v4423_v43 = vadd.f32 %v11872_v36, %v3494_v8  ;;  %v3497_v42 = vadd.f32 %v11595_v46, %v3496_v6  ;;  %v3498_v20 = vpop.f32.mrb[51].mxu1  ;;  %v5606_v37 = vld [vmem:[%s11251_s30 + $0x508] sm:$0xff]  ;;  %v5605_v5 = vld [vmem:[%s11251_s30 + $0x500] sm:$0xff]  ;;  %4653 = vmatmul.mubr.bf16.gmra.mrb[164].mxu0 %v10656_v17  ;;  %v11941_v36 = vpop.permute.xlu0 %6081 }
 0x185   : > { %8728 = vmatprep.mubr.msk.bf16.mxu0 %vm3026_vm0, %v10658_v55  ;;  %6476 = vperm.xlu1 %10378, %v5606_v37   ;;  %v10651_v17 = vld [vmem:[%s11185_s22 + $0x500] ss:$16 sps:$4 sm:$0xff]   ;;  %v10654_v55 = vld [vmem:[%s11185_s22 + $0x524] ss:$16 sps:$4 sm:$0xff]  }
 0x186   : > { %9819 = vst [vmem:[%s11640_s11 + $0x58] sm:$0xff] %v9307_v0   ;;  %v5245_v44 = vmax.f32 %v4423_v43, 0.0  ;;  %v4426_v21 = vadd.f32 %v11880_v49, %v3497_v42  ;;  %3708 = vmatmul.mubr.bf16.gmra.mrb[156].mxu1 %v10645_v9  ;;  %6471 = vperm.xlu0 %10377, %v5605_v5   ;;  %v5608_v43 = vld [vmem:[%s11251_s30 + $0x518] sm:$0xff]  ;;  %v5607_v42 = vld [vmem:[%s11251_s30 + $0x510] sm:$0xff] }
 0x187   : > { %3715 = vmatprep.mubr.bf16.mxu1 %v10648_v60  ;;  %v11944_v32 = vpop.permute.xlu1 %6096  ;;  %v11950_v0 = vpop.f32.mrb[60].mxu0 }
 0x188   : > { %v5246_v8 = vmax.f32 %v4426_v21, 0.0  ;;  %v6813_v49 = vmul.f32 %v11508_v51, %v5245_v44  ;;  %v4448_v29 = vpop.f32.mrb[61].mxu0  ;;  %v10662_v21 = vld [vmem:[%s11185_s22 + $0x548] ss:$16 sps:$4 sm:$0xff]  }
 0x189   : > { %v3501_v33 = vpop.f32.mrb[52].mxu1  ;;  %v11963_v5 = vpop.f32.mrb[62].mxu0  ;;  %6486 = vperm.xlu1 %10378, %v5608_v43  }
 0x18a   : > { %v6814_v9 = vmul.f32 %v11506_v50, %v5246_v8  ;;  %v3502_v6 = vadd.f32 %v11595_v46, %v3501_v33  ;;  %v3503_v60 = vpop.f32.mrb[53].mxu1  ;;  %v11960_v50 = vld [vmem:[%s12974_s2] ss:$0 sm:$0xff]  ;;  %v10664_v8 = vld [vmem:[%s11185_s22 + $0x56c] ss:$16 sps:$4 sm:$0xff]   ;;  %v4451_v33 = vpop.f32.mrb[63].mxu0  ;;  %6481 = vperm.xlu0 %10377, %v5607_v42  }
 0x18b   : > { %v3504_v20 = vpop.f32.mrb[54].mxu1  ;;  %v11966_v60 = vpop.permute.xlu0 %6091  ;;  %v10660_v33 = vld [vmem:[%s11185_s22 + $0x544] ss:$16 sps:$4 sm:$0xff]  }
 0x18c   : > { %v9312_v37 = vpack.c.bf16 %v6814_v9, %v6813_v49  ;;  %v4431_v51 = vadd.f32 %v11898_v26, %v3502_v6  ;;  %v3505_v46 = vadd.f32 %v11960_v50, %v3504_v20  ;;  %v3506_v44 = vpop.f32.mrb[55].mxu1  ;;  %v5610_v9 = vld [vmem:[%s11251_s30 + $0x528] sm:$0xff]  ;;  %v5609_v6 = vld [vmem:[%s11251_s30 + $0x520] sm:$0xff]  ;;  %4661 = vmatmul.mubr.bf16.gmra.mrb[168].mxu0 %v10662_v21  ;;  %v11972_v20 = vpop.permute.xlu1 %6106 }
 0x18d   : > { %12996 = vst [vmem:[#allocation21_spill] sm:$0xff] %v11972_v20  ;;  %8729 = vmatprep.mubr.msk.bf16.mxu0 %vm3026_vm0, %v10664_v8  ;;  %6496 = vperm.xlu1 %10378, %v5610_v9   ;;  %v5611_v44 = vld [vmem:[%s11251_s30 + $0x530] sm:$0xff]  ;;  %v10668_v9 = vld [vmem:[%s11185_s22 + $0x568] ss:$16 sps:$4 sm:$0xff]  }
 0x18e   : > { %9820 = vst [vmem:[%s11640_s11 + $0x60] sm:$0xff] %v9312_v37   ;;  %v5247_v49 = vmax.f32 %v4431_v51, 0.0  ;;  %v4434_v26 = vadd.f32 %v11906_v57, %v3505_v46  ;;  %3716 = vmatmul.mubr.bf16.gmra.mrb[160].mxu1 %v10651_v17  ;;  %6491 = vperm.xlu0 %10377, %v5609_v6   ;;  %v10657_v37 = vld [vmem:[%s11185_s22 + $0x520] ss:$16 sps:$4 sm:$0xff]   ;;  %v5612_v46 = vld [vmem:[%s11251_s30 + $0x538] sm:$0xff] }
 0x18f   : > { %3723 = vmatprep.mubr.bf16.mxu1 %v10654_v55  ;;  %v11975_v42 = vpop.permute.xlu0 %6101  ;;  %v11981_v51 = vpop.f32.mrb[64].mxu0 }
 0x190   : > { %v5248_v29 = vmax.f32 %v4434_v26, 0.0  ;;  %12997 = vst [vmem:[#allocation22_spill] sm:$0xff] %v11975_v42  ;;  %v6815_v57 = vmul.f32 %v11518_v63, %v5247_v49  ;;  %v4456_v26 = vpop.f32.mrb[65].mxu0  ;;  %v11992_v20 = vpop.permute.xlu1 %6116 }
 0x191   : > { %v3509_v43 = vpop.f32.mrb[56].mxu1  ;;  %6506 = vperm.xlu1 %10378, %v5612_v46  }
 0x192   : > { %v6816_v17 = vmul.f32 %v11516_v62, %v5248_v29  ;;  %v3510_v55 = vadd.f32 %v11960_v50, %v3509_v43  ;;  %v3511_v21 = vpop.f32.mrb[57].mxu1  ;;  %v11989_v29 = vpop.f32.mrb[66].mxu0  ;;  %v10670_v43 = vld [vmem:[%s11185_s22 + $0x58c] ss:$16 sps:$4 sm:$0xff]   ;;  %6501 = vperm.xlu0 %10377, %v5611_v44  }
 0x193   : > { %v3512_v8 = vpop.f32.mrb[58].mxu1  ;;  %v4459_v21 = vpop.f32.mrb[67].mxu0 }
 0x194   : > { %v9317_v6 = vpack.c.bf16 %v6816_v17, %v6815_v57  ;;  %v4439_v63 = vadd.f32 %v11924_v30, %v3510_v55  ;;  %v3513_v62 = vadd.f32 %v11960_v50, %v3512_v8  ;;  %v3514_v49 = vpop.f32.mrb[59].mxu1  ;;  %v5614_v57 = vld [vmem:[%s11251_s30 + $0x548] sm:$0xff]  ;;  %v5613_v17 = vld [vmem:[%s11251_s30 + $0x540] sm:$0xff]  ;;  %4669 = vmatmul.mubr.bf16.gmra.mrb[172].mxu0 %v10668_v9  ;;  %v11998_v30 = vpop.permute.xlu0 %6111 }
 0x195   : > { %8730 = vmatprep.mubr.msk.bf16.mxu0 %vm3026_vm0, %v10670_v43  ;;  %v12001_v44 = vpop.permute.xlu1 %6126  ;;  %6516 = vperm.xlu1 %10378, %v5614_v57   ;;  %v10663_v9 = vld [vmem:[%s11185_s22 + $0x540] ss:$16 sps:$4 sm:$0xff]   ;;  %v10666_v43 = vld [vmem:[%s11185_s22 + $0x564] ss:$16 sps:$4 sm:$0xff]  }
 0x196   : > { %9821 = vst [vmem:[%s11640_s11 + $0x68] sm:$0xff] %v9317_v6   ;;  %v5249_v42 = vmax.f32 %v4439_v63, 0.0  ;;  %v4442_v26 = vadd.f32 %v11932_v61, %v3513_v62  ;;  %3724 = vmatmul.mubr.bf16.gmra.mrb[164].mxu1 %v10657_v37  ;;  %12998 = vst [vmem:[#allocation23_spill] sm:$0xff] %v12001_v44  ;;  %6511 = vperm.xlu0 %10377, %v5613_v17   ;;  %v5616_v63 = vld [vmem:[%s11251_s30 + $0x558] sm:$0xff]  ;;  %v5615_v62 = vld [vmem:[%s11251_s30 + $0x550] sm:$0xff] }
 0x197   : > { %3731 = vmatprep.mubr.bf16.mxu1 %v10660_v33  ;;  %v12007_v6 = vpop.f32.mrb[68].mxu0 }
 0x198   : > { %v5250_v55 = vmax.f32 %v4442_v26, 0.0  ;;  %v6817_v61 = vmul.f32 %v11525_v3, %v5249_v42  ;;  %v4464_v21 = vpop.f32.mrb[69].mxu0  ;;  %v10674_v26 = vld [vmem:[%s11185_s22 + $0x588] ss:$16 sps:$4 sm:$0xff]  }
 0x199   : > { %v3517_v46 = vpop.f32.mrb[60].mxu1  ;;  %v12015_v17 = vpop.f32.mrb[70].mxu0  ;;  %6526 = vperm.xlu1 %10378, %v5616_v63  }
 0x19a   : > { %v6818_v37 = vmul.f32 %v11523_v2, %v5250_v55  ;;  %v3518_v8 = vadd.f32 %v11960_v50, %v3517_v46  ;;  %v3519_v33 = vpop.f32.mrb[61].mxu1  ;;  %v10676_v55 = vld [vmem:[%s11185_s22 + $0x5ac] ss:$16 sps:$4 sm:$0xff]   ;;  %v4467_v46 = vpop.f32.mrb[71].mxu0  ;;  %6521 = vperm.xlu0 %10377, %v5615_v62  }
 0x19b   : > { %v3520_v49 = vpop.f32.mrb[62].mxu1  ;;  %v12018_v33 = vpop.permute.xlu0 %6121 }
 0x19c   : > { %v9322_v57 = vpack.c.bf16 %v6818_v37, %v6817_v61  ;;  %v4447_v3 = vadd.f32 %v11950_v0, %v3518_v8  ;;  %v3521_v2 = vadd.f32 %v11960_v50, %v3520_v49  ;;  %v3522_v42 = vpop.f32.mrb[63].mxu1  ;;  %v5618_v61 = vld [vmem:[%s11251_s30 + $0x568] sm:$0xff]  ;;  %v5617_v37 = vld [vmem:[%s11251_s30 + $0x560] sm:$0xff]  ;;  %4677 = vmatmul.mubr.bf16.gmra.mrb[176].mxu0 %v10674_v26  ;;  %v12024_v0 = vpop.permute.xlu1 %6136 }
 0x19d   : > { %12999 = vst [vmem:[#allocation24_spill] sm:$0xff] %v12024_v0  ;;  %8731 = vmatprep.mubr.msk.bf16.mxu0 %vm3026_vm0, %v10676_v55  ;;  %6536 = vperm.xlu1 %10378, %v5618_v61   ;;  %v10669_v26 = vld [vmem:[%s11185_s22 + $0x560] ss:$16 sps:$4 sm:$0xff]   ;;  %v10672_v55 = vld [vmem:[%s11185_s22 + $0x584] ss:$16 sps:$4 sm:$0xff]  }
 0x19e   : > { %9822 = vst [vmem:[%s11640_s11 + $0x70] sm:$0xff] %v9322_v57   ;;  %v5251_v44 = vmax.f32 %v4447_v3, 0.0  ;;  %v4450_v21 = vadd.f32 %v11963_v5, %v3521_v2  ;;  %3732 = vmatmul.mubr.bf16.gmra.mrb[168].mxu1 %v10663_v9  ;;  %6531 = vperm.xlu0 %10377, %v5617_v37   ;;  %v5620_v3 = vld [vmem:[%s11251_s30 + $0x578] sm:$0xff]  ;;  %v5619_v2 = vld [vmem:[%s11251_s30 + $0x570] sm:$0xff] }
 0x19f   : > { %3739 = vmatprep.mubr.bf16.mxu1 %v10666_v43  ;;  %v12027_v62 = vpop.permute.xlu0 %6131  ;;  %v12033_v57 = vpop.f32.mrb[72].mxu0 }
 0x1a0   : > { %v5252_v8 = vmax.f32 %v4450_v21, 0.0  ;;  %v6819_v5 = vmul.f32 %v11535_v15, %v5251_v44  ;;  %v4472_v46 = vpop.f32.mrb[73].mxu0  ;;  %v10680_v21 = vld [vmem:[%s11185_s22 + $0x5a8] ss:$16 sps:$4 sm:$0xff]  }
 0x1a1   : > { %v3525_v63 = vpop.f32.mrb[64].mxu1  ;;  %v12041_v37 = vpop.f32.mrb[74].mxu0  ;;  %6546 = vperm.xlu1 %10378, %v5620_v3  }
 0x1a2   : > { %v6820_v9 = vmul.f32 %v11533_v14, %v5252_v8  ;;  %v3526_v49 = vadd.f32 %v11960_v50, %v3525_v63  ;;  %v3527_v43 = vpop.f32.mrb[65].mxu1  ;;  %v10682_v8 = vld [vmem:[%s11185_s22 + $0x5cc] ss:$16 sps:$4 sm:$0xff]   ;;  %v4475_v63 = vpop.f32.mrb[75].mxu0  ;;  %6541 = vperm.xlu0 %10377, %v5619_v2  }
 0x1a3   : > { %v3528_v42 = vpop.f32.mrb[66].mxu1  ;;  %v12044_v43 = vpop.permute.xlu1 %6146 }
 0x1a4   : > { %v9327_v61 = vpack.c.bf16 %v6820_v9, %v6819_v5  ;;  %v4455_v15 = vadd.f32 %v11981_v51, %v3526_v49  ;;  %v3529_v14 = vadd.f32 %v11960_v50, %v3528_v42  ;;  %v3530_v44 = vpop.f32.mrb[67].mxu1  ;;  %v5622_v5 = vld [vmem:[%s11251_s30 + $0x588] sm:$0xff]  ;;  %v5621_v9 = vld [vmem:[%s11251_s30 + $0x580] sm:$0xff]  ;;  %4685 = vmatmul.mubr.bf16.gmra.mrb[180].mxu0 %v10680_v21  ;;  %v12050_v51 = vpop.permute.xlu0 %6141 }
 0x1a5   : > { %8732 = vmatprep.mubr.msk.bf16.mxu0 %vm3026_vm0, %v10682_v8  ;;  %6556 = vperm.xlu1 %10378, %v5622_v5   ;;  %v10675_v21 = vld [vmem:[%s11185_s22 + $0x580] ss:$16 sps:$4 sm:$0xff]   ;;  %v10678_v8 = vld [vmem:[%s11185_s22 + $0x5a4] ss:$16 sps:$4 sm:$0xff]  }
 0x1a6   : > { %9823 = vst [vmem:[%s11640_s11 + $0x78] sm:$0xff] %v9327_v61   ;;  %v5253_v0 = vmax.f32 %v4455_v15, 0.0  ;;  %v4458_v46 = vadd.f32 %v11989_v29, %v3529_v14  ;;  %3740 = vmatmul.mubr.bf16.gmra.mrb[172].mxu1 %v10669_v26  ;;  %6551 = vperm.xlu0 %10377, %v5621_v9   ;;  %v5624_v15 = vld [vmem:[%s11251_s30 + $0x598] sm:$0xff]  ;;  %v5623_v14 = vld [vmem:[%s11251_s30 + $0x590] sm:$0xff] }
 0x1a7   : > { %3747 = vmatprep.mubr.bf16.mxu1 %v10672_v55  ;;  %v12053_v2 = vpop.permute.xlu1 %6156  ;;  %v12059_v61 = vpop.f32.mrb[76].mxu0 }
 0x1a8   : > { %v5254_v49 = vmax.f32 %v4458_v46, 0.0  ;;  %13000 = vst [vmem:[#allocation25_spill] sm:$0xff] %v12053_v2  ;;  %v6821_v29 = vmul.f32 %v11542_v23, %v5253_v0  ;;  %v4480_v63 = vpop.f32.mrb[77].mxu0  ;;  %v10686_v46 = vld [vmem:[%s11185_s22 + $0x5c8] ss:$16 sps:$4 sm:$0xff]  }
 0x1a9   : > { %v3533_v3 = vpop.f32.mrb[68].mxu1  ;;  %v12067_v9 = vpop.f32.mrb[78].mxu0  ;;  %6566 = vperm.xlu1 %10378, %v5624_v15  }
 0x1aa   : > { %v6822_v26 = vmul.f32 %v11540_v22, %v5254_v49  ;;  %v3534_v42 = vadd.f32 %v11960_v50, %v3533_v3  ;;  %v3535_v55 = vpop.f32.mrb[69].mxu1  ;;  %v10688_v49 = vld [vmem:[%s11185_s22 + $0x5ec] ss:$16 sps:$4 sm:$0xff]   ;;  %v4483_v3 = vpop.f32.mrb[79].mxu0  ;;  %6561 = vperm.xlu0 %10377, %v5623_v14  }
 0x1ab   : > { %v3536_v44 = vpop.f32.mrb[70].mxu1  ;;  %v12070_v55 = vpop.permute.xlu0 %6151 }
 0x1ac   : > { %v9332_v5 = vpack.c.bf16 %v6822_v26, %v6821_v29  ;;  %v4463_v23 = vadd.f32 %v12007_v6, %v3534_v42  ;;  %v3537_v22 = vadd.f32 %v11960_v50, %v3536_v44  ;;  %v3538_v0 = vpop.f32.mrb[71].mxu1  ;;  %v5626_v29 = vld [vmem:[%s11251_s30 + $0x5a8] sm:$0xff]  ;;  %v5625_v26 = vld [vmem:[%s11251_s30 + $0x5a0] sm:$0xff]  ;;  %4693 = vmatmul.mubr.bf16.gmra.mrb[184].mxu0 %v10686_v46  ;;  %v12076_v6 = vpop.permute.xlu1 %6166 }
 0x1ad   : > { %13001 = vst [vmem:[#allocation26_spill] sm:$0xff] %v12076_v6  ;;  %8733 = vmatprep.mubr.msk.bf16.mxu0 %vm3026_vm0, %v10688_v49  ;;  %6576 = vperm.xlu1 %10378, %v5626_v29   ;;  %v10681_v46 = vld [vmem:[%s11185_s22 + $0x5a0] ss:$16 sps:$4 sm:$0xff]   ;;  %v10684_v49 = vld [vmem:[%s11185_s22 + $0x5c4] ss:$16 sps:$4 sm:$0xff]  }
 0x1ae   : > { %9824 = vst [vmem:[%s11640_s11 + $0x80] sm:$0xff] %v9332_v5   ;;  %v5255_v2 = vmax.f32 %v4463_v23, 0.0  ;;  %v4466_v63 = vadd.f32 %v12015_v17, %v3537_v22  ;;  %3748 = vmatmul.mubr.bf16.gmra.mrb[176].mxu1 %v10675_v21  ;;  %6571 = vperm.xlu0 %10377, %v5625_v26   ;;  %v5628_v23 = vld [vmem:[%s11251_s30 + $0x5b8] sm:$0xff]  ;;  %v5627_v22 = vld [vmem:[%s11251_s30 + $0x5b0] sm:$0xff] }
 0x1af   : > { %3755 = vmatprep.mubr.bf16.mxu1 %v10678_v8  ;;  %v12079_v14 = vpop.permute.xlu0 %6161  ;;  %v12085_v5 = vpop.f32.mrb[80].mxu0 }
 0x1b0   : > { %v5256_v42 = vmax.f32 %v4466_v63, 0.0  ;;  %v6823_v17 = vmul.f32 %v11552_v35, %v5255_v2  ;;  %v4488_v3 = vpop.f32.mrb[81].mxu0  ;;  %v10692_v63 = vld [vmem:[%s11185_s22 + $0x5e8] ss:$16 sps:$4 sm:$0xff]  }
 0x1b1   : > { %v3541_v15 = vpop.f32.mrb[72].mxu1  ;;  %v12093_v26 = vpop.f32.mrb[82].mxu0  ;;  %6586 = vperm.xlu1 %10378, %v5628_v23  }
 0x1b2   : > { %v6824_v21 = vmul.f32 %v11550_v34, %v5256_v42  ;;  %v3542_v44 = vadd.f32 %v11960_v50, %v3541_v15  ;;  %v3543_v8 = vpop.f32.mrb[73].mxu1  ;;  %v10694_v42 = vld [vmem:[%s11185_s22 + $0x60c] ss:$16 sps:$4 sm:$0xff]   ;;  %v4491_v15 = vpop.f32.mrb[83].mxu0  ;;  %6581 = vperm.xlu0 %10377, %v5627_v22  }
 0x1b3   : > { %v3544_v0 = vpop.f32.mrb[74].mxu1  ;;  %v12096_v8 = vpop.permute.xlu1 %6176 }
 0x1b4   : > { %v9337_v29 = vpack.c.bf16 %v6824_v21, %v6823_v17  ;;  %v4471_v35 = vadd.f32 %v12033_v57, %v3542_v44  ;;  %v3545_v34 = vadd.f32 %v11960_v50, %v3544_v0  ;;  %v3546_v2 = vpop.f32.mrb[75].mxu1  ;;  %v5630_v17 = vld [vmem:[%s11251_s30 + $0x5c8] sm:$0xff]  ;;  %v5629_v21 = vld [vmem:[%s11251_s30 + $0x5c0] sm:$0xff]  ;;  %4701 = vmatmul.mubr.bf16.gmra.mrb[188].mxu0 %v10692_v63  ;;  %v12102_v57 = vpop.permute.xlu0 %6171 }
 0x1b5   : > { %8734 = vmatprep.mubr.msk.bf16.mxu0 %vm3026_vm0, %v10694_v42  ;;  %6596 = vperm.xlu1 %10378, %v5630_v17   ;;  %v10687_v63 = vld [vmem:[%s11185_s22 + $0x5c0] ss:$16 sps:$4 sm:$0xff]   ;;  %v10690_v42 = vld [vmem:[%s11185_s22 + $0x5e4] ss:$16 sps:$4 sm:$0xff]  }
 0x1b6   : > { %9825 = vst [vmem:[%s11640_s11 + $0x88] sm:$0xff] %v9337_v29   ;;  %v5257_v6 = vmax.f32 %v4471_v35, 0.0  ;;  %v4474_v3 = vadd.f32 %v12041_v37, %v3545_v34  ;;  %3756 = vmatmul.mubr.bf16.gmra.mrb[180].mxu1 %v10681_v46  ;;  %6591 = vperm.xlu0 %10377, %v5629_v21   ;;  %v5632_v35 = vld [vmem:[%s11251_s30 + $0x5d8] sm:$0xff]  ;;  %v5631_v34 = vld [vmem:[%s11251_s30 + $0x5d0] sm:$0xff] }
 0x1b7   : > { %3763 = vmatprep.mubr.bf16.mxu1 %v10684_v49  ;;  %v12105_v22 = vpop.permute.xlu1 %6186  ;;  %v12111_v29 = vpop.f32.mrb[84].mxu0 }
 0x1b8   : > { %v5258_v44 = vmax.f32 %v4474_v3, 0.0  ;;  %13002 = vst [vmem:[#allocation27_spill] sm:$0xff] %v12105_v22  ;;  %v6825_v37 = vmul.f32 %v11559_v41, %v5257_v6  ;;  %v4496_v15 = vpop.f32.mrb[85].mxu0  ;;  %v10698_v3 = vld [vmem:[%s11185_s22 + $0x608] ss:$16 sps:$4 sm:$0xff]  }
 0x1b9   : > { %v3549_v23 = vpop.f32.mrb[76].mxu1  ;;  %v12119_v21 = vpop.f32.mrb[86].mxu0  ;;  %6606 = vperm.xlu1 %10378, %v5632_v35  }
 0x1ba   : > { %v6826_v46 = vmul.f32 %v11557_v40, %v5258_v44  ;;  %v3550_v0 = vadd.f32 %v11960_v50, %v3549_v23  ;;  %v3551_v49 = vpop.f32.mrb[77].mxu1  ;;  %v10700_v44 = vld [vmem:[%s11185_s22 + $0x62c] ss:$16 sps:$4 sm:$0xff]   ;;  %v4499_v23 = vpop.f32.mrb[87].mxu0  ;;  %6601 = vperm.xlu0 %10377, %v5631_v34  }
 0x1bb   : > { %v3552_v2 = vpop.f32.mrb[78].mxu1  ;;  %v12122_v49 = vpop.permute.xlu0 %6181 }
 0x1bc   : > { %v9342_v17 = vpack.c.bf16 %v6826_v46, %v6825_v37  ;;  %v4479_v41 = vadd.f32 %v12059_v61, %v3550_v0  ;;  %v3553_v40 = vadd.f32 %v11960_v50, %v3552_v2  ;;  %v3554_v6 = vpop.f32.mrb[79].mxu1  ;;  %v5634_v37 = vld [vmem:[%s11251_s30 + $0x5e8] sm:$0xff]  ;;  %v5633_v46 = vld [vmem:[%s11251_s30 + $0x5e0] sm:$0xff]  ;;  %4709 = vmatmul.mubr.bf16.gmra.mrb[192].mxu0 %v10698_v3  ;;  %v12128_v61 = vpop.permute.xlu1 %6196 }
 0x1bd   : > { %13003 = vst [vmem:[#allocation28_spill] sm:$0xff] %v12128_v61  ;;  %8735 = vmatprep.mubr.msk.bf16.mxu0 %vm3026_vm0, %v10700_v44  ;;  %6616 = vperm.xlu1 %10378, %v5634_v37   ;;  %v10693_v3 = vld [vmem:[%s11185_s22 + $0x5e0] ss:$16 sps:$4 sm:$0xff]   ;;  %v10696_v44 = vld [vmem:[%s11185_s22 + $0x604] ss:$16 sps:$4 sm:$0xff]  }
 0x1be   : > { %9826 = vst [vmem:[%s11640_s11 + $0x90] sm:$0xff] %v9342_v17   ;;  %v5259_v22 = vmax.f32 %v4479_v41, 0.0  ;;  %v4482_v15 = vadd.f32 %v12067_v9, %v3553_v40  ;;  %3764 = vmatmul.mubr.bf16.gmra.mrb[184].mxu1 %v10687_v63  ;;  %6611 = vperm.xlu0 %10377, %v5633_v46   ;;  %v5636_v41 = vld [vmem:[%s11251_s30 + $0x5f8] sm:$0xff]  ;;  %v5635_v40 = vld [vmem:[%s11251_s30 + $0x5f0] sm:$0xff] }
 0x1bf   : > { %3771 = vmatprep.mubr.bf16.mxu1 %v10690_v42  ;;  %v12131_v34 = vpop.permute.xlu0 %6191  ;;  %v12137_v17 = vpop.f32.mrb[88].mxu0 }
 0x1c0   : > { %v5260_v0 = vmax.f32 %v4482_v15, 0.0  ;;  %13004 = vst [vmem:[#allocation29_spill] sm:$0xff] %v12131_v34  ;;  %v6827_v9 = vmul.f32 %v11571_v7, %v5259_v22  ;;  %v4504_v23 = vpop.f32.mrb[89].mxu0  ;;  %v10704_v15 = vld [vmem:[%s11185_s22 + $0x628] ss:$16 sps:$4 sm:$0xff]   ;;  %v5649_v34 = vld [vmem:[%s11251_s30 + $0x660] sm:$0xff] }
 0x1c1   : > { %v3557_v35 = vpop.f32.mrb[80].mxu1  ;;  %v12145_v46 = vpop.f32.mrb[90].mxu0  ;;  %6626 = vperm.xlu1 %10378, %v5636_v41  }
 0x1c2   : > { %v6828_v63 = vmul.f32 %v11569_v1, %v5260_v0  ;;  %v3558_v2 = vadd.f32 %v11960_v50, %v3557_v35  ;;  %v3559_v42 = vpop.f32.mrb[81].mxu1  ;;  %v10706_v0 = vld [vmem:[%s11185_s22 + $0x64c] ss:$16 sps:$4 sm:$0xff]   ;;  %v4507_v35 = vpop.f32.mrb[91].mxu0  ;;  %6621 = vperm.xlu0 %10377, %v5635_v40  }
 0x1c3   : > { %v3560_v6 = vpop.f32.mrb[82].mxu1  ;;  %v12148_v42 = vpop.permute.xlu1 %6206 }
 0x1c4   : > { %v9347_v37 = vpack.c.bf16 %v6828_v63, %v6827_v9  ;;  %v4487_v7 = vadd.f32 %v12085_v5, %v3558_v2  ;;  %v3561_v1 = vadd.f32 %v11960_v50, %v3560_v6  ;;  %v3562_v22 = vpop.f32.mrb[83].mxu1  ;;  %13005 = vst [vmem:[#allocation30_spill] sm:$0xff] %v12148_v42  ;;  %v5638_v9 = vld [vmem:[%s11251_s30 + $0x608] sm:$0xff]  ;;  %v5637_v63 = vld [vmem:[%s11251_s30 + $0x600] sm:$0xff]  ;;  %4717 = vmatmul.mubr.bf16.gmra.mrb[196].mxu0 %v10704_v15  ;;  %v12154_v5 = vpop.permute.xlu0 %6201 }
 0x1c5   : > { %13006 = vst [vmem:[#allocation31_spill] sm:$0xff] %v12154_v5  ;;  %8736 = vmatprep.mubr.msk.bf16.mxu0 %vm3026_vm0, %v10706_v0  ;;  %6636 = vperm.xlu1 %10378, %v5638_v9   ;;  %v13009_v6 = vld [vmem:[#allocation2_spill] sm:$0xff]  ;;  %v5640_v22 = vld [vmem:[%s11251_s30 + $0x618] sm:$0xff]  ;;  %v5639_v0 = vld [vmem:[%s11251_s30 + $0x610] sm:$0xff] }
 0x1c6   : > { %9827 = vst [vmem:[%s11640_s11 + $0x98] sm:$0xff] %v9347_v37   ;;  %v5261_v61 = vmax.f32 %v4487_v7, 0.0  ;;  %v4490_v23 = vadd.f32 %v12093_v26, %v3561_v1  ;;  %3772 = vmatmul.mubr.bf16.gmra.mrb[188].mxu1 %v10693_v3  ;;  %6631 = vperm.xlu0 %10377, %v5637_v63   ;;  %v13008_v26 = vld [vmem:[#allocation3_spill] sm:$0xff]  ;;  %v10699_v7 = vld [vmem:[%s11185_s22 + $0x600] ss:$16 sps:$4 sm:$0xff]  }
 0x1c7   : > { %3779 = vmatprep.mubr.bf16.mxu1 %v10696_v44  ;;  %v12157_v40 = vpop.permute.xlu1 %6216  ;;  %v12163_v1 = vpop.f32.mrb[92].mxu0  ;;  %v10710_v9 = vld [vmem:[%s11185_s22 + $0x648] ss:$16 sps:$4 sm:$0xff]  }
 0x1c8   : > { %v5262_v2 = vmax.f32 %v4490_v23, 0.0  ;;  %13007 = vst [vmem:[#allocation32_spill] sm:$0xff] %v12157_v40  ;;  %v6829_v3 = vmul.f32 %v13008_v26, %v5261_v61  ;;  %v10702_v23 = vld [vmem:[%s11185_s22 + $0x624] ss:$16 sps:$4 sm:$0xff]   ;;  %v4512_v42 = vpop.f32.mrb[93].mxu0  ;;  %v12174_v40 = vpop.permute.xlu0 %6211 }
 0x1c9   : > { %v3565_v41 = vpop.f32.mrb[84].mxu1  ;;  %13010 = vst [vmem:[#allocation3_spill] sm:$0xff] %v12174_v40  ;;  %6646 = vperm.xlu1 %10378, %v5640_v22  }
 0x1ca   : > { %v6830_v37 = vmul.f32 %v13009_v6, %v5262_v2  ;;  %v3566_v44 = vadd.f32 %v11960_v50, %v3565_v41  ;;  %v3567_v15 = vpop.f32.mrb[85].mxu1  ;;  %v12171_v41 = vpop.f32.mrb[94].mxu0  ;;  %v10712_v6 = vld [vmem:[%s11185_s22 + $0x66c] ss:$16 sps:$4 sm:$0xff]   ;;  %6641 = vperm.xlu0 %10377, %v5639_v0  }
 0x1cb   : > { %v3568_v35 = vpop.f32.mrb[86].mxu1  ;;  %v4515_v15 = vpop.f32.mrb[95].mxu0 }
 0x1cc   : > { %v9352_v63 = vpack.c.bf16 %v6830_v37, %v6829_v3  ;;  %v4495_v61 = vadd.f32 %v12111_v29, %v3566_v44  ;;  %v3569_v2 = vadd.f32 %v11960_v50, %v3568_v35  ;;  %v3570_v26 = vpop.f32.mrb[87].mxu1  ;;  %v5642_v3 = vld [vmem:[%s11251_s30 + $0x628] sm:$0xff]  ;;  %v5641_v37 = vld [vmem:[%s11251_s30 + $0x620] sm:$0xff]  ;;  %4725 = vmatmul.mubr.bf16.gmra.mrb[200].mxu0 %v10710_v9  ;;  %v12180_v29 = vpop.permute.xlu1 %6226  ;;  %v13014_v35 = vld [vmem:[#allocation4_spill] sm:$0xff] }
 0x1cd   : > { %13011 = vst [vmem:[#allocation2_spill] sm:$0xff] %v12180_v29  ;;  %8737 = vmatprep.mubr.msk.bf16.mxu0 %vm3026_vm0, %v10712_v6  ;;  %v12183_v0 = vpop.permute.xlu0 %6221  ;;  %6656 = vperm.xlu1 %10378, %v5642_v3   ;;  %v5644_v26 = vld [vmem:[%s11251_s30 + $0x638] sm:$0xff]  ;;  %v5643_v6 = vld [vmem:[%s11251_s30 + $0x630] sm:$0xff] }
 0x1ce   : > { %9828 = vst [vmem:[%s11640_s11 + $0xa0] sm:$0xff] %v9352_v63   ;;  %v5263_v5 = vmax.f32 %v4495_v61, 0.0  ;;  %v4498_v42 = vadd.f32 %v12119_v21, %v3569_v2  ;;  %3780 = vmatmul.mubr.bf16.gmra.mrb[192].mxu1 %v10699_v7  ;;  %13012 = vst [vmem:[#allocation33_spill] sm:$0xff] %v12183_v0  ;;  %6651 = vperm.xlu0 %10377, %v5641_v37   ;;  %v13013_v21 = vld [vmem:[#allocation5_spill] sm:$0xff]  ;;  %v10705_v61 = vld [vmem:[%s11185_s22 + $0x620] ss:$16 sps:$4 sm:$0xff]  }
 0x1cf   : > { %3787 = vmatprep.mubr.bf16.mxu1 %v10702_v23  ;;  %v12189_v2 = vpop.f32.mrb[96].mxu0  ;;  %v10716_v3 = vld [vmem:[%s11185_s22 + $0x668] ss:$16 sps:$4 sm:$0xff]  }
 0x1d0   : > { %v5264_v44 = vmax.f32 %v4498_v42, 0.0  ;;  %v6831_v7 = vmul.f32 %v13013_v21, %v5263_v5  ;;  %v10708_v42 = vld [vmem:[%s11185_s22 + $0x644] ss:$16 sps:$4 sm:$0xff]   ;;  %v4520_v29 = vpop.f32.mrb[97].mxu0  ;;  %v12200_v0 = vpop.permute.xlu1 %6236 }
 0x1d1   : > { %v3573_v22 = vpop.f32.mrb[88].mxu1  ;;  %13015 = vst [vmem:[#allocation5_spill] sm:$0xff] %v12200_v0  ;;  %6666 = vperm.xlu1 %10378, %v5644_v26  }
 0x1d2   : > { %v6832_v63 = vmul.f32 %v13014_v35, %v5264_v44  ;;  %v3574_v23 = vadd.f32 %v11960_v50, %v3573_v22  ;;  %v3575_v9 = vpop.f32.mrb[89].mxu1  ;;  %v12197_v22 = vpop.f32.mrb[98].mxu0  ;;  %v10718_v35 = vld [vmem:[%s11185_s22 + $0x68c] ss:$16 sps:$4 sm:$0xff]   ;;  %6661 = vperm.xlu0 %10377, %v5643_v6  }
 0x1d3   : > { %v3576_v15 = vpop.f32.mrb[90].mxu1  ;;  %v4523_v9 = vpop.f32.mrb[99].mxu0 }
 0x1d4   : > { %v9357_v37 = vpack.c.bf16 %v6832_v63, %v6831_v7  ;;  %v4503_v5 = vadd.f32 %v12137_v17, %v3574_v23  ;;  %v3577_v44 = vadd.f32 %v11960_v50, %v3576_v15  ;;  %v3578_v21 = vpop.f32.mrb[91].mxu1  ;;  %v5646_v7 = vld [vmem:[%s11251_s30 + $0x648] sm:$0xff]  ;;  %v5645_v63 = vld [vmem:[%s11251_s30 + $0x640] sm:$0xff]  ;;  %4733 = vmatmul.mubr.bf16.gmra.mrb[204].mxu0 %v10716_v3  ;;  %v12207_v23 = vpop.permute.xlu0 %6231 }
 0x1d5   : > { %8738 = vmatprep.mubr.msk.bf16.mxu0 %vm3026_vm0, %v10718_v35  ;;  %13016 = vst [vmem:[#allocation4_spill] sm:$0xff] %v12207_v23  ;;  %v12209_v6 = vpop.permute.xlu1 %6246  ;;  %6676 = vperm.xlu1 %10378, %v5646_v7   ;;  %v13019_v15 = vld [vmem:[#allocation6_spill] sm:$0xff]  ;;  %v5648_v21 = vld [vmem:[%s11251_s30 + $0x658] sm:$0xff]  ;;  %v5647_v35 = vld [vmem:[%s11251_s30 + $0x650] sm:$0xff] }
 0x1d6   : > { %9829 = vst [vmem:[%s11640_s11 + $0xa8] sm:$0xff] %v9357_v37   ;;  %v5265_v40 = vmax.f32 %v4503_v5, 0.0  ;;  %v4506_v29 = vadd.f32 %v12145_v46, %v3577_v44  ;;  %3788 = vmatmul.mubr.bf16.gmra.mrb[196].mxu1 %v10705_v61  ;;  %13017 = vst [vmem:[#allocation34_spill] sm:$0xff] %v12209_v6  ;;  %6671 = vperm.xlu0 %10377, %v5645_v63   ;;  %v13018_v46 = vld [vmem:[#allocation7_spill] sm:$0xff]  ;;  %v10711_v5 = vld [vmem:[%s11185_s22 + $0x640] ss:$16 sps:$4 sm:$0xff]  }
 0x1d7   : > { %3795 = vmatprep.mubr.bf16.mxu1 %v10708_v42  ;;  %v12215_v44 = vpop.f32.mrb[100].mxu0  ;;  %v10722_v7 = vld [vmem:[%s11185_s22 + $0x688] ss:$16 sps:$4 sm:$0xff]  }
 0x1d8   : > { %v5266_v17 = vmax.f32 %v4506_v29, 0.0  ;;  %v6833_v61 = vmul.f32 %v13018_v46, %v5265_v40  ;;  %v10714_v29 = vld [vmem:[%s11185_s22 + $0x664] ss:$16 sps:$4 sm:$0xff]   ;;  %v4528_v6 = vpop.f32.mrb[101].mxu0 }
 0x1d9   : > { %v3581_v26 = vpop.f32.mrb[92].mxu1  ;;  %6686 = vperm.xlu1 %10378, %v5648_v21   ;;  %v5650_v6 = vld [vmem:[%s11251_s30 + $0x668] sm:$0xff] }
 0x1da   : > { %v6834_v37 = vmul.f32 %v13019_v15, %v5266_v17  ;;  %v3582_v42 = vadd.f32 %v11960_v50, %v3581_v26  ;;  %v3583_v3 = vpop.f32.mrb[93].mxu1  ;;  %v12223_v26 = vpop.f32.mrb[102].mxu0  ;;  %v10724_v15 = vld [vmem:[%s11185_s22 + $0x6ac] ss:$16 sps:$4 sm:$0xff]   ;;  %6681 = vperm.xlu0 %10377, %v5647_v35  }
 0x1db   : > { %v3584_v9 = vpop.f32.mrb[94].mxu1  ;;  %v4531_v3 = vpop.f32.mrb[103].mxu0 }
 0x1dc   : > { %v9362_v63 = vpack.c.bf16 %v6834_v37, %v6833_v61  ;;  %v4511_v40 = vadd.f32 %v12163_v1, %v3582_v42  ;;  %v3585_v17 = vadd.f32 %v11960_v50, %v3584_v9  ;;  %v3586_v46 = vpop.f32.mrb[95].mxu1  ;;  %4741 = vmatmul.mubr.bf16.gmra.mrb[208].mxu0 %v10722_v7  ;;  %v12231_v61 = vpop.permute.xlu0 %6241  ;;  %v5652_v7 = vld [vmem:[%s11251_s30 + $0x678] sm:$0xff] }
 0x1dd   : > { %8739 = vmatprep.mubr.msk.bf16.mxu0 %vm3026_vm0, %v10724_v15  ;;  %v12233_v42 = vpop.permute.xlu1 %6256  ;;  %6696 = vperm.xlu1 %10378, %v5650_v6  }
 0x1de   : > { %9830 = vst [vmem:[%s11640_s11 + $0xb0] sm:$0xff] %v9362_v63   ;;  %v5267_v0 = vmax.f32 %v4511_v40, 0.0  ;;  %v4514_v23 = vadd.f32 %v12171_v41, %v3585_v17  ;;  %3796 = vmatmul.mubr.bf16.gmra.mrb[200].mxu1 %v10711_v5  ;;  %13020 = vst [vmem:[#allocation7_spill] sm:$0xff] %v12233_v42  ;;  %6691 = vperm.xlu0 %10377, %v5649_v34   ;;  %v13021_v5 = vld [vmem:[#allocation8_spill] sm:$0xff]  ;;  %v10728_v34 = vld [vmem:[%s11185_s22 + $0x6a8] ss:$16 sps:$4 sm:$0xff]  }
 0x1df   : > { %3803 = vmatprep.mubr.bf16.mxu1 %v10714_v29  ;;  %v12239_v29 = vpop.f32.mrb[104].mxu0  ;;  %v5651_v63 = vld [vmem:[%s11251_s30 + $0x670] sm:$0xff]  ;;  %v5653_v42 = vld [vmem:[%s11251_s30 + $0x680] sm:$0xff] }
 0x1e0   : > { %v5268_v1 = vmax.f32 %v4514_v23, 0.0  ;;  %v6835_v41 = vmul.f32 %v11623_v52, %v5267_v0  ;;  %v10717_v23 = vld [vmem:[%s11185_s22 + $0x660] ss:$16 sps:$4 sm:$0xff]   ;;  %v10720_v17 = vld [vmem:[%s11185_s22 + $0x684] ss:$16 sps:$4 sm:$0xff]   ;;  %v4536_v46 = vpop.f32.mrb[105].mxu0 }
 0x1e1   : > { %v3589_v37 = vpop.f32.mrb[96].mxu1  ;;  %v12247_v6 = vpop.f32.mrb[106].mxu0  ;;  %6706 = vperm.xlu1 %10378, %v5652_v7   ;;  %v5654_v46 = vld [vmem:[%s11251_s30 + $0x688] sm:$0xff] }
 0x1e2   : > { %v6836_v21 = vmul.f32 %v13021_v5, %v5268_v1  ;;  %v3590_v35 = vadd.f32 %v11960_v50, %v3589_v37  ;;  %v3591_v9 = vpop.f32.mrb[97].mxu1  ;;  %v10730_v1 = vld [vmem:[%s11185_s22 + $0x6cc] ss:$16 sps:$4 sm:$0xff]   ;;  %v4539_v37 = vpop.f32.mrb[107].mxu0  ;;  %6701 = vperm.xlu0 %10377, %v5651_v63  }
 0x1e3   : > { %v3592_v40 = vpop.f32.mrb[98].mxu1 }
 0x1e4   : > { %v9367_v15 = vpack.c.bf16 %v6836_v21, %v6835_v41  ;;  %v4519_v52 = vadd.f32 %v12189_v2, %v3590_v35  ;;  %v3593_v0 = vadd.f32 %v11960_v50, %v3592_v40  ;;  %v3594_v3 = vpop.f32.mrb[99].mxu1  ;;  %4749 = vmatmul.mubr.bf16.gmra.mrb[212].mxu0 %v10728_v34  ;;  %v12255_v41 = vpop.permute.xlu0 %6251 }
 0x1e5   : > { %8740 = vmatprep.mubr.msk.bf16.mxu0 %vm3026_vm0, %v10730_v1  ;;  %v12257_v35 = vpop.permute.xlu1 %6266  ;;  %6716 = vperm.xlu1 %10378, %v5654_v46   ;;  %v10726_v3 = vld [vmem:[%s11185_s22 + $0x6a4] ss:$16 sps:$4 sm:$0xff]  }
 0x1e6   : > { %9831 = vst [vmem:[%s11640_s11 + $0xb8] sm:$0xff] %v9367_v15   ;;  %v5269_v5 = vmax.f32 %v4519_v52, 0.0  ;;  %v4522_v9 = vadd.f32 %v12197_v22, %v3593_v0  ;;  %3804 = vmatmul.mubr.bf16.gmra.mrb[204].mxu1 %v10717_v23  ;;  %13022 = vst [vmem:[#allocation6_spill] sm:$0xff] %v12257_v35  ;;  %6711 = vperm.xlu0 %10377, %v5653_v42   ;;  %v13023_v23 = vld [vmem:[#allocation9_spill] sm:$0xff]  ;;  %v5655_v52 = vld [vmem:[%s11251_s30 + $0x690] sm:$0xff] }
 0x1e7   : > { %3811 = vmatprep.mubr.bf16.mxu1 %v10720_v17  ;;  %v10723_v17 = vld [vmem:[%s11185_s22 + $0x680] ss:$16 sps:$4 sm:$0xff]   ;;  %v12263_v34 = vpop.f32.mrb[108].mxu0  ;;  %v5656_v15 = vld [vmem:[%s11251_s30 + $0x698] sm:$0xff] }
 0x1e8   : > { %v5270_v2 = vmax.f32 %v4522_v9, 0.0  ;;  %v6837_v22 = vmul.f32 %v11649_v58, %v5269_v5  ;;  %v4544_v1 = vpop.f32.mrb[109].mxu0  ;;  %v10734_v42 = vld [vmem:[%s11185_s22 + $0x6c8] ss:$16 sps:$4 sm:$0xff]   ;;  %v5657_v35 = vld [vmem:[%s11251_s30 + $0x6a0] sm:$0xff] }
 0x1e9   : > { %v3597_v21 = vpop.f32.mrb[100].mxu1  ;;  %v12271_v46 = vpop.f32.mrb[110].mxu0  ;;  %6726 = vperm.xlu1 %10378, %v5656_v15   ;;  %v5658_v1 = vld [vmem:[%s11251_s30 + $0x6a8] sm:$0xff] }
 0x1ea   : > { %v6838_v7 = vmul.f32 %v13023_v23, %v5270_v2  ;;  %v3598_v63 = vadd.f32 %v11960_v50, %v3597_v21  ;;  %v3599_v40 = vpop.f32.mrb[101].mxu1  ;;  %v10736_v2 = vld [vmem:[%s11185_s22 + $0x6ec] ss:$16 sps:$4 sm:$0xff]   ;;  %v4547_v21 = vpop.f32.mrb[111].mxu0  ;;  %6721 = vperm.xlu0 %10377, %v5655_v52  }
 0x1eb   : > { %v3600_v0 = vpop.f32.mrb[102].mxu1 }
 0x1ec   : > { %v9372_v37 = vpack.c.bf16 %v6838_v7, %v6837_v22  ;;  %v4527_v58 = vadd.f32 %v12215_v44, %v3598_v63  ;;  %v3601_v5 = vadd.f32 %v11960_v50, %v3600_v0  ;;  %v3602_v9 = vpop.f32.mrb[103].mxu1  ;;  %4757 = vmatmul.mubr.bf16.gmra.mrb[216].mxu0 %v10734_v42  ;;  %v12279_v22 = vpop.permute.xlu0 %6261 }
 0x1ed   : > { %8741 = vmatprep.mubr.msk.bf16.mxu0 %vm3026_vm0, %v10736_v2  ;;  %v12281_v63 = vpop.permute.xlu1 %6276  ;;  %6736 = vperm.xlu1 %10378, %v5658_v1   ;;  %v10732_v9 = vld [vmem:[%s11185_s22 + $0x6c4] ss:$16 sps:$4 sm:$0xff]  }
 0x1ee   : > { %9832 = vst [vmem:[%s11640_s11 + $0xc0] sm:$0xff] %v9372_v37   ;;  %v5271_v23 = vmax.f32 %v4527_v58, 0.0  ;;  %v4530_v40 = vadd.f32 %v12223_v26, %v3601_v5  ;;  %3812 = vmatmul.mubr.bf16.gmra.mrb[208].mxu1 %v10723_v17  ;;  %13024 = vst [vmem:[#allocation8_spill] sm:$0xff] %v12281_v63  ;;  %6731 = vperm.xlu0 %10377, %v5657_v35   ;;  %v13025_v17 = vld [vmem:[#allocation10_spill] sm:$0xff]  ;;  %v5660_v37 = vld [vmem:[%s11251_s30 + $0x6b8] sm:$0xff] }
 0x1ef   : > { %3819 = vmatprep.mubr.bf16.mxu1 %v10726_v3  ;;  %v10729_v3 = vld [vmem:[%s11185_s22 + $0x6a0] ss:$16 sps:$4 sm:$0xff]   ;;  %v12287_v42 = vpop.f32.mrb[112].mxu0  ;;  %v10740_v35 = vld [vmem:[%s11185_s22 + $0x6e8] ss:$16 sps:$4 sm:$0xff]  }
 0x1f0   : > { %v5272_v44 = vmax.f32 %v4530_v40, 0.0  ;;  %v6839_v26 = vmul.f32 %v11658_v47, %v5271_v23  ;;  %v5659_v58 = vld [vmem:[%s11251_s30 + $0x6b0] sm:$0xff]  ;;  %v4552_v2 = vpop.f32.mrb[113].mxu0  ;;  %v5661_v63 = vld [vmem:[%s11251_s30 + $0x6c0] sm:$0xff] }
 0x1f1   : > { %v3605_v7 = vpop.f32.mrb[104].mxu1  ;;  %v12295_v1 = vpop.f32.mrb[114].mxu0  ;;  %6746 = vperm.xlu1 %10378, %v5660_v37   ;;  %v5662_v2 = vld [vmem:[%s11251_s30 + $0x6c8] sm:$0xff] }
 0x1f2   : > { %v6840_v15 = vmul.f32 %v13025_v17, %v5272_v44  ;;  %v3606_v52 = vadd.f32 %v11960_v50, %v3605_v7  ;;  %v3607_v0 = vpop.f32.mrb[105].mxu1  ;;  %v10742_v44 = vld [vmem:[%s11185_s22 + $0x70c] ss:$16 sps:$4 sm:$0xff]   ;;  %v4555_v7 = vpop.f32.mrb[115].mxu0  ;;  %6741 = vperm.xlu0 %10377, %v5659_v58  }
 0x1f3   : > { %v3608_v5 = vpop.f32.mrb[106].mxu1 }
 0x1f4   : > { %v9377_v21 = vpack.c.bf16 %v6840_v15, %v6839_v26  ;;  %v4535_v47 = vadd.f32 %v12239_v29, %v3606_v52  ;;  %v3609_v23 = vadd.f32 %v11960_v50, %v3608_v5  ;;  %v3610_v40 = vpop.f32.mrb[107].mxu1  ;;  %4765 = vmatmul.mubr.bf16.gmra.mrb[220].mxu0 %v10740_v35  ;;  %v12303_v26 = vpop.permute.xlu0 %6271  ;;  %v10735_v5 = vld [vmem:[%s11185_s22 + $0x6c0] ss:$16 sps:$4 sm:$0xff]   ;;  %v5664_v35 = vld [vmem:[%s11251_s30 + $0x6d8] sm:$0xff] }
 0x1f5   : > { %8742 = vmatprep.mubr.msk.bf16.mxu0 %vm3026_vm0, %v10742_v44  ;;  %v12305_v52 = vpop.permute.xlu1 %6286  ;;  %6756 = vperm.xlu1 %10378, %v5662_v2   ;;  %v10746_v44 = vld [vmem:[%s11185_s22 + $0x708] ss:$16 sps:$4 sm:$0xff]  }
 0x1f6   : > { %9833 = vst [vmem:[%s11640_s11 + $0xc8] sm:$0xff] %v9377_v21   ;;  %v5273_v17 = vmax.f32 %v4535_v47, 0.0  ;;  %v4538_v0 = vadd.f32 %v12247_v6, %v3609_v23  ;;  %3820 = vmatmul.mubr.bf16.gmra.mrb[212].mxu1 %v10729_v3  ;;  %6751 = vperm.xlu0 %10377, %v5661_v63   ;;  %v5663_v21 = vld [vmem:[%s11251_s30 + $0x6d0] sm:$0xff] }
 0x1f7   : > { %3827 = vmatprep.mubr.bf16.mxu1 %v10732_v9  ;;  %v12311_v9 = vpop.f32.mrb[116].mxu0  ;;  %v10738_v23 = vld [vmem:[%s11185_s22 + $0x6e4] ss:$16 sps:$4 sm:$0xff]  }
 0x1f8   : > { %v5274_v29 = vmax.f32 %v4538_v0, 0.0  ;;  %v6841_v6 = vmul.f32 %v11681_v25, %v5273_v17  ;;  %v4560_v40 = vpop.f32.mrb[117].mxu0  ;;  %v10748_v0 = vld [vmem:[%s11185_s22 + $0x72c] ss:$16 sps:$4 sm:$0xff]  }
 0x1f9   : > { %v3613_v15 = vpop.f32.mrb[108].mxu1  ;;  %v12324_v17 = vpop.f32.mrb[118].mxu0  ;;  %6766 = vperm.xlu1 %10378, %v5664_v35   ;;  %v10741_v40 = vld [vmem:[%s11185_s22 + $0x6e0] ss:$16 sps:$4 sm:$0xff]  }
 0x1fa   : > { %v6842_v3 = vmul.f32 %v11675_v54, %v5274_v29  ;;  %v3614_v37 = vadd.f32 %v11960_v50, %v3613_v15  ;;  %v3615_v58 = vpop.f32.mrb[109].mxu1  ;;  %v12321_v54 = vld [vmem:[%s12974_s2] ss:$0 sm:$0xff]  ;;  %v4563_v2 = vpop.f32.mrb[119].mxu0  ;;  %6761 = vperm.xlu0 %10377, %v5663_v21  }
 0x1fb   : > { %v3616_v47 = vpop.f32.mrb[110].mxu1  ;;  %v12334_v35 = vpop.permute.xlu1 %6296  ;;  %v10752_v2 = vld [vmem:[%s11185_s22 + $0x728] ss:$16 sps:$4 sm:$0xff]  }
 0x1fc   : > { %v9382_v63 = vpack.c.bf16 %v6842_v3, %v6841_v6  ;;  %v4543_v25 = vadd.f32 %v12263_v34, %v3614_v37  ;;  %v3617_v50 = vadd.f32 %v12321_v54, %v3616_v47  ;;  %v3618_v7 = vpop.f32.mrb[111].mxu1  ;;  %v5666_v34 = vld [vmem:[%s11251_s30 + $0x6e8] sm:$0xff]  ;;  %v5665_v6 = vld [vmem:[%s11251_s30 + $0x6e0] sm:$0xff]  ;;  %4773 = vmatmul.mubr.bf16.gmra.mrb[224].mxu0 %v10746_v44  ;;  %v12331_v3 = vpop.permute.xlu0 %6281 }
 0x1fd   : > { %8743 = vmatprep.mubr.msk.bf16.mxu0 %vm3026_vm0, %v10748_v0  ;;  %6776 = vperm.xlu1 %10378, %v5666_v34   ;;  %v10744_v7 = vld [vmem:[%s11185_s22 + $0x704] ss:$16 sps:$4 sm:$0xff]  }
 0x1fe   : > { %9834 = vst [vmem:[%s11640_s11 + $0xd0] sm:$0xff] %v9382_v63   ;;  %v5275_v29 = vmax.f32 %v4543_v25, 0.0  ;;  %v4546_v15 = vadd.f32 %v12271_v46, %v3617_v50  ;;  %3828 = vmatmul.mubr.bf16.gmra.mrb[216].mxu1 %v10735_v5  ;;  %6771 = vperm.xlu0 %10377, %v5665_v6   ;;  %v13026_v5 = vld [vmem:[#allocation11_spill] sm:$0xff]  ;;  %v5668_v63 = vld [vmem:[%s11251_s30 + $0x6f8] sm:$0xff]  ;;  %v5667_v25 = vld [vmem:[%s11251_s30 + $0x6f0] sm:$0xff] }
 0x1ff   : > { %3835 = vmatprep.mubr.bf16.mxu1 %v10738_v23  ;;  %v12340_v44 = vpop.f32.mrb[120].mxu0 }
 0x200   : > { %v5276_v37 = vmax.f32 %v4546_v15, 0.0  ;;  %v6843_v46 = vmul.f32 %v11701_v13, %v5275_v29  ;;  %v4568_v0 = vpop.f32.mrb[121].mxu0 }
 0x201   : > { %v3621_v58 = vpop.f32.mrb[112].mxu1  ;;  %v4569_v6 = vpop.f32.mrb[122].mxu0  ;;  %6786 = vperm.xlu1 %10378, %v5668_v63  }
 0x202   : > { %v6844_v21 = vmul.f32 %v13026_v5, %v5276_v37  ;;  %v3622_v47 = vadd.f32 %v12321_v54, %v3621_v58  ;;  %v3623_v23 = vpop.f32.mrb[113].mxu1  ;;  %v10754_v37 = vld [vmem:[%s11185_s22 + $0x74c] ss:$16 sps:$4 sm:$0xff]   ;;  %v4571_v58 = vpop.f32.mrb[123].mxu0 }
 0x203   : > { %v3624_v50 = vpop.f32.mrb[114].mxu1  ;;  %v12349_v5 = vpop.permute.xlu0 %6291  ;;  %6781 = vperm.xlu0 %10377, %v5667_v25  }
 0x204   : > { %v9387_v15 = vpack.c.bf16 %v6844_v21, %v6843_v46  ;;  %v4551_v34 = vadd.f32 %v12287_v42, %v3622_v47  ;;  %v3625_v13 = vadd.f32 %v12321_v54, %v3624_v50  ;;  %v3626_v29 = vpop.f32.mrb[115].mxu1  ;;  %4781 = vmatmul.mubr.bf16.gmra.mrb[228].mxu0 %v10752_v2  ;;  %v13027_v47 = vld [vmem:[#allocation12_spill] sm:$0xff] }
 0x205   : > { %8744 = vmatprep.mubr.msk.bf16.mxu0 %vm3026_vm0, %v10754_v37 }
 0x206   : > { %9835 = vst [vmem:[%s11640_s11 + $0xd8] sm:$0xff] %v9387_v15   ;;  %v5277_v23 = vmax.f32 %v4551_v34, 0.0  ;;  %v4554_v0 = vadd.f32 %v12295_v1, %v3625_v13  ;;  %3836 = vmatmul.mubr.bf16.gmra.mrb[220].mxu1 %v10741_v40  ;;  %v10747_v15 = vld [vmem:[%s11185_s22 + $0x700] ss:$16 sps:$4 sm:$0xff]   ;;  %v10750_v13 = vld [vmem:[%s11185_s22 + $0x724] ss:$16 sps:$4 sm:$0xff]  }
 0x207   : > { %3843 = vmatprep.mubr.bf16.mxu1 %v10744_v7  ;;  %v4574_v34 = vpop.f32.mrb[124].mxu0  ;;  %v10758_v7 = vld [vmem:[%s11185_s22 + $0x748] ss:$16 sps:$4 sm:$0xff]  }
 0x208   : > { %v5278_v42 = vmax.f32 %v4554_v0, 0.0  ;;  %v6845_v21 = vmul.f32 %v11710_v45, %v5277_v23  ;;  %v4576_v40 = vpop.f32.mrb[125].mxu0  ;;  %v10760_v45 = vld [vmem:[%s11185_s22 + $0x76c] ss:$16 sps:$4 sm:$0xff]  }
 0x209   : > { %v3629_v46 = vpop.f32.mrb[116].mxu1  ;;  %v4577_v0 = vpop.f32.mrb[126].mxu0 }
 0x20a   : > { %v6846_v50 = vmul.f32 %v13027_v47, %v5278_v42  ;;  %v3630_v63 = vadd.f32 %v12321_v54, %v3629_v46  ;;  %v3631_v25 = vpop.f32.mrb[117].mxu1  ;;  %v4579_v23 = vpop.f32.mrb[127].mxu0 }
 0x20b   : > { %v3632_v1 = vpop.f32.mrb[118].mxu1 }
 0x20c   : > { %v9392_v2 = vpack.c.bf16 %v6846_v50, %v6845_v21  ;;  %v4559_v29 = vadd.f32 %v12311_v9, %v3630_v63  ;;  %v3633_v37 = vadd.f32 %v12321_v54, %v3632_v1  ;;  %v3634_v58 = vpop.f32.mrb[119].mxu1  ;;  %4789 = vmatmul.mubr.bf16.gmra.mrb[232].mxu0 %v10758_v7  ;;  %v10753_v1 = vld [vmem:[%s11185_s22 + $0x720] ss:$16 sps:$4 sm:$0xff]  }
 0x20d   : > { %8745 = vmatprep.mubr.msk.bf16.mxu0 %vm3026_vm0, %v10760_v45 }
 0x20e   : > { %9836 = vst [vmem:[%s11640_s11 + $0xe0] sm:$0xff] %v9392_v2   ;;  %v5279_v42 = vmax.f32 %v4559_v29, 0.0  ;;  %v4562_v46 = vadd.f32 %v12324_v17, %v3633_v37  ;;  %3844 = vmatmul.mubr.bf16.gmra.mrb[224].mxu1 %v10747_v15  ;;  %v10756_v2 = vld [vmem:[%s11185_s22 + $0x744] ss:$16 sps:$4 sm:$0xff]  }
 0x20f   : > { %3851 = vmatprep.mubr.bf16.mxu1 %v10750_v13  ;;  %v4582_v40 = vpop.f32.mrb[128].mxu0  ;;  %v10764_v13 = vld [vmem:[%s11185_s22 + $0x768] ss:$16 sps:$4 sm:$0xff]  }
 0x210   : > { %v5280_v47 = vmax.f32 %v4562_v46, 0.0  ;;  %v6847_v21 = vmul.f32 %v11733_v53, %v5279_v42  ;;  %v4584_v15 = vpop.f32.mrb[129].mxu0  ;;  %v10766_v53 = vld [vmem:[%s11185_s22 + $0x78c] ss:$16 sps:$4 sm:$0xff]  }
 0x211   : > { %v3637_v9 = vpop.f32.mrb[120].mxu1  ;;  %v4585_v45 = vpop.f32.mrb[130].mxu0  ;;  %v10762_v15 = vld [vmem:[%s11185_s22 + $0x764] ss:$16 sps:$4 sm:$0xff]  }
 0x212   : > { %v6848_v50 = vmul.f32 %v11727_v19, %v5280_v47  ;;  %v3638_v63 = vadd.f32 %v12321_v54, %v3637_v9  ;;  %v3639_v25 = vpop.f32.mrb[121].mxu1  ;;  %v4587_v19 = vpop.f32.mrb[131].mxu0  ;;  %v13028_v9 = vld [vmem:[#allocation13_spill] sm:$0xff] }
 0x213   : > { %v3640_v17 = vpop.f32.mrb[122].mxu1  ;;  %v10759_v25 = vld [vmem:[%s11185_s22 + $0x740] ss:$16 sps:$4 sm:$0xff]  }
 0x214   : > { %v9397_v7 = vpack.c.bf16 %v6848_v50, %v6847_v21  ;;  %v4567_v29 = vadd.f32 %v12340_v44, %v3638_v63  ;;  %v3641_v37 = vadd.f32 %v12321_v54, %v3640_v17  ;;  %v3642_v58 = vpop.f32.mrb[123].mxu1  ;;  %4797 = vmatmul.mubr.bf16.gmra.mrb[236].mxu0 %v10764_v13 }
 0x215   : > { %8746 = vmatprep.mubr.msk.bf16.mxu0 %vm3026_vm0, %v10766_v53 }
 0x216   : > { %9837 = vst [vmem:[%s11640_s11 + $0xe8] sm:$0xff] %v9397_v7   ;;  %v5281_v23 = vmax.f32 %v4567_v29, 0.0  ;;  %v4570_v42 = vadd.f32 %v4569_v6, %v3641_v37  ;;  %3852 = vmatmul.mubr.bf16.gmra.mrb[228].mxu1 %v10753_v1 }
 0x217   : > { %3859 = vmatprep.mubr.bf16.mxu1 %v10756_v2  ;;  %v4590_v17 = vpop.f32.mrb[132].mxu0  ;;  %v10770_v2 = vld [vmem:[%s11185_s22 + $0x788] ss:$16 sps:$4 sm:$0xff]  }
 0x218   : > { %v5282_v46 = vmax.f32 %v4570_v42, 0.0  ;;  %v6849_v44 = vmul.f32 %v11753_v18, %v5281_v23  ;;  %v4592_v1 = vpop.f32.mrb[133].mxu0  ;;  %v10772_v18 = vld [vmem:[%s11185_s22 + $0x7ac] ss:$16 sps:$4 sm:$0xff]  }
 0x219   : > { %v3645_v47 = vpop.f32.mrb[124].mxu1  ;;  %v4593_v58 = vpop.f32.mrb[134].mxu0 }
 0x21a   : > { %v6850_v21 = vmul.f32 %v13028_v9, %v5282_v46  ;;  %v3646_v50 = vadd.f32 %v12321_v54, %v3645_v47  ;;  %v3647_v63 = vpop.f32.mrb[125].mxu1  ;;  %v4595_v53 = vpop.f32.mrb[135].mxu0  ;;  %v13029_v47 = vld [vmem:[#allocation14_spill] sm:$0xff] }
 0x21b   : > { %v3648_v6 = vpop.f32.mrb[126].mxu1 }
 0x21c   : > { %v9402_v13 = vpack.c.bf16 %v6850_v21, %v6849_v44  ;;  %v4575_v7 = vadd.f32 %v4574_v34, %v3646_v50  ;;  %v3649_v29 = vadd.f32 %v12321_v54, %v3648_v6  ;;  %v3650_v37 = vpop.f32.mrb[127].mxu1  ;;  %4805 = vmatmul.mubr.bf16.gmra.mrb[240].mxu0 %v10770_v2  ;;  %v10765_v50 = vld [vmem:[%s11185_s22 + $0x760] ss:$16 sps:$4 sm:$0xff]   ;;  %v10768_v6 = vld [vmem:[%s11185_s22 + $0x784] ss:$16 sps:$4 sm:$0xff]  }
 0x21d   : > { %8747 = vmatprep.mubr.msk.bf16.mxu0 %vm3026_vm0, %v10772_v18 }
 0x21e   : > { %9838 = vst [vmem:[%s11640_s11 + $0xf0] sm:$0xff] %v9402_v13   ;;  %v5283_v19 = vmax.f32 %v4575_v7, 0.0  ;;  %v4578_v23 = vadd.f32 %v4577_v0, %v3649_v29  ;;  %3860 = vmatmul.mubr.bf16.gmra.mrb[232].mxu1 %v10759_v25 }
 0x21f   : > { %3867 = vmatprep.mubr.bf16.mxu1 %v10762_v15  ;;  %v4598_v63 = vpop.f32.mrb[136].mxu0  ;;  %v10776_v15 = vld [vmem:[%s11185_s22 + $0x7a8] ss:$16 sps:$4 sm:$0xff]  }
 0x220   : > { %v5284_v42 = vmax.f32 %v4578_v23, 0.0  ;;  %v6851_v34 = vmul.f32 %v11762_v56, %v5283_v19  ;;  %v4600_v25 = vpop.f32.mrb[137].mxu0  ;;  %v10778_v56 = vld [vmem:[%s11185_s22 + $0x7cc] ss:$16 sps:$4 sm:$0xff]  }
 0x221   : > { %v3653_v46 = vpop.f32.mrb[128].mxu1  ;;  %v4601_v29 = vpop.f32.mrb[138].mxu0 }
 0x222   : > { %v6852_v44 = vmul.f32 %v13029_v47, %v5284_v42  ;;  %v3654_v9 = vadd.f32 %v12321_v54, %v3653_v46  ;;  %v3655_v21 = vpop.f32.mrb[129].mxu1  ;;  %v4603_v37 = vpop.f32.mrb[139].mxu0  ;;  %v10771_v47 = vld [vmem:[%s11185_s22 + $0x780] ss:$16 sps:$4 sm:$0xff]  }
 0x223   : > { %v3656_v0 = vpop.f32.mrb[130].mxu1  ;;  %v13030_v37 = vld [vmem:[#allocation15_spill] sm:$0xff] }
 0x224   : > { %v9407_v1 = vpack.c.bf16 %v6852_v44, %v6851_v34  ;;  %v4583_v2 = vadd.f32 %v4582_v40, %v3654_v9  ;;  %v3657_v13 = vadd.f32 %v12321_v54, %v3656_v0  ;;  %v3658_v7 = vpop.f32.mrb[131].mxu1  ;;  %4813 = vmatmul.mubr.bf16.gmra.mrb[244].mxu0 %v10776_v15  ;;  %v10774_v9 = vld [vmem:[%s11185_s22 + $0x7a4] ss:$16 sps:$4 sm:$0xff]  }
 0x225   : > { %8748 = vmatprep.mubr.msk.bf16.mxu0 %vm3026_vm0, %v10778_v56 }
 0x226   : > { %9839 = vst [vmem:[%s11640_s11 + $0xf8] sm:$0xff] %v9407_v1   ;;  %v5285_v18 = vmax.f32 %v4583_v2, 0.0  ;;  %v4586_v53 = vadd.f32 %v4585_v45, %v3657_v13  ;;  %3868 = vmatmul.mubr.bf16.gmra.mrb[236].mxu1 %v10765_v50  ;;  %v10782_v50 = vld [vmem:[%s11185_s22 + $0x7c8] ss:$16 sps:$4 sm:$0xff]  }
 0x227   : > { %3875 = vmatprep.mubr.bf16.mxu1 %v10768_v6  ;;  %v4606_v44 = vpop.f32.mrb[140].mxu0 }
 0x228   : > { %v5286_v19 = vmax.f32 %v4586_v53, 0.0  ;;  %v6853_v40 = vmul.f32 %v11785_v31, %v5285_v18  ;;  %v4608_v21 = vpop.f32.mrb[141].mxu0  ;;  %v10784_v31 = vld [vmem:[%s11185_s22 + $0x7ec] ss:$16 sps:$4 sm:$0xff]  }
 0x229   : > { %v3661_v23 = vpop.f32.mrb[132].mxu1  ;;  %v4609_v1 = vpop.f32.mrb[142].mxu0 }
 0x22a   : > { %v6854_v42 = vmul.f32 %v11779_v38, %v5286_v19  ;;  %v3662_v46 = vadd.f32 %v12321_v54, %v3661_v23  ;;  %v3663_v34 = vpop.f32.mrb[133].mxu1  ;;  %v4611_v2 = vpop.f32.mrb[143].mxu0  ;;  %v10777_v23 = vld [vmem:[%s11185_s22 + $0x7a0] ss:$16 sps:$4 sm:$0xff]  }
 0x22b   : > { %v3664_v45 = vpop.f32.mrb[134].mxu1  ;;  %v10788_v34 = vld [vmem:[%s11185_s22 + $0x7e8] ss:$16 sps:$4 sm:$0xff]   ;;  %v13031_v2 = vld [vmem:[#allocation16_spill] sm:$0xff] }
 0x22c   : > { %v9412_v0 = vpack.c.bf16 %v6854_v42, %v6853_v40  ;;  %v4591_v6 = vadd.f32 %v4590_v17, %v3662_v46  ;;  %v3665_v25 = vadd.f32 %v12321_v54, %v3664_v45  ;;  %v3666_v15 = vpop.f32.mrb[135].mxu1  ;;  %4821 = vmatmul.mubr.bf16.gmra.mrb[248].mxu0 %v10782_v50  ;;  %v10780_v42 = vld [vmem:[%s11185_s22 + $0x7c4] ss:$16 sps:$4 sm:$0xff]  }
 0x22d   : > { %8749 = vmatprep.mubr.msk.bf16.mxu0 %vm3026_vm0, %v10784_v31 }
 0x22e   : > { %9840 = vst [vmem:[%s11640_s11 + $0x100] sm:$0xff] %v9412_v0   ;;  %v5287_v38 = vmax.f32 %v4591_v6, 0.0  ;;  %v4594_v13 = vadd.f32 %v4593_v58, %v3665_v25  ;;  %3876 = vmatmul.mubr.bf16.gmra.mrb[240].mxu1 %v10771_v47 }
 0x22f   : > { %3883 = vmatprep.mubr.bf16.mxu1 %v10774_v9  ;;  %v4614_v40 = vpop.f32.mrb[144].mxu0 }
 0x230   : > { %v5288_v7 = vmax.f32 %v4594_v13, 0.0  ;;  %v6855_v17 = vmul.f32 %v11805_v39, %v5287_v38  ;;  %v4616_v46 = vpop.f32.mrb[145].mxu0  ;;  %v10792_v39 = vld [vmem:[%s11185_s22 + $0x80c] ss:$16 sps:$4 sm:$0xff]  }
 0x231   : > { %v3669_v56 = vpop.f32.mrb[136].mxu1  ;;  %v4617_v50 = vpop.f32.mrb[146].mxu0 }
 0x232   : > { %v6856_v18 = vmul.f32 %v13030_v37, %v5288_v7  ;;  %v3670_v53 = vadd.f32 %v12321_v54, %v3669_v56  ;;  %v3671_v19 = vpop.f32.mrb[137].mxu1  ;;  %v4619_v0 = vpop.f32.mrb[147].mxu0  ;;  %v10783_v56 = vld [vmem:[%s11185_s22 + $0x7c0] ss:$16 sps:$4 sm:$0xff]   ;;  %v10786_v37 = vld [vmem:[%s11185_s22 + $0x7e4] ss:$16 sps:$4 sm:$0xff]  }
 0x233   : > { %v3672_v58 = vpop.f32.mrb[138].mxu1 }
 0x234   : > { %v9417_v47 = vpack.c.bf16 %v6856_v18, %v6855_v17  ;;  %v4599_v45 = vadd.f32 %v4598_v63, %v3670_v53  ;;  %v3673_v9 = vadd.f32 %v12321_v54, %v3672_v58  ;;  %v3674_v21 = vpop.f32.mrb[139].mxu1  ;;  %4829 = vmatmul.mubr.bf16.gmra.mrb[252].mxu0 %v10788_v34  ;;  %v10790_v53 = vld [vmem:[%s11185_s22 + $0x808] ss:$16 sps:$4 sm:$0xff]  }
 0x235   : > { %8750 = vmatprep.mubr.msk.bf16.mxu0 %vm3026_vm0, %v10792_v39 }
 0x236   : > { %9841 = vst [vmem:[%s11640_s11 + $0x108] sm:$0xff] %v9417_v47   ;;  %v5289_v6 = vmax.f32 %v4599_v45, 0.0  ;;  %v4602_v25 = vadd.f32 %v4601_v29, %v3673_v9  ;;  %3884 = vmatmul.mubr.bf16.gmra.mrb[244].mxu1 %v10777_v23 }
 0x237   : > { %3891 = vmatprep.mubr.bf16.mxu1 %v10780_v42  ;;  %v4622_v17 = vpop.f32.mrb[148].mxu0 }
 0x238   : > { %v5290_v15 = vmax.f32 %v4602_v25, 0.0  ;;  %v6857_v63 = vmul.f32 %v11814_v4, %v5289_v6  ;;  %v4624_v18 = vpop.f32.mrb[149].mxu0  ;;  %v10798_v4 = vld [vmem:[%s11185_s22 + $0x82c] ss:$16 sps:$4 sm:$0xff]   ;;  %v10789_v25 = vld [vmem:[%s11185_s22 + $0x7e0] ss:$16 sps:$4 sm:$0xff]  }
 0x239   : > { %v3677_v31 = vpop.f32.mrb[140].mxu1  ;;  %v4625_v46 = vpop.f32.mrb[150].mxu0 }
 0x23a   : > { %v6858_v38 = vmul.f32 %v13031_v2, %v5290_v15  ;;  %v3678_v13 = vadd.f32 %v12321_v54, %v3677_v31  ;;  %v3679_v7 = vpop.f32.mrb[141].mxu1  ;;  %v4627_v34 = vpop.f32.mrb[151].mxu0  ;;  %v10795_v31 = vld [vmem:[%s11185_s22 + $0x804] ss:$16 sps:$4 sm:$0xff]   ;;  %v10796_v2 = vld [vmem:[%s11185_s22 + $0x828] ss:$16 sps:$4 sm:$0xff]  }
 0x23b   : > { %v3680_v29 = vpop.f32.mrb[142].mxu1  ;;  %v10793_v34 = vld [vmem:[%s11185_s22 + $0x800] ss:$16 sps:$4 sm:$0xff]  }
 0x23c   : > { %v9422_v19 = vpack.c.bf16 %v6858_v38, %v6857_v63  ;;  %v4607_v23 = vadd.f32 %v4606_v44, %v3678_v13  ;;  %v3681_v58 = vadd.f32 %v12321_v54, %v3680_v29  ;;  %v3682_v42 = vpop.f32.mrb[143].mxu1  ;;  %4837 = vmatmul.mubr.bf16.gmra.mrb[0].mxu0 %v10790_v53 }
 0x23d   : > { %8751 = vmatprep.mubr.msk.bf16.mxu0 %vm3026_vm0, %v10798_v4 }
 0x23e   : > { %9842 = vst [vmem:[%s11640_s11 + $0x110] sm:$0xff] %v9422_v19   ;;  %v5291_v47 = vmax.f32 %v4607_v23, 0.0  ;;  %v4610_v45 = vadd.f32 %v4609_v1, %v3681_v58  ;;  %3892 = vmatmul.mubr.bf16.gmra.mrb[248].mxu1 %v10783_v56  ;;  %v13032_v23 = vld [vmem:[#allocation17_spill] sm:$0xff] }
 0x23f   : > { %3899 = vmatprep.mubr.bf16.mxu1 %v10786_v37  ;;  %v4630_v15 = vpop.f32.mrb[152].mxu0 }
 0x240   : > { %v5292_v9 = vmax.f32 %v4610_v45, 0.0  ;;  %v6859_v44 = vmul.f32 %v11837_v10, %v5291_v47  ;;  %v4632_v63 = vpop.f32.mrb[153].mxu0  ;;  %v10804_v10 = vld [vmem:[%s11185_s22 + $0x84c] ss:$16 sps:$4 sm:$0xff]   ;;  %v10801_v45 = vld [vmem:[%s11185_s22 + $0x824] ss:$16 sps:$4 sm:$0xff]  }
 0x241   : > { %v3685_v21 = vpop.f32.mrb[144].mxu1  ;;  %v4633_v29 = vpop.f32.mrb[154].mxu0 }
 0x242   : > { %v6860_v39 = vmul.f32 %v11831_v24, %v5292_v9  ;;  %v3686_v0 = vadd.f32 %v12321_v54, %v3685_v21  ;;  %v3687_v6 = vpop.f32.mrb[145].mxu1  ;;  %v4635_v37 = vpop.f32.mrb[155].mxu0  ;;  %v10802_v21 = vld [vmem:[%s11185_s22 + $0x848] ss:$16 sps:$4 sm:$0xff]  }
 0x243   : > { %v3688_v1 = vpop.f32.mrb[146].mxu1  ;;  %v10799_v37 = vld [vmem:[%s11185_s22 + $0x820] ss:$16 sps:$4 sm:$0xff]  }
 0x244   : > { %v9427_v38 = vpack.c.bf16 %v6860_v39, %v6859_v44  ;;  %v4615_v13 = vadd.f32 %v4614_v40, %v3686_v0  ;;  %v3689_v7 = vadd.f32 %v12321_v54, %v3688_v1  ;;  %v3690_v56 = vpop.f32.mrb[147].mxu1  ;;  %4845 = vmatmul.mubr.bf16.gmra.mrb[4].mxu0 %v10796_v2 }
 0x245   : > { %8752 = vmatprep.mubr.msk.bf16.mxu0 %vm3026_vm0, %v10804_v10 }
 0x246   : > { %9843 = vst [vmem:[%s11640_s11 + $0x118] sm:$0xff] %v9427_v38   ;;  %v5293_v24 = vmax.f32 %v4615_v13, 0.0  ;;  %v4618_v18 = vadd.f32 %v4617_v50, %v3689_v7  ;;  %3900 = vmatmul.mubr.bf16.gmra.mrb[252].mxu1 %v10789_v25  ;;  %v13033_v13 = vld [vmem:[#allocation18_spill] sm:$0xff] }
 0x247   : > { %3907 = vmatprep.mubr.bf16.mxu1 %v10795_v31  ;;  %v4638_v47 = vpop.f32.mrb[156].mxu0 }
 0x248   : > { %v5294_v53 = vmax.f32 %v4618_v18, 0.0  ;;  %v6861_v40 = vmul.f32 %v11857_v11, %v5293_v24  ;;  %v4640_v9 = vpop.f32.mrb[157].mxu0  ;;  %v10810_v11 = vld [vmem:[%s11185_s22 + $0x86c] ss:$16 sps:$4 sm:$0xff]   ;;  %v10807_v18 = vld [vmem:[%s11185_s22 + $0x844] ss:$16 sps:$4 sm:$0xff]  }
 0x249   : > { %v3693_v19 = vpop.f32.mrb[148].mxu1  ;;  %v4641_v25 = vpop.f32.mrb[158].mxu0 }
 0x24a   : > { %v6862_v58 = vmul.f32 %v13032_v23, %v5294_v53  ;;  %v3694_v42 = vadd.f32 %v12321_v54, %v3693_v19  ;;  %v3695_v4 = vpop.f32.mrb[149].mxu1  ;;  %v4643_v1 = vpop.f32.mrb[159].mxu0  ;;  %v10808_v19 = vld [vmem:[%s11185_s22 + $0x868] ss:$16 sps:$4 sm:$0xff]  }
 0x24b   : > { %v3696_v50 = vpop.f32.mrb[150].mxu1  ;;  %v10813_v1 = vld [vmem:[%s11185_s22 + $0x864] ss:$16 sps:$4 sm:$0xff]  }
 0x24c   : > { %v9432_v44 = vpack.c.bf16 %v6862_v58, %v6861_v40  ;;  %v4623_v39 = vadd.f32 %v4622_v17, %v3694_v42  ;;  %v3697_v0 = vadd.f32 %v12321_v54, %v3696_v50  ;;  %v3698_v6 = vpop.f32.mrb[151].mxu1  ;;  %4853 = vmatmul.mubr.bf16.gmra.mrb[8].mxu0 %v10802_v21 }
 0x24d   : > { %8753 = vmatprep.mubr.msk.bf16.mxu0 %vm3026_vm0, %v10810_v11  ;;  %v10805_v6 = vld [vmem:[%s11185_s22 + $0x840] ss:$16 sps:$4 sm:$0xff]  }
 0x24e   : > { %9844 = vst [vmem:[%s11640_s11 + $0x120] sm:$0xff] %v9432_v44   ;;  %v5295_v31 = vmax.f32 %v4623_v39, 0.0  ;;  %v4626_v63 = vadd.f32 %v4625_v46, %v3697_v0  ;;  %3908 = vmatmul.mubr.bf16.gmra.mrb[148].mxu1 %v10793_v34 }
 0x24f   : > { %3915 = vmatprep.mubr.bf16.mxu1 %v10801_v45  ;;  %v4646_v24 = vpop.f32.mrb[160].mxu0 }
 0x250   : > { %v5296_v2 = vmax.f32 %v4626_v63, 0.0  ;;  %v6863_v17 = vmul.f32 %v11866_v16, %v5295_v31  ;;  %v4648_v53 = vpop.f32.mrb[161].mxu0  ;;  %v10816_v16 = vld [vmem:[%s11185_s22 + $0x88c] ss:$16 sps:$4 sm:$0xff]   ;;  %v10814_v63 = vld [vmem:[%s11185_s22 + $0x888] ss:$16 sps:$4 sm:$0xff]  }
 0x251   : > { %v3701_v38 = vpop.f32.mrb[152].mxu1  ;;  %v4649_v4 = vpop.f32.mrb[162].mxu0 }
 0x252   : > { %v6864_v7 = vmul.f32 %v13033_v13, %v5296_v2  ;;  %v3702_v56 = vadd.f32 %v12321_v54, %v3701_v38  ;;  %v3703_v10 = vpop.f32.mrb[153].mxu1  ;;  %v4651_v34 = vpop.f32.mrb[163].mxu0 }
 0x253   : > { %v3704_v46 = vpop.f32.mrb[154].mxu1  ;;  %v10820_v34 = vld [vmem:[%s11185_s22 + $0x8a8] ss:$16 sps:$4 sm:$0xff]  }
 0x254   : > { %v9437_v40 = vpack.c.bf16 %v6864_v7, %v6863_v17  ;;  %v4631_v23 = vadd.f32 %v4630_v15, %v3702_v56  ;;  %v3705_v58 = vadd.f32 %v12321_v54, %v3704_v46  ;;  %v3706_v42 = vpop.f32.mrb[155].mxu1  ;;  %4861 = vmatmul.mubr.bf16.gmra.mrb[12].mxu0 %v10808_v19 }
 0x255   : > { %8754 = vmatprep.mubr.msk.bf16.mxu0 %vm3026_vm0, %v10816_v16  ;;  %v10819_v42 = vld [vmem:[%s11185_s22 + $0x884] ss:$16 sps:$4 sm:$0xff]  }
 0x256   : > { %9845 = vst [vmem:[%s11640_s11 + $0x128] sm:$0xff] %v9437_v40   ;;  %v5297_v50 = vmax.f32 %v4631_v23, 0.0  ;;  %v4634_v45 = vadd.f32 %v4633_v29, %v3705_v58  ;;  %3916 = vmatmul.mubr.bf16.gmra.mrb[152].mxu1 %v10799_v37  ;;  %v10811_v23 = vld [vmem:[%s11185_s22 + $0x860] ss:$16 sps:$4 sm:$0xff]  }
 0x257   : > { %3923 = vmatprep.mubr.bf16.mxu1 %v10807_v18  ;;  %v4654_v11 = vpop.f32.mrb[164].mxu0  ;;  %v13034_v18 = vld [vmem:[#allocation19_spill] sm:$0xff] }
 0x258   : > { %v5298_v9 = vmax.f32 %v4634_v45, 0.0  ;;  %v6865_v15 = vmul.f32 %v11889_v27, %v5297_v50  ;;  %v4656_v31 = vpop.f32.mrb[165].mxu0  ;;  %v10822_v27 = vld [vmem:[%s11185_s22 + $0x8ac] ss:$16 sps:$4 sm:$0xff]  }
 0x259   : > { %v3709_v21 = vpop.f32.mrb[156].mxu1  ;;  %v4657_v7 = vpop.f32.mrb[166].mxu0 }
 0x25a   : > { %v6866_v44 = vmul.f32 %v11883_v12, %v5298_v9  ;;  %v3710_v39 = vadd.f32 %v12321_v54, %v3709_v21  ;;  %v3711_v0 = vpop.f32.mrb[157].mxu1  ;;  %v4659_v56 = vpop.f32.mrb[167].mxu0 }
 0x25b   : > { %v3712_v29 = vpop.f32.mrb[158].mxu1 }
 0x25c   : > { %v9442_v2 = vpack.c.bf16 %v6866_v44, %v6865_v15  ;;  %v4639_v38 = vadd.f32 %v4638_v47, %v3710_v39  ;;  %v3713_v17 = vadd.f32 %v12321_v54, %v3712_v29  ;;  %v3714_v13 = vpop.f32.mrb[159].mxu1  ;;  %4869 = vmatmul.mubr.bf16.gmra.mrb[16].mxu0 %v10814_v63 }
 0x25d   : > { %8755 = vmatprep.mubr.msk.bf16.mxu0 %vm3026_vm0, %v10822_v27  ;;  %v10826_v27 = vld [vmem:[%s11185_s22 + $0x8c8] ss:$16 sps:$4 sm:$0xff]  }
 0x25e   : > { %9846 = vst [vmem:[%s11640_s11 + $0x130] sm:$0xff] %v9442_v2   ;;  %v5299_v12 = vmax.f32 %v4639_v38, 0.0  ;;  %v4642_v10 = vadd.f32 %v4641_v25, %v3713_v17  ;;  %3924 = vmatmul.mubr.bf16.gmra.mrb[156].mxu1 %v10805_v6  ;;  %v10817_v38 = vld [vmem:[%s11185_s22 + $0x880] ss:$16 sps:$4 sm:$0xff]  }
 0x25f   : > { %3931 = vmatprep.mubr.bf16.mxu1 %v10813_v1  ;;  %v4662_v58 = vpop.f32.mrb[168].mxu0  ;;  %v13035_v1 = vld [vmem:[#allocation20_spill] sm:$0xff] }
 0x260   : > { %v5300_v37 = vmax.f32 %v4642_v10, 0.0  ;;  %v6867_v47 = vmul.f32 %v11909_v48, %v5299_v12  ;;  %v4664_v16 = vpop.f32.mrb[169].mxu0  ;;  %v10828_v48 = vld [vmem:[%s11185_s22 + $0x8cc] ss:$16 sps:$4 sm:$0xff]  }
 0x261   : > { %v3717_v46 = vpop.f32.mrb[160].mxu1  ;;  %v4665_v15 = vpop.f32.mrb[170].mxu0 }
 0x262   : > { %v6868_v53 = vmul.f32 %v13034_v18, %v5300_v37  ;;  %v3718_v19 = vadd.f32 %v12321_v54, %v3717_v46  ;;  %v3719_v40 = vpop.f32.mrb[161].mxu1  ;;  %v4667_v44 = vpop.f32.mrb[171].mxu0 }
 0x263   : > { %v3720_v25 = vpop.f32.mrb[162].mxu1 }
 0x264   : > { %v9447_v50 = vpack.c.bf16 %v6868_v53, %v6867_v47  ;;  %v4647_v45 = vadd.f32 %v4646_v24, %v3718_v19  ;;  %v3721_v9 = vadd.f32 %v12321_v54, %v3720_v25  ;;  %v3722_v21 = vpop.f32.mrb[163].mxu1  ;;  %4877 = vmatmul.mubr.bf16.gmra.mrb[20].mxu0 %v10820_v34  ;;  %v10834_v47 = vld [vmem:[%s11185_s22 + $0x8ec] ss:$16 sps:$4 sm:$0xff]   ;;  %v10823_v34 = vld [vmem:[%s11185_s22 + $0x8a0] ss:$16 sps:$4 sm:$0xff]  }
 0x265   : > { %8756 = vmatprep.mubr.msk.bf16.mxu0 %vm3026_vm0, %v10828_v48 }
 0x266   : > { %9847 = vst [vmem:[%s11640_s11 + $0x138] sm:$0xff] %v9447_v50   ;;  %v5301_v39 = vmax.f32 %v4647_v45, 0.0  ;;  %v4650_v0 = vadd.f32 %v4649_v4, %v3721_v9  ;;  %3932 = vmatmul.mubr.bf16.gmra.mrb[160].mxu1 %v10811_v23  ;;  %v10825_v4 = vld [vmem:[%s11185_s22 + $0x8a4] ss:$16 sps:$4 sm:$0xff]   ;;  %v10832_v9 = vld [vmem:[%s11185_s22 + $0x8e8] ss:$16 sps:$4 sm:$0xff]  }
 0x267   : > { %3939 = vmatprep.mubr.bf16.mxu1 %v10819_v42  ;;  %v4670_v17 = vpop.f32.mrb[172].mxu0  ;;  %v10831_v45 = vld [vmem:[%s11185_s22 + $0x8c4] ss:$16 sps:$4 sm:$0xff]  }
 0x268   : > { %v5302_v6 = vmax.f32 %v4650_v0, 0.0  ;;  %v6869_v29 = vmul.f32 %v11918_v28, %v5301_v39  ;;  %v4672_v46 = vpop.f32.mrb[173].mxu0 }
 0x269   : > { %v3725_v24 = vpop.f32.mrb[164].mxu1  ;;  %v4673_v28 = vpop.f32.mrb[174].mxu0 }
 0x26a   : > { %v6870_v31 = vmul.f32 %v13035_v1, %v5302_v6  ;;  %v3726_v63 = vadd.f32 %v12321_v54, %v3725_v24  ;;  %v3727_v2 = vpop.f32.mrb[165].mxu1  ;;  %v4675_v19 = vpop.f32.mrb[175].mxu0  ;;  %v10840_v6 = vld [vmem:[%s11185_s22 + $0x90c] ss:$16 sps:$4 sm:$0xff]  }
 0x26b   : > { %v3728_v13 = vpop.f32.mrb[166].mxu1 }
 0x26c   : > { %v9452_v56 = vpack.c.bf16 %v6870_v31, %v6869_v29  ;;  %v4655_v12 = vadd.f32 %v4654_v11, %v3726_v63  ;;  %v3729_v10 = vadd.f32 %v12321_v54, %v3728_v13  ;;  %v3730_v37 = vpop.f32.mrb[167].mxu1  ;;  %4885 = vmatmul.mubr.bf16.gmra.mrb[24].mxu0 %v10826_v27  ;;  %v10829_v13 = vld [vmem:[%s11185_s22 + $0x8c0] ss:$16 sps:$4 sm:$0xff]   ;;  %v10837_v27 = vld [vmem:[%s11185_s22 + $0x8e4] ss:$16 sps:$4 sm:$0xff]  }
 0x26d   : > { %8757 = vmatprep.mubr.msk.bf16.mxu0 %vm3026_vm0, %v10834_v47 }
 0x26e   : > { %9848 = vst [vmem:[%s11640_s11 + $0x140] sm:$0xff] %v9452_v56   ;;  %v5303_v18 = vmax.f32 %v4655_v12, 0.0  ;;  %v4658_v53 = vadd.f32 %v4657_v7, %v3729_v10  ;;  %3940 = vmatmul.mubr.bf16.gmra.mrb[164].mxu1 %v10817_v38  ;;  %v10838_v56 = vld [vmem:[%s11185_s22 + $0x908] ss:$16 sps:$4 sm:$0xff]  }
 0x26f   : > { %3947 = vmatprep.mubr.bf16.mxu1 %v10825_v4  ;;  %v4678_v7 = vpop.f32.mrb[176].mxu0 }
 0x270   : > { %v5304_v40 = vmax.f32 %v4658_v53, 0.0  ;;  %v6871_v23 = vmul.f32 %v11941_v36, %v5303_v18  ;;  %v4680_v0 = vpop.f32.mrb[177].mxu0  ;;  %v10846_v18 = vld [vmem:[%s11185_s22 + $0x92c] ss:$16 sps:$4 sm:$0xff]  }
 0x271   : > { %v3733_v11 = vpop.f32.mrb[168].mxu1  ;;  %v4681_v36 = vpop.f32.mrb[178].mxu0 }
 0x272   : > { %v6872_v25 = vmul.f32 %v11935_v59, %v5304_v40  ;;  %v3734_v42 = vadd.f32 %v12321_v54, %v3733_v11  ;;  %v3735_v16 = vpop.f32.mrb[169].mxu1  ;;  %v4683_v29 = vpop.f32.mrb[179].mxu0  ;;  %v13036_v11 = vld [vmem:[#allocation22_spill] sm:$0xff] }
 0x273   : > { %v3736_v50 = vpop.f32.mrb[170].mxu1 }
 0x274   : > { %v9457_v21 = vpack.c.bf16 %v6872_v25, %v6871_v23  ;;  %v4663_v48 = vadd.f32 %v4662_v58, %v3734_v42  ;;  %v3737_v44 = vadd.f32 %v12321_v54, %v3736_v50  ;;  %v3738_v39 = vpop.f32.mrb[171].mxu1  ;;  %4893 = vmatmul.mubr.bf16.gmra.mrb[28].mxu0 %v10832_v9  ;;  %v13037_v25 = vld [vmem:[#allocation21_spill] sm:$0xff]  ;;  %v10835_v50 = vld [vmem:[%s11185_s22 + $0x8e0] ss:$16 sps:$4 sm:$0xff]   ;;  %v10843_v9 = vld [vmem:[%s11185_s22 + $0x904] ss:$16 sps:$4 sm:$0xff]  }
 0x275   : > { %8758 = vmatprep.mubr.msk.bf16.mxu0 %vm3026_vm0, %v10840_v6 }
 0x276   : > { %9849 = vst [vmem:[%s11640_s11 + $0x148] sm:$0xff] %v9457_v21   ;;  %v5305_v24 = vmax.f32 %v4663_v48, 0.0  ;;  %v4666_v59 = vadd.f32 %v4665_v15, %v3737_v44  ;;  %3948 = vmatmul.mubr.bf16.gmra.mrb[168].mxu1 %v10823_v34  ;;  %v10844_v21 = vld [vmem:[%s11185_s22 + $0x928] ss:$16 sps:$4 sm:$0xff]  }
 0x277   : > { %3955 = vmatprep.mubr.bf16.mxu1 %v10831_v45  ;;  %v4686_v15 = vpop.f32.mrb[180].mxu0 }
 0x278   : > { %v5306_v1 = vmax.f32 %v4666_v59, 0.0  ;;  %v6873_v31 = vmul.f32 %v11966_v60, %v5305_v24  ;;  %v4688_v47 = vpop.f32.mrb[181].mxu0  ;;  %v10852_v24 = vld [vmem:[%s11185_s22 + $0x94c] ss:$16 sps:$4 sm:$0xff]  }
 0x279   : > { %v3741_v58 = vpop.f32.mrb[172].mxu1  ;;  %v4689_v60 = vpop.f32.mrb[182].mxu0 }
 0x27a   : > { %v6874_v63 = vmul.f32 %v11944_v32, %v5306_v1  ;;  %v3742_v2 = vadd.f32 %v12321_v54, %v3741_v58  ;;  %v3743_v38 = vpop.f32.mrb[173].mxu1  ;;  %v4691_v19 = vpop.f32.mrb[183].mxu0 }
 0x27b   : > { %v3744_v4 = vpop.f32.mrb[174].mxu1 }
 0x27c   : > { %v9462_v12 = vpack.c.bf16 %v6874_v63, %v6873_v31  ;;  %v4671_v10 = vadd.f32 %v4670_v17, %v3742_v2  ;;  %v3745_v37 = vadd.f32 %v12321_v54, %v3744_v4  ;;  %v3746_v46 = vpop.f32.mrb[175].mxu1  ;;  %4901 = vmatmul.mubr.bf16.gmra.mrb[32].mxu0 %v10838_v56  ;;  %v10841_v4 = vld [vmem:[%s11185_s22 + $0x900] ss:$16 sps:$4 sm:$0xff]   ;;  %v10849_v56 = vld [vmem:[%s11185_s22 + $0x924] ss:$16 sps:$4 sm:$0xff]  }
 0x27d   : > { %8759 = vmatprep.mubr.msk.bf16.mxu0 %vm3026_vm0, %v10846_v18 }
 0x27e   : > { %9850 = vst [vmem:[%s11640_s11 + $0x150] sm:$0xff] %v9462_v12   ;;  %v5307_v53 = vmax.f32 %v4671_v10, 0.0  ;;  %v4674_v32 = vadd.f32 %v4673_v28, %v3745_v37  ;;  %3956 = vmatmul.mubr.bf16.gmra.mrb[172].mxu1 %v10829_v13  ;;  %v10850_v12 = vld [vmem:[%s11185_s22 + $0x948] ss:$16 sps:$4 sm:$0xff]  }
 0x27f   : > { %3963 = vmatprep.mubr.bf16.mxu1 %v10837_v27  ;;  %v4694_v28 = vpop.f32.mrb[184].mxu0 }
 0x280   : > { %v5308_v40 = vmax.f32 %v4674_v32, 0.0  ;;  %v6875_v23 = vmul.f32 %v13036_v11, %v5307_v53  ;;  %v4696_v6 = vpop.f32.mrb[185].mxu0  ;;  %v10858_v53 = vld [vmem:[%s11185_s22 + $0x96c] ss:$16 sps:$4 sm:$0xff]  }
 0x281   : > { %v3749_v17 = vpop.f32.mrb[176].mxu1  ;;  %v4697_v59 = vpop.f32.mrb[186].mxu0  ;;  %v13038_v11 = vld [vmem:[#allocation23_spill] sm:$0xff] }
 0x282   : > { %v6876_v42 = vmul.f32 %v13037_v25, %v5308_v40  ;;  %v3750_v16 = vadd.f32 %v12321_v54, %v3749_v17  ;;  %v3751_v34 = vpop.f32.mrb[177].mxu1  ;;  %v4699_v58 = vpop.f32.mrb[187].mxu0 }
 0x283   : > { %v3752_v45 = vpop.f32.mrb[178].mxu1  ;;  %v13039_v58 = vld [vmem:[#allocation24_spill] sm:$0xff] }
 0x284   : > { %v9467_v48 = vpack.c.bf16 %v6876_v42, %v6875_v23  ;;  %v4679_v44 = vadd.f32 %v4678_v7, %v3750_v16  ;;  %v3753_v39 = vadd.f32 %v12321_v54, %v3752_v45  ;;  %v3754_v0 = vpop.f32.mrb[179].mxu1  ;;  %4909 = vmatmul.mubr.bf16.gmra.mrb[36].mxu0 %v10844_v21  ;;  %v10847_v16 = vld [vmem:[%s11185_s22 + $0x920] ss:$16 sps:$4 sm:$0xff]   ;;  %v10856_v45 = vld [vmem:[%s11185_s22 + $0x968] ss:$16 sps:$4 sm:$0xff]  }
 0x285   : > { %8760 = vmatprep.mubr.msk.bf16.mxu0 %vm3026_vm0, %v10852_v24  ;;  %v10864_v0 = vld [vmem:[%s11185_s22 + $0x98c] ss:$16 sps:$4 sm:$0xff]  }
 0x286   : > { %9851 = vst [vmem:[%s11640_s11 + $0x158] sm:$0xff] %v9467_v48   ;;  %v5309_v29 = vmax.f32 %v4679_v44, 0.0  ;;  %v4682_v1 = vadd.f32 %v4681_v36, %v3753_v39  ;;  %3964 = vmatmul.mubr.bf16.gmra.mrb[176].mxu1 %v10835_v50  ;;  %v10855_v50 = vld [vmem:[%s11185_s22 + $0x944] ss:$16 sps:$4 sm:$0xff]  }
 0x287   : > { %3971 = vmatprep.mubr.bf16.mxu1 %v10843_v9  ;;  %v4702_v36 = vpop.f32.mrb[188].mxu0 }
 0x288   : > { %v5310_v31 = vmax.f32 %v4682_v1, 0.0  ;;  %v6877_v63 = vmul.f32 %v11998_v30, %v5309_v29  ;;  %v4704_v18 = vpop.f32.mrb[189].mxu0 }
 0x289   : > { %v3757_v7 = vpop.f32.mrb[180].mxu1  ;;  %v4705_v30 = vpop.f32.mrb[190].mxu0 }
 0x28a   : > { %v6878_v2 = vmul.f32 %v11992_v20, %v5310_v31  ;;  %v3758_v38 = vadd.f32 %v12321_v54, %v3757_v7  ;;  %v3759_v13 = vpop.f32.mrb[181].mxu1  ;;  %v4707_v19 = vpop.f32.mrb[191].mxu0 }
 0x28b   : > { %v3760_v27 = vpop.f32.mrb[182].mxu1 }
 0x28c   : > { %v9472_v10 = vpack.c.bf16 %v6878_v2, %v6877_v63  ;;  %v4687_v37 = vadd.f32 %v4686_v15, %v3758_v38  ;;  %v3761_v46 = vadd.f32 %v12321_v54, %v3760_v27  ;;  %v3762_v47 = vpop.f32.mrb[183].mxu1  ;;  %4917 = vmatmul.mubr.bf16.gmra.mrb[40].mxu0 %v10850_v12  ;;  %v10853_v2 = vld [vmem:[%s11185_s22 + $0x940] ss:$16 sps:$4 sm:$0xff]   ;;  %v10862_v27 = vld [vmem:[%s11185_s22 + $0x988] ss:$16 sps:$4 sm:$0xff]  }
 0x28d   : > { %8761 = vmatprep.mubr.msk.bf16.mxu0 %vm3026_vm0, %v10858_v53 }
 0x28e   : > { %9852 = vst [vmem:[%s11640_s11 + $0x160] sm:$0xff] %v9472_v10   ;;  %v5311_v32 = vmax.f32 %v4687_v37, 0.0  ;;  %v4690_v20 = vadd.f32 %v4689_v60, %v3761_v46  ;;  %3972 = vmatmul.mubr.bf16.gmra.mrb[180].mxu1 %v10841_v4  ;;  %v10861_v4 = vld [vmem:[%s11185_s22 + $0x964] ss:$16 sps:$4 sm:$0xff]   ;;  %v10870_v46 = vld [vmem:[%s11185_s22 + $0x9ac] ss:$16 sps:$4 sm:$0xff]  }
 0x28f   : > { %3979 = vmatprep.mubr.bf16.mxu1 %v10849_v56  ;;  %v4710_v60 = vpop.f32.mrb[192].mxu0 }
 0x290   : > { %v5312_v40 = vmax.f32 %v4690_v20, 0.0  ;;  %v6879_v17 = vmul.f32 %v12018_v33, %v5311_v32  ;;  %v4712_v39 = vpop.f32.mrb[193].mxu0 }
 0x291   : > { %v3765_v15 = vpop.f32.mrb[184].mxu1  ;;  %v4713_v6 = vpop.f32.mrb[194].mxu0 }
 0x292   : > { %v6880_v23 = vmul.f32 %v13038_v11, %v5312_v40  ;;  %v3766_v25 = vadd.f32 %v12321_v54, %v3765_v15  ;;  %v3767_v42 = vpop.f32.mrb[185].mxu1  ;;  %v4715_v29 = vpop.f32.mrb[195].mxu0  ;;  %v10859_v11 = vld [vmem:[%s11185_s22 + $0x960] ss:$16 sps:$4 sm:$0xff]  }
 0x293   : > { %v3768_v34 = vpop.f32.mrb[186].mxu1  ;;  %v10868_v42 = vld [vmem:[%s11185_s22 + $0x9a8] ss:$16 sps:$4 sm:$0xff]  }
 0x294   : > { %v9477_v9 = vpack.c.bf16 %v6880_v23, %v6879_v17  ;;  %v4695_v21 = vadd.f32 %v4694_v28, %v3766_v25  ;;  %v3769_v48 = vadd.f32 %v12321_v54, %v3768_v34  ;;  %v3770_v44 = vpop.f32.mrb[187].mxu1  ;;  %4925 = vmatmul.mubr.bf16.gmra.mrb[44].mxu0 %v10856_v45  ;;  %v10867_v25 = vld [vmem:[%s11185_s22 + $0x984] ss:$16 sps:$4 sm:$0xff]  }
 0x295   : > { %8762 = vmatprep.mubr.msk.bf16.mxu0 %vm3026_vm0, %v10864_v0 }
 0x296   : > { %9853 = vst [vmem:[%s11640_s11 + $0x168] sm:$0xff] %v9477_v9   ;;  %v5313_v33 = vmax.f32 %v4695_v21, 0.0  ;;  %v4698_v24 = vadd.f32 %v4697_v59, %v3769_v48  ;;  %3980 = vmatmul.mubr.bf16.gmra.mrb[184].mxu1 %v10847_v16  ;;  %v12542_v59 = vld [vmem:[%s12974_s2] ss:$0 sm:$0xff]  ;;  %v10876_v21 = vld [vmem:[%s11185_s22 + $0x9cc] ss:$16 sps:$4 sm:$0xff]  }
 0x297   : > { %3987 = vmatprep.mubr.bf16.mxu1 %v10855_v50  ;;  %v4718_v38 = vpop.f32.mrb[196].mxu0 }
 0x298   : > { %v5314_v1 = vmax.f32 %v4698_v24, 0.0  ;;  %v6881_v54 = vmul.f32 %v12027_v62, %v5313_v33  ;;  %v4720_v37 = vpop.f32.mrb[197].mxu0  ;;  %v13040_v33 = vld [vmem:[#allocation25_spill] sm:$0xff] }
 0x299   : > { %v3773_v28 = vpop.f32.mrb[188].mxu1  ;;  %v4721_v47 = vpop.f32.mrb[198].mxu0 }
 0x29a   : > { %v6882_v31 = vmul.f32 %v13039_v58, %v5314_v1  ;;  %v3774_v7 = vadd.f32 %v12542_v59, %v3773_v28  ;;  %v3775_v63 = vpop.f32.mrb[189].mxu1  ;;  %v4723_v32 = vpop.f32.mrb[199].mxu0  ;;  %v10865_v28 = vld [vmem:[%s11185_s22 + $0x980] ss:$16 sps:$4 sm:$0xff]   ;;  %v10873_v58 = vld [vmem:[%s11185_s22 + $0x9a4] ss:$16 sps:$4 sm:$0xff]  }
 0x29b   : > { %v3776_v13 = vpop.f32.mrb[190].mxu1 }
 0x29c   : > { %v9482_v56 = vpack.c.bf16 %v6882_v31, %v6881_v54  ;;  %v4703_v12 = vadd.f32 %v4702_v36, %v3774_v7  ;;  %v3777_v62 = vadd.f32 %v12542_v59, %v3776_v13  ;;  %v3778_v10 = vpop.f32.mrb[191].mxu1  ;;  %4933 = vmatmul.mubr.bf16.gmra.mrb[48].mxu0 %v10862_v27  ;;  %v10874_v31 = vld [vmem:[%s11185_s22 + $0x9c8] ss:$16 sps:$4 sm:$0xff]   ;;  %v10882_v27 = vld [vmem:[%s11185_s22 + $0x9ec] ss:$16 sps:$4 sm:$0xff]  }
 0x29d   : > { %8763 = vmatprep.mubr.msk.bf16.mxu0 %vm3026_vm0, %v10870_v46  ;;  %v13041_v46 = vld [vmem:[#allocation26_spill] sm:$0xff] }
 0x29e   : > { %9854 = vst [vmem:[%s11640_s11 + $0x170] sm:$0xff] %v9482_v56   ;;  %v5315_v18 = vmax.f32 %v4703_v12, 0.0  ;;  %v4706_v53 = vadd.f32 %v4705_v30, %v3777_v62  ;;  %3988 = vmatmul.mubr.bf16.gmra.mrb[188].mxu1 %v10853_v2 }
 0x29f   : > { %3995 = vmatprep.mubr.bf16.mxu1 %v10861_v4  ;;  %v4726_v30 = vpop.f32.mrb[200].mxu0 }
 0x2a0   : > { %v5316_v20 = vmax.f32 %v4706_v53, 0.0  ;;  %v6883_v19 = vmul.f32 %v12050_v51, %v5315_v18  ;;  %v4728_v9 = vpop.f32.mrb[201].mxu0 }
 0x2a1   : > { %v3781_v36 = vpop.f32.mrb[192].mxu1  ;;  %v4729_v51 = vpop.f32.mrb[202].mxu0 }
 0x2a2   : > { %v6884_v40 = vmul.f32 %v12044_v43, %v5316_v20  ;;  %v3782_v15 = vadd.f32 %v12542_v59, %v3781_v36  ;;  %v3783_v17 = vpop.f32.mrb[193].mxu1  ;;  %v4731_v44 = vpop.f32.mrb[203].mxu0  ;;  %v10871_v20 = vld [vmem:[%s11185_s22 + $0x9a0] ss:$16 sps:$4 sm:$0xff]  }
 0x2a3   : > { %v3784_v23 = vpop.f32.mrb[194].mxu1  ;;  %v10877_v44 = vld [vmem:[%s11185_s22 + $0x9c0] ss:$16 sps:$4 sm:$0xff]  }
 0x2a4   : > { %v9487_v16 = vpack.c.bf16 %v6884_v40, %v6883_v19  ;;  %v4711_v34 = vadd.f32 %v4710_v60, %v3782_v15  ;;  %v3785_v50 = vadd.f32 %v12542_v59, %v3784_v23  ;;  %v3786_v45 = vpop.f32.mrb[195].mxu1  ;;  %4941 = vmatmul.mubr.bf16.gmra.mrb[52].mxu0 %v10868_v42  ;;  %v10879_v19 = vld [vmem:[%s11185_s22 + $0x9c4] ss:$16 sps:$4 sm:$0xff]   ;;  %v10880_v40 = vld [vmem:[%s11185_s22 + $0x9e8] ss:$16 sps:$4 sm:$0xff]  }
 0x2a5   : > { %8764 = vmatprep.mubr.msk.bf16.mxu0 %vm3026_vm0, %v10876_v21  ;;  %v10888_v42 = vld [vmem:[%s11185_s22 + $0xa0c] ss:$16 sps:$4 sm:$0xff]  }
 0x2a6   : > { %9855 = vst [vmem:[%s11640_s11 + $0x178] sm:$0xff] %v9487_v16   ;;  %v5317_v48 = vmax.f32 %v4711_v34, 0.0  ;;  %v4714_v43 = vadd.f32 %v4713_v6, %v3785_v50  ;;  %3996 = vmatmul.mubr.bf16.gmra.mrb[192].mxu1 %v10859_v11 }
 0x2a7   : > { %4003 = vmatprep.mubr.bf16.mxu1 %v10867_v25  ;;  %v4734_v6 = vpop.f32.mrb[204].mxu0 }
 0x2a8   : > { %v5318_v39 = vmax.f32 %v4714_v43, 0.0  ;;  %v6885_v0 = vmul.f32 %v12070_v55, %v5317_v48  ;;  %v4736_v4 = vpop.f32.mrb[205].mxu0 }
 0x2a9   : > { %v3789_v60 = vpop.f32.mrb[196].mxu1  ;;  %v4737_v55 = vpop.f32.mrb[206].mxu0 }
 0x2aa   : > { %v6886_v24 = vmul.f32 %v13040_v33, %v5318_v39  ;;  %v3790_v29 = vadd.f32 %v12542_v59, %v3789_v60  ;;  %v3791_v1 = vpop.f32.mrb[197].mxu1  ;;  %v4739_v62 = vpop.f32.mrb[207].mxu0  ;;  %v10885_v60 = vld [vmem:[%s11185_s22 + $0x9e4] ss:$16 sps:$4 sm:$0xff]  }
 0x2ab   : > { %v3792_v54 = vpop.f32.mrb[198].mxu1  ;;  %v10891_v62 = vld [vmem:[%s11185_s22 + $0xa04] ss:$16 sps:$4 sm:$0xff]  }
 0x2ac   : > { %v9492_v7 = vpack.c.bf16 %v6886_v24, %v6885_v0  ;;  %v4719_v63 = vadd.f32 %v4718_v38, %v3790_v29  ;;  %v3793_v2 = vadd.f32 %v12542_v59, %v3792_v54  ;;  %v3794_v13 = vpop.f32.mrb[199].mxu1  ;;  %4949 = vmatmul.mubr.bf16.gmra.mrb[56].mxu0 %v10874_v31  ;;  %v10886_v0 = vld [vmem:[%s11185_s22 + $0xa08] ss:$16 sps:$4 sm:$0xff]   ;;  %v10894_v54 = vld [vmem:[%s11185_s22 + $0xa2c] ss:$16 sps:$4 sm:$0xff]  }
 0x2ad   : > { %8765 = vmatprep.mubr.msk.bf16.mxu0 %vm3026_vm0, %v10882_v27 }
 0x2ae   : > { %9856 = vst [vmem:[%s11640_s11 + $0x180] sm:$0xff] %v9492_v7   ;;  %v5319_v56 = vmax.f32 %v4719_v63, 0.0  ;;  %v4722_v12 = vadd.f32 %v4721_v47, %v3793_v2  ;;  %4004 = vmatmul.mubr.bf16.gmra.mrb[196].mxu1 %v10865_v28  ;;  %v13042_v2 = vld [vmem:[#allocation27_spill] sm:$0xff] }
 0x2af   : > { %4011 = vmatprep.mubr.bf16.mxu1 %v10873_v58  ;;  %v4742_v47 = vpop.f32.mrb[208].mxu0 }
 0x2b0   : > { %v5320_v10 = vmax.f32 %v4722_v12, 0.0  ;;  %v6887_v37 = vmul.f32 %v12079_v14, %v5319_v56  ;;  %v4744_v25 = vpop.f32.mrb[209].mxu0  ;;  %v10883_v56 = vld [vmem:[%s11185_s22 + $0x9e0] ss:$16 sps:$4 sm:$0xff]  }
 0x2b1   : > { %v3797_v38 = vpop.f32.mrb[200].mxu1  ;;  %v4745_v14 = vpop.f32.mrb[210].mxu0 }
 0x2b2   : > { %v6888_v18 = vmul.f32 %v13041_v46, %v5320_v10  ;;  %v3798_v53 = vadd.f32 %v12542_v59, %v3797_v38  ;;  %v3799_v32 = vpop.f32.mrb[201].mxu1  ;;  %v4747_v50 = vpop.f32.mrb[211].mxu0  ;;  %v10892_v10 = vld [vmem:[%s11185_s22 + $0xa28] ss:$16 sps:$4 sm:$0xff]  }
 0x2b3   : > { %v3800_v36 = vpop.f32.mrb[202].mxu1  ;;  %v10900_v32 = vld [vmem:[%s11185_s22 + $0xa4c] ss:$16 sps:$4 sm:$0xff]   ;;  %v10897_v50 = vld [vmem:[%s11185_s22 + $0xa24] ss:$16 sps:$4 sm:$0xff]  }
 0x2b4   : > { %v9497_v15 = vpack.c.bf16 %v6888_v18, %v6887_v37  ;;  %v4727_v17 = vadd.f32 %v4726_v30, %v3798_v53  ;;  %v3801_v11 = vadd.f32 %v12542_v59, %v3800_v36  ;;  %v3802_v23 = vpop.f32.mrb[203].mxu1  ;;  %4957 = vmatmul.mubr.bf16.gmra.mrb[60].mxu0 %v10880_v40 }
 0x2b5   : > { %8766 = vmatprep.mubr.msk.bf16.mxu0 %vm3026_vm0, %v10888_v42 }
 0x2b6   : > { %9857 = vst [vmem:[%s11640_s11 + $0x188] sm:$0xff] %v9497_v15   ;;  %v5321_v16 = vmax.f32 %v4727_v17, 0.0  ;;  %v4730_v34 = vadd.f32 %v4729_v51, %v3801_v11  ;;  %4012 = vmatmul.mubr.bf16.gmra.mrb[200].mxu1 %v10871_v20  ;;  %v13043_v15 = vld [vmem:[#allocation29_spill] sm:$0xff]  ;;  %v13044_v11 = vld [vmem:[#allocation28_spill] sm:$0xff] }
 0x2b7   : > { %4019 = vmatprep.mubr.bf16.mxu1 %v10879_v19  ;;  %v4750_v51 = vpop.f32.mrb[212].mxu0 }
 0x2b8   : > { %v5322_v45 = vmax.f32 %v4730_v34, 0.0  ;;  %v6889_v9 = vmul.f32 %v12102_v57, %v5321_v16  ;;  %v4752_v28 = vpop.f32.mrb[213].mxu0  ;;  %v10889_v16 = vld [vmem:[%s11185_s22 + $0xa00] ss:$16 sps:$4 sm:$0xff]  }
 0x2b9   : > { %v3805_v30 = vpop.f32.mrb[204].mxu1  ;;  %v4753_v57 = vpop.f32.mrb[214].mxu0  ;;  %v13046_v28 = vld [vmem:[#allocation30_spill] sm:$0xff] }
 0x2ba   : > { %v6890_v21 = vmul.f32 %v12096_v8, %v5322_v45  ;;  %v3806_v48 = vadd.f32 %v12542_v59, %v3805_v30  ;;  %v3807_v43 = vpop.f32.mrb[205].mxu1  ;;  %v4755_v31 = vpop.f32.mrb[215].mxu0  ;;  %v10898_v45 = vld [vmem:[%s11185_s22 + $0xa48] ss:$16 sps:$4 sm:$0xff]  }
 0x2bb   : > { %v3808_v39 = vpop.f32.mrb[206].mxu1  ;;  %v10895_v31 = vld [vmem:[%s11185_s22 + $0xa20] ss:$16 sps:$4 sm:$0xff]  }
 0x2bc   : > { %v9502_v33 = vpack.c.bf16 %v6890_v21, %v6889_v9  ;;  %v4735_v24 = vadd.f32 %v4734_v6, %v3806_v48  ;;  %v3809_v29 = vadd.f32 %v12542_v59, %v3808_v39  ;;  %v3810_v1 = vpop.f32.mrb[207].mxu1  ;;  %4965 = vmatmul.mubr.bf16.gmra.mrb[64].mxu0 %v10886_v0 }
 0x2bd   : > { %8767 = vmatprep.mubr.msk.bf16.mxu0 %vm3026_vm0, %v10894_v54 }
 0x2be   : > { %9858 = vst [vmem:[%s11640_s11 + $0x190] sm:$0xff] %v9502_v33   ;;  %v5323_v58 = vmax.f32 %v4735_v24, 0.0  ;;  %v4738_v8 = vadd.f32 %v4737_v55, %v3809_v29  ;;  %4020 = vmatmul.mubr.bf16.gmra.mrb[204].mxu1 %v10877_v44  ;;  %v10906_v44 = vld [vmem:[%s11185_s22 + $0xa6c] ss:$16 sps:$4 sm:$0xff]  }
 0x2bf   : > { %4027 = vmatprep.mubr.bf16.mxu1 %v10885_v60  ;;  %v4758_v55 = vpop.f32.mrb[216].mxu0  ;;  %v13045_v29 = vld [vmem:[#allocation31_spill] sm:$0xff] }
 0x2c0   : > { %v5324_v7 = vmax.f32 %v4738_v8, 0.0  ;;  %v6891_v63 = vmul.f32 %v12122_v49, %v5323_v58  ;;  %v4760_v53 = vpop.f32.mrb[217].mxu0 }
 0x2c1   : > { %v3813_v6 = vpop.f32.mrb[208].mxu1  ;;  %v4761_v49 = vpop.f32.mrb[218].mxu0 }
 0x2c2   : > { %v6892_v13 = vmul.f32 %v13042_v2, %v5324_v7  ;;  %v3814_v4 = vadd.f32 %v12542_v59, %v3813_v6  ;;  %v3815_v27 = vpop.f32.mrb[209].mxu1  ;;  %v4763_v19 = vpop.f32.mrb[219].mxu0  ;;  %v10903_v6 = vld [vmem:[%s11185_s22 + $0xa44] ss:$16 sps:$4 sm:$0xff]  }
 0x2c3   : > { %v3816_v12 = vpop.f32.mrb[210].mxu1 }
 0x2c4   : > { %v9507_v38 = vpack.c.bf16 %v6892_v13, %v6891_v63  ;;  %v4743_v37 = vadd.f32 %v4742_v47, %v3814_v4  ;;  %v3817_v46 = vadd.f32 %v12542_v59, %v3816_v12  ;;  %v3818_v18 = vpop.f32.mrb[211].mxu1  ;;  %4973 = vmatmul.mubr.bf16.gmra.mrb[68].mxu0 %v10892_v10  ;;  %v10904_v63 = vld [vmem:[%s11185_s22 + $0xa68] ss:$16 sps:$4 sm:$0xff]   ;;  %v10912_v12 = vld [vmem:[%s11185_s22 + $0xa8c] ss:$16 sps:$4 sm:$0xff]  }
 0x2c5   : > { %8768 = vmatprep.mubr.msk.bf16.mxu0 %vm3026_vm0, %v10900_v32  ;;  %v13047_v18 = vld [vmem:[#allocation3_spill] sm:$0xff]  ;;  %v13048_v32 = vld [vmem:[#allocation32_spill] sm:$0xff] }
 0x2c6   : > { %9859 = vst [vmem:[%s11640_s11 + $0x198] sm:$0xff] %v9507_v38   ;;  %v5325_v20 = vmax.f32 %v4743_v37, 0.0  ;;  %v4746_v36 = vadd.f32 %v4745_v14, %v3817_v46  ;;  %4028 = vmatmul.mubr.bf16.gmra.mrb[208].mxu1 %v10883_v56 }
 0x2c7   : > { %4035 = vmatprep.mubr.bf16.mxu1 %v10891_v62  ;;  %v4766_v14 = vpop.f32.mrb[220].mxu0 }
 0x2c8   : > { %v5326_v40 = vmax.f32 %v4746_v36, 0.0  ;;  %v6893_v17 = vmul.f32 %v13043_v15, %v5325_v20  ;;  %v4768_v43 = vpop.f32.mrb[221].mxu0  ;;  %v10909_v15 = vld [vmem:[%s11185_s22 + $0xa64] ss:$16 sps:$4 sm:$0xff]  }
 0x2c9   : > { %v3821_v47 = vpop.f32.mrb[212].mxu1  ;;  %v4769_v39 = vpop.f32.mrb[222].mxu0 }
 0x2ca   : > { %v6894_v23 = vmul.f32 %v13044_v11, %v5326_v40  ;;  %v3822_v25 = vadd.f32 %v12542_v59, %v3821_v47  ;;  %v3823_v42 = vpop.f32.mrb[213].mxu1  ;;  %v4771_v33 = vpop.f32.mrb[223].mxu0  ;;  %v10901_v40 = vld [vmem:[%s11185_s22 + $0xa40] ss:$16 sps:$4 sm:$0xff]   ;;  %v10910_v11 = vld [vmem:[%s11185_s22 + $0xa88] ss:$16 sps:$4 sm:$0xff]  }
 0x2cb   : > { %v3824_v34 = vpop.f32.mrb[214].mxu1 }
 0x2cc   : > { %v9512_v30 = vpack.c.bf16 %v6894_v23, %v6893_v17  ;;  %v4751_v9 = vadd.f32 %v4750_v51, %v3822_v25  ;;  %v3825_v21 = vadd.f32 %v12542_v59, %v3824_v34  ;;  %v3826_v48 = vpop.f32.mrb[215].mxu1  ;;  %4981 = vmatmul.mubr.bf16.gmra.mrb[72].mxu0 %v10898_v45 }
 0x2cd   : > { %8769 = vmatprep.mubr.msk.bf16.mxu0 %vm3026_vm0, %v10906_v44  ;;  %v13050_v44 = vld [vmem:[#allocation2_spill] sm:$0xff] }
 0x2ce   : > { %9860 = vst [vmem:[%s11640_s11 + $0x1a0] sm:$0xff] %v9512_v30   ;;  %v5327_v60 = vmax.f32 %v4751_v9, 0.0  ;;  %v4754_v0 = vadd.f32 %v4753_v57, %v3825_v21  ;;  %4036 = vmatmul.mubr.bf16.gmra.mrb[212].mxu1 %v10889_v16 }
 0x2cf   : > { %4043 = vmatprep.mubr.bf16.mxu1 %v10897_v50  ;;  %v4774_v57 = vpop.f32.mrb[224].mxu0  ;;  %v10918_v50 = vld [vmem:[%s11185_s22 + $0xaac] ss:$16 sps:$4 sm:$0xff]  }
 0x2d0   : > { %v5328_v24 = vmax.f32 %v4754_v0, 0.0  ;;  %v6895_v1 = vmul.f32 %v13045_v29, %v5327_v60  ;;  %v4776_v56 = vpop.f32.mrb[225].mxu0  ;;  %v10915_v29 = vld [vmem:[%s11185_s22 + $0xa84] ss:$16 sps:$4 sm:$0xff]  }
 0x2d1   : > { %v3829_v51 = vpop.f32.mrb[216].mxu1  ;;  %v4777_v62 = vpop.f32.mrb[226].mxu0 }
 0x2d2   : > { %v6896_v54 = vmul.f32 %v13046_v28, %v5328_v24  ;;  %v3830_v58 = vadd.f32 %v12542_v59, %v3829_v51  ;;  %v3831_v8 = vpop.f32.mrb[217].mxu1  ;;  %v4779_v37 = vpop.f32.mrb[227].mxu0  ;;  %v10907_v24 = vld [vmem:[%s11185_s22 + $0xa60] ss:$16 sps:$4 sm:$0xff]   ;;  %v10916_v28 = vld [vmem:[%s11185_s22 + $0xaa8] ss:$16 sps:$4 sm:$0xff]  }
 0x2d3   : > { %v3832_v7 = vpop.f32.mrb[218].mxu1 }
 0x2d4   : > { %v9517_v2 = vpack.c.bf16 %v6896_v54, %v6895_v1  ;;  %v4759_v13 = vadd.f32 %v4758_v55, %v3830_v58  ;;  %v3833_v4 = vadd.f32 %v12542_v59, %v3832_v7  ;;  %v3834_v27 = vpop.f32.mrb[219].mxu1  ;;  %4989 = vmatmul.mubr.bf16.gmra.mrb[76].mxu0 %v10904_v63 }
 0x2d5   : > { %8770 = vmatprep.mubr.msk.bf16.mxu0 %vm3026_vm0, %v10912_v12  ;;  %v13052_v12 = vld [vmem:[#allocation5_spill] sm:$0xff] }
 0x2d6   : > { %9861 = vst [vmem:[%s11640_s11 + $0x1a8] sm:$0xff] %v9517_v2   ;;  %v5329_v10 = vmax.f32 %v4759_v13, 0.0  ;;  %v4762_v38 = vadd.f32 %v4761_v49, %v3833_v4  ;;  %4044 = vmatmul.mubr.bf16.gmra.mrb[216].mxu1 %v10895_v31 }
 0x2d7   : > { %4051 = vmatprep.mubr.bf16.mxu1 %v10903_v6  ;;  %v4782_v49 = vpop.f32.mrb[228].mxu0  ;;  %v10924_v6 = vld [vmem:[%s11185_s22 + $0xacc] ss:$16 sps:$4 sm:$0xff]  }
 0x2d8   : > { %v5330_v46 = vmax.f32 %v4762_v38, 0.0  ;;  %v6897_v53 = vmul.f32 %v13047_v18, %v5329_v10  ;;  %v4784_v17 = vpop.f32.mrb[229].mxu0  ;;  %v10921_v18 = vld [vmem:[%s11185_s22 + $0xaa4] ss:$16 sps:$4 sm:$0xff]  }
 0x2d9   : > { %v3837_v55 = vpop.f32.mrb[220].mxu1  ;;  %v4785_v34 = vpop.f32.mrb[230].mxu0 }
 0x2da   : > { %v6898_v20 = vmul.f32 %v13048_v32, %v5330_v46  ;;  %v3838_v36 = vadd.f32 %v12542_v59, %v3837_v55  ;;  %v3839_v19 = vpop.f32.mrb[221].mxu1  ;;  %v4787_v45 = vpop.f32.mrb[231].mxu0  ;;  %v10913_v46 = vld [vmem:[%s11185_s22 + $0xa80] ss:$16 sps:$4 sm:$0xff]   ;;  %v10922_v32 = vld [vmem:[%s11185_s22 + $0xac8] ss:$16 sps:$4 sm:$0xff]  }
 0x2db   : > { %v3840_v47 = vpop.f32.mrb[222].mxu1 }
 0x2dc   : > { %v9522_v23 = vpack.c.bf16 %v6898_v20, %v6897_v53  ;;  %v4767_v25 = vadd.f32 %v4766_v14, %v3838_v36  ;;  %v3841_v42 = vadd.f32 %v12542_v59, %v3840_v47  ;;  %v3842_v16 = vpop.f32.mrb[223].mxu1  ;;  %4997 = vmatmul.mubr.bf16.gmra.mrb[80].mxu0 %v10910_v11  ;;  %v13049_v14 = vld [vmem:[#allocation33_spill] sm:$0xff] }
 0x2dd   : > { %8771 = vmatprep.mubr.msk.bf16.mxu0 %vm3026_vm0, %v10918_v50  ;;  %v13053_v16 = vld [vmem:[#allocation34_spill] sm:$0xff] }
 0x2de   : > { %9862 = vst [vmem:[%s11640_s11 + $0x1b0] sm:$0xff] %v9522_v23   ;;  %v5331_v30 = vmax.f32 %v4767_v25, 0.0  ;;  %v4770_v9 = vadd.f32 %v4769_v39, %v3841_v42  ;;  %4052 = vmatmul.mubr.bf16.gmra.mrb[220].mxu1 %v10901_v40 }
 0x2df   : > { %4059 = vmatprep.mubr.bf16.mxu1 %v10909_v15  ;;  %v4790_v51 = vpop.f32.mrb[232].mxu0  ;;  %v10930_v15 = vld [vmem:[%s11185_s22 + $0xaec] ss:$16 sps:$4 sm:$0xff]  }
 0x2e0   : > { %v5332_v21 = vmax.f32 %v4770_v9, 0.0  ;;  %v6899_v43 = vmul.f32 %v13049_v14, %v5331_v30  ;;  %v4792_v1 = vpop.f32.mrb[233].mxu0  ;;  %v10919_v9 = vld [vmem:[%s11185_s22 + $0xaa0] ss:$16 sps:$4 sm:$0xff]  }
 0x2e1   : > { %v3845_v48 = vpop.f32.mrb[224].mxu1  ;;  %v4793_v7 = vpop.f32.mrb[234].mxu0 }
 0x2e2   : > { %v6900_v60 = vmul.f32 %v13050_v44, %v5332_v21  ;;  %v3846_v0 = vadd.f32 %v12542_v59, %v3845_v48  ;;  %v3847_v33 = vpop.f32.mrb[225].mxu1  ;;  %v4795_v63 = vpop.f32.mrb[235].mxu0  ;;  %v10927_v48 = vld [vmem:[%s11185_s22 + $0xac4] ss:$16 sps:$4 sm:$0xff]  }
 0x2e3   : > { %v3848_v39 = vpop.f32.mrb[226].mxu1  ;;  %v10925_v63 = vld [vmem:[%s11185_s22 + $0xac0] ss:$16 sps:$4 sm:$0xff]  }
 0x2e4   : > { %v9527_v54 = vpack.c.bf16 %v6900_v60, %v6899_v43  ;;  %v4775_v58 = vadd.f32 %v4774_v57, %v3846_v0  ;;  %v3849_v8 = vadd.f32 %v12542_v59, %v3848_v39  ;;  %v3850_v31 = vpop.f32.mrb[227].mxu1  ;;  %5005 = vmatmul.mubr.bf16.gmra.mrb[84].mxu0 %v10916_v28  ;;  %v13051_v57 = vld [vmem:[#allocation4_spill] sm:$0xff]  ;;  %v10928_v43 = vld [vmem:[%s11185_s22 + $0xae8] ss:$16 sps:$4 sm:$0xff]  }
 0x2e5   : > { %8772 = vmatprep.mubr.msk.bf16.mxu0 %vm3026_vm0, %v10924_v6 }
 0x2e6   : > { %9863 = vst [vmem:[%s11640_s11 + $0x1b8] sm:$0xff] %v9527_v54   ;;  %v5333_v2 = vmax.f32 %v4775_v58, 0.0  ;;  %v4778_v13 = vadd.f32 %v4777_v62, %v3849_v8  ;;  %4060 = vmatmul.mubr.bf16.gmra.mrb[224].mxu1 %v10907_v24  ;;  %v13054_v58 = vld [vmem:[#allocation7_spill] sm:$0xff] }
 0x2e7   : > { %4067 = vmatprep.mubr.bf16.mxu1 %v10915_v29  ;;  %v4798_v55 = vpop.f32.mrb[236].mxu0 }
 0x2e8   : > { %v5334_v4 = vmax.f32 %v4778_v13, 0.0  ;;  %v6901_v56 = vmul.f32 %v13051_v57, %v5333_v2  ;;  %v4800_v53 = vpop.f32.mrb[237].mxu0  ;;  %v10933_v13 = vld [vmem:[%s11185_s22 + $0xae4] ss:$16 sps:$4 sm:$0xff]  }
 0x2e9   : > { %v3853_v27 = vpop.f32.mrb[228].mxu1  ;;  %v4801_v47 = vpop.f32.mrb[238].mxu0 }
 0x2ea   : > { %v6902_v10 = vmul.f32 %v13052_v12, %v5334_v4  ;;  %v3854_v38 = vadd.f32 %v12542_v59, %v3853_v27  ;;  %v3855_v37 = vpop.f32.mrb[229].mxu1  ;;  %v4803_v17 = vpop.f32.mrb[239].mxu0  ;;  %v10934_v27 = vld [vmem:[%s11185_s22 + $0xb08] ss:$16 sps:$4 sm:$0xff]  }
 0x2eb   : > { %v3856_v62 = vpop.f32.mrb[230].mxu1  ;;  %v10939_v17 = vld [vmem:[%s11185_s22 + $0xb04] ss:$16 sps:$4 sm:$0xff]  }
 0x2ec   : > { %v9532_v20 = vpack.c.bf16 %v6902_v10, %v6901_v56  ;;  %v4783_v36 = vadd.f32 %v4782_v49, %v3854_v38  ;;  %v3857_v19 = vadd.f32 %v12542_v59, %v3856_v62  ;;  %v3858_v40 = vpop.f32.mrb[231].mxu1  ;;  %5013 = vmatmul.mubr.bf16.gmra.mrb[88].mxu0 %v10922_v32  ;;  %v13055_v32 = vld [vmem:[#allocation6_spill] sm:$0xff] }
 0x2ed   : > { %8773 = vmatprep.mubr.msk.bf16.mxu0 %vm3026_vm0, %v10930_v15  ;;  %v10931_v40 = vld [vmem:[%s11185_s22 + $0xae0] ss:$16 sps:$4 sm:$0xff]  }
 0x2ee   : > { %9864 = vst [vmem:[%s11640_s11 + $0x1c0] sm:$0xff] %v9532_v20   ;;  %v5335_v11 = vmax.f32 %v4783_v36, 0.0  ;;  %v4786_v23 = vadd.f32 %v4785_v34, %v3857_v19  ;;  %4068 = vmatmul.mubr.bf16.gmra.mrb[228].mxu1 %v10913_v46 }
 0x2ef   : > { %4075 = vmatprep.mubr.bf16.mxu1 %v10921_v18  ;;  %v4806_v21 = vpop.f32.mrb[240].mxu0 }
 0x2f0   : > { %v5336_v25 = vmax.f32 %v4786_v23, 0.0  ;;  %v6903_v49 = vmul.f32 %v12231_v61, %v5335_v11  ;;  %v4808_v14 = vpop.f32.mrb[241].mxu0  ;;  %v10936_v61 = vld [vmem:[%s11185_s22 + $0xb0c] ss:$16 sps:$4 sm:$0xff]   ;;  %v10940_v23 = vld [vmem:[%s11185_s22 + $0xb28] ss:$16 sps:$4 sm:$0xff]  }
 0x2f1   : > { %v3861_v42 = vpop.f32.mrb[232].mxu1  ;;  %v4809_v24 = vpop.f32.mrb[242].mxu0  ;;  %v13056_v14 = vld [vmem:[#allocation8_spill] sm:$0xff] }
 0x2f2   : > { %v6904_v50 = vmul.f32 %v13053_v16, %v5336_v25  ;;  %v3862_v45 = vadd.f32 %v12542_v59, %v3861_v42  ;;  %v3863_v30 = vpop.f32.mrb[233].mxu1  ;;  %v4811_v39 = vpop.f32.mrb[243].mxu0 }
 0x2f3   : > { %v3864_v34 = vpop.f32.mrb[234].mxu1 }
 0x2f4   : > { %v9537_v44 = vpack.c.bf16 %v6904_v50, %v6903_v49  ;;  %v4791_v60 = vadd.f32 %v4790_v51, %v3862_v45  ;;  %v3865_v0 = vadd.f32 %v12542_v59, %v3864_v34  ;;  %v3866_v33 = vpop.f32.mrb[235].mxu1  ;;  %5021 = vmatmul.mubr.bf16.gmra.mrb[92].mxu0 %v10928_v43 }
 0x2f5   : > { %8774 = vmatprep.mubr.msk.bf16.mxu0 %vm3026_vm0, %v10936_v61  ;;  %v10945_v61 = vld [vmem:[%s11185_s22 + $0xb24] ss:$16 sps:$4 sm:$0xff]  }
 0x2f6   : > { %9865 = vst [vmem:[%s11640_s11 + $0x1c8] sm:$0xff] %v9537_v44   ;;  %v5337_v29 = vmax.f32 %v4791_v60, 0.0  ;;  %v4794_v1 = vadd.f32 %v4793_v7, %v3865_v0  ;;  %4076 = vmatmul.mubr.bf16.gmra.mrb[232].mxu1 %v10919_v9  ;;  %v10937_v0 = vld [vmem:[%s11185_s22 + $0xb00] ss:$16 sps:$4 sm:$0xff]  }
 0x2f7   : > { %4083 = vmatprep.mubr.bf16.mxu1 %v10927_v48  ;;  %v4814_v2 = vpop.f32.mrb[244].mxu0 }
 0x2f8   : > { %v5338_v28 = vmax.f32 %v4794_v1, 0.0  ;;  %v6905_v51 = vmul.f32 %v12255_v41, %v5337_v29  ;;  %v4816_v4 = vpop.f32.mrb[245].mxu0  ;;  %v10942_v41 = vld [vmem:[%s11185_s22 + $0xb2c] ss:$16 sps:$4 sm:$0xff]   ;;  %v10946_v29 = vld [vmem:[%s11185_s22 + $0xb48] ss:$16 sps:$4 sm:$0xff]  }
 0x2f9   : > { %v3869_v54 = vpop.f32.mrb[236].mxu1  ;;  %v4817_v38 = vpop.f32.mrb[246].mxu0 }
 0x2fa   : > { %v6906_v8 = vmul.f32 %v13054_v58, %v5338_v28  ;;  %v3870_v31 = vadd.f32 %v12542_v59, %v3869_v54  ;;  %v3871_v6 = vpop.f32.mrb[237].mxu1  ;;  %v4819_v37 = vpop.f32.mrb[247].mxu0 }
 0x2fb   : > { %v3872_v7 = vpop.f32.mrb[238].mxu1 }
 0x2fc   : > { %v9542_v57 = vpack.c.bf16 %v6906_v8, %v6905_v51  ;;  %v4799_v56 = vadd.f32 %v4798_v55, %v3870_v31  ;;  %v3873_v12 = vadd.f32 %v12542_v59, %v3872_v7  ;;  %v3874_v10 = vpop.f32.mrb[239].mxu1  ;;  %5029 = vmatmul.mubr.bf16.gmra.mrb[96].mxu0 %v10934_v27 }
 0x2fd   : > { %8775 = vmatprep.mubr.msk.bf16.mxu0 %vm3026_vm0, %v10942_v41  ;;  %v10951_v10 = vld [vmem:[%s11185_s22 + $0xb44] ss:$16 sps:$4 sm:$0xff]   ;;  %v10952_v41 = vld [vmem:[%s11185_s22 + $0xb68] ss:$16 sps:$4 sm:$0xff]  }
 0x2fe   : > { %9866 = vst [vmem:[%s11640_s11 + $0x1d0] sm:$0xff] %v9542_v57   ;;  %v5339_v46 = vmax.f32 %v4799_v56, 0.0  ;;  %v4802_v62 = vadd.f32 %v4801_v47, %v3873_v12  ;;  %4084 = vmatmul.mubr.bf16.gmra.mrb[236].mxu1 %v10925_v63  ;;  %v10943_v57 = vld [vmem:[%s11185_s22 + $0xb20] ss:$16 sps:$4 sm:$0xff]  }
 0x2ff   : > { %4091 = vmatprep.mubr.bf16.mxu1 %v10933_v13  ;;  %v4822_v15 = vpop.f32.mrb[248].mxu0 }
 0x300   : > { %v5340_v18 = vmax.f32 %v4802_v62, 0.0  ;;  %v6907_v55 = vmul.f32 %v12279_v22, %v5339_v46  ;;  %v4824_v11 = vpop.f32.mrb[249].mxu0  ;;  %v10948_v22 = vld [vmem:[%s11185_s22 + $0xb4c] ss:$16 sps:$4 sm:$0xff]  }
 0x301   : > { %v3877_v53 = vpop.f32.mrb[240].mxu1  ;;  %v4825_v50 = vpop.f32.mrb[250].mxu0 }
 0x302   : > { %v6908_v20 = vmul.f32 %v13055_v32, %v5340_v18  ;;  %v3878_v36 = vadd.f32 %v12542_v59, %v3877_v53  ;;  %v3879_v19 = vpop.f32.mrb[241].mxu1  ;;  %v4827_v45 = vpop.f32.mrb[251].mxu0 }
 0x303   : > { %v3880_v47 = vpop.f32.mrb[242].mxu1 }
 0x304   : > { %v9547_v25 = vpack.c.bf16 %v6908_v20, %v6907_v55  ;;  %v4807_v42 = vadd.f32 %v4806_v21, %v3878_v36  ;;  %v3881_v49 = vadd.f32 %v12542_v59, %v3880_v47  ;;  %v3882_v16 = vpop.f32.mrb[243].mxu1  ;;  %5037 = vmatmul.mubr.bf16.gmra.mrb[100].mxu0 %v10940_v23 }
 0x305   : > { %8776 = vmatprep.mubr.msk.bf16.mxu0 %vm3026_vm0, %v10948_v22 }
 0x306   : > { %9867 = vst [vmem:[%s11640_s11 + $0x1d8] sm:$0xff] %v9547_v25   ;;  %v5341_v30 = vmax.f32 %v4807_v42, 0.0  ;;  %v4810_v9 = vadd.f32 %v4809_v24, %v3881_v49  ;;  %4092 = vmatmul.mubr.bf16.gmra.mrb[240].mxu1 %v10931_v40  ;;  %v10957_v25 = vld [vmem:[%s11185_s22 + $0xb64] ss:$16 sps:$4 sm:$0xff]   ;;  %v10958_v49 = vld [vmem:[%s11185_s22 + $0xb88] ss:$16 sps:$4 sm:$0xff]  }
 0x307   : > { %4099 = vmatprep.mubr.bf16.mxu1 %v10939_v17  ;;  %v4830_v33 = vpop.f32.mrb[252].mxu0  ;;  %v10949_v17 = vld [vmem:[%s11185_s22 + $0xb40] ss:$16 sps:$4 sm:$0xff]  }
 0x308   : > { %v5342_v34 = vmax.f32 %v4810_v9, 0.0  ;;  %v6909_v21 = vmul.f32 %v12303_v26, %v5341_v30  ;;  %v4832_v39 = vpop.f32.mrb[253].mxu0  ;;  %v10954_v26 = vld [vmem:[%s11185_s22 + $0xb6c] ss:$16 sps:$4 sm:$0xff]  }
 0x309   : > { %v3885_v48 = vpop.f32.mrb[244].mxu1  ;;  %v4833_v58 = vpop.f32.mrb[254].mxu0  ;;  %v10966_v9 = vld [vmem:[%s11185_s22 + $0xbac] ss:$16 sps:$4 sm:$0xff]  }
 0x30a   : > { %v6910_v43 = vmul.f32 %v13056_v14, %v5342_v34  ;;  %v3886_v44 = vadd.f32 %v12542_v59, %v3885_v48  ;;  %v3887_v60 = vpop.f32.mrb[245].mxu1  ;;  %v4835_v8 = vpop.f32.mrb[255].mxu0 }
 0x30b   : > { %v3888_v24 = vpop.f32.mrb[246].mxu1  ;;  %v6307_v48 = vpop.permute.xlu1 %6306 }
 0x30c   : > { %v9552_v1 = vpack.c.bf16 %v6910_v43, %v6909_v21  ;;  %v4815_v28 = vadd.f32 %v4814_v2, %v3886_v44  ;;  %v3889_v54 = vadd.f32 %v12542_v59, %v3888_v24  ;;  %v3890_v51 = vpop.f32.mrb[247].mxu1  ;;  %5045 = vmatmul.mubr.bf16.gmra.mrb[104].mxu0 %v10946_v29  ;;  %v6302_v14 = vpop.permute.xlu0 %6301  ;;  %v10955_v24 = vld [vmem:[%s11185_s22 + $0xb60] ss:$16 sps:$4 sm:$0xff]   ;;  %v10963_v29 = vld [vmem:[%s11185_s22 + $0xb84] ss:$16 sps:$4 sm:$0xff]  }
 0x30d   : > { %8777 = vmatprep.mubr.msk.bf16.mxu0 %vm3026_vm0, %v10954_v26 }
 0x30e   : > { %9868 = vst [vmem:[%s11640_s11 + $0x1e0] sm:$0xff] %v9552_v1   ;;  %v5343_v31 = vmax.f32 %v4815_v28, 0.0  ;;  %v4818_v6 = vadd.f32 %v4817_v38, %v3889_v54  ;;  %4100 = vmatmul.mubr.bf16.gmra.mrb[244].mxu1 %v10937_v0  ;;  %v10964_v28 = vld [vmem:[%s11185_s22 + $0xba8] ss:$16 sps:$4 sm:$0xff]  }
 0x30f   : > { %4107 = vmatprep.mubr.bf16.mxu1 %v10945_v61  ;;  %v4838_v56 = vpop.f32.mrb[0].mxu0 }
 0x310   : > { %v5344_v63 = vmax.f32 %v4818_v6, 0.0  ;;  %v6911_v2 = vmul.f32 %v12331_v3, %v5343_v31  ;;  %v4840_v38 = vpop.f32.mrb[1].mxu0  ;;  %v10960_v3 = vld [vmem:[%s11185_s22 + $0xb8c] ss:$16 sps:$4 sm:$0xff]  }
 0x311   : > { %v3893_v7 = vpop.f32.mrb[248].mxu1  ;;  %v4841_v53 = vpop.f32.mrb[2].mxu0  ;;  %v10972_v31 = vld [vmem:[%s11185_s22 + $0xbcc] ss:$16 sps:$4 sm:$0xff]   ;;  %v10961_v38 = vld [vmem:[%s11185_s22 + $0xb80] ss:$16 sps:$4 sm:$0xff]  }
 0x312   : > { %v6912_v13 = vmul.f32 %v12305_v52, %v5344_v63  ;;  %v3894_v4 = vadd.f32 %v12542_v59, %v3893_v7  ;;  %v3895_v27 = vpop.f32.mrb[249].mxu1  ;;  %v4843_v55 = vpop.f32.mrb[3].mxu0 }
 0x313   : > { %v3896_v12 = vpop.f32.mrb[250].mxu1 }
 0x314   : > { %v9557_v37 = vpack.c.bf16 %v6912_v13, %v6911_v2  ;;  %v4823_v46 = vadd.f32 %v4822_v15, %v3894_v4  ;;  %v3897_v62 = vadd.f32 %v12542_v59, %v3896_v12  ;;  %v3898_v18 = vpop.f32.mrb[251].mxu1  ;;  %5053 = vmatmul.mubr.bf16.gmra.mrb[108].mxu0 %v10952_v41  ;;  %v6317_v2 = vpop.permute.xlu1 %6316 }
 0x315   : > { %8778 = vmatprep.mubr.msk.bf16.mxu0 %vm3026_vm0, %v10960_v3  ;;  %v6312_v4 = vpop.permute.xlu0 %6311  ;;  %v10970_v18 = vld [vmem:[%s11185_s22 + $0xbc8] ss:$16 sps:$4 sm:$0xff]  }
 0x316   : > { %9869 = vst [vmem:[%s11640_s11 + $0x1e8] sm:$0xff] %v9557_v37   ;;  %v5345_v52 = vmax.f32 %v4823_v46, 0.0  ;;  %v4826_v32 = vadd.f32 %v4825_v50, %v3897_v62  ;;  %4108 = vmatmul.mubr.bf16.gmra.mrb[248].mxu1 %v10943_v57  ;;  %v10969_v46 = vld [vmem:[%s11185_s22 + $0xba4] ss:$16 sps:$4 sm:$0xff]  }
 0x317   : > { %4115 = vmatprep.mubr.bf16.mxu1 %v10951_v10  ;;  %v4846_v11 = vpop.f32.mrb[4].mxu0 }
 0x318   : > { %v5346_v20 = vmax.f32 %v4826_v32, 0.0  ;;  %v6913_v19 = vmul.f32 %v12349_v5, %v5345_v52  ;;  %v4848_v42 = vpop.f32.mrb[5].mxu0 }
 0x319   : > { %v3901_v36 = vpop.f32.mrb[252].mxu1  ;;  %v4849_v30 = vpop.f32.mrb[6].mxu0 }
 0x31a   : > { %v6914_v40 = vmul.f32 %v12334_v35, %v5346_v20  ;;  %v3902_v15 = vadd.f32 %v12542_v59, %v3901_v36  ;;  %v3903_v47 = vpop.f32.mrb[253].mxu1  ;;  %v4851_v5 = vpop.f32.mrb[7].mxu0  ;;  %v10978_v20 = vld [vmem:[%s11185_s22 + $0xbec] ss:$16 sps:$4 sm:$0xff]  }
 0x31b   : > { %v3904_v23 = vpop.f32.mrb[254].mxu1 }
 0x31c   : > { %v9562_v16 = vpack.c.bf16 %v6914_v40, %v6913_v19  ;;  %v4831_v50 = vadd.f32 %v4830_v33, %v3902_v15  ;;  %v3905_v22 = vadd.f32 %v12542_v59, %v3904_v23  ;;  %v3906_v45 = vpop.f32.mrb[255].mxu1  ;;  %5061 = vmatmul.mubr.bf16.gmra.mrb[112].mxu0 %v10958_v49  ;;  %v6327_v15 = vpop.permute.xlu1 %6326 }
 0x31d   : > { %8779 = vmatprep.mubr.msk.bf16.mxu0 %vm3026_vm0, %v10966_v9  ;;  %v10975_v45 = vld [vmem:[%s11185_s22 + $0xbc4] ss:$16 sps:$4 sm:$0xff]   ;;  %v10976_v9 = vld [vmem:[%s11185_s22 + $0xbe8] ss:$16 sps:$4 sm:$0xff]  }
 0x31e   : > { %9870 = vst [vmem:[%s11640_s11 + $0x1f0] sm:$0xff] %v9562_v16   ;;  %v5347_v35 = vmax.f32 %v4831_v50, 0.0  ;;  %v4834_v34 = vadd.f32 %v4833_v58, %v3905_v22  ;;  %4116 = vmatmul.mubr.bf16.gmra.mrb[252].mxu1 %v10949_v17  ;;  %v6322_v17 = vpop.permute.xlu0 %6321  ;;  %v10967_v16 = vld [vmem:[%s11185_s22 + $0xba0] ss:$16 sps:$4 sm:$0xff]  }
 0x31f   : > { %4123 = vmatprep.mubr.bf16.mxu1 %v10957_v25  ;;  %v4854_v61 = vpop.f32.mrb[8].mxu0 }
 0x320   : > { %v5348_v21 = vmax.f32 %v4834_v34, 0.0  ;;  %v6915_v44 = vmul.f32 %v6302_v14, %v5347_v35  ;;  %v4856_v1 = vpop.f32.mrb[9].mxu0  ;;  %v10984_v14 = vld [vmem:[%s11185_s22 + $0xc0c] ss:$16 sps:$4 sm:$0xff]  }
 0x321   : > { %v3909_v43 = vpop.f32.mrb[148].mxu1  ;;  %v4857_v8 = vpop.f32.mrb[10].mxu0 }
 0x322   : > { %v6916_v60 = vmul.f32 %v6307_v48, %v5348_v21  ;;  %v3910_v0 = vadd.f32 %v12542_v59, %v3909_v43  ;;  %v3911_v33 = vpop.f32.mrb[149].mxu1  ;;  %v4859_v6 = vpop.f32.mrb[11].mxu0 }
 0x323   : > { %v3912_v39 = vpop.f32.mrb[150].mxu1 }
 0x324   : > { %v9567_v54 = vpack.c.bf16 %v6916_v60, %v6915_v44  ;;  %v4839_v51 = vadd.f32 %v4838_v56, %v3910_v0  ;;  %v3913_v58 = vadd.f32 %v12542_v59, %v3912_v39  ;;  %v3914_v26 = vpop.f32.mrb[151].mxu1  ;;  %5069 = vmatmul.mubr.bf16.gmra.mrb[116].mxu0 %v10964_v28  ;;  %v6337_v0 = vpop.permute.xlu1 %6336 }
 0x325   : > { %8780 = vmatprep.mubr.msk.bf16.mxu0 %vm3026_vm0, %v10972_v31  ;;  %v10981_v26 = vld [vmem:[%s11185_s22 + $0xbe4] ss:$16 sps:$4 sm:$0xff]   ;;  %v10982_v31 = vld [vmem:[%s11185_s22 + $0xc08] ss:$16 sps:$4 sm:$0xff]  }
 0x326   : > { %9871 = vst [vmem:[%s11640_s11 + $0x1f8] sm:$0xff] %v9567_v54   ;;  %v5349_v63 = vmax.f32 %v4839_v51, 0.0  ;;  %v4842_v7 = vadd.f32 %v4841_v53, %v3913_v58  ;;  %4124 = vmatmul.mubr.bf16.gmra.mrb[148].mxu1 %v10955_v24  ;;  %v6332_v24 = vpop.permute.xlu0 %6331  ;;  %v10973_v54 = vld [vmem:[%s11185_s22 + $0xbc0] ss:$16 sps:$4 sm:$0xff]  }
 0x327   : > { %4131 = vmatprep.mubr.bf16.mxu1 %v10963_v29  ;;  %v12722_v41 = vpop.f32.mrb[12].mxu0  ;;  %v12743_v29 = vld [vmem:[%s12974_s2] ss:$0 sm:$0xff] }
 0x328   : > { %v5350_v13 = vmax.f32 %v4842_v7, 0.0  ;;  %v6917_v57 = vmul.f32 %v6312_v4, %v5349_v63  ;;  %v4864_v62 = vpop.f32.mrb[13].mxu0  ;;  %v10990_v4 = vld [vmem:[%s11185_s22 + $0xc2c] ss:$16 sps:$4 sm:$0xff]  }
 0x329   : > { %v3917_v27 = vpop.f32.mrb[152].mxu1  ;;  %v4865_v32 = vpop.f32.mrb[14].mxu0 }
 0x32a   : > { %v6918_v56 = vmul.f32 %v6317_v2, %v5350_v13  ;;  %v3918_v12 = vadd.f32 %v12542_v59, %v3917_v27  ;;  %v3919_v10 = vpop.f32.mrb[153].mxu1  ;;  %v4867_v36 = vpop.f32.mrb[15].mxu0 }
 0x32b   : > { %v3920_v37 = vpop.f32.mrb[154].mxu1 }
 0x32c   : > { %v9572_v53 = vpack.c.bf16 %v6918_v56, %v6917_v57  ;;  %v4847_v3 = vadd.f32 %v4846_v11, %v3918_v12  ;;  %v3921_v55 = vadd.f32 %v12542_v59, %v3920_v37  ;;  %v3922_v52 = vpop.f32.mrb[155].mxu1  ;;  %5077 = vmatmul.mubr.bf16.gmra.mrb[120].mxu0 %v10970_v18  ;;  %v6347_v12 = vpop.permute.xlu1 %6346 }
 0x32d   : > { %8781 = vmatprep.mubr.msk.bf16.mxu0 %vm3026_vm0, %v10978_v20  ;;  %v10987_v52 = vld [vmem:[%s11185_s22 + $0xc04] ss:$16 sps:$4 sm:$0xff]   ;;  %v10988_v20 = vld [vmem:[%s11185_s22 + $0xc28] ss:$16 sps:$4 sm:$0xff]  }
 0x32e   : > { %9872 = vst [vmem:[%s11640_s11 + $0x200] sm:$0xff] %v9572_v53   ;;  %v5351_v19 = vmax.f32 %v4847_v3, 0.0  ;;  %v4850_v40 = vadd.f32 %v4849_v30, %v3921_v55  ;;  %4132 = vmatmul.mubr.bf16.gmra.mrb[152].mxu1 %v10961_v38  ;;  %v6342_v38 = vpop.permute.xlu0 %6341  ;;  %v10979_v53 = vld [vmem:[%s11185_s22 + $0xbe0] ss:$16 sps:$4 sm:$0xff]  }
 0x32f   : > { %4139 = vmatprep.mubr.bf16.mxu1 %v10969_v46  ;;  %v12732_v50 = vpop.f32.mrb[16].mxu0 }
 0x330   : > { %v5352_v47 = vmax.f32 %v4850_v40, 0.0  ;;  %v6919_v23 = vmul.f32 %v6322_v17, %v5351_v19  ;;  %v4872_v30 = vpop.f32.mrb[17].mxu0  ;;  %v10996_v17 = vld [vmem:[%s11185_s22 + $0xc4c] ss:$16 sps:$4 sm:$0xff]  }
 0x331   : > { %v3925_v11 = vpop.f32.mrb[156].mxu1  ;;  %v4873_v21 = vpop.f32.mrb[18].mxu0 }
 0x332   : > { %v6920_v25 = vmul.f32 %v6327_v15, %v5352_v47  ;;  %v3926_v42 = vadd.f32 %v12542_v59, %v3925_v11  ;;  %v3927_v49 = vpop.f32.mrb[157].mxu1  ;;  %v4875_v43 = vpop.f32.mrb[19].mxu0 }
 0x333   : > { %v3928_v22 = vpop.f32.mrb[158].mxu1 }
 0x334   : > { %v9577_v5 = vpack.c.bf16 %v6920_v25, %v6919_v23  ;;  %v4855_v35 = vadd.f32 %v4854_v61, %v3926_v42  ;;  %v3929_v34 = vadd.f32 %v12542_v59, %v3928_v22  ;;  %v3930_v48 = vpop.f32.mrb[159].mxu1  ;;  %5085 = vmatmul.mubr.bf16.gmra.mrb[124].mxu0 %v10976_v9  ;;  %v6357_v42 = vpop.permute.xlu1 %6356 }
 0x335   : > { %8782 = vmatprep.mubr.msk.bf16.mxu0 %vm3026_vm0, %v10984_v14  ;;  %v10993_v48 = vld [vmem:[%s11185_s22 + $0xc24] ss:$16 sps:$4 sm:$0xff]   ;;  %v10994_v14 = vld [vmem:[%s11185_s22 + $0xc48] ss:$16 sps:$4 sm:$0xff]  }
 0x336   : > { %9873 = vst [vmem:[%s11640_s11 + $0x208] sm:$0xff] %v9577_v5   ;;  %v5353_v44 = vmax.f32 %v4855_v35, 0.0  ;;  %v4858_v60 = vadd.f32 %v4857_v8, %v3929_v34  ;;  %4140 = vmatmul.mubr.bf16.gmra.mrb[156].mxu1 %v10967_v16  ;;  %v6352_v16 = vpop.permute.xlu0 %6351  ;;  %v10985_v5 = vld [vmem:[%s11185_s22 + $0xc00] ss:$16 sps:$4 sm:$0xff]  }
 0x337   : > { %4147 = vmatprep.mubr.bf16.mxu1 %v10975_v45  ;;  %v4878_v51 = vpop.f32.mrb[20].mxu0 }
 0x338   : > { %v5354_v33 = vmax.f32 %v4858_v60, 0.0  ;;  %v6921_v59 = vmul.f32 %v6332_v24, %v5353_v44  ;;  %v4880_v8 = vpop.f32.mrb[21].mxu0  ;;  %v11002_v24 = vld [vmem:[%s11185_s22 + $0xc6c] ss:$16 sps:$4 sm:$0xff]  }
 0x339   : > { %v3933_v61 = vpop.f32.mrb[160].mxu1  ;;  %v4881_v13 = vpop.f32.mrb[22].mxu0 }
 0x33a   : > { %v6922_v39 = vmul.f32 %v6337_v0, %v5354_v33  ;;  %v3934_v1 = vadd.f32 %v12743_v29, %v3933_v61  ;;  %v3935_v28 = vpop.f32.mrb[161].mxu1  ;;  %v4883_v27 = vpop.f32.mrb[23].mxu0 }
 0x33b   : > { %v3936_v58 = vpop.f32.mrb[162].mxu1 }
 0x33c   : > { %v9582_v6 = vpack.c.bf16 %v6922_v39, %v6921_v59  ;;  %v4863_v63 = vadd.f32 %v12722_v41, %v3934_v1  ;;  %v3937_v7 = vadd.f32 %v12743_v29, %v3936_v58  ;;  %v3938_v2 = vpop.f32.mrb[163].mxu1  ;;  %5093 = vmatmul.mubr.bf16.gmra.mrb[128].mxu0 %v10982_v31  ;;  %v6367_v1 = vpop.permute.xlu1 %6366 }
 0x33d   : > { %8783 = vmatprep.mubr.msk.bf16.mxu0 %vm3026_vm0, %v10990_v4  ;;  %v10999_v2 = vld [vmem:[%s11185_s22 + $0xc44] ss:$16 sps:$4 sm:$0xff]   ;;  %v11000_v4 = vld [vmem:[%s11185_s22 + $0xc68] ss:$16 sps:$4 sm:$0xff]  }
 0x33e   : > { %9874 = vst [vmem:[%s11640_s11 + $0x210] sm:$0xff] %v9582_v6   ;;  %v5355_v57 = vmax.f32 %v4863_v63, 0.0  ;;  %v4866_v56 = vadd.f32 %v4865_v32, %v3937_v7  ;;  %4148 = vmatmul.mubr.bf16.gmra.mrb[160].mxu1 %v10973_v54  ;;  %v6362_v54 = vpop.permute.xlu0 %6361  ;;  %v10991_v6 = vld [vmem:[%s11185_s22 + $0xc20] ss:$16 sps:$4 sm:$0xff]  }
 0x33f   : > { %4155 = vmatprep.mubr.bf16.mxu1 %v10981_v26  ;;  %v4886_v3 = vpop.f32.mrb[24].mxu0 }
 0x340   : > { %v5356_v10 = vmax.f32 %v4866_v56, 0.0  ;;  %v6923_v37 = vmul.f32 %v6342_v38, %v5355_v57  ;;  %v4888_v32 = vpop.f32.mrb[25].mxu0  ;;  %v11008_v38 = vld [vmem:[%s11185_s22 + $0xc8c] ss:$16 sps:$4 sm:$0xff]  }
 0x341   : > { %v3941_v41 = vpop.f32.mrb[164].mxu1  ;;  %v4889_v47 = vpop.f32.mrb[26].mxu0 }
 0x342   : > { %v6924_v46 = vmul.f32 %v6347_v12, %v5356_v10  ;;  %v3942_v62 = vadd.f32 %v12743_v29, %v3941_v41  ;;  %v3943_v18 = vpop.f32.mrb[165].mxu1  ;;  %v4891_v11 = vpop.f32.mrb[27].mxu0 }
 0x343   : > { %v3944_v55 = vpop.f32.mrb[166].mxu1 }
 0x344   : > { %v9587_v36 = vpack.c.bf16 %v6924_v46, %v6923_v37  ;;  %v4871_v19 = vadd.f32 %v12732_v50, %v3942_v62  ;;  %v3945_v40 = vadd.f32 %v12743_v29, %v3944_v55  ;;  %v3946_v15 = vpop.f32.mrb[167].mxu1  ;;  %5101 = vmatmul.mubr.bf16.gmra.mrb[132].mxu0 %v10988_v20  ;;  %v6377_v62 = vpop.permute.xlu1 %6376 }
 0x345   : > { %8784 = vmatprep.mubr.msk.bf16.mxu0 %vm3026_vm0, %v10996_v17  ;;  %v11005_v15 = vld [vmem:[%s11185_s22 + $0xc64] ss:$16 sps:$4 sm:$0xff]   ;;  %v11006_v17 = vld [vmem:[%s11185_s22 + $0xc88] ss:$16 sps:$4 sm:$0xff]  }
 0x346   : > { %9875 = vst [vmem:[%s11640_s11 + $0x218] sm:$0xff] %v9587_v36   ;;  %v5357_v23 = vmax.f32 %v4871_v19, 0.0  ;;  %v4874_v25 = vadd.f32 %v4873_v21, %v3945_v40  ;;  %4156 = vmatmul.mubr.bf16.gmra.mrb[164].mxu1 %v10979_v53  ;;  %v6372_v53 = vpop.permute.xlu0 %6371  ;;  %v10997_v36 = vld [vmem:[%s11185_s22 + $0xc40] ss:$16 sps:$4 sm:$0xff]  }
 0x347   : > { %4163 = vmatprep.mubr.bf16.mxu1 %v10987_v52  ;;  %v4894_v35 = vpop.f32.mrb[28].mxu0 }
 0x348   : > { %v5358_v49 = vmax.f32 %v4874_v25, 0.0  ;;  %v6925_v22 = vmul.f32 %v6352_v16, %v5357_v23  ;;  %v4896_v21 = vpop.f32.mrb[29].mxu0  ;;  %v11014_v16 = vld [vmem:[%s11185_s22 + $0xcac] ss:$16 sps:$4 sm:$0xff]  }
 0x349   : > { %v3949_v50 = vpop.f32.mrb[168].mxu1  ;;  %v4897_v33 = vpop.f32.mrb[30].mxu0 }
 0x34a   : > { %v6926_v45 = vmul.f32 %v6357_v42, %v5358_v49  ;;  %v3950_v30 = vadd.f32 %v12743_v29, %v3949_v50  ;;  %v3951_v9 = vpop.f32.mrb[169].mxu1  ;;  %v4899_v61 = vpop.f32.mrb[31].mxu0 }
 0x34b   : > { %v3952_v34 = vpop.f32.mrb[170].mxu1 }
 0x34c   : > { %v9592_v43 = vpack.c.bf16 %v6926_v45, %v6925_v22  ;;  %v4879_v44 = vadd.f32 %v4878_v51, %v3950_v30  ;;  %v3953_v60 = vadd.f32 %v12743_v29, %v3952_v34  ;;  %v3954_v0 = vpop.f32.mrb[171].mxu1  ;;  %5109 = vmatmul.mubr.bf16.gmra.mrb[136].mxu0 %v10994_v14  ;;  %v6387_v30 = vpop.permute.xlu1 %6386 }
 0x34d   : > { %8785 = vmatprep.mubr.msk.bf16.mxu0 %vm3026_vm0, %v11002_v24  ;;  %v11011_v0 = vld [vmem:[%s11185_s22 + $0xc84] ss:$16 sps:$4 sm:$0xff]   ;;  %v11012_v24 = vld [vmem:[%s11185_s22 + $0xca8] ss:$16 sps:$4 sm:$0xff]  }
 0x34e   : > { %9876 = vst [vmem:[%s11640_s11 + $0x220] sm:$0xff] %v9592_v43   ;;  %v5359_v59 = vmax.f32 %v4879_v44, 0.0  ;;  %v4882_v39 = vadd.f32 %v4881_v13, %v3953_v60  ;;  %4164 = vmatmul.mubr.bf16.gmra.mrb[168].mxu1 %v10985_v5  ;;  %v6382_v5 = vpop.permute.xlu0 %6381  ;;  %v11003_v43 = vld [vmem:[%s11185_s22 + $0xc60] ss:$16 sps:$4 sm:$0xff]  }
 0x34f   : > { %4171 = vmatprep.mubr.bf16.mxu1 %v10993_v48  ;;  %v4902_v63 = vpop.f32.mrb[32].mxu0 }
 0x350   : > { %v5360_v28 = vmax.f32 %v4882_v39, 0.0  ;;  %v6927_v58 = vmul.f32 %v6362_v54, %v5359_v59  ;;  %v4904_v13 = vpop.f32.mrb[33].mxu0  ;;  %v11020_v54 = vld [vmem:[%s11185_s22 + $0xccc] ss:$16 sps:$4 sm:$0xff]  }
 0x351   : > { %v3957_v51 = vpop.f32.mrb[172].mxu1  ;;  %v4905_v10 = vpop.f32.mrb[34].mxu0 }
 0x352   : > { %v6928_v26 = vmul.f32 %v6367_v1, %v5360_v28  ;;  %v3958_v8 = vadd.f32 %v12743_v29, %v3957_v51  ;;  %v3959_v31 = vpop.f32.mrb[173].mxu1  ;;  %v4907_v41 = vpop.f32.mrb[35].mxu0 }
 0x353   : > { %v3960_v7 = vpop.f32.mrb[174].mxu1 }
 0x354   : > { %v9597_v27 = vpack.c.bf16 %v6928_v26, %v6927_v58  ;;  %v4887_v57 = vadd.f32 %v4886_v3, %v3958_v8  ;;  %v3961_v56 = vadd.f32 %v12743_v29, %v3960_v7  ;;  %v3962_v12 = vpop.f32.mrb[175].mxu1  ;;  %5117 = vmatmul.mubr.bf16.gmra.mrb[140].mxu0 %v11000_v4  ;;  %v6397_v8 = vpop.permute.xlu1 %6396 }
 0x355   : > { %8786 = vmatprep.mubr.msk.bf16.mxu0 %vm3026_vm0, %v11008_v38  ;;  %v11017_v12 = vld [vmem:[%s11185_s22 + $0xca4] ss:$16 sps:$4 sm:$0xff]   ;;  %v11018_v38 = vld [vmem:[%s11185_s22 + $0xcc8] ss:$16 sps:$4 sm:$0xff]  }
 0x356   : > { %9877 = vst [vmem:[%s11640_s11 + $0x228] sm:$0xff] %v9597_v27   ;;  %v5361_v37 = vmax.f32 %v4887_v57, 0.0  ;;  %v4890_v46 = vadd.f32 %v4889_v47, %v3961_v56  ;;  %4172 = vmatmul.mubr.bf16.gmra.mrb[172].mxu1 %v10991_v6  ;;  %v6392_v6 = vpop.permute.xlu0 %6391  ;;  %v11009_v27 = vld [vmem:[%s11185_s22 + $0xc80] ss:$16 sps:$4 sm:$0xff]  }
 0x357   : > { %4179 = vmatprep.mubr.bf16.mxu1 %v10999_v2  ;;  %v4910_v19 = vpop.f32.mrb[36].mxu0 }
 0x358   : > { %v5362_v18 = vmax.f32 %v4890_v46, 0.0  ;;  %v6929_v55 = vmul.f32 %v6372_v53, %v5361_v37  ;;  %v4912_v47 = vpop.f32.mrb[37].mxu0  ;;  %v11026_v53 = vld [vmem:[%s11185_s22 + $0xcec] ss:$16 sps:$4 sm:$0xff]  }
 0x359   : > { %v3965_v3 = vpop.f32.mrb[176].mxu1  ;;  %v4913_v49 = vpop.f32.mrb[38].mxu0 }
 0x35a   : > { %v6930_v52 = vmul.f32 %v6377_v62, %v5362_v18  ;;  %v3966_v32 = vadd.f32 %v12743_v29, %v3965_v3  ;;  %v3967_v20 = vpop.f32.mrb[177].mxu1  ;;  %v4915_v50 = vpop.f32.mrb[39].mxu0 }
 0x35b   : > { %v3968_v40 = vpop.f32.mrb[178].mxu1 }
 0x35c   : > { %v9602_v11 = vpack.c.bf16 %v6930_v52, %v6929_v55  ;;  %v4895_v23 = vadd.f32 %v4894_v35, %v3966_v32  ;;  %v3969_v25 = vadd.f32 %v12743_v29, %v3968_v40  ;;  %v3970_v42 = vpop.f32.mrb[179].mxu1  ;;  %5125 = vmatmul.mubr.bf16.gmra.mrb[144].mxu0 %v11006_v17  ;;  %v6407_v32 = vpop.permute.xlu1 %6406 }
 0x35d   : > { %8787 = vmatprep.mubr.msk.bf16.mxu0 %vm3026_vm0, %v11014_v16  ;;  %v11023_v42 = vld [vmem:[%s11185_s22 + $0xcc4] ss:$16 sps:$4 sm:$0xff]   ;;  %v11024_v16 = vld [vmem:[%s11185_s22 + $0xce8] ss:$16 sps:$4 sm:$0xff]  }
 0x35e   : > { %9878 = vst [vmem:[%s11640_s11 + $0x230] sm:$0xff] %v9602_v11   ;;  %v5363_v22 = vmax.f32 %v4895_v23, 0.0  ;;  %v4898_v45 = vadd.f32 %v4897_v33, %v3969_v25  ;;  %4180 = vmatmul.mubr.bf16.gmra.mrb[176].mxu1 %v10997_v36  ;;  %v6402_v36 = vpop.permute.xlu0 %6401  ;;  %v11015_v11 = vld [vmem:[%s11185_s22 + $0xca0] ss:$16 sps:$4 sm:$0xff]  }
 0x35f   : > { %4187 = vmatprep.mubr.bf16.mxu1 %v11005_v15  ;;  %v4918_v44 = vpop.f32.mrb[40].mxu0 }
 0x360   : > { %v5364_v9 = vmax.f32 %v4898_v45, 0.0  ;;  %v6931_v34 = vmul.f32 %v6382_v5, %v5363_v22  ;;  %v4920_v33 = vpop.f32.mrb[41].mxu0  ;;  %v11032_v5 = vld [vmem:[%s11185_s22 + $0xd0c] ss:$16 sps:$4 sm:$0xff]  }
 0x361   : > { %v3973_v35 = vpop.f32.mrb[180].mxu1  ;;  %v4921_v28 = vpop.f32.mrb[42].mxu0 }
 0x362   : > { %v6932_v48 = vmul.f32 %v6387_v30, %v5364_v9  ;;  %v3974_v21 = vadd.f32 %v12743_v29, %v3973_v35  ;;  %v3975_v14 = vpop.f32.mrb[181].mxu1  ;;  %v4923_v51 = vpop.f32.mrb[43].mxu0 }
 0x363   : > { %v3976_v60 = vpop.f32.mrb[182].mxu1 }
 0x364   : > { %v9607_v61 = vpack.c.bf16 %v6932_v48, %v6931_v34  ;;  %v4903_v59 = vadd.f32 %v4902_v63, %v3974_v21  ;;  %v3977_v39 = vadd.f32 %v12743_v29, %v3976_v60  ;;  %v3978_v1 = vpop.f32.mrb[183].mxu1  ;;  %5133 = vmatmul.mubr.bf16.gmra.mrb[148].mxu0 %v11012_v24  ;;  %v6417_v21 = vpop.permute.xlu1 %6416 }
 0x365   : > { %8788 = vmatprep.mubr.msk.bf16.mxu0 %vm3026_vm0, %v11020_v54  ;;  %v11029_v1 = vld [vmem:[%s11185_s22 + $0xce4] ss:$16 sps:$4 sm:$0xff]   ;;  %v11030_v54 = vld [vmem:[%s11185_s22 + $0xd08] ss:$16 sps:$4 sm:$0xff]  }
 0x366   : > { %9879 = vst [vmem:[%s11640_s11 + $0x238] sm:$0xff] %v9607_v61   ;;  %v5365_v58 = vmax.f32 %v4903_v59, 0.0  ;;  %v4906_v26 = vadd.f32 %v4905_v10, %v3977_v39  ;;  %4188 = vmatmul.mubr.bf16.gmra.mrb[180].mxu1 %v11003_v43  ;;  %v6412_v43 = vpop.permute.xlu0 %6411  ;;  %v11021_v61 = vld [vmem:[%s11185_s22 + $0xcc0] ss:$16 sps:$4 sm:$0xff]  }
 0x367   : > { %4195 = vmatprep.mubr.bf16.mxu1 %v11011_v0  ;;  %v4926_v57 = vpop.f32.mrb[44].mxu0 }
 0x368   : > { %v5366_v31 = vmax.f32 %v4906_v26, 0.0  ;;  %v6933_v7 = vmul.f32 %v6392_v6, %v5365_v58  ;;  %v4928_v10 = vpop.f32.mrb[45].mxu0  ;;  %v11038_v6 = vld [vmem:[%s11185_s22 + $0xd2c] ss:$16 sps:$4 sm:$0xff]  }
 0x369   : > { %v3981_v63 = vpop.f32.mrb[184].mxu1  ;;  %v4929_v18 = vpop.f32.mrb[46].mxu0 }
 0x36a   : > { %v6934_v2 = vmul.f32 %v6397_v8, %v5366_v31  ;;  %v3982_v13 = vadd.f32 %v12743_v29, %v3981_v63  ;;  %v3983_v4 = vpop.f32.mrb[185].mxu1  ;;  %v4931_v3 = vpop.f32.mrb[47].mxu0 }
 0x36b   : > { %v3984_v56 = vpop.f32.mrb[186].mxu1 }
 0x36c   : > { %v9612_v41 = vpack.c.bf16 %v6934_v2, %v6933_v7  ;;  %v4911_v37 = vadd.f32 %v4910_v19, %v3982_v13  ;;  %v3985_v46 = vadd.f32 %v12743_v29, %v3984_v56  ;;  %v3986_v62 = vpop.f32.mrb[187].mxu1  ;;  %5141 = vmatmul.mubr.bf16.gmra.mrb[152].mxu0 %v11018_v38  ;;  %v6427_v13 = vpop.permute.xlu1 %6426 }
 0x36d   : > { %8789 = vmatprep.mubr.msk.bf16.mxu0 %vm3026_vm0, %v11026_v53  ;;  %v11035_v62 = vld [vmem:[%s11185_s22 + $0xd04] ss:$16 sps:$4 sm:$0xff]   ;;  %v11036_v53 = vld [vmem:[%s11185_s22 + $0xd28] ss:$16 sps:$4 sm:$0xff]  }
 0x36e   : > { %9880 = vst [vmem:[%s11640_s11 + $0x240] sm:$0xff] %v9612_v41   ;;  %v5367_v55 = vmax.f32 %v4911_v37, 0.0  ;;  %v4914_v52 = vadd.f32 %v4913_v49, %v3985_v46  ;;  %4196 = vmatmul.mubr.bf16.gmra.mrb[184].mxu1 %v11009_v27  ;;  %v6422_v27 = vpop.permute.xlu0 %6421  ;;  %v11027_v41 = vld [vmem:[%s11185_s22 + $0xce0] ss:$16 sps:$4 sm:$0xff]  }
 0x36f   : > { %4203 = vmatprep.mubr.bf16.mxu1 %v11017_v12  ;;  %v4934_v23 = vpop.f32.mrb[48].mxu0 }
 0x370   : > { %v5368_v20 = vmax.f32 %v4914_v52, 0.0  ;;  %v6935_v40 = vmul.f32 %v6402_v36, %v5367_v55  ;;  %v4936_v49 = vpop.f32.mrb[49].mxu0  ;;  %v11044_v36 = vld [vmem:[%s11185_s22 + $0xd4c] ss:$16 sps:$4 sm:$0xff]  }
 0x371   : > { %v3989_v19 = vpop.f32.mrb[188].mxu1  ;;  %v4937_v9 = vpop.f32.mrb[50].mxu0 }
 0x372   : > { %v6936_v15 = vmul.f32 %v6407_v32, %v5368_v20  ;;  %v3990_v47 = vadd.f32 %v12743_v29, %v3989_v19  ;;  %v3991_v17 = vpop.f32.mrb[189].mxu1  ;;  %v4939_v35 = vpop.f32.mrb[51].mxu0 }
 0x373   : > { %v3992_v25 = vpop.f32.mrb[190].mxu1 }
 0x374   : > { %v9617_v50 = vpack.c.bf16 %v6936_v15, %v6935_v40  ;;  %v4919_v22 = vadd.f32 %v4918_v44, %v3990_v47  ;;  %v3993_v45 = vadd.f32 %v12743_v29, %v3992_v25  ;;  %v3994_v30 = vpop.f32.mrb[191].mxu1  ;;  %5149 = vmatmul.mubr.bf16.gmra.mrb[156].mxu0 %v11024_v16  ;;  %v6437_v47 = vpop.permute.xlu1 %6436 }
 0x375   : > { %8790 = vmatprep.mubr.msk.bf16.mxu0 %vm3026_vm0, %v11032_v5  ;;  %v11041_v30 = vld [vmem:[%s11185_s22 + $0xd24] ss:$16 sps:$4 sm:$0xff]   ;;  %v11042_v5 = vld [vmem:[%s11185_s22 + $0xd48] ss:$16 sps:$4 sm:$0xff]  }
 0x376   : > { %9881 = vst [vmem:[%s11640_s11 + $0x248] sm:$0xff] %v9617_v50   ;;  %v5369_v34 = vmax.f32 %v4919_v22, 0.0  ;;  %v4922_v48 = vadd.f32 %v4921_v28, %v3993_v45  ;;  %4204 = vmatmul.mubr.bf16.gmra.mrb[188].mxu1 %v11015_v11  ;;  %v6432_v11 = vpop.permute.xlu0 %6431  ;;  %v11033_v50 = vld [vmem:[%s11185_s22 + $0xd00] ss:$16 sps:$4 sm:$0xff]  }
 0x377   : > { %4211 = vmatprep.mubr.bf16.mxu1 %v11023_v42  ;;  %v4942_v59 = vpop.f32.mrb[52].mxu0 }
 0x378   : > { %v5370_v14 = vmax.f32 %v4922_v48, 0.0  ;;  %v6937_v60 = vmul.f32 %v6412_v43, %v5369_v34  ;;  %v4944_v28 = vpop.f32.mrb[53].mxu0  ;;  %v11050_v43 = vld [vmem:[%s11185_s22 + $0xd6c] ss:$16 sps:$4 sm:$0xff]  }
 0x379   : > { %v3997_v44 = vpop.f32.mrb[192].mxu1  ;;  %v4945_v31 = vpop.f32.mrb[54].mxu0 }
 0x37a   : > { %v6938_v0 = vmul.f32 %v6417_v21, %v5370_v14  ;;  %v3998_v33 = vadd.f32 %v12743_v29, %v3997_v44  ;;  %v3999_v24 = vpop.f32.mrb[193].mxu1  ;;  %v4947_v63 = vpop.f32.mrb[55].mxu0 }
 0x37b   : > { %v4000_v39 = vpop.f32.mrb[194].mxu1 }
 0x37c   : > { %v9622_v51 = vpack.c.bf16 %v6938_v0, %v6937_v60  ;;  %v4927_v58 = vadd.f32 %v4926_v57, %v3998_v33  ;;  %v4001_v26 = vadd.f32 %v12743_v29, %v4000_v39  ;;  %v4002_v8 = vpop.f32.mrb[195].mxu1  ;;  %5157 = vmatmul.mubr.bf16.gmra.mrb[160].mxu0 %v11030_v54  ;;  %v6447_v33 = vpop.permute.xlu1 %6446 }
 0x37d   : > { %8791 = vmatprep.mubr.msk.bf16.mxu0 %vm3026_vm0, %v11038_v6  ;;  %v11047_v8 = vld [vmem:[%s11185_s22 + $0xd44] ss:$16 sps:$4 sm:$0xff]   ;;  %v11048_v6 = vld [vmem:[%s11185_s22 + $0xd68] ss:$16 sps:$4 sm:$0xff]  }
 0x37e   : > { %9882 = vst [vmem:[%s11640_s11 + $0x250] sm:$0xff] %v9622_v51   ;;  %v5371_v7 = vmax.f32 %v4927_v58, 0.0  ;;  %v4930_v2 = vadd.f32 %v4929_v18, %v4001_v26  ;;  %4212 = vmatmul.mubr.bf16.gmra.mrb[192].mxu1 %v11021_v61  ;;  %v6442_v61 = vpop.permute.xlu0 %6441  ;;  %v11039_v51 = vld [vmem:[%s11185_s22 + $0xd20] ss:$16 sps:$4 sm:$0xff]  }
 0x37f   : > { %4219 = vmatprep.mubr.bf16.mxu1 %v11029_v1  ;;  %v4950_v37 = vpop.f32.mrb[56].mxu0 }
 0x380   : > { %v5372_v4 = vmax.f32 %v4930_v2, 0.0  ;;  %v6939_v56 = vmul.f32 %v6422_v27, %v5371_v7  ;;  %v4952_v18 = vpop.f32.mrb[57].mxu0  ;;  %v11056_v27 = vld [vmem:[%s11185_s22 + $0xd8c] ss:$16 sps:$4 sm:$0xff]  }
 0x381   : > { %v4005_v57 = vpop.f32.mrb[196].mxu1  ;;  %v4953_v20 = vpop.f32.mrb[58].mxu0 }
 0x382   : > { %v6940_v12 = vmul.f32 %v6427_v13, %v5372_v4  ;;  %v4006_v10 = vadd.f32 %v12743_v29, %v4005_v57  ;;  %v4007_v38 = vpop.f32.mrb[197].mxu1  ;;  %v4955_v19 = vpop.f32.mrb[59].mxu0 }
 0x383   : > { %v4008_v46 = vpop.f32.mrb[198].mxu1 }
 0x384   : > { %v9627_v3 = vpack.c.bf16 %v6940_v12, %v6939_v56  ;;  %v4935_v55 = vadd.f32 %v4934_v23, %v4006_v10  ;;  %v4009_v52 = vadd.f32 %v12743_v29, %v4008_v46  ;;  %v4010_v32 = vpop.f32.mrb[199].mxu1  ;;  %5165 = vmatmul.mubr.bf16.gmra.mrb[164].mxu0 %v11036_v53  ;;  %v6457_v10 = vpop.permute.xlu1 %6456 }
 0x385   : > { %8792 = vmatprep.mubr.msk.bf16.mxu0 %vm3026_vm0, %v11044_v36  ;;  %v11053_v32 = vld [vmem:[%s11185_s22 + $0xd64] ss:$16 sps:$4 sm:$0xff]   ;;  %v11054_v36 = vld [vmem:[%s11185_s22 + $0xd88] ss:$16 sps:$4 sm:$0xff]  }
 0x386   : > { %9883 = vst [vmem:[%s11640_s11 + $0x258] sm:$0xff] %v9627_v3   ;;  %v5373_v40 = vmax.f32 %v4935_v55, 0.0  ;;  %v4938_v15 = vadd.f32 %v4937_v9, %v4009_v52  ;;  %4220 = vmatmul.mubr.bf16.gmra.mrb[196].mxu1 %v11027_v41  ;;  %v6452_v41 = vpop.permute.xlu0 %6451  ;;  %v11045_v3 = vld [vmem:[%s11185_s22 + $0xd40] ss:$16 sps:$4 sm:$0xff]  }
 0x387   : > { %4227 = vmatprep.mubr.bf16.mxu1 %v11035_v62  ;;  %v4958_v22 = vpop.f32.mrb[60].mxu0 }
 0x388   : > { %v5374_v17 = vmax.f32 %v4938_v15, 0.0  ;;  %v6941_v25 = vmul.f32 %v6432_v11, %v5373_v40  ;;  %v4960_v9 = vpop.f32.mrb[61].mxu0  ;;  %v11062_v11 = vld [vmem:[%s11185_s22 + $0xdac] ss:$16 sps:$4 sm:$0xff]  }
 0x389   : > { %v4013_v23 = vpop.f32.mrb[200].mxu1  ;;  %v4961_v14 = vpop.f32.mrb[62].mxu0 }
 0x38a   : > { %v6942_v42 = vmul.f32 %v6437_v47, %v5374_v17  ;;  %v4014_v49 = vadd.f32 %v12743_v29, %v4013_v23  ;;  %v4015_v16 = vpop.f32.mrb[201].mxu1  ;;  %v4963_v44 = vpop.f32.mrb[63].mxu0 }
 0x38b   : > { %v4016_v45 = vpop.f32.mrb[202].mxu1 }
 0x38c   : > { %v9632_v35 = vpack.c.bf16 %v6942_v42, %v6941_v25  ;;  %v4943_v34 = vadd.f32 %v4942_v59, %v4014_v49  ;;  %v4017_v48 = vadd.f32 %v12743_v29, %v4016_v45  ;;  %v4018_v21 = vpop.f32.mrb[203].mxu1  ;;  %5173 = vmatmul.mubr.bf16.gmra.mrb[168].mxu0 %v11042_v5  ;;  %v6467_v49 = vpop.permute.xlu1 %6466 }
 0x38d   : > { %8793 = vmatprep.mubr.msk.bf16.mxu0 %vm3026_vm0, %v11050_v43  ;;  %v11059_v21 = vld [vmem:[%s11185_s22 + $0xd84] ss:$16 sps:$4 sm:$0xff]   ;;  %v11060_v43 = vld [vmem:[%s11185_s22 + $0xda8] ss:$16 sps:$4 sm:$0xff]  }
 0x38e   : > { %9884 = vst [vmem:[%s11640_s11 + $0x260] sm:$0xff] %v9632_v35   ;;  %v5375_v60 = vmax.f32 %v4943_v34, 0.0  ;;  %v4946_v0 = vadd.f32 %v4945_v31, %v4017_v48  ;;  %4228 = vmatmul.mubr.bf16.gmra.mrb[200].mxu1 %v11033_v50  ;;  %v6462_v50 = vpop.permute.xlu0 %6461  ;;  %v11051_v35 = vld [vmem:[%s11185_s22 + $0xd60] ss:$16 sps:$4 sm:$0xff]  }
 0x38f   : > { %4235 = vmatprep.mubr.bf16.mxu1 %v11041_v30  ;;  %v4966_v58 = vpop.f32.mrb[64].mxu0 }
 0x390   : > { %v5376_v24 = vmax.f32 %v4946_v0, 0.0  ;;  %v6943_v39 = vmul.f32 %v6442_v61, %v5375_v60  ;;  %v4968_v31 = vpop.f32.mrb[65].mxu0  ;;  %v11068_v61 = vld [vmem:[%s11185_s22 + $0xdcc] ss:$16 sps:$4 sm:$0xff]  }
 0x391   : > { %v4021_v59 = vpop.f32.mrb[204].mxu1  ;;  %v4969_v4 = vpop.f32.mrb[66].mxu0 }
 0x392   : > { %v6944_v1 = vmul.f32 %v6447_v33, %v5376_v24  ;;  %v4022_v28 = vadd.f32 %v12743_v29, %v4021_v59  ;;  %v4023_v54 = vpop.f32.mrb[205].mxu1  ;;  %v4971_v57 = vpop.f32.mrb[67].mxu0 }
 0x393   : > { %v4024_v26 = vpop.f32.mrb[206].mxu1 }
 0x394   : > { %v9637_v63 = vpack.c.bf16 %v6944_v1, %v6943_v39  ;;  %v4951_v7 = vadd.f32 %v4950_v37, %v4022_v28  ;;  %v4025_v2 = vadd.f32 %v12743_v29, %v4024_v26  ;;  %v4026_v13 = vpop.f32.mrb[207].mxu1  ;;  %5181 = vmatmul.mubr.bf16.gmra.mrb[172].mxu0 %v11048_v6  ;;  %v6477_v28 = vpop.permute.xlu1 %6476 }
 0x395   : > { %8794 = vmatprep.mubr.msk.bf16.mxu0 %vm3026_vm0, %v11056_v27  ;;  %v11065_v13 = vld [vmem:[%s11185_s22 + $0xda4] ss:$16 sps:$4 sm:$0xff]   ;;  %v11066_v27 = vld [vmem:[%s11185_s22 + $0xdc8] ss:$16 sps:$4 sm:$0xff]  }
 0x396   : > { %9885 = vst [vmem:[%s11640_s11 + $0x268] sm:$0xff] %v9637_v63   ;;  %v5377_v56 = vmax.f32 %v4951_v7, 0.0  ;;  %v4954_v12 = vadd.f32 %v4953_v20, %v4025_v2  ;;  %4236 = vmatmul.mubr.bf16.gmra.mrb[204].mxu1 %v11039_v51  ;;  %v6472_v51 = vpop.permute.xlu0 %6471  ;;  %v11057_v63 = vld [vmem:[%s11185_s22 + $0xd80] ss:$16 sps:$4 sm:$0xff]  }
 0x397   : > { %4243 = vmatprep.mubr.bf16.mxu1 %v11047_v8  ;;  %v4974_v55 = vpop.f32.mrb[68].mxu0 }
 0x398   : > { %v5378_v38 = vmax.f32 %v4954_v12, 0.0  ;;  %v6945_v46 = vmul.f32 %v6452_v41, %v5377_v56  ;;  %v4976_v20 = vpop.f32.mrb[69].mxu0  ;;  %v11074_v41 = vld [vmem:[%s11185_s22 + $0xdec] ss:$16 sps:$4 sm:$0xff]  }
 0x399   : > { %v4029_v37 = vpop.f32.mrb[208].mxu1  ;;  %v4977_v17 = vpop.f32.mrb[70].mxu0 }
 0x39a   : > { %v6946_v62 = vmul.f32 %v6457_v10, %v5378_v38  ;;  %v4030_v18 = vadd.f32 %v12743_v29, %v4029_v37  ;;  %v4031_v53 = vpop.f32.mrb[209].mxu1  ;;  %v4979_v23 = vpop.f32.mrb[71].mxu0 }
 0x39b   : > { %v4032_v52 = vpop.f32.mrb[210].mxu1 }
 0x39c   : > { %v9642_v19 = vpack.c.bf16 %v6946_v62, %v6945_v46  ;;  %v4959_v40 = vadd.f32 %v4958_v22, %v4030_v18  ;;  %v4033_v15 = vadd.f32 %v12743_v29, %v4032_v52  ;;  %v4034_v47 = vpop.f32.mrb[211].mxu1  ;;  %5189 = vmatmul.mubr.bf16.gmra.mrb[176].mxu0 %v11054_v36  ;;  %v6487_v18 = vpop.permute.xlu1 %6486 }
 0x39d   : > { %8795 = vmatprep.mubr.msk.bf16.mxu0 %vm3026_vm0, %v11062_v11  ;;  %v11071_v47 = vld [vmem:[%s11185_s22 + $0xdc4] ss:$16 sps:$4 sm:$0xff]   ;;  %v11072_v11 = vld [vmem:[%s11185_s22 + $0xde8] ss:$16 sps:$4 sm:$0xff]  }
 0x39e   : > { %9886 = vst [vmem:[%s11640_s11 + $0x270] sm:$0xff] %v9642_v19   ;;  %v5379_v25 = vmax.f32 %v4959_v40, 0.0  ;;  %v4962_v42 = vadd.f32 %v4961_v14, %v4033_v15  ;;  %4244 = vmatmul.mubr.bf16.gmra.mrb[208].mxu1 %v11045_v3  ;;  %v6482_v3 = vpop.permute.xlu0 %6481  ;;  %v11063_v19 = vld [vmem:[%s11185_s22 + $0xda0] ss:$16 sps:$4 sm:$0xff]  }
 0x39f   : > { %4251 = vmatprep.mubr.bf16.mxu1 %v11053_v32  ;;  %v4982_v34 = vpop.f32.mrb[72].mxu0 }
 0x3a0   : > { %v5380_v16 = vmax.f32 %v4962_v42, 0.0  ;;  %v6947_v45 = vmul.f32 %v6462_v50, %v5379_v25  ;;  %v4984_v14 = vpop.f32.mrb[73].mxu0 }
 0x3a1   : > { %v4037_v22 = vpop.f32.mrb[212].mxu1  ;;  %v4985_v24 = vpop.f32.mrb[74].mxu0 }
 0x3a2   : > { %v6948_v30 = vmul.f32 %v6467_v49, %v5380_v16  ;;  %v4038_v9 = vadd.f32 %v12743_v29, %v4037_v22  ;;  %v4039_v5 = vpop.f32.mrb[213].mxu1  ;;  %v4987_v59 = vpop.f32.mrb[75].mxu0 }
 0x3a3   : > { %v4040_v48 = vpop.f32.mrb[214].mxu1  ;;  %v6492_v5 = vpop.permute.xlu0 %6491 }
 0x3a4   : > { %v9647_v44 = vpack.c.bf16 %v6948_v30, %v6947_v45  ;;  %v4967_v60 = vadd.f32 %v4966_v58, %v4038_v9  ;;  %v4041_v0 = vadd.f32 %v12743_v29, %v4040_v48  ;;  %v4042_v33 = vpop.f32.mrb[215].mxu1  ;;  %5197 = vmatmul.mubr.bf16.gmra.mrb[180].mxu0 %v11060_v43  ;;  %v6497_v30 = vpop.permute.xlu1 %6496  ;;  %v11069_v43 = vld [vmem:[%s11185_s22 + $0xdc0] ss:$16 sps:$4 sm:$0xff]  }
 0x3a5   : > { %8796 = vmatprep.mubr.msk.bf16.mxu0 %vm3026_vm0, %v11068_v61 }
 0x3a6   : > { %9887 = vst [vmem:[%s11640_s11 + $0x278] sm:$0xff] %v9647_v44   ;;  %v5381_v39 = vmax.f32 %v4967_v60, 0.0  ;;  %v4970_v1 = vadd.f32 %v4969_v4, %v4041_v0  ;;  %4252 = vmatmul.mubr.bf16.gmra.mrb[212].mxu1 %v11051_v35  ;;  %v11077_v0 = vld [vmem:[%s11185_s22 + $0xde4] ss:$16 sps:$4 sm:$0xff]  }
 0x3a7   : > { %4259 = vmatprep.mubr.bf16.mxu1 %v11059_v21  ;;  %v4990_v7 = vpop.f32.mrb[76].mxu0 }
 0x3a8   : > { %v5382_v54 = vmax.f32 %v4970_v1, 0.0  ;;  %v6949_v26 = vmul.f32 %v6472_v51, %v5381_v39  ;;  %v4992_v4 = vpop.f32.mrb[77].mxu0 }
 0x3a9   : > { %v4045_v58 = vpop.f32.mrb[216].mxu1  ;;  %v4993_v38 = vpop.f32.mrb[78].mxu0 }
 0x3aa   : > { %v6950_v8 = vmul.f32 %v6477_v28, %v5382_v54  ;;  %v4046_v31 = vadd.f32 %v12743_v29, %v4045_v58  ;;  %v4047_v6 = vpop.f32.mrb[217].mxu1  ;;  %v4995_v37 = vpop.f32.mrb[79].mxu0 }
 0x3ab   : > { %v4048_v2 = vpop.f32.mrb[218].mxu1  ;;  %v6507_v58 = vpop.permute.xlu1 %6506 }
 0x3ac   : > { %v9652_v57 = vpack.c.bf16 %v6950_v8, %v6949_v26  ;;  %v4975_v56 = vadd.f32 %v4974_v55, %v4046_v31  ;;  %v4049_v12 = vadd.f32 %v12743_v29, %v4048_v2  ;;  %v4050_v10 = vpop.f32.mrb[219].mxu1  ;;  %5205 = vmatmul.mubr.bf16.gmra.mrb[184].mxu0 %v11066_v27  ;;  %v6502_v8 = vpop.permute.xlu0 %6501 }
 0x3ad   : > { %8797 = vmatprep.mubr.msk.bf16.mxu0 %vm3026_vm0, %v11074_v41 }
 0x3ae   : > { %9888 = vst [vmem:[%s11640_s11 + $0x280] sm:$0xff] %v9652_v57   ;;  %v5383_v46 = vmax.f32 %v4975_v56, 0.0  ;;  %v4978_v62 = vadd.f32 %v4977_v17, %v4049_v12  ;;  %4260 = vmatmul.mubr.bf16.gmra.mrb[216].mxu1 %v11057_v63 }
 0x3af   : > { %4267 = vmatprep.mubr.bf16.mxu1 %v11065_v13  ;;  %v4998_v40 = vpop.f32.mrb[80].mxu0  ;;  %v11075_v13 = vld [vmem:[%s11185_s22 + $0xde0] ss:$16 sps:$4 sm:$0xff]  }
 0x3b0   : > { %v5384_v53 = vmax.f32 %v4978_v62, 0.0  ;;  %v6951_v52 = vmul.f32 %v6482_v3, %v5383_v46  ;;  %v5000_v17 = vpop.f32.mrb[81].mxu0  ;;  %v6512_v3 = vpop.permute.xlu0 %6511 }
 0x3b1   : > { %v4053_v55 = vpop.f32.mrb[220].mxu1  ;;  %v5001_v16 = vpop.f32.mrb[82].mxu0 }
 0x3b2   : > { %v6952_v32 = vmul.f32 %v6487_v18, %v5384_v53  ;;  %v4054_v20 = vadd.f32 %v12743_v29, %v4053_v55  ;;  %v4055_v36 = vpop.f32.mrb[221].mxu1  ;;  %v5003_v50 = vpop.f32.mrb[83].mxu0 }
 0x3b3   : > { %v4056_v15 = vpop.f32.mrb[222].mxu1  ;;  %v6517_v18 = vpop.permute.xlu1 %6516 }
 0x3b4   : > { %v9657_v23 = vpack.c.bf16 %v6952_v32, %v6951_v52  ;;  %v4983_v25 = vadd.f32 %v4982_v34, %v4054_v20  ;;  %v4057_v42 = vadd.f32 %v12743_v29, %v4056_v15  ;;  %v4058_v49 = vpop.f32.mrb[223].mxu1  ;;  %5213 = vmatmul.mubr.bf16.gmra.mrb[188].mxu0 %v11072_v11 }
 0x3b6   : > { %9889 = vst [vmem:[%s11640_s11 + $0x288] sm:$0xff] %v9657_v23   ;;  %v5385_v22 = vmax.f32 %v4983_v25, 0.0  ;;  %v4986_v45 = vadd.f32 %v4985_v24, %v4057_v42  ;;  %4268 = vmatmul.mubr.bf16.gmra.mrb[220].mxu1 %v11063_v19 }
 0x3b7   : > { %4275 = vmatprep.mubr.bf16.mxu1 %v11071_v47  ;;  %v5006_v44 = vpop.f32.mrb[84].mxu0  ;;  %v6527_v50 = vpop.permute.xlu1 %6526 }
 0x3b8   : > { %v5386_v9 = vmax.f32 %v4986_v45, 0.0  ;;  %v6953_v48 = vmul.f32 %v6492_v5, %v5385_v22  ;;  %v5008_v33 = vpop.f32.mrb[85].mxu0  ;;  %v6522_v45 = vpop.permute.xlu0 %6521 }
 0x3b9   : > { %v4061_v35 = vpop.f32.mrb[224].mxu1  ;;  %v5009_v1 = vpop.f32.mrb[86].mxu0 }
 0x3ba   : > { %v6954_v34 = vmul.f32 %v6497_v30, %v5386_v9  ;;  %v4062_v21 = vadd.f32 %v12743_v29, %v4061_v35  ;;  %v4063_v14 = vpop.f32.mrb[225].mxu1  ;;  %v5011_v28 = vpop.f32.mrb[87].mxu0  ;;  %v12888_v35 = vld [vmem:[%s12974_s2] ss:$0 sm:$0xff] }
 0x3bb   : > { %v4064_v60 = vpop.f32.mrb[226].mxu1 }
 0x3bc   : > { %v9662_v61 = vpack.c.bf16 %v6954_v34, %v6953_v48  ;;  %v4991_v24 = vadd.f32 %v4990_v7, %v4062_v21  ;;  %v4065_v59 = vadd.f32 %v12743_v29, %v4064_v60  ;;  %v4066_v39 = vpop.f32.mrb[227].mxu1  ;;  %v6532_v28 = vpop.permute.xlu0 %6531 }
 0x3bd   : > { %v6537_v39 = vpop.permute.xlu1 %6536 }
 0x3be   : > { %9890 = vst [vmem:[%s11640_s11 + $0x290] sm:$0xff] %v9662_v61   ;;  %v5387_v54 = vmax.f32 %v4991_v24, 0.0  ;;  %v4994_v51 = vadd.f32 %v4993_v38, %v4065_v59  ;;  %4276 = vmatmul.mubr.bf16.gmra.mrb[224].mxu1 %v11069_v43 }
 0x3bf   : > { %4283 = vmatprep.mubr.bf16.mxu1 %v11077_v0  ;;  %v5014_v4 = vpop.f32.mrb[88].mxu0 }
 0x3c0   : > { %v5388_v26 = vmax.f32 %v4994_v51, 0.0  ;;  %v6955_v6 = vmul.f32 %v6502_v8, %v5387_v54  ;;  %v5016_v57 = vpop.f32.mrb[89].mxu0 }
 0x3c1   : > { %v4069_v31 = vpop.f32.mrb[228].mxu1  ;;  %v5017_v41 = vpop.f32.mrb[90].mxu0 }
 0x3c2   : > { %v6956_v63 = vmul.f32 %v6507_v58, %v5388_v26  ;;  %v4070_v7 = vadd.f32 %v12743_v29, %v4069_v31  ;;  %v4071_v2 = vpop.f32.mrb[229].mxu1  ;;  %v5019_v37 = vpop.f32.mrb[91].mxu0 }
 0x3c3   : > { %v4072_v27 = vpop.f32.mrb[230].mxu1 }
 0x3c4   : > { %v9667_v56 = vpack.c.bf16 %v6956_v63, %v6955_v6  ;;  %v4999_v12 = vadd.f32 %v4998_v40, %v4070_v7  ;;  %v4073_v10 = vadd.f32 %v12743_v29, %v4072_v27  ;;  %v4074_v38 = vpop.f32.mrb[231].mxu1 }
 0x3c6   : > { %9891 = vst [vmem:[%s11640_s11 + $0x298] sm:$0xff] %v9667_v56   ;;  %v5389_v46 = vmax.f32 %v4999_v12, 0.0  ;;  %v5002_v62 = vadd.f32 %v5001_v16, %v4073_v10  ;;  %4284 = vmatmul.mubr.bf16.gmra.mrb[228].mxu1 %v11075_v13  ;;  %v6547_v10 = vpop.permute.xlu1 %6546 }
 0x3c7   : > { %v5022_v19 = vpop.f32.mrb[92].mxu0 }
 0x3c8   : > { %v5390_v53 = vmax.f32 %v5002_v62, 0.0  ;;  %v6957_v52 = vmul.f32 %v6512_v3, %v5389_v46  ;;  %v5024_v15 = vpop.f32.mrb[93].mxu0 }
 0x3c9   : > { %v4077_v55 = vpop.f32.mrb[232].mxu1  ;;  %v5025_v25 = vpop.f32.mrb[94].mxu0 }
 0x3ca   : > { %v6958_v32 = vmul.f32 %v6517_v18, %v5390_v53  ;;  %v4078_v20 = vadd.f32 %v12743_v29, %v4077_v55  ;;  %v4079_v36 = vpop.f32.mrb[233].mxu1  ;;  %v5027_v42 = vpop.f32.mrb[95].mxu0 }
 0x3cb   : > { %v4080_v40 = vpop.f32.mrb[234].mxu1 }
 0x3cc   : > { %v9672_v47 = vpack.c.bf16 %v6958_v32, %v6957_v52  ;;  %v5007_v17 = vadd.f32 %v5006_v44, %v4078_v20  ;;  %v4081_v11 = vadd.f32 %v12743_v29, %v4080_v40  ;;  %v4082_v23 = vpop.f32.mrb[235].mxu1 }
 0x3ce   : > { %9892 = vst [vmem:[%s11640_s11 + $0x2a0] sm:$0xff] %v9672_v47   ;;  %v5391_v49 = vmax.f32 %v5007_v17, 0.0  ;;  %v5010_v16 = vadd.f32 %v5009_v1, %v4081_v11  ;;  %v6557_v11 = vpop.permute.xlu1 %6556 }
 0x3cf   : > { %v5030_v34 = vpop.f32.mrb[96].mxu0 }
 0x3d0   : > { %v5392_v22 = vmax.f32 %v5010_v16, 0.0  ;;  %v6959_v9 = vmul.f32 %v6522_v45, %v5391_v49  ;;  %v5032_v14 = vpop.f32.mrb[97].mxu0 }
 0x3d1   : > { %v4085_v30 = vpop.f32.mrb[236].mxu1  ;;  %v5033_v33 = vpop.f32.mrb[98].mxu0 }
 0x3d2   : > { %v6960_v5 = vmul.f32 %v6527_v50, %v5392_v22  ;;  %v4086_v29 = vadd.f32 %v12888_v35, %v4085_v30  ;;  %v4087_v48 = vpop.f32.mrb[237].mxu1  ;;  %v5035_v61 = vpop.f32.mrb[99].mxu0 }
 0x3d3   : > { %v4088_v21 = vpop.f32.mrb[238].mxu1 }
 0x3d4   : > { %v9677_v43 = vpack.c.bf16 %v6960_v5, %v6959_v9  ;;  %v5015_v44 = vadd.f32 %v5014_v4, %v4086_v29  ;;  %v4089_v60 = vadd.f32 %v12888_v35, %v4088_v21  ;;  %v4090_v0 = vpop.f32.mrb[239].mxu1 }
 0x3d6   : > { %9893 = vst [vmem:[%s11640_s11 + $0x2a8] sm:$0xff] %v9677_v43   ;;  %v5393_v24 = vmax.f32 %v5015_v44, 0.0  ;;  %v5018_v59 = vadd.f32 %v5017_v41, %v4089_v60  ;;  %v6542_v41 = vpop.permute.xlu0 %6541  ;;  %v6567_v60 = vpop.permute.xlu1 %6566 }
 0x3d7   : > { %v5038_v31 = vpop.f32.mrb[100].mxu0 }
 0x3d8   : > { %v5394_v1 = vmax.f32 %v5018_v59, 0.0  ;;  %v6961_v51 = vmul.f32 %v6532_v28, %v5393_v24  ;;  %v5040_v63 = vpop.f32.mrb[101].mxu0 }
 0x3d9   : > { %v4093_v54 = vpop.f32.mrb[240].mxu1  ;;  %v5041_v27 = vpop.f32.mrb[102].mxu0 }
 0x3da   : > { %v6962_v58 = vmul.f32 %v6537_v39, %v5394_v1  ;;  %v4094_v26 = vadd.f32 %v12888_v35, %v4093_v54  ;;  %v4095_v8 = vpop.f32.mrb[241].mxu1  ;;  %v5043_v57 = vpop.f32.mrb[103].mxu0 }
 0x3db   : > { %v4096_v6 = vpop.f32.mrb[242].mxu1 }
 0x3dc   : > { %v9682_v7 = vpack.c.bf16 %v6962_v58, %v6961_v51  ;;  %v5023_v2 = vadd.f32 %v5022_v19, %v4094_v26  ;;  %v4097_v13 = vadd.f32 %v12888_v35, %v4096_v6  ;;  %v4098_v4 = vpop.f32.mrb[243].mxu1 }
 0x3de   : > { %9894 = vst [vmem:[%s11640_s11 + $0x2b0] sm:$0xff] %v9682_v7   ;;  %v5395_v56 = vmax.f32 %v5023_v2, 0.0  ;;  %v5026_v12 = vadd.f32 %v5025_v25, %v4097_v13  ;;  %v6552_v25 = vpop.permute.xlu0 %6551  ;;  %v6577_v13 = vpop.permute.xlu1 %6576 }
 0x3df   : > { %v5046_v3 = vpop.f32.mrb[104].mxu0 }
 0x3e0   : > { %v5396_v38 = vmax.f32 %v5026_v12, 0.0  ;;  %v6963_v46 = vmul.f32 %v6542_v41, %v5395_v56  ;;  %v5048_v52 = vpop.f32.mrb[105].mxu0 }
 0x3e1   : > { %v4101_v37 = vpop.f32.mrb[244].mxu1  ;;  %v5049_v40 = vpop.f32.mrb[106].mxu0 }
 0x3e2   : > { %v6964_v62 = vmul.f32 %v6547_v10, %v5396_v38  ;;  %v4102_v18 = vadd.f32 %v12888_v35, %v4101_v37  ;;  %v4103_v53 = vpop.f32.mrb[245].mxu1  ;;  %v5051_v15 = vpop.f32.mrb[107].mxu0 }
 0x3e3   : > { %v4104_v55 = vpop.f32.mrb[246].mxu1 }
 0x3e4   : > { %v9687_v32 = vpack.c.bf16 %v6964_v62, %v6963_v46  ;;  %v5031_v20 = vadd.f32 %v5030_v34, %v4102_v18  ;;  %v4105_v36 = vadd.f32 %v12888_v35, %v4104_v55  ;;  %v4106_v19 = vpop.f32.mrb[247].mxu1 }
 0x3e6   : > { %9895 = vst [vmem:[%s11640_s11 + $0x2b8] sm:$0xff] %v9687_v32   ;;  %v5397_v47 = vmax.f32 %v5031_v20, 0.0  ;;  %v5034_v17 = vadd.f32 %v5033_v33, %v4105_v36  ;;  %v6562_v33 = vpop.permute.xlu0 %6561  ;;  %v6587_v36 = vpop.permute.xlu1 %6586 }
 0x3e7   : > { %v5054_v45 = vpop.f32.mrb[108].mxu0 }
 0x3e8   : > { %v5398_v23 = vmax.f32 %v5034_v17, 0.0  ;;  %v6965_v49 = vmul.f32 %v6552_v25, %v5397_v47  ;;  %v5056_v9 = vpop.f32.mrb[109].mxu0 }
 0x3e9   : > { %v4109_v42 = vpop.f32.mrb[248].mxu1  ;;  %v5057_v21 = vpop.f32.mrb[110].mxu0 }
 0x3ea   : > { %v6966_v16 = vmul.f32 %v6557_v11, %v5398_v23  ;;  %v4110_v50 = vadd.f32 %v12888_v35, %v4109_v42  ;;  %v4111_v22 = vpop.f32.mrb[249].mxu1  ;;  %v5059_v14 = vpop.f32.mrb[111].mxu0 }
 0x3eb   : > { %v4112_v30 = vpop.f32.mrb[250].mxu1 }
 0x3ec   : > { %v9692_v5 = vpack.c.bf16 %v6966_v16, %v6965_v49  ;;  %v5039_v29 = vadd.f32 %v5038_v31, %v4110_v50  ;;  %v4113_v48 = vadd.f32 %v12888_v35, %v4112_v30  ;;  %v4114_v34 = vpop.f32.mrb[251].mxu1 }
 0x3ee   : > { %9896 = vst [vmem:[%s11640_s11 + $0x2c0] sm:$0xff] %v9692_v5   ;;  %v5399_v43 = vmax.f32 %v5039_v29, 0.0  ;;  %v5042_v44 = vadd.f32 %v5041_v27, %v4113_v48  ;;  %v6572_v27 = vpop.permute.xlu0 %6571  ;;  %v6597_v48 = vpop.permute.xlu1 %6596 }
 0x3ef   : > { %v5062_v28 = vpop.f32.mrb[112].mxu0 }
 0x3f0   : > { %v5400_v0 = vmax.f32 %v5042_v44, 0.0  ;;  %v6967_v24 = vmul.f32 %v6562_v33, %v5399_v43  ;;  %v5064_v51 = vpop.f32.mrb[113].mxu0 }
 0x3f1   : > { %v4117_v61 = vpop.f32.mrb[252].mxu1  ;;  %v5065_v6 = vpop.f32.mrb[114].mxu0 }
 0x3f2   : > { %v6968_v59 = vmul.f32 %v6567_v60, %v5400_v0  ;;  %v4118_v39 = vadd.f32 %v12888_v35, %v4117_v61  ;;  %v4119_v1 = vpop.f32.mrb[253].mxu1  ;;  %v5067_v63 = vpop.f32.mrb[115].mxu0 }
 0x3f3   : > { %v4120_v54 = vpop.f32.mrb[254].mxu1 }
 0x3f4   : > { %v9697_v58 = vpack.c.bf16 %v6968_v59, %v6967_v24  ;;  %v5047_v26 = vadd.f32 %v5046_v3, %v4118_v39  ;;  %v4121_v8 = vadd.f32 %v12888_v35, %v4120_v54  ;;  %v4122_v31 = vpop.f32.mrb[255].mxu1 }
 0x3f6   : > { %9897 = vst [vmem:[%s11640_s11 + $0x2c8] sm:$0xff] %v9697_v58   ;;  %v5401_v7 = vmax.f32 %v5047_v26, 0.0  ;;  %v5050_v2 = vadd.f32 %v5049_v40, %v4121_v8  ;;  %v6582_v40 = vpop.permute.xlu0 %6581  ;;  %v6607_v8 = vpop.permute.xlu1 %6606 }
 0x3f7   : > { %v5070_v41 = vpop.f32.mrb[116].mxu0 }
 0x3f8   : > { %v5402_v4 = vmax.f32 %v5050_v2, 0.0  ;;  %v6969_v56 = vmul.f32 %v6572_v27, %v5401_v7  ;;  %v5072_v46 = vpop.f32.mrb[117].mxu0 }
 0x3f9   : > { %v4125_v57 = vpop.f32.mrb[148].mxu1  ;;  %v5073_v55 = vpop.f32.mrb[118].mxu0 }
 0x3fa   : > { %v6970_v12 = vmul.f32 %v6577_v13, %v5402_v4  ;;  %v4126_v10 = vadd.f32 %v12888_v35, %v4125_v57  ;;  %v4127_v38 = vpop.f32.mrb[149].mxu1  ;;  %v5075_v52 = vpop.f32.mrb[119].mxu0 }
 0x3fb   : > { %v4128_v37 = vpop.f32.mrb[150].mxu1 }
 0x3fc   : > { %v9702_v62 = vpack.c.bf16 %v6970_v12, %v6969_v56  ;;  %v5055_v18 = vadd.f32 %v5054_v45, %v4126_v10  ;;  %v4129_v53 = vadd.f32 %v12888_v35, %v4128_v37  ;;  %v4130_v3 = vpop.f32.mrb[151].mxu1 }
 0x3fe   : > { %9898 = vst [vmem:[%s11640_s11 + $0x2d0] sm:$0xff] %v9702_v62   ;;  %v5403_v32 = vmax.f32 %v5055_v18, 0.0  ;;  %v5058_v20 = vadd.f32 %v5057_v21, %v4129_v53  ;;  %v6592_v21 = vpop.permute.xlu0 %6591  ;;  %v6617_v53 = vpop.permute.xlu1 %6616 }
 0x3ff   : > { %v5078_v25 = vpop.f32.mrb[120].mxu0 }
 0x400   : > { %v5404_v19 = vmax.f32 %v5058_v20, 0.0  ;;  %v6971_v47 = vmul.f32 %v6582_v40, %v5403_v32  ;;  %v5080_v49 = vpop.f32.mrb[121].mxu0 }
 0x401   : > { %v4133_v15 = vpop.f32.mrb[152].mxu1  ;;  %v5081_v30 = vpop.f32.mrb[122].mxu0 }
 0x402   : > { %v6972_v17 = vmul.f32 %v6587_v36, %v5404_v19  ;;  %v4134_v11 = vadd.f32 %v12888_v35, %v4133_v15  ;;  %v4135_v23 = vpop.f32.mrb[153].mxu1  ;;  %v5083_v9 = vpop.f32.mrb[123].mxu0 }
 0x403   : > { %v4136_v42 = vpop.f32.mrb[154].mxu1 }
 0x404   : > { %v9707_v16 = vpack.c.bf16 %v6972_v17, %v6971_v47  ;;  %v5063_v50 = vadd.f32 %v5062_v28, %v4134_v11  ;;  %v4137_v22 = vadd.f32 %v12888_v35, %v4136_v42  ;;  %v4138_v45 = vpop.f32.mrb[155].mxu1 }
 0x406   : > { %9899 = vst [vmem:[%s11640_s11 + $0x2d8] sm:$0xff] %v9707_v16   ;;  %v5405_v5 = vmax.f32 %v5063_v50, 0.0  ;;  %v5066_v29 = vadd.f32 %v5065_v6, %v4137_v22  ;;  %v6602_v6 = vpop.permute.xlu0 %6601  ;;  %v6627_v22 = vpop.permute.xlu1 %6626 }
 0x407   : > { %v5086_v33 = vpop.f32.mrb[124].mxu0 }
 0x408   : > { %v5406_v34 = vmax.f32 %v5066_v29, 0.0  ;;  %v6973_v43 = vmul.f32 %v6592_v21, %v5405_v5  ;;  %v5088_v24 = vpop.f32.mrb[125].mxu0 }
 0x409   : > { %v4141_v14 = vpop.f32.mrb[156].mxu1  ;;  %v5089_v54 = vpop.f32.mrb[126].mxu0 }
 0x40a   : > { %v6974_v44 = vmul.f32 %v6597_v48, %v5406_v34  ;;  %v4142_v60 = vadd.f32 %v12888_v35, %v4141_v14  ;;  %v4143_v0 = vpop.f32.mrb[157].mxu1  ;;  %v5091_v51 = vpop.f32.mrb[127].mxu0 }
 0x40b   : > { %v4144_v61 = vpop.f32.mrb[158].mxu1 }
 0x40c   : > { %v9712_v59 = vpack.c.bf16 %v6974_v44, %v6973_v43  ;;  %v5071_v39 = vadd.f32 %v5070_v41, %v4142_v60  ;;  %v4145_v1 = vadd.f32 %v12888_v35, %v4144_v61  ;;  %v4146_v28 = vpop.f32.mrb[159].mxu1 }
 0x40e   : > { %9900 = vst [vmem:[%s11640_s11 + $0x2e0] sm:$0xff] %v9712_v59   ;;  %v5407_v58 = vmax.f32 %v5071_v39, 0.0  ;;  %v5074_v26 = vadd.f32 %v5073_v55, %v4145_v1  ;;  %v6612_v55 = vpop.permute.xlu0 %6611  ;;  %v6637_v1 = vpop.permute.xlu1 %6636 }
 0x40f   : > { %v5094_v27 = vpop.f32.mrb[128].mxu0 }
 0x410   : > { %v5408_v31 = vmax.f32 %v5074_v26, 0.0  ;;  %v6975_v7 = vmul.f32 %v6602_v6, %v5407_v58  ;;  %v5096_v56 = vpop.f32.mrb[129].mxu0 }
 0x411   : > { %v4149_v63 = vpop.f32.mrb[160].mxu1  ;;  %v5097_v37 = vpop.f32.mrb[130].mxu0 }
 0x412   : > { %v6976_v2 = vmul.f32 %v6607_v8, %v5408_v31  ;;  %v4150_v13 = vadd.f32 %v12888_v35, %v4149_v63  ;;  %v4151_v4 = vpop.f32.mrb[161].mxu1  ;;  %v5099_v46 = vpop.f32.mrb[131].mxu0 }
 0x413   : > { %v4152_v57 = vpop.f32.mrb[162].mxu1 }
 0x414   : > { %v9717_v12 = vpack.c.bf16 %v6976_v2, %v6975_v7  ;;  %v5079_v10 = vadd.f32 %v5078_v25, %v4150_v13  ;;  %v4153_v38 = vadd.f32 %v12888_v35, %v4152_v57  ;;  %v4154_v41 = vpop.f32.mrb[163].mxu1 }
 0x416   : > { %9901 = vst [vmem:[%s11640_s11 + $0x2e8] sm:$0xff] %v9717_v12   ;;  %v5409_v62 = vmax.f32 %v5079_v10, 0.0  ;;  %v5082_v18 = vadd.f32 %v5081_v30, %v4153_v38  ;;  %v6622_v30 = vpop.permute.xlu0 %6621  ;;  %v6647_v38 = vpop.permute.xlu1 %6646 }
 0x417   : > { %v5102_v40 = vpop.f32.mrb[132].mxu0 }
 0x418   : > { %v5410_v3 = vmax.f32 %v5082_v18, 0.0  ;;  %v6977_v32 = vmul.f32 %v6612_v55, %v5409_v62  ;;  %v5104_v47 = vpop.f32.mrb[133].mxu0 }
 0x419   : > { %v4157_v52 = vpop.f32.mrb[164].mxu1  ;;  %v5105_v42 = vpop.f32.mrb[134].mxu0 }
 0x41a   : > { %v6978_v20 = vmul.f32 %v6617_v53, %v5410_v3  ;;  %v4158_v36 = vadd.f32 %v12888_v35, %v4157_v52  ;;  %v4159_v19 = vpop.f32.mrb[165].mxu1  ;;  %v5107_v49 = vpop.f32.mrb[135].mxu0 }
 0x41b   : > { %v4160_v15 = vpop.f32.mrb[166].mxu1 }
 0x41c   : > { %v9722_v17 = vpack.c.bf16 %v6978_v20, %v6977_v32  ;;  %v5087_v11 = vadd.f32 %v5086_v33, %v4158_v36  ;;  %v4161_v23 = vadd.f32 %v12888_v35, %v4160_v15  ;;  %v4162_v25 = vpop.f32.mrb[167].mxu1 }
 0x41e   : > { %9902 = vst [vmem:[%s11640_s11 + $0x2f0] sm:$0xff] %v9722_v17   ;;  %v5411_v16 = vmax.f32 %v5087_v11, 0.0  ;;  %v5090_v50 = vadd.f32 %v5089_v54, %v4161_v23  ;;  %v6632_v54 = vpop.permute.xlu0 %6631  ;;  %v6657_v23 = vpop.permute.xlu1 %6656 }
 0x41f   : > { %v5110_v21 = vpop.f32.mrb[136].mxu0 }
 0x420   : > { %v5412_v45 = vmax.f32 %v5090_v50, 0.0  ;;  %v6979_v5 = vmul.f32 %v6622_v30, %v5411_v16  ;;  %v5112_v43 = vpop.f32.mrb[137].mxu0 }
 0x421   : > { %v4165_v9 = vpop.f32.mrb[168].mxu1  ;;  %v5113_v61 = vpop.f32.mrb[138].mxu0 }
 0x422   : > { %v6980_v29 = vmul.f32 %v6627_v22, %v5412_v45  ;;  %v4166_v48 = vadd.f32 %v12888_v35, %v4165_v9  ;;  %v4167_v34 = vpop.f32.mrb[169].mxu1  ;;  %v5115_v24 = vpop.f32.mrb[139].mxu0 }
 0x423   : > { %v4168_v14 = vpop.f32.mrb[170].mxu1 }
 0x424   : > { %v9727_v44 = vpack.c.bf16 %v6980_v29, %v6979_v5  ;;  %v5095_v60 = vadd.f32 %v5094_v27, %v4166_v48  ;;  %v4169_v0 = vadd.f32 %v12888_v35, %v4168_v14  ;;  %v4170_v33 = vpop.f32.mrb[171].mxu1 }
 0x426   : > { %9903 = vst [vmem:[%s11640_s11 + $0x2f8] sm:$0xff] %v9727_v44   ;;  %v5413_v59 = vmax.f32 %v5095_v60, 0.0  ;;  %v5098_v39 = vadd.f32 %v5097_v37, %v4169_v0  ;;  %v6642_v37 = vpop.permute.xlu0 %6641  ;;  %v6667_v0 = vpop.permute.xlu1 %6666 }
 0x427   : > { %v5118_v6 = vpop.f32.mrb[140].mxu0 }
 0x428   : > { %v5414_v28 = vmax.f32 %v5098_v39, 0.0  ;;  %v6981_v58 = vmul.f32 %v6632_v54, %v5413_v59  ;;  %v5120_v7 = vpop.f32.mrb[141].mxu0 }
 0x429   : > { %v4173_v51 = vpop.f32.mrb[172].mxu1  ;;  %v5121_v57 = vpop.f32.mrb[142].mxu0 }
 0x42a   : > { %v6982_v26 = vmul.f32 %v6637_v1, %v5414_v28  ;;  %v4174_v8 = vadd.f32 %v12888_v35, %v4173_v51  ;;  %v4175_v31 = vpop.f32.mrb[173].mxu1  ;;  %v5123_v56 = vpop.f32.mrb[143].mxu0 }
 0x42b   : > { %v4176_v63 = vpop.f32.mrb[174].mxu1 }
 0x42c   : > { %v9732_v2 = vpack.c.bf16 %v6982_v26, %v6981_v58  ;;  %v5103_v13 = vadd.f32 %v5102_v40, %v4174_v8  ;;  %v4177_v4 = vadd.f32 %v12888_v35, %v4176_v63  ;;  %v4178_v27 = vpop.f32.mrb[175].mxu1 }
 0x42e   : > { %9904 = vst [vmem:[%s11640_s11 + $0x300] sm:$0xff] %v9732_v2   ;;  %v5415_v12 = vmax.f32 %v5103_v13, 0.0  ;;  %v5106_v10 = vadd.f32 %v5105_v42, %v4177_v4  ;;  %v6652_v42 = vpop.permute.xlu0 %6651  ;;  %v6677_v4 = vpop.permute.xlu1 %6676 }
 0x42f   : > { %v5126_v55 = vpop.f32.mrb[144].mxu0 }
 0x430   : > { %v5416_v41 = vmax.f32 %v5106_v10, 0.0  ;;  %v6983_v62 = vmul.f32 %v6642_v37, %v5415_v12  ;;  %v5128_v32 = vpop.f32.mrb[145].mxu0 }
 0x431   : > { %v4181_v46 = vpop.f32.mrb[176].mxu1  ;;  %v5129_v15 = vpop.f32.mrb[146].mxu0 }
 0x432   : > { %v6984_v18 = vmul.f32 %v6647_v38, %v5416_v41  ;;  %v4182_v53 = vadd.f32 %v12888_v35, %v4181_v46  ;;  %v4183_v3 = vpop.f32.mrb[177].mxu1  ;;  %v5131_v47 = vpop.f32.mrb[147].mxu0 }
 0x433   : > { %v4184_v52 = vpop.f32.mrb[178].mxu1 }
 0x434   : > { %v9737_v20 = vpack.c.bf16 %v6984_v18, %v6983_v62  ;;  %v5111_v36 = vadd.f32 %v5110_v21, %v4182_v53  ;;  %v4185_v19 = vadd.f32 %v12888_v35, %v4184_v52  ;;  %v4186_v40 = vpop.f32.mrb[179].mxu1 }
 0x436   : > { %9905 = vst [vmem:[%s11640_s11 + $0x308] sm:$0xff] %v9737_v20   ;;  %v5417_v17 = vmax.f32 %v5111_v36, 0.0  ;;  %v5114_v11 = vadd.f32 %v5113_v61, %v4185_v19  ;;  %v6662_v61 = vpop.permute.xlu0 %6661  ;;  %v6687_v19 = vpop.permute.xlu1 %6686 }
 0x437   : > { %v5134_v30 = vpop.f32.mrb[148].mxu0 }
 0x438   : > { %v5418_v25 = vmax.f32 %v5114_v11, 0.0  ;;  %v6985_v16 = vmul.f32 %v6652_v42, %v5417_v17  ;;  %v5136_v5 = vpop.f32.mrb[149].mxu0 }
 0x439   : > { %v4189_v49 = vpop.f32.mrb[180].mxu1  ;;  %v5137_v14 = vpop.f32.mrb[150].mxu0 }
 0x43a   : > { %v6986_v50 = vmul.f32 %v6657_v23, %v5418_v25  ;;  %v4190_v22 = vadd.f32 %v12888_v35, %v4189_v49  ;;  %v4191_v45 = vpop.f32.mrb[181].mxu1  ;;  %v5139_v43 = vpop.f32.mrb[151].mxu0 }
 0x43b   : > { %v4192_v9 = vpop.f32.mrb[182].mxu1 }
 0x43c   : > { %v9742_v29 = vpack.c.bf16 %v6986_v50, %v6985_v16  ;;  %v5119_v48 = vadd.f32 %v5118_v6, %v4190_v22  ;;  %v4193_v34 = vadd.f32 %v12888_v35, %v4192_v9  ;;  %v4194_v21 = vpop.f32.mrb[183].mxu1 }
 0x43e   : > { %9906 = vst [vmem:[%s11640_s11 + $0x310] sm:$0xff] %v9742_v29   ;;  %v5419_v44 = vmax.f32 %v5119_v48, 0.0  ;;  %v5122_v60 = vadd.f32 %v5121_v57, %v4193_v34  ;;  %v6672_v57 = vpop.permute.xlu0 %6671  ;;  %v6697_v34 = vpop.permute.xlu1 %6696 }
 0x43f   : > { %v5142_v54 = vpop.f32.mrb[152].mxu0 }
 0x440   : > { %v5420_v33 = vmax.f32 %v5122_v60, 0.0  ;;  %v6987_v59 = vmul.f32 %v6662_v61, %v5419_v44  ;;  %v5144_v58 = vpop.f32.mrb[153].mxu0 }
 0x441   : > { %v4197_v24 = vpop.f32.mrb[184].mxu1  ;;  %v5145_v63 = vpop.f32.mrb[154].mxu0 }
 0x442   : > { %v6988_v39 = vmul.f32 %v6667_v0, %v5420_v33  ;;  %v4198_v1 = vadd.f32 %v12888_v35, %v4197_v24  ;;  %v4199_v28 = vpop.f32.mrb[185].mxu1  ;;  %v5147_v7 = vpop.f32.mrb[155].mxu0 }
 0x443   : > { %v4200_v51 = vpop.f32.mrb[186].mxu1 }
 0x444   : > { %v9747_v26 = vpack.c.bf16 %v6988_v39, %v6987_v59  ;;  %v5127_v8 = vadd.f32 %v5126_v55, %v4198_v1  ;;  %v4201_v31 = vadd.f32 %v12888_v35, %v4200_v51  ;;  %v4202_v6 = vpop.f32.mrb[187].mxu1 }
 0x446   : > { %9907 = vst [vmem:[%s11640_s11 + $0x318] sm:$0xff] %v9747_v26   ;;  %v5421_v2 = vmax.f32 %v5127_v8, 0.0  ;;  %v5130_v13 = vadd.f32 %v5129_v15, %v4201_v31  ;;  %v6682_v15 = vpop.permute.xlu0 %6681  ;;  %v6707_v31 = vpop.permute.xlu1 %6706 }
 0x447   : > { %v5150_v37 = vpop.f32.mrb[156].mxu0 }
 0x448   : > { %v5422_v27 = vmax.f32 %v5130_v13, 0.0  ;;  %v6989_v12 = vmul.f32 %v6672_v57, %v5421_v2  ;;  %v5152_v62 = vpop.f32.mrb[157].mxu0 }
 0x449   : > { %v4205_v56 = vpop.f32.mrb[188].mxu1  ;;  %v5153_v52 = vpop.f32.mrb[158].mxu0 }
 0x44a   : > { %v6990_v10 = vmul.f32 %v6677_v4, %v5422_v27  ;;  %v4206_v38 = vadd.f32 %v12888_v35, %v4205_v56  ;;  %v4207_v41 = vpop.f32.mrb[189].mxu1  ;;  %v5155_v32 = vpop.f32.mrb[159].mxu0 }
 0x44b   : > { %v4208_v46 = vpop.f32.mrb[190].mxu1 }
 0x44c   : > { %v9752_v18 = vpack.c.bf16 %v6990_v10, %v6989_v12  ;;  %v5135_v53 = vadd.f32 %v5134_v30, %v4206_v38  ;;  %v4209_v3 = vadd.f32 %v12888_v35, %v4208_v46  ;;  %v4210_v55 = vpop.f32.mrb[191].mxu1 }
 0x44e   : > { %9908 = vst [vmem:[%s11640_s11 + $0x320] sm:$0xff] %v9752_v18   ;;  %v5423_v20 = vmax.f32 %v5135_v53, 0.0  ;;  %v5138_v36 = vadd.f32 %v5137_v14, %v4209_v3  ;;  %v6692_v14 = vpop.permute.xlu0 %6691  ;;  %v6717_v3 = vpop.permute.xlu1 %6716 }
 0x44f   : > { %v5158_v42 = vpop.f32.mrb[160].mxu0 }
 0x450   : > { %v5424_v40 = vmax.f32 %v5138_v36, 0.0  ;;  %v6991_v17 = vmul.f32 %v6682_v15, %v5423_v20  ;;  %v5160_v16 = vpop.f32.mrb[161].mxu0 }
 0x451   : > { %v4213_v47 = vpop.f32.mrb[192].mxu1  ;;  %v5161_v9 = vpop.f32.mrb[162].mxu0 }
 0x452   : > { %v6992_v11 = vmul.f32 %v6687_v19, %v5424_v40  ;;  %v4214_v23 = vadd.f32 %v12888_v35, %v4213_v47  ;;  %v4215_v25 = vpop.f32.mrb[193].mxu1  ;;  %v5163_v5 = vpop.f32.mrb[163].mxu0 }
 0x453   : > { %v4216_v49 = vpop.f32.mrb[194].mxu1 }
 0x454   : > { %v9757_v50 = vpack.c.bf16 %v6992_v11, %v6991_v17  ;;  %v5143_v22 = vadd.f32 %v5142_v54, %v4214_v23  ;;  %v4217_v45 = vadd.f32 %v12888_v35, %v4216_v49  ;;  %v4218_v30 = vpop.f32.mrb[195].mxu1 }
 0x456   : > { %9909 = vst [vmem:[%s11640_s11 + $0x328] sm:$0xff] %v9757_v50   ;;  %v5425_v29 = vmax.f32 %v5143_v22, 0.0  ;;  %v5146_v48 = vadd.f32 %v5145_v63, %v4217_v45  ;;  %v6702_v63 = vpop.permute.xlu0 %6701  ;;  %v6727_v45 = vpop.permute.xlu1 %6726 }
 0x457   : > { %v5166_v61 = vpop.f32.mrb[164].mxu0 }
 0x458   : > { %v5426_v21 = vmax.f32 %v5146_v48, 0.0  ;;  %v6993_v44 = vmul.f32 %v6692_v14, %v5425_v29  ;;  %v5168_v59 = vpop.f32.mrb[165].mxu0 }
 0x459   : > { %v4221_v43 = vpop.f32.mrb[196].mxu1  ;;  %v5169_v51 = vpop.f32.mrb[166].mxu0 }
 0x45a   : > { %v6994_v60 = vmul.f32 %v6697_v34, %v5426_v21  ;;  %v4222_v0 = vadd.f32 %v12888_v35, %v4221_v43  ;;  %v4223_v33 = vpop.f32.mrb[197].mxu1  ;;  %v5171_v58 = vpop.f32.mrb[167].mxu0 }
 0x45b   : > { %v4224_v24 = vpop.f32.mrb[198].mxu1 }
 0x45c   : > { %v9762_v39 = vpack.c.bf16 %v6994_v60, %v6993_v44  ;;  %v5151_v1 = vadd.f32 %v5150_v37, %v4222_v0  ;;  %v4225_v28 = vadd.f32 %v12888_v35, %v4224_v24  ;;  %v4226_v54 = vpop.f32.mrb[199].mxu1 }
 0x45e   : > { %9910 = vst [vmem:[%s11640_s11 + $0x330] sm:$0xff] %v9762_v39   ;;  %v5427_v26 = vmax.f32 %v5151_v1, 0.0  ;;  %v5154_v8 = vadd.f32 %v5153_v52, %v4225_v28  ;;  %v6712_v52 = vpop.permute.xlu0 %6711  ;;  %v6737_v28 = vpop.permute.xlu1 %6736 }
 0x45f   : > { %v5174_v57 = vpop.f32.mrb[168].mxu0 }
 0x460   : > { %v5428_v6 = vmax.f32 %v5154_v8, 0.0  ;;  %v6995_v2 = vmul.f32 %v6702_v63, %v5427_v26  ;;  %v5176_v12 = vpop.f32.mrb[169].mxu0 }
 0x461   : > { %v4229_v7 = vpop.f32.mrb[200].mxu1  ;;  %v5177_v46 = vpop.f32.mrb[170].mxu0 }
 0x462   : > { %v6996_v13 = vmul.f32 %v6707_v31, %v5428_v6  ;;  %v4230_v4 = vadd.f32 %v12888_v35, %v4229_v7  ;;  %v4231_v27 = vpop.f32.mrb[201].mxu1  ;;  %v5179_v62 = vpop.f32.mrb[171].mxu0 }
 0x463   : > { %v4232_v56 = vpop.f32.mrb[202].mxu1 }
 0x464   : > { %v9767_v10 = vpack.c.bf16 %v6996_v13, %v6995_v2  ;;  %v5159_v38 = vadd.f32 %v5158_v42, %v4230_v4  ;;  %v4233_v41 = vadd.f32 %v12888_v35, %v4232_v56  ;;  %v4234_v37 = vpop.f32.mrb[203].mxu1 }
 0x466   : > { %9911 = vst [vmem:[%s11640_s11 + $0x338] sm:$0xff] %v9767_v10   ;;  %v5429_v18 = vmax.f32 %v5159_v38, 0.0  ;;  %v5162_v53 = vadd.f32 %v5161_v9, %v4233_v41  ;;  %v6722_v9 = vpop.permute.xlu0 %6721  ;;  %v6747_v41 = vpop.permute.xlu1 %6746 }
 0x467   : > { %v5182_v15 = vpop.f32.mrb[172].mxu0 }
 0x468   : > { %v5430_v55 = vmax.f32 %v5162_v53, 0.0  ;;  %v6997_v20 = vmul.f32 %v6712_v52, %v5429_v18  ;;  %v5184_v17 = vpop.f32.mrb[173].mxu0 }
 0x469   : > { %v4237_v32 = vpop.f32.mrb[204].mxu1  ;;  %v5185_v49 = vpop.f32.mrb[174].mxu0 }
 0x46a   : > { %v6998_v36 = vmul.f32 %v6717_v3, %v5430_v55  ;;  %v4238_v19 = vadd.f32 %v12888_v35, %v4237_v32  ;;  %v4239_v40 = vpop.f32.mrb[205].mxu1  ;;  %v5187_v16 = vpop.f32.mrb[175].mxu0 }
 0x46b   : > { %v4240_v47 = vpop.f32.mrb[206].mxu1 }
 0x46c   : > { %v9772_v11 = vpack.c.bf16 %v6998_v36, %v6997_v20  ;;  %v5167_v23 = vadd.f32 %v5166_v61, %v4238_v19  ;;  %v4241_v25 = vadd.f32 %v12888_v35, %v4240_v47  ;;  %v4242_v42 = vpop.f32.mrb[207].mxu1 }
 0x46e   : > { %9912 = vst [vmem:[%s11640_s11 + $0x340] sm:$0xff] %v9772_v11   ;;  %v5431_v50 = vmax.f32 %v5167_v23, 0.0  ;;  %v5170_v22 = vadd.f32 %v5169_v51, %v4241_v25  ;;  %v6732_v51 = vpop.permute.xlu0 %6731  ;;  %v6757_v25 = vpop.permute.xlu1 %6756 }
 0x46f   : > { %v5190_v14 = vpop.f32.mrb[176].mxu0 }
 0x470   : > { %v5432_v30 = vmax.f32 %v5170_v22, 0.0  ;;  %v6999_v29 = vmul.f32 %v6722_v9, %v5431_v50  ;;  %v5192_v44 = vpop.f32.mrb[177].mxu0 }
 0x471   : > { %v4245_v5 = vpop.f32.mrb[208].mxu1  ;;  %v5193_v24 = vpop.f32.mrb[178].mxu0 }
 0x472   : > { %v7000_v48 = vmul.f32 %v6727_v45, %v5432_v30  ;;  %v4246_v34 = vadd.f32 %v12888_v35, %v4245_v5  ;;  %v4247_v21 = vpop.f32.mrb[209].mxu1  ;;  %v5195_v59 = vpop.f32.mrb[179].mxu0 }
 0x473   : > { %v4248_v43 = vpop.f32.mrb[210].mxu1 }
 0x474   : > { %v9777_v60 = vpack.c.bf16 %v7000_v48, %v6999_v29  ;;  %v5175_v0 = vadd.f32 %v5174_v57, %v4246_v34  ;;  %v4249_v33 = vadd.f32 %v12888_v35, %v4248_v43  ;;  %v4250_v61 = vpop.f32.mrb[211].mxu1 }
 0x476   : > { %9913 = vst [vmem:[%s11640_s11 + $0x348] sm:$0xff] %v9777_v60   ;;  %v5433_v39 = vmax.f32 %v5175_v0, 0.0  ;;  %v5178_v1 = vadd.f32 %v5177_v46, %v4249_v33  ;;  %v6742_v46 = vpop.permute.xlu0 %6741  ;;  %v6767_v33 = vpop.permute.xlu1 %6766 }
 0x477   : > { %v5198_v63 = vpop.f32.mrb[180].mxu0 }
 0x478   : > { %v5434_v54 = vmax.f32 %v5178_v1, 0.0  ;;  %v7001_v26 = vmul.f32 %v6732_v51, %v5433_v39  ;;  %v5200_v2 = vpop.f32.mrb[181].mxu0 }
 0x479   : > { %v4253_v58 = vpop.f32.mrb[212].mxu1  ;;  %v5201_v56 = vpop.f32.mrb[182].mxu0 }
 0x47a   : > { %v7002_v8 = vmul.f32 %v6737_v28, %v5434_v54  ;;  %v4254_v31 = vadd.f32 %v12888_v35, %v4253_v58  ;;  %v4255_v6 = vpop.f32.mrb[213].mxu1  ;;  %v5203_v12 = vpop.f32.mrb[183].mxu0 }
 0x47b   : > { %v4256_v7 = vpop.f32.mrb[214].mxu1 }
 0x47c   : > { %v9782_v13 = vpack.c.bf16 %v7002_v8, %v7001_v26  ;;  %v5183_v4 = vadd.f32 %v5182_v15, %v4254_v31  ;;  %v4257_v27 = vadd.f32 %v12888_v35, %v4256_v7  ;;  %v4258_v57 = vpop.f32.mrb[215].mxu1  ;;  %v6777_v7 = vpop.permute.xlu1 %6776 }
 0x47e   : > { %9914 = vst [vmem:[%s11640_s11 + $0x350] sm:$0xff] %v9782_v13   ;;  %v5435_v10 = vmax.f32 %v5183_v4, 0.0  ;;  %v5186_v38 = vadd.f32 %v5185_v49, %v4257_v27  ;;  %v6752_v49 = vpop.permute.xlu0 %6751 }
 0x47f   : > { %v5206_v52 = vpop.f32.mrb[184].mxu0 }
 0x480   : > { %v5436_v37 = vmax.f32 %v5186_v38, 0.0  ;;  %v7003_v18 = vmul.f32 %v6742_v46, %v5435_v10  ;;  %v5208_v20 = vpop.f32.mrb[185].mxu0 }
 0x481   : > { %v4261_v62 = vpop.f32.mrb[216].mxu1  ;;  %v5209_v47 = vpop.f32.mrb[186].mxu0 }
 0x482   : > { %v7004_v53 = vmul.f32 %v6747_v41, %v5436_v37  ;;  %v4262_v3 = vadd.f32 %v12888_v35, %v4261_v62  ;;  %v4263_v55 = vpop.f32.mrb[217].mxu1  ;;  %v5211_v17 = vpop.f32.mrb[187].mxu0 }
 0x483   : > { %v4264_v32 = vpop.f32.mrb[218].mxu1 }
 0x484   : > { %v9787_v36 = vpack.c.bf16 %v7004_v53, %v7003_v18  ;;  %v5191_v19 = vadd.f32 %v5190_v14, %v4262_v3  ;;  %v4265_v40 = vadd.f32 %v12888_v35, %v4264_v32  ;;  %v4266_v15 = vpop.f32.mrb[219].mxu1  ;;  %v6787_v3 = vpop.permute.xlu1 %6786 }
 0x486   : > { %9915 = vst [vmem:[%s11640_s11 + $0x358] sm:$0xff] %v9787_v36   ;;  %v5437_v11 = vmax.f32 %v5191_v19, 0.0  ;;  %v5194_v23 = vadd.f32 %v5193_v24, %v4265_v40  ;;  %v6762_v24 = vpop.permute.xlu0 %6761 }
 0x487   : > { %v5214_v9 = vpop.f32.mrb[188].mxu0 }
 0x488   : > { %v5438_v42 = vmax.f32 %v5194_v23, 0.0  ;;  %v7005_v50 = vmul.f32 %v6752_v49, %v5437_v11  ;;  %v5216_v29 = vpop.f32.mrb[189].mxu0 }
 0x489   : > { %v4269_v16 = vpop.f32.mrb[220].mxu1  ;;  %v5217_v43 = vpop.f32.mrb[190].mxu0 }
 0x48a   : > { %v7006_v22 = vmul.f32 %v6757_v25, %v5438_v42  ;;  %v4270_v45 = vadd.f32 %v12888_v35, %v4269_v16  ;;  %v4271_v30 = vpop.f32.mrb[221].mxu1  ;;  %v5219_v44 = vpop.f32.mrb[191].mxu0 }
 0x48b   : > { %v4272_v5 = vpop.f32.mrb[222].mxu1  ;;  %v6772_v13 = vpop.permute.xlu0 %6771 }
 0x48c   : > { %v9792_v48 = vpack.c.bf16 %v7006_v22, %v7005_v50  ;;  %v5199_v34 = vadd.f32 %v5198_v63, %v4270_v45  ;;  %v4273_v21 = vadd.f32 %v12888_v35, %v4272_v5  ;;  %v4274_v14 = vpop.f32.mrb[223].mxu1 }
 0x48e   : > { %9916 = vst [vmem:[%s11640_s11 + $0x360] sm:$0xff] %v9792_v48   ;;  %v5439_v60 = vmax.f32 %v5199_v34, 0.0  ;;  %v5202_v0 = vadd.f32 %v5201_v56, %v4273_v21 }
 0x48f   : > { %v6782_v55 = vpop.permute.xlu0 %6781 }
 0x490   : > { %v5440_v61 = vmax.f32 %v5202_v0, 0.0  ;;  %v7007_v39 = vmul.f32 %v6762_v24, %v5439_v60 }
 0x491   : > { %v4277_v59 = vpop.f32.mrb[224].mxu1 }
 0x492   : > { %v7008_v1 = vmul.f32 %v6767_v33, %v5440_v61  ;;  %v4278_v28 = vadd.f32 %v12888_v35, %v4277_v59  ;;  %v4279_v54 = vpop.f32.mrb[225].mxu1 }
 0x493   : > { %v4280_v51 = vpop.f32.mrb[226].mxu1 }
 0x494   : > { %v9797_v58 = vpack.c.bf16 %v7008_v1, %v7007_v39  ;;  %v5207_v26 = vadd.f32 %v5206_v52, %v4278_v28  ;;  %v4281_v8 = vadd.f32 %v12888_v35, %v4280_v51  ;;  %v4282_v31 = vpop.f32.mrb[227].mxu1 }
 0x496   : > { %9917 = vst [vmem:[%s11640_s11 + $0x368] sm:$0xff] %v9797_v58   ;;  %v5441_v6 = vmax.f32 %v5207_v26, 0.0  ;;  %v5210_v63 = vadd.f32 %v5209_v47, %v4281_v8 }
 0x498   : > { %v5442_v2 = vmax.f32 %v5210_v63, 0.0  ;;  %v7009_v27 = vmul.f32 %v6772_v13, %v5441_v6 }
 0x499   : > { %v4285_v4 = vpop.f32.mrb[228].mxu1 }
 0x49a   : > { %v7010_v57 = vmul.f32 %v6777_v7, %v5442_v2  ;;  %v4286_v56 = vadd.f32 %v12888_v35, %v4285_v4  ;;  %v4287_v12 = vpop.f32.mrb[229].mxu1 }
 0x49b   : > { %v4288_v10 = vpop.f32.mrb[230].mxu1 }
 0x49c   : > { %v9802_v38 = vpack.c.bf16 %v7010_v57, %v7009_v27  ;;  %v5215_v41 = vadd.f32 %v5214_v9, %v4286_v56  ;;  %v4289_v37 = vadd.f32 %v12888_v35, %v4288_v10  ;;  %v4290_v46 = vpop.f32.mrb[231].mxu1 }
 0x49e   : > { %9918 = vst [vmem:[%s11640_s11 + $0x370] sm:$0xff] %v9802_v38   ;;  %v5443_v62 = vmax.f32 %v5215_v41, 0.0  ;;  %v5218_v18 = vadd.f32 %v5217_v43, %v4289_v37 }
 0x4a0   : > { %v5444_v53 = vmax.f32 %v5218_v18, 0.0  ;;  %v7011_v52 = vmul.f32 %v6782_v55, %v5443_v62 }
 0x4a2   : > { %v7012_v32 = vmul.f32 %v6787_v3, %v5444_v53 }
 0x4a4   : > { %v9807_v20 = vpack.c.bf16 %v7012_v32, %v7011_v52 }
 0x4a6   : > { %9919 = vst [vmem:[%s11640_s11 + $0x378] sm:$0xff] %v9807_v20  }
 0x4a7 PF: > { %s14_s15 = sadd.s32 1, %s11089_s15  }
 0x4a8   : > { %p11_p4 = scmp.ge.s32.totalorder %s14_s15, 8  }
 0x4aa   :  { %13 = sbr.rel (!%p11_p4) target bundleno = 1 (0x1), region = 69 }

// kernel: sp_middle_fhd_people_forward.7
= control target key start
LH: loop header
LB: loop body
LE: loop exit
PB: predicated region body
PF: predicated region fallthrough
CT: control target
= control target key end

     0   :  { %s4789_s15 = smov 0   ;;  %s5380_s0 = inlined_call_operand.vmem [shape: bf16[1408,432], index: 0, kind: input, shape index: {}]   ;;  %s5381_s1 = inlined_call_operand.vmem [shape: bf16[432,128], index: 1, kind: input, shape index: {}]   ;;  %s5382_s2 = inlined_call_operand.vmem [shape: f32[1,128], index: 2, kind: input, shape index: {}]   ;;  %s5383_s3 = inlined_call_operand.vmem [shape: f32[1408,1], index: 3, kind: input, shape index: {}]   ;;  %s5384_s4 = inlined_call_operand.vmem [shape: bf16[1408,128], index: 4, kind: output, shape index: {}]  }
   0x1 LB: > { %s3577_s16 = sadd.s32 4294967295, %s4761_s15   ;;  %p3581_p0 = scmp.ge.s32.totalorder %s4761_s15, 1  ;;  %s4761_s15 = sphi %s4789_s15, %s14_s15  }
   0x2   : > { %p175_p1 = scmp.lt.s32.totalorder %s4761_s15, 3 }
   0x4   : > { %p176_p2 = pnand %p3581_p0, %p175_p1 }
   0x5   : > { %v4463_v0 = vld [vmem:[%s5381_s1] sm:$0xff] (!%p176_p2)   ;;  %v4763_v1 = vmov (!%p176_p2), 0   ;;  %v4464_v2 = vld [vmem:[%s5381_s1 + $0x8] sm:$0xff] (!%p176_p2)   ;;  %v4465_v4 = vld [vmem:[%s5381_s1 + $0x10] sm:$0xff] (!%p176_p2)   ;;  %s207_s29 = smul.u32 (!%p176_p2), 88, %s3577_s16  ;;  %vm1462_vm0 = vcmask (!%p176_p2), 392192  }
   0x6   : > { %179 = sbr.rel (%p176_p2) target bundleno = 639 (0x27f), region = 36  ;;  %1595 = vmatprep.subr.bf16.mxu1 (!%p176_p2), %v4763_v1  ;;  %1980 = vmatprep.subr.bf16.mxu0 (!%p176_p2), %v4763_v1  ;;  %v4468_v3 = vld [vmem:[%s5381_s1 + $0x80] sm:$0xff] (!%p176_p2)   ;;  %v4470_v5 = vld [vmem:[%s5381_s1 + $0x88] sm:$0xff] (!%p176_p2)   ;;  %v4466_v6 = vld [vmem:[%s5381_s1 + $0x18] sm:$0xff] (!%p176_p2)  }
   0x7   : > { %1596 = vmatpush1.bf16.msra.mxu1 (!%p176_p2), %v4463_v0  ;;  %4461 = vset.pattern.permute.xlu0 (!%p176_p2), %v4763_v1  ;;  %v4472_v7 = vld [vmem:[%s5381_s1 + $0x90] sm:$0xff] (!%p176_p2)   ;;  %v4467_v8 = vld [vmem:[%s5381_s1 + $0x20] sm:$0xff] (!%p176_p2)   ;;  %p208_p3 = scmp.lt.s32.totalorder (!%p176_p2), %s207_s29, 175  ;;  %v4474_v9 = vld [vmem:[%s5381_s1 + $0x98] sm:$0xff] (!%p176_p2)  }
   0x8   : > { %1597 = vmatprep.subr.bf16.mxu1 (!%p176_p2), %v4763_v1  ;;  %4462 = vset.pattern.permute.xlu1 (!%p176_p2), %v4763_v1  ;;  %v4469_v10 = vld [vmem:[%s5381_s1 + $0x28] sm:$0xff] (!%p176_p2)   ;;  %v4476_v11 = vld [vmem:[%s5381_s1 + $0xa0] sm:$0xff] (!%p176_p2)   ;;  %v4471_v12 = vld [vmem:[%s5381_s1 + $0x30] sm:$0xff] (!%p176_p2)  }
   0x9   : > { %1981 = vmatpush1.bf16.msra.mxu0 (!%p176_p2), %v4468_v3  ;;  %v4478_v13 = vld [vmem:[%s5381_s1 + $0xa8] sm:$0xff] (!%p176_p2)   ;;  %v4473_v14 = vld [vmem:[%s5381_s1 + $0x38] sm:$0xff] (!%p176_p2)   ;;  %v4480_v15 = vld [vmem:[%s5381_s1 + $0xb0] sm:$0xff] (!%p176_p2)  }
   0xa   : > { %1982 = vmatprep.subr.bf16.mxu0 (!%p176_p2), %v4763_v1  ;;  %v4475_v18 = vld [vmem:[%s5381_s1 + $0x40] sm:$0xff] (!%p176_p2)   ;;  %v4482_v19 = vld [vmem:[%s5381_s1 + $0xb8] sm:$0xff] (!%p176_p2)   ;;  %v4477_v20 = vld [vmem:[%s5381_s1 + $0x48] sm:$0xff] (!%p176_p2)  }
   0xb   : > { %1598 = vmatpush1.bf16.msra.mxu1 (!%p176_p2), %v4464_v2  ;;  %v4484_v21 = vld [vmem:[%s5381_s1 + $0xc0] sm:$0xff] (!%p176_p2)   ;;  %v4479_v22 = vld [vmem:[%s5381_s1 + $0x50] sm:$0xff] (!%p176_p2)   ;;  %v4486_v23 = vld [vmem:[%s5381_s1 + $0xc8] sm:$0xff] (!%p176_p2)  }
   0xc   : > { %1599 = vmatprep.subr.bf16.mxu1 (!%p176_p2), %v4763_v1  ;;  %v4481_v24 = vld [vmem:[%s5381_s1 + $0x58] sm:$0xff] (!%p176_p2)   ;;  %v4488_v25 = vld [vmem:[%s5381_s1 + $0xd0] sm:$0xff] (!%p176_p2)   ;;  %v4483_v26 = vld [vmem:[%s5381_s1 + $0x60] sm:$0xff] (!%p176_p2)  }
   0xd   : > { %1983 = vmatpush1.bf16.msra.mxu0 %v4470_v5  ;;  %s5386_s29 = smov (!%p208_p3, %s207_s29), 175  ;;  %v4485_v29 = vld [vmem:[%s5381_s1 + $0x68] sm:$0xff]   ;;  %v4487_v30 = vld [vmem:[%s5381_s1 + $0x70] sm:$0xff]   ;;  %v4489_v33 = vld [vmem:[%s5381_s1 + $0x78] sm:$0xff]  }
   0xe   : > { %1984 = vmatprep.subr.bf16.mxu0 %v4763_v1  ;;  %s3924_s17 = sshll.u32 %s5386_s29, 4  ;;  %s3584_s24 = sshll.u32 %s5386_s29, 3 }
   0xf   : > { %1600 = vmatpush1.bf16.msra.mxu1 %v4465_v4  ;;  %s4857_s22 = scalar_lea.vmem %s5380_s0, %s3924_s17  ;;  %s4923_s30 = scalar_lea.vmem %s5383_s3, %s3584_s24 }
  0x10   : > { %1601 = vmatprep.subr.bf16.mxu1 %v4763_v1  ;;  %v4492_v16 = vld [vmem:[%s4857_s22 + $0xc] ss:$16 sps:$4 sm:$0xff]   ;;  %v4495_v17 = vld [vmem:[%s4857_s22 + $0x4] ss:$16 sps:$4 sm:$0xff]   ;;  %v4490_v27 = vld [vmem:[%s4857_s22 + $0x8] ss:$16 sps:$4 sm:$0xff]  }
  0x11   : > { %1985 = vmatpush1.bf16.msra.mxu0 %v4472_v7  ;;  %3790 = vmatprep.mubr.msk.bf16.mxu0 %vm1462_vm0, %v4492_v16  ;;  %v4496_v28 = vld [vmem:[%s4857_s22 + $0x2c] ss:$16 sps:$4 sm:$0xff]   ;;  %v4500_v31 = vld [vmem:[%s4857_s22 + $0x28] ss:$16 sps:$4 sm:$0xff]   ;;  %v2453_v34 = vld [vmem:[%s4923_s30] sm:$0xff]  ;;  %s3585_s9 = sshll.u32 %s5386_s29, 2 }
  0x12   : > { %1986 = vmatprep.subr.bf16.mxu0 %v4763_v1  ;;  %1627 = vmatprep.mubr.bf16.mxu1 %v4495_v17  ;;  %v4502_v32 = vld [vmem:[%s4857_s22 + $0x4c] ss:$16 sps:$4 sm:$0xff]   ;;  %v2455_v35 = vld [vmem:[%s4923_s30 + $0x10] sm:$0xff]  ;;  %v4506_v39 = vld [vmem:[%s4857_s22 + $0x48] ss:$16 sps:$4 sm:$0xff]   ;;  %s5171_s12 = scalar_lea.vmem %s5384_s4, %s3585_s9 }
  0x13   : > { %1602 = vmatpush1.bf16.msra.mxu1 %v4466_v6  ;;  %v4493_v36 = vld [vmem:[%s4857_s22] ss:$16 sps:$4 sm:$0xff]   ;;  %2543 = vperm.xlu0 %4461, %v2453_v34   ;;  %v2454_v37 = vld [vmem:[%s4923_s30 + $0x8] sm:$0xff]  ;;  %v4498_v38 = vld [vmem:[%s4857_s22 + $0x24] ss:$16 sps:$4 sm:$0xff]  }
  0x14   : > { %1603 = vmatprep.subr.bf16.mxu1 %v4763_v1  ;;  %2553 = vperm.xlu1 %4462, %v2455_v35   ;;  %v2456_v40 = vld [vmem:[%s4923_s30 + $0x18] sm:$0xff]  ;;  %v2458_v42 = vld [vmem:[%s4923_s30 + $0x28] sm:$0xff]  ;;  %v2457_v43 = vld [vmem:[%s4923_s30 + $0x20] sm:$0xff] }
  0x15   : > { %1987 = vmatpush1.bf16.msra.mxu0 %v4474_v9  ;;  %v4508_v41 = vld [vmem:[%s4857_s22 + $0x6c] ss:$16 sps:$4 sm:$0xff]   ;;  %v4501_v44 = vld [vmem:[%s4857_s22 + $0x20] ss:$16 sps:$4 sm:$0xff]   ;;  %v4504_v47 = vld [vmem:[%s4857_s22 + $0x44] ss:$16 sps:$4 sm:$0xff]  }
  0x16   : > { %1988 = vmatprep.subr.bf16.mxu0 %v4763_v1  ;;  %v2460_v45 = vld [vmem:[%s4923_s30 + $0x38] sm:$0xff]  ;;  %v2459_v46 = vld [vmem:[%s4923_s30 + $0x30] sm:$0xff]  ;;  %v2462_v50 = vld [vmem:[%s4923_s30 + $0x48] sm:$0xff] }
  0x17   : > { %1604 = vmatpush1.bf16.msra.mxu1 %v4467_v8  ;;  %2548 = vperm.xlu0 %4461, %v2454_v37   ;;  %v4512_v48 = vld [vmem:[%s4857_s22 + $0x68] ss:$16 sps:$4 sm:$0xff]   ;;  %v4514_v49 = vld [vmem:[%s4857_s22 + $0x8c] ss:$16 sps:$4 sm:$0xff]   ;;  %v2461_v51 = vld [vmem:[%s4923_s30 + $0x40] sm:$0xff] }
  0x18   : > { %1605 = vmatprep.subr.bf16.mxu1 %v4763_v1  ;;  %2558 = vperm.xlu1 %4462, %v2456_v40   ;;  %v4507_v52 = vld [vmem:[%s4857_s22 + $0x40] ss:$16 sps:$4 sm:$0xff]   ;;  %v2464_v53 = vld [vmem:[%s4923_s30 + $0x58] sm:$0xff]  ;;  %v4510_v55 = vld [vmem:[%s4857_s22 + $0x64] ss:$16 sps:$4 sm:$0xff]  }
  0x19   : > { %1989 = vmatpush1.bf16.msra.mxu0 %v4476_v11  ;;  %v2463_v54 = vld [vmem:[%s4923_s30 + $0x50] sm:$0xff]  ;;  %v4518_v56 = vld [vmem:[%s4857_s22 + $0x88] ss:$16 sps:$4 sm:$0xff]   ;;  %v4520_v57 = vld [vmem:[%s4857_s22 + $0xac] ss:$16 sps:$4 sm:$0xff]  }
  0x1a   : > { %1990 = vmatprep.subr.bf16.mxu0 %v4763_v1  ;;  %v2466_v58 = vld [vmem:[%s4923_s30 + $0x68] sm:$0xff]  ;;  %v2465_v59 = vld [vmem:[%s4923_s30 + $0x60] sm:$0xff]  ;;  %v2468_v61 = vld [vmem:[%s4923_s30 + $0x78] sm:$0xff] }
  0x1b   : > { %1606 = vmatpush1.bf16.msra.mxu1 %v4469_v10  ;;  %2563 = vperm.xlu0 %4461, %v2457_v43   ;;  %v4513_v60 = vld [vmem:[%s4857_s22 + $0x60] ss:$16 sps:$4 sm:$0xff]   ;;  %v4516_v63 = vld [vmem:[%s4857_s22 + $0x84] ss:$16 sps:$4 sm:$0xff]   ;;  %v4524_v0 = vld [vmem:[%s4857_s22 + $0xa8] ss:$16 sps:$4 sm:$0xff]  }
  0x1c   : > { %1607 = vmatprep.subr.bf16.mxu1 %v4763_v1  ;;  %2568 = vperm.xlu1 %4462, %v2458_v42   ;;  %v2467_v62 = vld [vmem:[%s4923_s30 + $0x70] sm:$0xff]  ;;  %v2470_v2 = vld [vmem:[%s4923_s30 + $0x88] sm:$0xff]  ;;  %v2469_v3 = vld [vmem:[%s4923_s30 + $0x80] sm:$0xff] }
  0x1d   : > { %1991 = vmatpush1.bf16.msra.mxu0 %v4478_v13  ;;  %v4519_v4 = vld [vmem:[%s4857_s22 + $0x80] ss:$16 sps:$4 sm:$0xff]   ;;  %v2472_v5 = vld [vmem:[%s4923_s30 + $0x98] sm:$0xff]  ;;  %v4522_v7 = vld [vmem:[%s4857_s22 + $0xa4] ss:$16 sps:$4 sm:$0xff]  }
  0x1e   : > { %1992 = vmatprep.subr.bf16.mxu0 %v4763_v1  ;;  %v2471_v6 = vld [vmem:[%s4923_s30 + $0x90] sm:$0xff]  ;;  %v4530_v8 = vld [vmem:[%s4857_s22 + $0xc8] ss:$16 sps:$4 sm:$0xff]   ;;  %v4532_v9 = vld [vmem:[%s4857_s22 + $0xec] ss:$16 sps:$4 sm:$0xff]  }
  0x1f   : > { %1608 = vmatpush1.bf16.msra.mxu1 %v4471_v12  ;;  %2573 = vperm.xlu0 %4461, %v2459_v46   ;;  %v2474_v10 = vld [vmem:[%s4923_s30 + $0xa8] sm:$0xff]  ;;  %v2473_v11 = vld [vmem:[%s4923_s30 + $0xa0] sm:$0xff]  ;;  %v2476_v13 = vld [vmem:[%s4923_s30 + $0xb8] sm:$0xff] }
  0x20   : > { %1609 = vmatprep.subr.bf16.mxu1 %v4763_v1  ;;  %2578 = vperm.xlu1 %4462, %v2460_v45   ;;  %v4525_v12 = vld [vmem:[%s4857_s22 + $0xa0] ss:$16 sps:$4 sm:$0xff]   ;;  %v4536_v16 = vld [vmem:[%s4857_s22 + $0xe8] ss:$16 sps:$4 sm:$0xff]   ;;  %v4538_v17 = vld [vmem:[%s4857_s22 + $0x10c] ss:$16 sps:$4 sm:$0xff]  }
  0x21   : > { %1993 = vmatpush1.bf16.msra.mxu0 %v4480_v15  ;;  %v4528_v15 = vld [vmem:[%s4857_s22 + $0xc4] ss:$16 sps:$4 sm:$0xff]   ;;  %v2486_v34 = vld [vmem:[%s4923_s30 + $0x108] sm:$0xff]  ;;  %v2488_v37 = vld [vmem:[%s4923_s30 + $0x118] sm:$0xff] }
  0x22   : > { %1994 = vmatprep.subr.bf16.mxu0 %v4763_v1  ;;  %v2485_v35 = vld [vmem:[%s4923_s30 + $0x100] sm:$0xff]  ;;  %v4554_v40 = vld [vmem:[%s4857_s22 + $0x148] ss:$16 sps:$4 sm:$0xff]   ;;  %v2491_v46 = vld [vmem:[%s4923_s30 + $0x130] sm:$0xff] }
  0x23   : > { %1610 = vmatpush1.bf16.msra.mxu1 %v4473_v14  ;;  %2583 = vperm.xlu0 %4461, %v2461_v51   ;;  %v2475_v14 = vld [vmem:[%s4923_s30 + $0xb0] sm:$0xff]  ;;  %v2490_v42 = vld [vmem:[%s4923_s30 + $0x128] sm:$0xff]  ;;  %v2489_v43 = vld [vmem:[%s4923_s30 + $0x120] sm:$0xff] }
  0x24   : > { %1611 = vmatprep.subr.bf16.mxu1 %v4763_v1  ;;  %2588 = vperm.xlu1 %4462, %v2462_v50   ;;  %v2492_v45 = vld [vmem:[%s4923_s30 + $0x138] sm:$0xff]  ;;  %v2494_v50 = vld [vmem:[%s4923_s30 + $0x148] sm:$0xff]  ;;  %v2493_v51 = vld [vmem:[%s4923_s30 + $0x140] sm:$0xff] }
  0x25   : > { %1995 = vmatpush1.bf16.msra.mxu0 %v4482_v19  ;;  %v2477_v19 = vld [vmem:[%s4923_s30 + $0xc0] sm:$0xff] }
  0x26   : > { %1996 = vmatprep.subr.bf16.mxu0 %v4763_v1 }
  0x27   : > { %1612 = vmatpush1.bf16.msra.mxu1 %v4475_v18  ;;  %2593 = vperm.xlu0 %4461, %v2463_v54   ;;  %v2478_v18 = vld [vmem:[%s4923_s30 + $0xc8] sm:$0xff]  ;;  %v2495_v54 = vld [vmem:[%s4923_s30 + $0x150] sm:$0xff] }
  0x28   : > { %1613 = vmatprep.subr.bf16.mxu1 %v4763_v1  ;;  %2598 = vperm.xlu1 %4462, %v2464_v53   ;;  %v2496_v53 = vld [vmem:[%s4923_s30 + $0x158] sm:$0xff] }
  0x29   : > { %1997 = vmatpush1.bf16.msra.mxu0 %v4484_v21  ;;  %v2480_v21 = vld [vmem:[%s4923_s30 + $0xd8] sm:$0xff] }
  0x2a   : > { %1998 = vmatprep.subr.bf16.mxu0 %v4763_v1 }
  0x2b   : > { %1614 = vmatpush1.bf16.msra.mxu1 %v4477_v20  ;;  %2603 = vperm.xlu0 %4461, %v2465_v59   ;;  %v4531_v20 = vld [vmem:[%s4857_s22 + $0xc0] ss:$16 sps:$4 sm:$0xff]  }
  0x2c   : > { %1615 = vmatprep.subr.bf16.mxu1 %v4763_v1  ;;  %2608 = vperm.xlu1 %4462, %v2466_v58   ;;  %v2498_v58 = vld [vmem:[%s4923_s30 + $0x168] sm:$0xff]  ;;  %v2497_v59 = vld [vmem:[%s4923_s30 + $0x160] sm:$0xff] }
  0x2d   : > { %1999 = vmatpush1.bf16.msra.mxu0 %v4486_v23  ;;  %v4534_v23 = vld [vmem:[%s4857_s22 + $0xe4] ss:$16 sps:$4 sm:$0xff]  }
  0x2e   : > { %2000 = vmatprep.subr.bf16.mxu0 %v4763_v1 }
  0x2f   : > { %1616 = vmatpush1.bf16.msra.mxu1 %v4479_v22  ;;  %2613 = vperm.xlu0 %4461, %v2467_v62   ;;  %v2479_v22 = vld [vmem:[%s4923_s30 + $0xd0] sm:$0xff] }
  0x30   : > { %1617 = vmatprep.subr.bf16.mxu1 %v4763_v1  ;;  %2618 = vperm.xlu1 %4462, %v2468_v61   ;;  %v2500_v61 = vld [vmem:[%s4923_s30 + $0x178] sm:$0xff]  ;;  %v2499_v62 = vld [vmem:[%s4923_s30 + $0x170] sm:$0xff] }
  0x31   : > { %2001 = vmatpush1.bf16.msra.mxu0 %v4488_v25  ;;  %v4544_v25 = vld [vmem:[%s4857_s22 + $0x12c] ss:$16 sps:$4 sm:$0xff]  }
  0x33   : > { %1618 = vmatpush1.bf16.msra.mxu1 %v4481_v24  ;;  %2623 = vperm.xlu0 %4461, %v2469_v3   ;;  %v4542_v24 = vld [vmem:[%s4857_s22 + $0x108] ss:$16 sps:$4 sm:$0xff]   ;;  %v2501_v3 = vld [vmem:[%s4923_s30 + $0x180] sm:$0xff] }
  0x34   : > { %1619 = vmatprep.subr.bf16.mxu1 %v4763_v1  ;;  %2013 = vmatmul.mubr.bf16.vlgmr.msra.gmra.mrb[0].mxu0 %v4490_v27  ;;  %v2481_v27 = vld [vmem:[%s4923_s30 + $0xe0] sm:$0xff] }
  0x35   : > { %3791 = vmatprep.mubr.msk.bf16.mxu0 %vm1462_vm0, %v4496_v28  ;;  %2628 = vperm.xlu1 %4462, %v2470_v2   ;;  %v4537_v28 = vld [vmem:[%s4857_s22 + $0xe0] ss:$16 sps:$4 sm:$0xff]   ;;  %v2502_v2 = vld [vmem:[%s4923_s30 + $0x188] sm:$0xff] }
  0x37   : > { %1620 = vmatpush1.bf16.msra.mxu1 %v4483_v26  ;;  %2633 = vperm.xlu0 %4461, %v2471_v6   ;;  %v2482_v26 = vld [vmem:[%s4923_s30 + $0xe8] sm:$0xff]  ;;  %v2503_v6 = vld [vmem:[%s4923_s30 + $0x190] sm:$0xff] }
  0x38   : > { %1621 = vmatprep.subr.bf16.mxu1 %v4763_v1 }
  0x39   : > { %2638 = vperm.xlu1 %4462, %v2472_v5   ;;  %v2504_v5 = vld [vmem:[%s4923_s30 + $0x198] sm:$0xff] }
  0x3b   : > { %1622 = vmatpush1.bf16.msra.mxu1 %v4485_v29  ;;  %2643 = vperm.xlu0 %4461, %v2473_v11   ;;  %v2484_v29 = vld [vmem:[%s4923_s30 + $0xf8] sm:$0xff]  ;;  %v2505_v11 = vld [vmem:[%s4923_s30 + $0x1a0] sm:$0xff] }
  0x3c   : > { %1623 = vmatprep.subr.bf16.mxu1 %v4763_v1  ;;  %2021 = vmatmul.mubr.bf16.gmra.mrb[4].mxu0 %v4500_v31  ;;  %v4540_v31 = vld [vmem:[%s4857_s22 + $0x104] ss:$16 sps:$4 sm:$0xff]  }
  0x3d   : > { %3792 = vmatprep.mubr.msk.bf16.mxu0 %vm1462_vm0, %v4502_v32  ;;  %2648 = vperm.xlu1 %4462, %v2474_v10   ;;  %v4548_v32 = vld [vmem:[%s4857_s22 + $0x128] ss:$16 sps:$4 sm:$0xff]  }
  0x3e   : > { %v2506_v10 = vld [vmem:[%s4923_s30 + $0x1a8] sm:$0xff] }
  0x3f   : > { %1624 = vmatpush1.bf16.msra.mxu1 %v4487_v30  ;;  %2653 = vperm.xlu0 %4461, %v2475_v14   ;;  %v2483_v30 = vld [vmem:[%s4923_s30 + $0xf0] sm:$0xff] }
  0x40   : > { %1625 = vmatprep.subr.bf16.mxu1 %v4763_v1  ;;  %v4526_v1 = vld [vmem:[%s4857_s22 + $0xcc] ss:$16 sps:$4 sm:$0xff]   ;;  %v2507_v14 = vld [vmem:[%s4923_s30 + $0x1b0] sm:$0xff] }
  0x41   : > { %2658 = vperm.xlu1 %4462, %v2476_v13   ;;  %v2508_v13 = vld [vmem:[%s4923_s30 + $0x1b8] sm:$0xff] }
  0x43   : > { %1626 = vmatpush1.bf16.msra.mxu1 %v4489_v33  ;;  %2663 = vperm.xlu0 %4461, %v2477_v19   ;;  %v4550_v33 = vld [vmem:[%s4857_s22 + $0x14c] ss:$16 sps:$4 sm:$0xff]   ;;  %v2509_v19 = vld [vmem:[%s4923_s30 + $0x1c0] sm:$0xff] }
  0x44   : > { %2029 = vmatmul.mubr.bf16.gmra.mrb[8].mxu0 %v4506_v39  ;;  %v4546_v39 = vld [vmem:[%s4857_s22 + $0x124] ss:$16 sps:$4 sm:$0xff]  }
  0x45   : > { %3793 = vmatprep.mubr.msk.bf16.mxu0 %vm1462_vm0, %v4508_v41  ;;  %2668 = vperm.xlu1 %4462, %v2478_v18   ;;  %v4556_v41 = vld [vmem:[%s4857_s22 + $0x16c] ss:$16 sps:$4 sm:$0xff]  }
  0x46   : > { %1628 = vmatmul.mubr.bf16.vlgmr.msra.gmra.mrb[0].mxu1 %v4493_v36  ;;  %v4543_v36 = vld [vmem:[%s4857_s22 + $0x100] ss:$16 sps:$4 sm:$0xff]   ;;  %v2510_v18 = vld [vmem:[%s4923_s30 + $0x1c8] sm:$0xff] }
  0x47   : > { %1635 = vmatprep.mubr.bf16.mxu1 %v4498_v38  ;;  %2673 = vperm.xlu0 %4461, %v2479_v22   ;;  %v2487_v38 = vld [vmem:[%s4923_s30 + $0x110] sm:$0xff] }
  0x48   : > { %v2511_v22 = vld [vmem:[%s4923_s30 + $0x1d0] sm:$0xff] }
  0x49   : > { %2678 = vperm.xlu1 %4462, %v2480_v21   ;;  %v2512_v21 = vld [vmem:[%s4923_s30 + $0x1d8] sm:$0xff] }
  0x4b   : > { %2683 = vperm.xlu0 %4461, %v2481_v27   ;;  %v2513_v27 = vld [vmem:[%s4923_s30 + $0x1e0] sm:$0xff] }
  0x4c   : > { %2037 = vmatmul.mubr.bf16.gmra.mrb[12].mxu0 %v4512_v48  ;;  %v4560_v48 = vld [vmem:[%s4857_s22 + $0x168] ss:$16 sps:$4 sm:$0xff]  }
  0x4d   : > { %3794 = vmatprep.mubr.msk.bf16.mxu0 %vm1462_vm0, %v4514_v49  ;;  %2688 = vperm.xlu1 %4462, %v2482_v26   ;;  %v4562_v49 = vld [vmem:[%s4857_s22 + $0x18c] ss:$16 sps:$4 sm:$0xff]  }
  0x4e   : > { %1636 = vmatmul.mubr.bf16.gmra.mrb[4].mxu1 %v4501_v44  ;;  %v4549_v44 = vld [vmem:[%s4857_s22 + $0x120] ss:$16 sps:$4 sm:$0xff]   ;;  %v2514_v26 = vld [vmem:[%s4923_s30 + $0x1e8] sm:$0xff] }
  0x4f   : > { %1643 = vmatprep.mubr.bf16.mxu1 %v4504_v47  ;;  %2693 = vperm.xlu0 %4461, %v2483_v30   ;;  %v4552_v47 = vld [vmem:[%s4857_s22 + $0x144] ss:$16 sps:$4 sm:$0xff]  }
  0x50   : > { %v2515_v30 = vld [vmem:[%s4923_s30 + $0x1f0] sm:$0xff] }
  0x51   : > { %2698 = vperm.xlu1 %4462, %v2484_v29   ;;  %v2516_v29 = vld [vmem:[%s4923_s30 + $0x1f8] sm:$0xff] }
  0x53   : > { %2703 = vperm.xlu0 %4461, %v2485_v35   ;;  %v2517_v35 = vld [vmem:[%s4923_s30 + $0x200] sm:$0xff] }
  0x54   : > { %2045 = vmatmul.mubr.bf16.gmra.mrb[16].mxu0 %v4518_v56  ;;  %v4566_v56 = vld [vmem:[%s4857_s22 + $0x188] ss:$16 sps:$4 sm:$0xff]  }
  0x55   : > { %3795 = vmatprep.mubr.msk.bf16.mxu0 %vm1462_vm0, %v4520_v57  ;;  %2708 = vperm.xlu1 %4462, %v2486_v34   ;;  %v4568_v57 = vld [vmem:[%s4857_s22 + $0x1ac] ss:$16 sps:$4 sm:$0xff]  }
  0x56   : > { %1644 = vmatmul.mubr.bf16.gmra.mrb[8].mxu1 %v4507_v52  ;;  %v4555_v52 = vld [vmem:[%s4857_s22 + $0x140] ss:$16 sps:$4 sm:$0xff]   ;;  %v2518_v34 = vld [vmem:[%s4923_s30 + $0x208] sm:$0xff] }
  0x57   : > { %1651 = vmatprep.mubr.bf16.mxu1 %v4510_v55  ;;  %2713 = vperm.xlu0 %4461, %v2487_v38   ;;  %v4558_v55 = vld [vmem:[%s4857_s22 + $0x164] ss:$16 sps:$4 sm:$0xff]  }
  0x58   : > { %v2519_v38 = vld [vmem:[%s4923_s30 + $0x210] sm:$0xff] }
  0x59   : > { %2718 = vperm.xlu1 %4462, %v2488_v37   ;;  %v2520_v37 = vld [vmem:[%s4923_s30 + $0x218] sm:$0xff] }
  0x5b   : > { %2723 = vperm.xlu0 %4461, %v2489_v43   ;;  %v2521_v43 = vld [vmem:[%s4923_s30 + $0x220] sm:$0xff] }
  0x5c   : > { %2053 = vmatmul.mubr.bf16.gmra.mrb[20].mxu0 %v4524_v0  ;;  %v4572_v0 = vld [vmem:[%s4857_s22 + $0x1a8] ss:$16 sps:$4 sm:$0xff]  }
  0x5d   : > { %3796 = vmatprep.mubr.msk.bf16.mxu0 %vm1462_vm0, %v4526_v1  ;;  %2728 = vperm.xlu1 %4462, %v2490_v42   ;;  %v4574_v1 = vld [vmem:[%s4857_s22 + $0x1cc] ss:$16 sps:$4 sm:$0xff]  }
  0x5e   : > { %1652 = vmatmul.mubr.bf16.gmra.mrb[12].mxu1 %v4513_v60  ;;  %v4561_v60 = vld [vmem:[%s4857_s22 + $0x160] ss:$16 sps:$4 sm:$0xff]   ;;  %v2522_v42 = vld [vmem:[%s4923_s30 + $0x228] sm:$0xff] }
  0x5f   : > { %1659 = vmatprep.mubr.bf16.mxu1 %v4516_v63  ;;  %2733 = vperm.xlu0 %4461, %v2491_v46   ;;  %v4564_v63 = vld [vmem:[%s4857_s22 + $0x184] ss:$16 sps:$4 sm:$0xff]  }
  0x60   : > { %v2523_v46 = vld [vmem:[%s4923_s30 + $0x230] sm:$0xff] }
  0x61   : > { %2738 = vperm.xlu1 %4462, %v2492_v45   ;;  %v2524_v45 = vld [vmem:[%s4923_s30 + $0x238] sm:$0xff] }
  0x63   : > { %2743 = vperm.xlu0 %4461, %v2493_v51   ;;  %v2525_v51 = vld [vmem:[%s4923_s30 + $0x240] sm:$0xff] }
  0x64   : > { %2061 = vmatmul.mubr.bf16.gmra.mrb[24].mxu0 %v4530_v8  ;;  %v4578_v8 = vld [vmem:[%s4857_s22 + $0x1c8] ss:$16 sps:$4 sm:$0xff]  }
  0x65   : > { %3797 = vmatprep.mubr.msk.bf16.mxu0 %vm1462_vm0, %v4532_v9  ;;  %2748 = vperm.xlu1 %4462, %v2494_v50   ;;  %v4580_v9 = vld [vmem:[%s4857_s22 + $0x1ec] ss:$16 sps:$4 sm:$0xff]  }
  0x66   : > { %1660 = vmatmul.mubr.bf16.gmra.mrb[16].mxu1 %v4519_v4  ;;  %v4567_v4 = vld [vmem:[%s4857_s22 + $0x180] ss:$16 sps:$4 sm:$0xff]   ;;  %v2526_v50 = vld [vmem:[%s4923_s30 + $0x248] sm:$0xff] }
  0x67   : > { %1667 = vmatprep.mubr.bf16.mxu1 %v4522_v7  ;;  %2753 = vperm.xlu0 %4461, %v2495_v54   ;;  %v4570_v7 = vld [vmem:[%s4857_s22 + $0x1a4] ss:$16 sps:$4 sm:$0xff]  }
  0x68   : > { %v2527_v54 = vld [vmem:[%s4923_s30 + $0x250] sm:$0xff] }
  0x69   : > { %2758 = vperm.xlu1 %4462, %v2496_v53   ;;  %v2528_v53 = vld [vmem:[%s4923_s30 + $0x258] sm:$0xff] }
  0x6b   : > { %2763 = vperm.xlu0 %4461, %v2497_v59   ;;  %v2529_v59 = vld [vmem:[%s4923_s30 + $0x260] sm:$0xff] }
  0x6c   : > { %2069 = vmatmul.mubr.bf16.gmra.mrb[28].mxu0 %v4536_v16  ;;  %v4584_v16 = vld [vmem:[%s4857_s22 + $0x1e8] ss:$16 sps:$4 sm:$0xff]  }
  0x6d   : > { %3798 = vmatprep.mubr.msk.bf16.mxu0 %vm1462_vm0, %v4538_v17  ;;  %2768 = vperm.xlu1 %4462, %v2498_v58   ;;  %v4586_v17 = vld [vmem:[%s4857_s22 + $0x20c] ss:$16 sps:$4 sm:$0xff]  }
  0x6e   : > { %1668 = vmatmul.mubr.bf16.gmra.mrb[20].mxu1 %v4525_v12  ;;  %v4573_v12 = vld [vmem:[%s4857_s22 + $0x1a0] ss:$16 sps:$4 sm:$0xff]   ;;  %v2530_v58 = vld [vmem:[%s4923_s30 + $0x268] sm:$0xff] }
  0x6f   : > { %1675 = vmatprep.mubr.bf16.mxu1 %v4528_v15  ;;  %2773 = vperm.xlu0 %4461, %v2499_v62   ;;  %v4576_v15 = vld [vmem:[%s4857_s22 + $0x1c4] ss:$16 sps:$4 sm:$0xff]  }
  0x70   : > { %v2531_v62 = vld [vmem:[%s4923_s30 + $0x270] sm:$0xff] }
  0x71   : > { %2778 = vperm.xlu1 %4462, %v2500_v61   ;;  %v2532_v61 = vld [vmem:[%s4923_s30 + $0x278] sm:$0xff] }
  0x73   : > { %2783 = vperm.xlu0 %4461, %v2501_v3   ;;  %v2533_v3 = vld [vmem:[%s4923_s30 + $0x280] sm:$0xff] }
  0x74   : > { %2077 = vmatmul.mubr.bf16.gmra.mrb[32].mxu0 %v4542_v24  ;;  %v4590_v24 = vld [vmem:[%s4857_s22 + $0x208] ss:$16 sps:$4 sm:$0xff]  }
  0x75   : > { %3799 = vmatprep.mubr.msk.bf16.mxu0 %vm1462_vm0, %v4544_v25  ;;  %2788 = vperm.xlu1 %4462, %v2502_v2   ;;  %v4592_v25 = vld [vmem:[%s4857_s22 + $0x22c] ss:$16 sps:$4 sm:$0xff]  }
  0x76   : > { %1676 = vmatmul.mubr.bf16.gmra.mrb[24].mxu1 %v4531_v20  ;;  %v4579_v20 = vld [vmem:[%s4857_s22 + $0x1c0] ss:$16 sps:$4 sm:$0xff]   ;;  %v2534_v2 = vld [vmem:[%s4923_s30 + $0x288] sm:$0xff] }
  0x77   : > { %1683 = vmatprep.mubr.bf16.mxu1 %v4534_v23  ;;  %2793 = vperm.xlu0 %4461, %v2503_v6   ;;  %v4582_v23 = vld [vmem:[%s4857_s22 + $0x1e4] ss:$16 sps:$4 sm:$0xff]  }
  0x78   : > { %v2535_v6 = vld [vmem:[%s4923_s30 + $0x290] sm:$0xff] }
  0x79   : > { %2798 = vperm.xlu1 %4462, %v2504_v5   ;;  %v2536_v5 = vld [vmem:[%s4923_s30 + $0x298] sm:$0xff] }
  0x7b   : > { %2803 = vperm.xlu0 %4461, %v2505_v11   ;;  %v2537_v11 = vld [vmem:[%s4923_s30 + $0x2a0] sm:$0xff] }
  0x7c   : > { %2085 = vmatmul.mubr.bf16.gmra.mrb[36].mxu0 %v4548_v32  ;;  %v4596_v32 = vld [vmem:[%s4857_s22 + $0x228] ss:$16 sps:$4 sm:$0xff]  }
  0x7d   : > { %3800 = vmatprep.mubr.msk.bf16.mxu0 %vm1462_vm0, %v4550_v33  ;;  %2808 = vperm.xlu1 %4462, %v2506_v10   ;;  %v4598_v33 = vld [vmem:[%s4857_s22 + $0x24c] ss:$16 sps:$4 sm:$0xff]  }
  0x7e   : > { %1684 = vmatmul.mubr.bf16.gmra.mrb[28].mxu1 %v4537_v28  ;;  %v4585_v28 = vld [vmem:[%s4857_s22 + $0x1e0] ss:$16 sps:$4 sm:$0xff]   ;;  %v2538_v10 = vld [vmem:[%s4923_s30 + $0x2a8] sm:$0xff] }
  0x7f   : > { %1691 = vmatprep.mubr.bf16.mxu1 %v4540_v31  ;;  %2813 = vperm.xlu0 %4461, %v2507_v14   ;;  %v4588_v31 = vld [vmem:[%s4857_s22 + $0x204] ss:$16 sps:$4 sm:$0xff]  }
  0x80   : > { %v2539_v14 = vld [vmem:[%s4923_s30 + $0x2b0] sm:$0xff] }
  0x81   : > { %2818 = vperm.xlu1 %4462, %v2508_v13   ;;  %v2540_v13 = vld [vmem:[%s4923_s30 + $0x2b8] sm:$0xff] }
  0x83   : > { %2823 = vperm.xlu0 %4461, %v2509_v19   ;;  %v4630_v19 = vld [vmem:[%s4857_s22 + $0x2e4] ss:$16 sps:$4 sm:$0xff]  }
  0x84   : > { %2093 = vmatmul.mubr.bf16.gmra.mrb[40].mxu0 %v4554_v40  ;;  %v4602_v40 = vld [vmem:[%s4857_s22 + $0x248] ss:$16 sps:$4 sm:$0xff]  }
  0x85   : > { %3801 = vmatprep.mubr.msk.bf16.mxu0 %vm1462_vm0, %v4556_v41  ;;  %2828 = vperm.xlu1 %4462, %v2510_v18   ;;  %v4604_v41 = vld [vmem:[%s4857_s22 + $0x26c] ss:$16 sps:$4 sm:$0xff]   ;;  %v4627_v18 = vld [vmem:[%s4857_s22 + $0x2c0] ss:$16 sps:$4 sm:$0xff]  }
  0x86   : > { %1692 = vmatmul.mubr.bf16.gmra.mrb[32].mxu1 %v4543_v36  ;;  %v4591_v36 = vld [vmem:[%s4857_s22 + $0x200] ss:$16 sps:$4 sm:$0xff]  }
  0x87   : > { %1699 = vmatprep.mubr.bf16.mxu1 %v4546_v39  ;;  %2833 = vperm.xlu0 %4461, %v2511_v22   ;;  %v4594_v39 = vld [vmem:[%s4857_s22 + $0x224] ss:$16 sps:$4 sm:$0xff]   ;;  %v4633_v22 = vld [vmem:[%s4857_s22 + $0x2e0] ss:$16 sps:$4 sm:$0xff]  }
  0x89   : > { %2838 = vperm.xlu1 %4462, %v2512_v21   ;;  %v4640_v21 = vld [vmem:[%s4857_s22 + $0x32c] ss:$16 sps:$4 sm:$0xff]  }
  0x8b   : > { %2843 = vperm.xlu0 %4461, %v2513_v27   ;;  %v4642_v27 = vld [vmem:[%s4857_s22 + $0x324] ss:$16 sps:$4 sm:$0xff]  }
  0x8c   : > { %2101 = vmatmul.mubr.bf16.gmra.mrb[44].mxu0 %v4560_v48  ;;  %v4608_v48 = vld [vmem:[%s4857_s22 + $0x268] ss:$16 sps:$4 sm:$0xff]  }
  0x8d   : > { %3802 = vmatprep.mubr.msk.bf16.mxu0 %vm1462_vm0, %v4562_v49  ;;  %2848 = vperm.xlu1 %4462, %v2514_v26   ;;  %v4610_v49 = vld [vmem:[%s4857_s22 + $0x28c] ss:$16 sps:$4 sm:$0xff]   ;;  %v4639_v26 = vld [vmem:[%s4857_s22 + $0x300] ss:$16 sps:$4 sm:$0xff]  }
  0x8e   : > { %1700 = vmatmul.mubr.bf16.gmra.mrb[36].mxu1 %v4549_v44  ;;  %v4597_v44 = vld [vmem:[%s4857_s22 + $0x220] ss:$16 sps:$4 sm:$0xff]  }
  0x8f   : > { %1707 = vmatprep.mubr.bf16.mxu1 %v4552_v47  ;;  %2853 = vperm.xlu0 %4461, %v2515_v30   ;;  %v4600_v47 = vld [vmem:[%s4857_s22 + $0x244] ss:$16 sps:$4 sm:$0xff]   ;;  %v4645_v30 = vld [vmem:[%s4857_s22 + $0x320] ss:$16 sps:$4 sm:$0xff]  }
  0x91   : > { %2858 = vperm.xlu1 %4462, %v2516_v29   ;;  %v4652_v29 = vld [vmem:[%s4857_s22 + $0x36c] ss:$16 sps:$4 sm:$0xff]  }
  0x93   : > { %2863 = vperm.xlu0 %4461, %v2517_v35  }
  0x94   : > { %2109 = vmatmul.mubr.bf16.gmra.mrb[48].mxu0 %v4566_v56  ;;  %v4614_v56 = vld [vmem:[%s4857_s22 + $0x288] ss:$16 sps:$4 sm:$0xff]  }
  0x95   : > { %3803 = vmatprep.mubr.msk.bf16.mxu0 %vm1462_vm0, %v4568_v57  ;;  %2868 = vperm.xlu1 %4462, %v2518_v34   ;;  %v4616_v57 = vld [vmem:[%s4857_s22 + $0x2ac] ss:$16 sps:$4 sm:$0xff]   ;;  %v4656_v34 = vld [vmem:[%s4857_s22 + $0x368] ss:$16 sps:$4 sm:$0xff]  }
  0x96   : > { %1708 = vmatmul.mubr.bf16.gmra.mrb[40].mxu1 %v4555_v52  ;;  %v4603_v52 = vld [vmem:[%s4857_s22 + $0x240] ss:$16 sps:$4 sm:$0xff]  }
  0x97   : > { %1715 = vmatprep.mubr.bf16.mxu1 %v4558_v55  ;;  %2873 = vperm.xlu0 %4461, %v2519_v38   ;;  %v4606_v55 = vld [vmem:[%s4857_s22 + $0x264] ss:$16 sps:$4 sm:$0xff]   ;;  %v4651_v38 = vld [vmem:[%s4857_s22 + $0x340] ss:$16 sps:$4 sm:$0xff]  }
  0x99   : > { %2878 = vperm.xlu1 %4462, %v2520_v37  }
  0x9b   : > { %2883 = vperm.xlu0 %4461, %v2521_v43  }
  0x9c   : > { %2117 = vmatmul.mubr.bf16.gmra.mrb[52].mxu0 %v4572_v0  ;;  %v4620_v0 = vld [vmem:[%s4857_s22 + $0x2a8] ss:$16 sps:$4 sm:$0xff]  }
  0x9d   : > { %3804 = vmatprep.mubr.msk.bf16.mxu0 %vm1462_vm0, %v4574_v1  ;;  %2888 = vperm.xlu1 %4462, %v2522_v42   ;;  %v4622_v1 = vld [vmem:[%s4857_s22 + $0x2cc] ss:$16 sps:$4 sm:$0xff]   ;;  %v4662_v42 = vld [vmem:[%s4857_s22 + $0x388] ss:$16 sps:$4 sm:$0xff]  }
  0x9e   : > { %1716 = vmatmul.mubr.bf16.gmra.mrb[44].mxu1 %v4561_v60  ;;  %v4609_v60 = vld [vmem:[%s4857_s22 + $0x260] ss:$16 sps:$4 sm:$0xff]  }
  0x9f   : > { %1723 = vmatprep.mubr.bf16.mxu1 %v4564_v63  ;;  %2893 = vperm.xlu0 %4461, %v2523_v46   ;;  %v4612_v63 = vld [vmem:[%s4857_s22 + $0x284] ss:$16 sps:$4 sm:$0xff]   ;;  %v5155_v46 = vld [vmem:[%s5382_s2] ss:$0 sm:$0xff] }
  0xa1   : > { %2898 = vperm.xlu1 %4462, %v2524_v45  }
  0xa3   : > { %2903 = vperm.xlu0 %4461, %v2525_v51   ;;  %v4657_v51 = vld [vmem:[%s4857_s22 + $0x360] ss:$16 sps:$4 sm:$0xff]  }
  0xa4   : > { %2125 = vmatmul.mubr.bf16.gmra.mrb[56].mxu0 %v4578_v8  ;;  %v4626_v8 = vld [vmem:[%s4857_s22 + $0x2c8] ss:$16 sps:$4 sm:$0xff]  }
  0xa5   : > { %3805 = vmatprep.mubr.msk.bf16.mxu0 %vm1462_vm0, %v4580_v9  ;;  %2908 = vperm.xlu1 %4462, %v2526_v50   ;;  %v4628_v9 = vld [vmem:[%s4857_s22 + $0x2ec] ss:$16 sps:$4 sm:$0xff]  }
  0xa6   : > { %1724 = vmatmul.mubr.bf16.gmra.mrb[48].mxu1 %v4567_v4  ;;  %v4615_v4 = vld [vmem:[%s4857_s22 + $0x280] ss:$16 sps:$4 sm:$0xff]  }
  0xa7   : > { %1731 = vmatprep.mubr.bf16.mxu1 %v4570_v7  ;;  %2913 = vperm.xlu0 %4461, %v2527_v54   ;;  %v4618_v7 = vld [vmem:[%s4857_s22 + $0x2a4] ss:$16 sps:$4 sm:$0xff]  }
  0xa8   : > { %v4660_v54 = vld [vmem:[%s4857_s22 + $0x384] ss:$16 sps:$4 sm:$0xff]  }
  0xa9   : > { %2918 = vperm.xlu1 %4462, %v2528_v53  }
  0xab   : > { %2923 = vperm.xlu0 %4461, %v2529_v59  }
  0xac   : > { %2133 = vmatmul.mubr.bf16.gmra.mrb[60].mxu0 %v4584_v16  ;;  %v4632_v16 = vld [vmem:[%s4857_s22 + $0x2e8] ss:$16 sps:$4 sm:$0xff]  }
  0xad   : > { %3806 = vmatprep.mubr.msk.bf16.mxu0 %vm1462_vm0, %v4586_v17  ;;  %2928 = vperm.xlu1 %4462, %v2530_v58   ;;  %v4634_v17 = vld [vmem:[%s4857_s22 + $0x30c] ss:$16 sps:$4 sm:$0xff]  }
  0xae   : > { %1732 = vmatmul.mubr.bf16.gmra.mrb[52].mxu1 %v4573_v12  ;;  %v4621_v12 = vld [vmem:[%s4857_s22 + $0x2a0] ss:$16 sps:$4 sm:$0xff]  }
  0xaf   : > { %1739 = vmatprep.mubr.bf16.mxu1 %v4576_v15  ;;  %2933 = vperm.xlu0 %4461, %v2531_v62   ;;  %v4624_v15 = vld [vmem:[%s4857_s22 + $0x2c4] ss:$16 sps:$4 sm:$0xff]  }
  0xb1   : > { %2938 = vperm.xlu1 %4462, %v2532_v61   ;;  %v4670_v61 = vld [vmem:[%s4857_s22 + $0x3cc] ss:$16 sps:$4 sm:$0xff]  }
  0xb3   : > { %2943 = vperm.xlu0 %4461, %v2533_v3   ;;  %v2554_v3 = vpop.permute.xlu1 %2553 }
  0xb4   : > { %2141 = vmatmul.mubr.bf16.gmra.mrb[64].mxu0 %v4590_v24  ;;  %v4644_v24 = vld [vmem:[%s4857_s22 + $0x328] ss:$16 sps:$4 sm:$0xff]  }
  0xb5   : > { %3807 = vmatprep.mubr.msk.bf16.mxu0 %vm1462_vm0, %v4592_v25  ;;  %2948 = vperm.xlu1 %4462, %v2534_v2   ;;  %v4646_v25 = vld [vmem:[%s4857_s22 + $0x34c] ss:$16 sps:$4 sm:$0xff]  }
  0xb6   : > { %1740 = vmatmul.mubr.bf16.gmra.mrb[56].mxu1 %v4579_v20  ;;  %v4638_v20 = vld [vmem:[%s4857_s22 + $0x308] ss:$16 sps:$4 sm:$0xff]  }
  0xb7   : > { %1747 = vmatprep.mubr.bf16.mxu1 %v4582_v23  ;;  %2953 = vperm.xlu0 %4461, %v2535_v6   ;;  %v4636_v23 = vld [vmem:[%s4857_s22 + $0x304] ss:$16 sps:$4 sm:$0xff]  }
  0xb9   : > { %2958 = vperm.xlu1 %4462, %v2536_v5  }
  0xbb   : > { %2963 = vperm.xlu0 %4461, %v2537_v11  }
  0xbc   : > { %2149 = vmatmul.mubr.bf16.gmra.mrb[68].mxu0 %v4596_v32  ;;  %v4648_v32 = vld [vmem:[%s4857_s22 + $0x344] ss:$16 sps:$4 sm:$0xff]  }
  0xbd   : > { %3808 = vmatprep.mubr.msk.bf16.mxu0 %vm1462_vm0, %v4598_v33  ;;  %2968 = vperm.xlu1 %4462, %v2538_v10  }
  0xbe   : > { %1748 = vmatmul.mubr.bf16.gmra.mrb[60].mxu1 %v4585_v28  ;;  %v4650_v28 = vld [vmem:[%s4857_s22 + $0x348] ss:$16 sps:$4 sm:$0xff]  }
  0xbf   : > { %1755 = vmatprep.mubr.bf16.mxu1 %v4588_v31  ;;  %2973 = vperm.xlu0 %4461, %v2539_v14   ;;  %v4674_v14 = vld [vmem:[%s4857_s22 + $0x3c8] ss:$16 sps:$4 sm:$0xff]  }
  0xc1   : > { %2978 = vperm.xlu1 %4462, %v2540_v13  }
  0xc4   : > { %2157 = vmatmul.mubr.bf16.gmra.mrb[72].mxu0 %v4602_v40  ;;  %v4654_v40 = vld [vmem:[%s4857_s22 + $0x364] ss:$16 sps:$4 sm:$0xff]  }
  0xc5   : > { %3809 = vmatprep.mubr.msk.bf16.mxu0 %vm1462_vm0, %v4604_v41 }
  0xc6   : > { %1756 = vmatmul.mubr.bf16.gmra.mrb[64].mxu1 %v4591_v36  ;;  %v4658_v36 = vld [vmem:[%s4857_s22 + $0x38c] ss:$16 sps:$4 sm:$0xff]  }
  0xc7   : > { %1763 = vmatprep.mubr.bf16.mxu1 %v4594_v39 }
  0xcc   : > { %2165 = vmatmul.mubr.bf16.gmra.mrb[76].mxu0 %v4608_v48  ;;  %v2544_v48 = vpop.permute.xlu0 %2543 }
  0xcd   : > { %3810 = vmatprep.mubr.msk.bf16.mxu0 %vm1462_vm0, %v4610_v49 }
  0xce   : > { %1764 = vmatmul.mubr.bf16.gmra.mrb[68].mxu1 %v4597_v44  ;;  %v4664_v44 = vld [vmem:[%s4857_s22 + $0x3ac] ss:$16 sps:$4 sm:$0xff]  }
  0xcf   : > { %1771 = vmatprep.mubr.bf16.mxu1 %v4600_v47 }
  0xd4   : > { %2173 = vmatmul.mubr.bf16.gmra.mrb[80].mxu0 %v4614_v56  ;;  %v4668_v56 = vld [vmem:[%s4857_s22 + $0x3a8] ss:$16 sps:$4 sm:$0xff]  }
  0xd5   : > { %3811 = vmatprep.mubr.msk.bf16.mxu0 %vm1462_vm0, %v4616_v57 }
  0xd6   : > { %1772 = vmatmul.mubr.bf16.gmra.mrb[72].mxu1 %v4603_v52 }
  0xd7   : > { %1779 = vmatprep.mubr.bf16.mxu1 %v4606_v55 }
  0xdc   : > { %2181 = vmatmul.mubr.bf16.gmra.mrb[84].mxu0 %v4620_v0 }
  0xdd   : > { %3812 = vmatprep.mubr.msk.bf16.mxu0 %vm1462_vm0, %v4622_v1  ;;  %v2549_v1 = vpop.permute.xlu0 %2548 }
  0xde   : > { %1780 = vmatmul.mubr.bf16.gmra.mrb[76].mxu1 %v4609_v60 }
  0xdf   : > { %1787 = vmatprep.mubr.bf16.mxu1 %v4612_v63 }
  0xe4   : > { %2189 = vmatmul.mubr.bf16.gmra.mrb[88].mxu0 %v4626_v8 }
  0xe5   : > { %3813 = vmatprep.mubr.msk.bf16.mxu0 %vm1462_vm0, %v4628_v9  ;;  %v4663_v9 = vld [vmem:[%s4857_s22 + $0x380] ss:$16 sps:$4 sm:$0xff]  }
  0xe6   : > { %1788 = vmatmul.mubr.bf16.gmra.mrb[80].mxu1 %v4615_v4 }
  0xe7   : > { %1795 = vmatprep.mubr.bf16.mxu1 %v4618_v7 }
  0xec   : > { %2197 = vmatmul.mubr.bf16.gmra.mrb[92].mxu0 %v4632_v16 }
  0xed   : > { %3814 = vmatprep.mubr.msk.bf16.mxu0 %vm1462_vm0, %v4634_v17 }
  0xee   : > { %1796 = vmatmul.mubr.bf16.gmra.mrb[84].mxu1 %v4621_v12  ;;  %v4666_v12 = vld [vmem:[%s4857_s22 + $0x3a4] ss:$16 sps:$4 sm:$0xff]  }
  0xef   : > { %1803 = vmatprep.mubr.bf16.mxu1 %v4624_v15 }
  0xf4   : > { %2205 = vmatmul.mubr.bf16.gmra.mrb[96].mxu0 %v4638_v20  ;;  %v4676_v20 = vld [vmem:[%s4857_s22 + $0x3ec] ss:$16 sps:$4 sm:$0xff]  }
  0xf5   : > { %3815 = vmatprep.mubr.msk.bf16.mxu0 %vm1462_vm0, %v4640_v21 }
  0xf6   : > { %1804 = vmatmul.mubr.bf16.gmra.mrb[88].mxu1 %v4627_v18 }
  0xf7   : > { %1811 = vmatprep.mubr.bf16.mxu1 %v4630_v19 }
  0xfc   : > { %2213 = vmatmul.mubr.bf16.gmra.mrb[100].mxu0 %v4644_v24 }
  0xfd   : > { %3816 = vmatprep.mubr.msk.bf16.mxu0 %vm1462_vm0, %v4646_v25  ;;  %v2559_v25 = vpop.permute.xlu1 %2558 }
  0xfe   : > { %1812 = vmatmul.mubr.bf16.gmra.mrb[92].mxu1 %v4633_v22 }
  0xff   : > { %1819 = vmatprep.mubr.bf16.mxu1 %v4636_v23 }
 0x104   : > { %2221 = vmatmul.mubr.bf16.gmra.mrb[104].mxu0 %v4650_v28 }
 0x105   : > { %3817 = vmatprep.mubr.msk.bf16.mxu0 %vm1462_vm0, %v4652_v29 }
 0x106   : > { %1820 = vmatmul.mubr.bf16.gmra.mrb[96].mxu1 %v4639_v26 }
 0x107   : > { %1827 = vmatprep.mubr.bf16.mxu1 %v4642_v27  ;;  %v2014_v31 = vpop.f32.mrb[0].mxu0 }
 0x108   : > { %v2016_v33 = vpop.f32.mrb[1].mxu0 }
 0x109   : > { %v2017_v35 = vpop.f32.mrb[2].mxu0 }
 0x10a   : > { %v2019_v37 = vpop.f32.mrb[3].mxu0 }
 0x10c   : > { %2229 = vmatmul.mubr.bf16.gmra.mrb[108].mxu0 %v4656_v34  ;;  %v4672_v34 = vld [vmem:[%s4857_s22 + $0x3c4] ss:$16 sps:$4 sm:$0xff]  }
 0x10d   : > { %3818 = vmatprep.mubr.msk.bf16.mxu0 %vm1462_vm0, %v4658_v36  ;;  %v4680_v36 = vld [vmem:[%s4857_s22 + $0x3e8] ss:$16 sps:$4 sm:$0xff]  }
 0x10e   : > { %1828 = vmatmul.mubr.bf16.gmra.mrb[100].mxu1 %v4645_v30 }
 0x10f   : > { %1835 = vmatprep.mubr.bf16.mxu1 %v4648_v32  ;;  %v2022_v39 = vpop.f32.mrb[4].mxu0 }
 0x110   : > { %v2024_v41 = vpop.f32.mrb[5].mxu0 }
 0x111   : > { %v2025_v43 = vpop.f32.mrb[6].mxu0 }
 0x112   : > { %v2027_v45 = vpop.f32.mrb[7].mxu0 }
 0x114   : > { %2237 = vmatmul.mubr.bf16.gmra.mrb[112].mxu0 %v4662_v42  ;;  %v4682_v42 = vld [vmem:[%s4857_s22 + $0x40c] ss:$16 sps:$4 sm:$0xff]  }
 0x115   : > { %3819 = vmatprep.mubr.msk.bf16.mxu0 %vm1462_vm0, %v4664_v44 }
 0x116   : > { %1836 = vmatmul.mubr.bf16.gmra.mrb[104].mxu1 %v4651_v38 }
 0x117   : > { %1843 = vmatprep.mubr.bf16.mxu1 %v4654_v40  ;;  %v2030_v52 = vpop.f32.mrb[8].mxu0 }
 0x118   : > { %v2032_v55 = vpop.f32.mrb[9].mxu0 }
 0x119   : > { %v1629_v47 = vpop.f32.mrb[0].mxu1  ;;  %v2033_v60 = vpop.f32.mrb[10].mxu0  ;;  %v4675_v55 = vld [vmem:[%s4857_s22 + $0x3c0] ss:$16 sps:$4 sm:$0xff]  }
 0x11a   : > { %v1630_v49 = vadd.f32 %v5155_v46, %v1629_v47  ;;  %v1631_v50 = vpop.f32.mrb[1].mxu1  ;;  %v2035_v62 = vpop.f32.mrb[11].mxu0 }
 0x11b   : > { %v1632_v53 = vpop.f32.mrb[2].mxu1  ;;  %v2569_v47 = vpop.permute.xlu1 %2568 }
 0x11c   : > { %v2015_v57 = vadd.f32 %v2014_v31, %v1630_v49  ;;  %v1633_v58 = vadd.f32 %v5155_v46, %v1632_v53  ;;  %v1634_v59 = vpop.f32.mrb[3].mxu1  ;;  %2245 = vmatmul.mubr.bf16.gmra.mrb[116].mxu0 %v4668_v56  ;;  %v4669_v31 = vld [vmem:[%s4857_s22 + $0x3a0] ss:$16 sps:$4 sm:$0xff]   ;;  %v2564_v49 = vpop.permute.xlu0 %2563 }
 0x11d   : > { %3820 = vmatprep.mubr.msk.bf16.mxu0 %vm1462_vm0, %v4670_v61 }
 0x11e   : > { %v2018_v63 = vadd.f32 %v2017_v35, %v1633_v58  ;;  %v2365_v0 = vmax.f32 %v2015_v57, 0.0  ;;  %1844 = vmatmul.mubr.bf16.gmra.mrb[108].mxu1 %v4657_v51  ;;  %v4678_v58 = vld [vmem:[%s4857_s22 + $0x3e4] ss:$16 sps:$4 sm:$0xff]  }
 0x11f   : > { %1851 = vmatprep.mubr.bf16.mxu1 %v4660_v54  ;;  %v2038_v10 = vpop.f32.mrb[12].mxu0 }
 0x120   : > { %v2366_v2 = vmax.f32 %v2018_v63, 0.0  ;;  %v2981_v5 = vmul.f32 %v2544_v48, %v2365_v0  ;;  %v2040_v13 = vpop.f32.mrb[13].mxu0 }
 0x121   : > { %v1637_v4 = vpop.f32.mrb[4].mxu1  ;;  %v2041_v19 = vpop.f32.mrb[14].mxu0 }
 0x122   : > { %v2982_v6 = vmul.f32 %v2549_v1, %v2366_v2  ;;  %v1638_v7 = vadd.f32 %v5155_v46, %v1637_v4  ;;  %v1639_v8 = vpop.f32.mrb[5].mxu1  ;;  %v2043_v21 = vpop.f32.mrb[15].mxu0  ;;  %v4688_v2 = vld [vmem:[%s4857_s22 + $0x42c] ss:$16 sps:$4 sm:$0xff]  }
 0x123   : > { %v1640_v11 = vpop.f32.mrb[6].mxu1  ;;  %v2574_v8 = vpop.permute.xlu0 %2573 }
 0x124   : > { %v4016_v15 = vpack.c.bf16 %v2982_v6, %v2981_v5  ;;  %v2023_v16 = vadd.f32 %v2022_v39, %v1638_v7  ;;  %v1641_v17 = vadd.f32 %v5155_v46, %v1640_v11  ;;  %v1642_v18 = vpop.f32.mrb[7].mxu1  ;;  %2253 = vmatmul.mubr.bf16.gmra.mrb[120].mxu0 %v4674_v14  ;;  %v2579_v6 = vpop.permute.xlu1 %2578  ;;  %v4681_v14 = vld [vmem:[%s4857_s22 + $0x3e0] ss:$16 sps:$4 sm:$0xff]  }
 0x125   : > { %3821 = vmatprep.mubr.msk.bf16.mxu0 %vm1462_vm0, %v4676_v20 }
 0x126   : > { %4017 = vst [vmem:[%s5171_s12] sm:$0xff] %v4016_v15   ;;  %v2367_v22 = vmax.f32 %v2023_v16, 0.0  ;;  %v2026_v23 = vadd.f32 %v2025_v43, %v1641_v17  ;;  %1852 = vmatmul.mubr.bf16.gmra.mrb[112].mxu1 %v4663_v9  ;;  %v4684_v17 = vld [vmem:[%s4857_s22 + $0x404] ss:$16 sps:$4 sm:$0xff]  }
 0x127   : > { %1859 = vmatprep.mubr.bf16.mxu1 %v4666_v12  ;;  %v2046_v32 = vpop.f32.mrb[16].mxu0 }
 0x128   : > { %v2368_v24 = vmax.f32 %v2026_v23, 0.0  ;;  %v2983_v27 = vmul.f32 %v2554_v3, %v2367_v22  ;;  %v2048_v35 = vpop.f32.mrb[17].mxu0 }
 0x129   : > { %v1645_v26 = vpop.f32.mrb[8].mxu1  ;;  %v2049_v41 = vpop.f32.mrb[18].mxu0 }
 0x12a   : > { %v2984_v28 = vmul.f32 %v2559_v25, %v2368_v24  ;;  %v1646_v29 = vadd.f32 %v5155_v46, %v1645_v26  ;;  %v1647_v30 = vpop.f32.mrb[9].mxu1  ;;  %v2051_v43 = vpop.f32.mrb[19].mxu0  ;;  %v4694_v25 = vld [vmem:[%s4857_s22 + $0x44c] ss:$16 sps:$4 sm:$0xff]  }
 0x12b   : > { %v1648_v33 = vpop.f32.mrb[10].mxu1 }
 0x12c   : > { %v4021_v37 = vpack.c.bf16 %v2984_v28, %v2983_v27  ;;  %v2031_v38 = vadd.f32 %v2030_v52, %v1646_v29  ;;  %v1649_v39 = vadd.f32 %v5155_v46, %v1648_v33  ;;  %v1650_v40 = vpop.f32.mrb[11].mxu1  ;;  %2261 = vmatmul.mubr.bf16.gmra.mrb[124].mxu0 %v4680_v36  ;;  %v2589_v29 = vpop.permute.xlu1 %2588 }
 0x12d   : > { %3822 = vmatprep.mubr.msk.bf16.mxu0 %vm1462_vm0, %v4682_v42  ;;  %v4690_v40 = vld [vmem:[%s4857_s22 + $0x424] ss:$16 sps:$4 sm:$0xff]   ;;  %v4698_v42 = vld [vmem:[%s4857_s22 + $0x448] ss:$16 sps:$4 sm:$0xff]  }
 0x12e   : > { %4233 = vst [vmem:[%s5171_s12 + $0x8] sm:$0xff] %v4021_v37   ;;  %v2369_v44 = vmax.f32 %v2031_v38, 0.0  ;;  %v2034_v45 = vadd.f32 %v2033_v60, %v1649_v39  ;;  %1860 = vmatmul.mubr.bf16.gmra.mrb[116].mxu1 %v4669_v31  ;;  %v4686_v60 = vld [vmem:[%s4857_s22 + $0x408] ss:$16 sps:$4 sm:$0xff]   ;;  %v2584_v31 = vpop.permute.xlu0 %2583  ;;  %v4687_v37 = vld [vmem:[%s4857_s22 + $0x400] ss:$16 sps:$4 sm:$0xff]  }
 0x12f   : > { %1867 = vmatprep.mubr.bf16.mxu1 %v4672_v34  ;;  %v2054_v56 = vpop.f32.mrb[20].mxu0 }
 0x130   : > { %v2370_v48 = vmax.f32 %v2034_v45, 0.0  ;;  %v2985_v51 = vmul.f32 %v2564_v49, %v2369_v44  ;;  %v2056_v59 = vpop.f32.mrb[21].mxu0  ;;  %v4700_v49 = vld [vmem:[%s4857_s22 + $0x46c] ss:$16 sps:$4 sm:$0xff]  }
 0x131   : > { %v1653_v50 = vpop.f32.mrb[12].mxu1  ;;  %v2057_v1 = vpop.f32.mrb[22].mxu0 }
 0x132   : > { %v2986_v52 = vmul.f32 %v2569_v47, %v2370_v48  ;;  %v1654_v53 = vadd.f32 %v5155_v46, %v1653_v50  ;;  %v1655_v54 = vpop.f32.mrb[13].mxu1  ;;  %v2059_v3 = vpop.f32.mrb[23].mxu0 }
 0x133   : > { %v1656_v57 = vpop.f32.mrb[14].mxu1 }
 0x134   : > { %v4026_v61 = vpack.c.bf16 %v2986_v52, %v2985_v51  ;;  %v2039_v62 = vadd.f32 %v2038_v10, %v1654_v53  ;;  %v1657_v63 = vadd.f32 %v5155_v46, %v1656_v57  ;;  %v1658_v0 = vpop.f32.mrb[15].mxu1  ;;  %2269 = vmatmul.mubr.bf16.gmra.mrb[128].mxu0 %v4686_v60  ;;  %v2599_v53 = vpop.permute.xlu1 %2598 }
 0x135   : > { %3823 = vmatprep.mubr.msk.bf16.mxu0 %vm1462_vm0, %v4688_v2  ;;  %v4696_v0 = vld [vmem:[%s4857_s22 + $0x444] ss:$16 sps:$4 sm:$0xff]   ;;  %v4704_v2 = vld [vmem:[%s4857_s22 + $0x468] ss:$16 sps:$4 sm:$0xff]  }
 0x136   : > { %4234 = vst [vmem:[%s5171_s12 + $0x10] sm:$0xff] %v4026_v61   ;;  %v2371_v4 = vmax.f32 %v2039_v62, 0.0  ;;  %v2042_v5 = vadd.f32 %v2041_v19, %v1657_v63  ;;  %1868 = vmatmul.mubr.bf16.gmra.mrb[120].mxu1 %v4675_v55  ;;  %v4692_v19 = vld [vmem:[%s4857_s22 + $0x428] ss:$16 sps:$4 sm:$0xff]   ;;  %v2594_v55 = vpop.permute.xlu0 %2593  ;;  %v4693_v61 = vld [vmem:[%s4857_s22 + $0x420] ss:$16 sps:$4 sm:$0xff]  }
 0x137   : > { %1875 = vmatprep.mubr.bf16.mxu1 %v4678_v58  ;;  %v2062_v15 = vpop.f32.mrb[24].mxu0 }
 0x138   : > { %v2372_v7 = vmax.f32 %v2042_v5, 0.0  ;;  %v2987_v10 = vmul.f32 %v2574_v8, %v2371_v4  ;;  %v2064_v18 = vpop.f32.mrb[25].mxu0  ;;  %v4706_v8 = vld [vmem:[%s4857_s22 + $0x48c] ss:$16 sps:$4 sm:$0xff]  }
 0x139   : > { %v1661_v9 = vpop.f32.mrb[16].mxu1  ;;  %v2065_v24 = vpop.f32.mrb[26].mxu0 }
 0x13a   : > { %v2988_v11 = vmul.f32 %v2579_v6, %v2372_v7  ;;  %v1662_v12 = vadd.f32 %v5155_v46, %v1661_v9  ;;  %v1663_v13 = vpop.f32.mrb[17].mxu1  ;;  %v2067_v26 = vpop.f32.mrb[27].mxu0 }
 0x13b   : > { %v1664_v16 = vpop.f32.mrb[18].mxu1 }
 0x13c   : > { %v4031_v20 = vpack.c.bf16 %v2988_v11, %v2987_v10  ;;  %v2047_v21 = vadd.f32 %v2046_v32, %v1662_v12  ;;  %v1665_v22 = vadd.f32 %v5155_v46, %v1664_v16  ;;  %v1666_v23 = vpop.f32.mrb[19].mxu1  ;;  %2277 = vmatmul.mubr.bf16.gmra.mrb[132].mxu0 %v4692_v19  ;;  %v2609_v12 = vpop.permute.xlu1 %2608 }
 0x13d   : > { %3824 = vmatprep.mubr.msk.bf16.mxu0 %vm1462_vm0, %v4694_v25  ;;  %v4702_v23 = vld [vmem:[%s4857_s22 + $0x464] ss:$16 sps:$4 sm:$0xff]   ;;  %v4710_v25 = vld [vmem:[%s4857_s22 + $0x488] ss:$16 sps:$4 sm:$0xff]  }
 0x13e   : > { %4235 = vst [vmem:[%s5171_s12 + $0x18] sm:$0xff] %v4031_v20   ;;  %v2373_v27 = vmax.f32 %v2047_v21, 0.0  ;;  %v2050_v28 = vadd.f32 %v2049_v41, %v1665_v22  ;;  %1876 = vmatmul.mubr.bf16.gmra.mrb[124].mxu1 %v4681_v14  ;;  %v2604_v14 = vpop.permute.xlu0 %2603  ;;  %v4699_v20 = vld [vmem:[%s4857_s22 + $0x440] ss:$16 sps:$4 sm:$0xff]  }
 0x13f   : > { %1883 = vmatprep.mubr.bf16.mxu1 %v4684_v17  ;;  %v2070_v38 = vpop.f32.mrb[28].mxu0 }
 0x140   : > { %v2374_v30 = vmax.f32 %v2050_v28, 0.0  ;;  %v2989_v33 = vmul.f32 %v2584_v31, %v2373_v27  ;;  %v2072_v41 = vpop.f32.mrb[29].mxu0  ;;  %v4712_v31 = vld [vmem:[%s4857_s22 + $0x4ac] ss:$16 sps:$4 sm:$0xff]  }
 0x141   : > { %v1669_v32 = vpop.f32.mrb[20].mxu1  ;;  %v2073_v48 = vpop.f32.mrb[30].mxu0 }
 0x142   : > { %v2990_v34 = vmul.f32 %v2589_v29, %v2374_v30  ;;  %v1670_v35 = vadd.f32 %v5155_v46, %v1669_v32  ;;  %v1671_v36 = vpop.f32.mrb[21].mxu1  ;;  %v2075_v50 = vpop.f32.mrb[31].mxu0 }
 0x143   : > { %v1672_v39 = vpop.f32.mrb[22].mxu1 }
 0x144   : > { %v4036_v43 = vpack.c.bf16 %v2990_v34, %v2989_v33  ;;  %v2055_v44 = vadd.f32 %v2054_v56, %v1670_v35  ;;  %v1673_v45 = vadd.f32 %v5155_v46, %v1672_v39  ;;  %v1674_v47 = vpop.f32.mrb[23].mxu1  ;;  %2285 = vmatmul.mubr.bf16.gmra.mrb[136].mxu0 %v4698_v42  ;;  %v2619_v35 = vpop.permute.xlu1 %2618 }
 0x145   : > { %3825 = vmatprep.mubr.msk.bf16.mxu0 %vm1462_vm0, %v4700_v49  ;;  %v4708_v47 = vld [vmem:[%s4857_s22 + $0x484] ss:$16 sps:$4 sm:$0xff]   ;;  %v4716_v49 = vld [vmem:[%s4857_s22 + $0x4a8] ss:$16 sps:$4 sm:$0xff]  }
 0x146   : > { %4236 = vst [vmem:[%s5171_s12 + $0x20] sm:$0xff] %v4036_v43   ;;  %v2375_v51 = vmax.f32 %v2055_v44, 0.0  ;;  %v2058_v52 = vadd.f32 %v2057_v1, %v1673_v45  ;;  %1884 = vmatmul.mubr.bf16.gmra.mrb[128].mxu1 %v4687_v37  ;;  %v2614_v37 = vpop.permute.xlu0 %2613  ;;  %v4705_v43 = vld [vmem:[%s4857_s22 + $0x460] ss:$16 sps:$4 sm:$0xff]  }
 0x147   : > { %1891 = vmatprep.mubr.bf16.mxu1 %v4690_v40  ;;  %v2078_v62 = vpop.f32.mrb[32].mxu0 }
 0x148   : > { %v2376_v54 = vmax.f32 %v2058_v52, 0.0  ;;  %v2991_v57 = vmul.f32 %v2594_v55, %v2375_v51  ;;  %v2080_v1 = vpop.f32.mrb[33].mxu0  ;;  %v4718_v55 = vld [vmem:[%s4857_s22 + $0x4cc] ss:$16 sps:$4 sm:$0xff]  }
 0x149   : > { %v1677_v56 = vpop.f32.mrb[24].mxu1  ;;  %v2081_v7 = vpop.f32.mrb[34].mxu0 }
 0x14a   : > { %v2992_v58 = vmul.f32 %v2599_v53, %v2376_v54  ;;  %v1678_v59 = vadd.f32 %v5155_v46, %v1677_v56  ;;  %v1679_v60 = vpop.f32.mrb[25].mxu1  ;;  %v2083_v9 = vpop.f32.mrb[35].mxu0 }
 0x14b   : > { %v1680_v63 = vpop.f32.mrb[26].mxu1 }
 0x14c   : > { %v4041_v3 = vpack.c.bf16 %v2992_v58, %v2991_v57  ;;  %v2063_v4 = vadd.f32 %v2062_v15, %v1678_v59  ;;  %v1681_v5 = vadd.f32 %v5155_v46, %v1680_v63  ;;  %v1682_v6 = vpop.f32.mrb[27].mxu1  ;;  %2293 = vmatmul.mubr.bf16.gmra.mrb[140].mxu0 %v4704_v2  ;;  %v2629_v59 = vpop.permute.xlu1 %2628 }
 0x14d   : > { %3826 = vmatprep.mubr.msk.bf16.mxu0 %vm1462_vm0, %v4706_v8  ;;  %v4714_v6 = vld [vmem:[%s4857_s22 + $0x4a4] ss:$16 sps:$4 sm:$0xff]   ;;  %v4722_v8 = vld [vmem:[%s4857_s22 + $0x4c8] ss:$16 sps:$4 sm:$0xff]  }
 0x14e   : > { %4237 = vst [vmem:[%s5171_s12 + $0x28] sm:$0xff] %v4041_v3   ;;  %v2377_v10 = vmax.f32 %v2063_v4, 0.0  ;;  %v2066_v11 = vadd.f32 %v2065_v24, %v1681_v5  ;;  %1892 = vmatmul.mubr.bf16.gmra.mrb[132].mxu1 %v4693_v61  ;;  %v2624_v61 = vpop.permute.xlu0 %2623  ;;  %v4711_v3 = vld [vmem:[%s4857_s22 + $0x480] ss:$16 sps:$4 sm:$0xff]  }
 0x14f   : > { %1899 = vmatprep.mubr.bf16.mxu1 %v4696_v0  ;;  %v2086_v21 = vpop.f32.mrb[36].mxu0 }
 0x150   : > { %v2378_v13 = vmax.f32 %v2066_v11, 0.0  ;;  %v2993_v16 = vmul.f32 %v2604_v14, %v2377_v10  ;;  %v2088_v24 = vpop.f32.mrb[37].mxu0  ;;  %v4724_v14 = vld [vmem:[%s4857_s22 + $0x4ec] ss:$16 sps:$4 sm:$0xff]  }
 0x151   : > { %v1685_v15 = vpop.f32.mrb[28].mxu1  ;;  %v2089_v30 = vpop.f32.mrb[38].mxu0 }
 0x152   : > { %v2994_v17 = vmul.f32 %v2609_v12, %v2378_v13  ;;  %v1686_v18 = vadd.f32 %v5155_v46, %v1685_v15  ;;  %v1687_v19 = vpop.f32.mrb[29].mxu1  ;;  %v2091_v32 = vpop.f32.mrb[39].mxu0 }
 0x153   : > { %v1688_v22 = vpop.f32.mrb[30].mxu1 }
 0x154   : > { %v4046_v26 = vpack.c.bf16 %v2994_v17, %v2993_v16  ;;  %v2071_v27 = vadd.f32 %v2070_v38, %v1686_v18  ;;  %v1689_v28 = vadd.f32 %v5155_v46, %v1688_v22  ;;  %v1690_v29 = vpop.f32.mrb[31].mxu1  ;;  %2301 = vmatmul.mubr.bf16.gmra.mrb[144].mxu0 %v4710_v25  ;;  %v2639_v18 = vpop.permute.xlu1 %2638 }
 0x155   : > { %3827 = vmatprep.mubr.msk.bf16.mxu0 %vm1462_vm0, %v4712_v31  ;;  %v4720_v29 = vld [vmem:[%s4857_s22 + $0x4c4] ss:$16 sps:$4 sm:$0xff]   ;;  %v4728_v31 = vld [vmem:[%s4857_s22 + $0x4e8] ss:$16 sps:$4 sm:$0xff]  }
 0x156   : > { %4238 = vst [vmem:[%s5171_s12 + $0x30] sm:$0xff] %v4046_v26   ;;  %v2379_v33 = vmax.f32 %v2071_v27, 0.0  ;;  %v2074_v34 = vadd.f32 %v2073_v48, %v1689_v28  ;;  %1900 = vmatmul.mubr.bf16.gmra.mrb[136].mxu1 %v4699_v20  ;;  %v2634_v20 = vpop.permute.xlu0 %2633  ;;  %v4717_v26 = vld [vmem:[%s4857_s22 + $0x4a0] ss:$16 sps:$4 sm:$0xff]  }
 0x157   : > { %1907 = vmatprep.mubr.bf16.mxu1 %v4702_v23  ;;  %v2094_v44 = vpop.f32.mrb[40].mxu0 }
 0x158   : > { %v2380_v36 = vmax.f32 %v2074_v34, 0.0  ;;  %v2995_v39 = vmul.f32 %v2614_v37, %v2379_v33  ;;  %v2096_v48 = vpop.f32.mrb[41].mxu0  ;;  %v4730_v37 = vld [vmem:[%s4857_s22 + $0x50c] ss:$16 sps:$4 sm:$0xff]  }
 0x159   : > { %v1693_v38 = vpop.f32.mrb[32].mxu1  ;;  %v2097_v54 = vpop.f32.mrb[42].mxu0 }
 0x15a   : > { %v2996_v40 = vmul.f32 %v2619_v35, %v2380_v36  ;;  %v1694_v41 = vadd.f32 %v5155_v46, %v1693_v38  ;;  %v1695_v42 = vpop.f32.mrb[33].mxu1  ;;  %v2099_v56 = vpop.f32.mrb[43].mxu0 }
 0x15b   : > { %v1696_v45 = vpop.f32.mrb[34].mxu1 }
 0x15c   : > { %v4051_v50 = vpack.c.bf16 %v2996_v40, %v2995_v39  ;;  %v2079_v51 = vadd.f32 %v2078_v62, %v1694_v41  ;;  %v1697_v52 = vadd.f32 %v5155_v46, %v1696_v45  ;;  %v1698_v53 = vpop.f32.mrb[35].mxu1  ;;  %2309 = vmatmul.mubr.bf16.gmra.mrb[148].mxu0 %v4716_v49  ;;  %v2649_v41 = vpop.permute.xlu1 %2648 }
 0x15d   : > { %3828 = vmatprep.mubr.msk.bf16.mxu0 %vm1462_vm0, %v4718_v55  ;;  %v4726_v53 = vld [vmem:[%s4857_s22 + $0x4e4] ss:$16 sps:$4 sm:$0xff]   ;;  %v4734_v55 = vld [vmem:[%s4857_s22 + $0x508] ss:$16 sps:$4 sm:$0xff]  }
 0x15e   : > { %4239 = vst [vmem:[%s5171_s12 + $0x38] sm:$0xff] %v4051_v50   ;;  %v2381_v57 = vmax.f32 %v2079_v51, 0.0  ;;  %v2082_v58 = vadd.f32 %v2081_v7, %v1697_v52  ;;  %1908 = vmatmul.mubr.bf16.gmra.mrb[140].mxu1 %v4705_v43  ;;  %v2644_v43 = vpop.permute.xlu0 %2643  ;;  %v4723_v50 = vld [vmem:[%s4857_s22 + $0x4c0] ss:$16 sps:$4 sm:$0xff]  }
 0x15f   : > { %1915 = vmatprep.mubr.bf16.mxu1 %v4708_v47  ;;  %v2102_v4 = vpop.f32.mrb[44].mxu0 }
 0x160   : > { %v2382_v60 = vmax.f32 %v2082_v58, 0.0  ;;  %v2997_v63 = vmul.f32 %v2624_v61, %v2381_v57  ;;  %v2104_v7 = vpop.f32.mrb[45].mxu0  ;;  %v4736_v61 = vld [vmem:[%s4857_s22 + $0x52c] ss:$16 sps:$4 sm:$0xff]  }
 0x161   : > { %v1701_v62 = vpop.f32.mrb[36].mxu1  ;;  %v2105_v13 = vpop.f32.mrb[46].mxu0 }
 0x162   : > { %v2998_v0 = vmul.f32 %v2629_v59, %v2382_v60  ;;  %v1702_v1 = vadd.f32 %v5155_v46, %v1701_v62  ;;  %v1703_v2 = vpop.f32.mrb[37].mxu1  ;;  %v2107_v15 = vpop.f32.mrb[47].mxu0 }
 0x163   : > { %v1704_v5 = vpop.f32.mrb[38].mxu1 }
 0x164   : > { %v4056_v9 = vpack.c.bf16 %v2998_v0, %v2997_v63  ;;  %v2087_v10 = vadd.f32 %v2086_v21, %v1702_v1  ;;  %v1705_v11 = vadd.f32 %v5155_v46, %v1704_v5  ;;  %v1706_v12 = vpop.f32.mrb[39].mxu1  ;;  %2317 = vmatmul.mubr.bf16.gmra.mrb[152].mxu0 %v4722_v8  ;;  %v2659_v1 = vpop.permute.xlu1 %2658 }
 0x165   : > { %3829 = vmatprep.mubr.msk.bf16.mxu0 %vm1462_vm0, %v4724_v14  ;;  %v4732_v12 = vld [vmem:[%s4857_s22 + $0x504] ss:$16 sps:$4 sm:$0xff]   ;;  %v4740_v14 = vld [vmem:[%s4857_s22 + $0x528] ss:$16 sps:$4 sm:$0xff]  }
 0x166   : > { %4240 = vst [vmem:[%s5171_s12 + $0x40] sm:$0xff] %v4056_v9   ;;  %v2383_v16 = vmax.f32 %v2087_v10, 0.0  ;;  %v2090_v17 = vadd.f32 %v2089_v30, %v1705_v11  ;;  %1916 = vmatmul.mubr.bf16.gmra.mrb[144].mxu1 %v4711_v3  ;;  %v2654_v3 = vpop.permute.xlu0 %2653  ;;  %v4729_v9 = vld [vmem:[%s4857_s22 + $0x4e0] ss:$16 sps:$4 sm:$0xff]  }
 0x167   : > { %1923 = vmatprep.mubr.bf16.mxu1 %v4714_v6  ;;  %v2110_v27 = vpop.f32.mrb[48].mxu0 }
 0x168   : > { %v2384_v19 = vmax.f32 %v2090_v17, 0.0  ;;  %v2999_v22 = vmul.f32 %v2634_v20, %v2383_v16  ;;  %v2112_v30 = vpop.f32.mrb[49].mxu0  ;;  %v4742_v20 = vld [vmem:[%s4857_s22 + $0x54c] ss:$16 sps:$4 sm:$0xff]  }
 0x169   : > { %v1709_v21 = vpop.f32.mrb[40].mxu1  ;;  %v2113_v36 = vpop.f32.mrb[50].mxu0 }
 0x16a   : > { %v3000_v23 = vmul.f32 %v2639_v18, %v2384_v19  ;;  %v1710_v24 = vadd.f32 %v5155_v46, %v1709_v21  ;;  %v1711_v25 = vpop.f32.mrb[41].mxu1  ;;  %v2115_v38 = vpop.f32.mrb[51].mxu0 }
 0x16b   : > { %v1712_v28 = vpop.f32.mrb[42].mxu1 }
 0x16c   : > { %v4061_v32 = vpack.c.bf16 %v3000_v23, %v2999_v22  ;;  %v2095_v33 = vadd.f32 %v2094_v44, %v1710_v24  ;;  %v1713_v34 = vadd.f32 %v5155_v46, %v1712_v28  ;;  %v1714_v35 = vpop.f32.mrb[43].mxu1  ;;  %2325 = vmatmul.mubr.bf16.gmra.mrb[156].mxu0 %v4728_v31  ;;  %v2669_v24 = vpop.permute.xlu1 %2668 }
 0x16d   : > { %3830 = vmatprep.mubr.msk.bf16.mxu0 %vm1462_vm0, %v4730_v37  ;;  %v4738_v35 = vld [vmem:[%s4857_s22 + $0x524] ss:$16 sps:$4 sm:$0xff]   ;;  %v4746_v37 = vld [vmem:[%s4857_s22 + $0x548] ss:$16 sps:$4 sm:$0xff]  }
 0x16e   : > { %4241 = vst [vmem:[%s5171_s12 + $0x48] sm:$0xff] %v4061_v32   ;;  %v2385_v39 = vmax.f32 %v2095_v33, 0.0  ;;  %v2098_v40 = vadd.f32 %v2097_v54, %v1713_v34  ;;  %1924 = vmatmul.mubr.bf16.gmra.mrb[148].mxu1 %v4717_v26  ;;  %v2664_v26 = vpop.permute.xlu0 %2663  ;;  %v4735_v32 = vld [vmem:[%s4857_s22 + $0x500] ss:$16 sps:$4 sm:$0xff]  }
 0x16f   : > { %1931 = vmatprep.mubr.bf16.mxu1 %v4720_v29  ;;  %v2118_v51 = vpop.f32.mrb[52].mxu0 }
 0x170   : > { %v2386_v42 = vmax.f32 %v2098_v40, 0.0  ;;  %v3001_v45 = vmul.f32 %v2644_v43, %v2385_v39  ;;  %v2120_v54 = vpop.f32.mrb[53].mxu0  ;;  %v4748_v43 = vld [vmem:[%s4857_s22 + $0x56c] ss:$16 sps:$4 sm:$0xff]  }
 0x171   : > { %v1717_v44 = vpop.f32.mrb[44].mxu1  ;;  %v2121_v60 = vpop.f32.mrb[54].mxu0 }
 0x172   : > { %v3002_v47 = vmul.f32 %v2649_v41, %v2386_v42  ;;  %v1718_v48 = vadd.f32 %v5155_v46, %v1717_v44  ;;  %v1719_v49 = vpop.f32.mrb[45].mxu1  ;;  %v2123_v62 = vpop.f32.mrb[55].mxu0 }
 0x173   : > { %v1720_v52 = vpop.f32.mrb[46].mxu1 }
 0x174   : > { %v4066_v56 = vpack.c.bf16 %v3002_v47, %v3001_v45  ;;  %v2103_v57 = vadd.f32 %v2102_v4, %v1718_v48  ;;  %v1721_v58 = vadd.f32 %v5155_v46, %v1720_v52  ;;  %v1722_v59 = vpop.f32.mrb[47].mxu1  ;;  %2333 = vmatmul.mubr.bf16.gmra.mrb[160].mxu0 %v4734_v55  ;;  %v2679_v48 = vpop.permute.xlu1 %2678 }
 0x175   : > { %3831 = vmatprep.mubr.msk.bf16.mxu0 %vm1462_vm0, %v4736_v61  ;;  %v4744_v59 = vld [vmem:[%s4857_s22 + $0x544] ss:$16 sps:$4 sm:$0xff]   ;;  %v4752_v61 = vld [vmem:[%s4857_s22 + $0x568] ss:$16 sps:$4 sm:$0xff]  }
 0x176   : > { %4242 = vst [vmem:[%s5171_s12 + $0x50] sm:$0xff] %v4066_v56   ;;  %v2387_v63 = vmax.f32 %v2103_v57, 0.0  ;;  %v2106_v0 = vadd.f32 %v2105_v13, %v1721_v58  ;;  %1932 = vmatmul.mubr.bf16.gmra.mrb[152].mxu1 %v4723_v50  ;;  %v2674_v50 = vpop.permute.xlu0 %2673  ;;  %v4741_v56 = vld [vmem:[%s4857_s22 + $0x520] ss:$16 sps:$4 sm:$0xff]  }
 0x177   : > { %1939 = vmatprep.mubr.bf16.mxu1 %v4726_v53  ;;  %v2126_v10 = vpop.f32.mrb[56].mxu0 }
 0x178   : > { %v2388_v2 = vmax.f32 %v2106_v0, 0.0  ;;  %v3003_v5 = vmul.f32 %v2654_v3, %v2387_v63  ;;  %v2128_v13 = vpop.f32.mrb[57].mxu0 }
 0x179   : > { %v1725_v4 = vpop.f32.mrb[48].mxu1  ;;  %v2129_v19 = vpop.f32.mrb[58].mxu0 }
 0x17a   : > { %v3004_v6 = vmul.f32 %v2659_v1, %v2388_v2  ;;  %v1726_v7 = vadd.f32 %v5155_v46, %v1725_v4  ;;  %v1727_v8 = vpop.f32.mrb[49].mxu1  ;;  %v2131_v21 = vpop.f32.mrb[59].mxu0 }
 0x17b   : > { %v1728_v11 = vpop.f32.mrb[50].mxu1  ;;  %v2684_v8 = vpop.permute.xlu0 %2683 }
 0x17c   : > { %v4071_v15 = vpack.c.bf16 %v3004_v6, %v3003_v5  ;;  %v2111_v16 = vadd.f32 %v2110_v27, %v1726_v7  ;;  %v1729_v17 = vadd.f32 %v5155_v46, %v1728_v11  ;;  %v1730_v18 = vpop.f32.mrb[51].mxu1  ;;  %2341 = vmatmul.mubr.bf16.gmra.mrb[164].mxu0 %v4740_v14  ;;  %v2689_v6 = vpop.permute.xlu1 %2688  ;;  %v4747_v14 = vld [vmem:[%s4857_s22 + $0x540] ss:$16 sps:$4 sm:$0xff]  }
 0x17d   : > { %3832 = vmatprep.mubr.msk.bf16.mxu0 %vm1462_vm0, %v4742_v20 }
 0x17e   : > { %4243 = vst [vmem:[%s5171_s12 + $0x58] sm:$0xff] %v4071_v15   ;;  %v2389_v22 = vmax.f32 %v2111_v16, 0.0  ;;  %v2114_v23 = vadd.f32 %v2113_v36, %v1729_v17  ;;  %1940 = vmatmul.mubr.bf16.gmra.mrb[156].mxu1 %v4729_v9  ;;  %v4750_v17 = vld [vmem:[%s4857_s22 + $0x564] ss:$16 sps:$4 sm:$0xff]  }
 0x17f   : > { %1947 = vmatprep.mubr.bf16.mxu1 %v4732_v12  ;;  %v2134_v33 = vpop.f32.mrb[60].mxu0 }
 0x180   : > { %v2390_v25 = vmax.f32 %v2114_v23, 0.0  ;;  %v3005_v28 = vmul.f32 %v2664_v26, %v2389_v22  ;;  %v2136_v36 = vpop.f32.mrb[61].mxu0 }
 0x181   : > { %v1733_v27 = vpop.f32.mrb[52].mxu1  ;;  %v2137_v42 = vpop.f32.mrb[62].mxu0 }
 0x182   : > { %v3006_v29 = vmul.f32 %v2669_v24, %v2390_v25  ;;  %v1734_v30 = vadd.f32 %v5155_v46, %v1733_v27  ;;  %v1735_v31 = vpop.f32.mrb[53].mxu1  ;;  %v2139_v44 = vpop.f32.mrb[63].mxu0 }
 0x183   : > { %v1736_v34 = vpop.f32.mrb[54].mxu1  ;;  %v2699_v27 = vpop.permute.xlu1 %2698 }
 0x184   : > { %v4076_v38 = vpack.c.bf16 %v3006_v29, %v3005_v28  ;;  %v2119_v39 = vadd.f32 %v2118_v51, %v1734_v30  ;;  %v1737_v40 = vadd.f32 %v5155_v46, %v1736_v34  ;;  %v1738_v41 = vpop.f32.mrb[55].mxu1  ;;  %2349 = vmatmul.mubr.bf16.gmra.mrb[168].mxu0 %v4746_v37  ;;  %v2694_v29 = vpop.permute.xlu0 %2693 }
 0x185   : > { %3833 = vmatprep.mubr.msk.bf16.mxu0 %vm1462_vm0, %v4748_v43 }
 0x186   : > { %4244 = vst [vmem:[%s5171_s12 + $0x60] sm:$0xff] %v4076_v38   ;;  %v2391_v45 = vmax.f32 %v2119_v39, 0.0  ;;  %v2122_v47 = vadd.f32 %v2121_v60, %v1737_v40  ;;  %1948 = vmatmul.mubr.bf16.gmra.mrb[160].mxu1 %v4735_v32 }
 0x187   : > { %1955 = vmatprep.mubr.bf16.mxu1 %v4738_v35  ;;  %v2142_v57 = vpop.f32.mrb[64].mxu0  ;;  %v4753_v35 = vld [vmem:[%s4857_s22 + $0x560] ss:$16 sps:$4 sm:$0xff]  }
 0x188   : > { %v2392_v49 = vmax.f32 %v2122_v47, 0.0  ;;  %v3007_v52 = vmul.f32 %v2674_v50, %v2391_v45  ;;  %v2144_v60 = vpop.f32.mrb[65].mxu0  ;;  %v2704_v50 = vpop.permute.xlu0 %2703 }
 0x189   : > { %v1741_v51 = vpop.f32.mrb[56].mxu1  ;;  %v2145_v2 = vpop.f32.mrb[66].mxu0 }
 0x18a   : > { %v3008_v53 = vmul.f32 %v2679_v48, %v2392_v49  ;;  %v1742_v54 = vadd.f32 %v5155_v46, %v1741_v51  ;;  %v1743_v55 = vpop.f32.mrb[57].mxu1  ;;  %v2147_v3 = vpop.f32.mrb[67].mxu0 }
 0x18b   : > { %v1744_v58 = vpop.f32.mrb[58].mxu1  ;;  %v2709_v48 = vpop.permute.xlu1 %2708 }
 0x18c   : > { %v4081_v62 = vpack.c.bf16 %v3008_v53, %v3007_v52  ;;  %v2127_v63 = vadd.f32 %v2126_v10, %v1742_v54  ;;  %v1745_v0 = vadd.f32 %v5155_v46, %v1744_v58  ;;  %v1746_v1 = vpop.f32.mrb[59].mxu1  ;;  %2357 = vmatmul.mubr.bf16.gmra.mrb[172].mxu0 %v4752_v61 }
 0x18e   : > { %4245 = vst [vmem:[%s5171_s12 + $0x68] sm:$0xff] %v4081_v62   ;;  %v2393_v4 = vmax.f32 %v2127_v63, 0.0  ;;  %v2130_v5 = vadd.f32 %v2129_v19, %v1745_v0  ;;  %1956 = vmatmul.mubr.bf16.gmra.mrb[164].mxu1 %v4741_v56 }
 0x18f   : > { %1963 = vmatprep.mubr.bf16.mxu1 %v4744_v59  ;;  %v2150_v15 = vpop.f32.mrb[68].mxu0  ;;  %v2719_v3 = vpop.permute.xlu1 %2718 }
 0x190   : > { %v2394_v7 = vmax.f32 %v2130_v5, 0.0  ;;  %v3009_v11 = vmul.f32 %v2684_v8, %v2393_v4  ;;  %v2152_v18 = vpop.f32.mrb[69].mxu0  ;;  %v2714_v5 = vpop.permute.xlu0 %2713 }
 0x191   : > { %v1749_v9 = vpop.f32.mrb[60].mxu1  ;;  %v2153_v23 = vpop.f32.mrb[70].mxu0 }
 0x192   : > { %v3010_v10 = vmul.f32 %v2689_v6, %v2394_v7  ;;  %v1750_v12 = vadd.f32 %v5155_v46, %v1749_v9  ;;  %v1751_v13 = vpop.f32.mrb[61].mxu1  ;;  %v2155_v24 = vpop.f32.mrb[71].mxu0 }
 0x193   : > { %v1752_v16 = vpop.f32.mrb[62].mxu1 }
 0x194   : > { %v4086_v20 = vpack.c.bf16 %v3010_v10, %v3009_v11  ;;  %v2135_v19 = vadd.f32 %v2134_v33, %v1750_v12  ;;  %v1753_v21 = vadd.f32 %v5155_v46, %v1752_v16  ;;  %v1754_v22 = vpop.f32.mrb[63].mxu1  ;;  %v2724_v24 = vpop.permute.xlu0 %2723 }
 0x195   : > { %v2729_v22 = vpop.permute.xlu1 %2728 }
 0x196   : > { %4246 = vst [vmem:[%s5171_s12 + $0x70] sm:$0xff] %v4086_v20   ;;  %v2395_v25 = vmax.f32 %v2135_v19, 0.0  ;;  %v2138_v26 = vadd.f32 %v2137_v42, %v1753_v21  ;;  %1964 = vmatmul.mubr.bf16.gmra.mrb[168].mxu1 %v4747_v14 }
 0x197   : > { %1971 = vmatprep.mubr.bf16.mxu1 %v4750_v17  ;;  %v2158_v36 = vpop.f32.mrb[72].mxu0 }
 0x198   : > { %v2396_v28 = vmax.f32 %v2138_v26, 0.0  ;;  %v3011_v31 = vmul.f32 %v2694_v29, %v2395_v25  ;;  %v2160_v38 = vpop.f32.mrb[73].mxu0 }
 0x199   : > { %v1757_v30 = vpop.f32.mrb[64].mxu1  ;;  %v2161_v43 = vpop.f32.mrb[74].mxu0 }
 0x19a   : > { %v3012_v32 = vmul.f32 %v2699_v27, %v2396_v28  ;;  %v1758_v33 = vadd.f32 %v5155_v46, %v1757_v30  ;;  %v1759_v34 = vpop.f32.mrb[65].mxu1  ;;  %v2163_v44 = vpop.f32.mrb[75].mxu0 }
 0x19b   : > { %v1760_v37 = vpop.f32.mrb[66].mxu1 }
 0x19c   : > { %v4091_v39 = vpack.c.bf16 %v3012_v32, %v3011_v31  ;;  %v2143_v40 = vadd.f32 %v2142_v57, %v1758_v33  ;;  %v1761_v41 = vadd.f32 %v5155_v46, %v1760_v37  ;;  %v1762_v42 = vpop.f32.mrb[67].mxu1 }
 0x19e   : > { %4247 = vst [vmem:[%s5171_s12 + $0x78] sm:$0xff] %v4091_v39   ;;  %v2397_v45 = vmax.f32 %v2143_v40, 0.0  ;;  %v2146_v47 = vadd.f32 %v2145_v2, %v1761_v41  ;;  %1972 = vmatmul.mubr.bf16.gmra.mrb[172].mxu1 %v4753_v35  ;;  %v5300_v35 = vld [vmem:[%s5382_s2] ss:$0 sm:$0xff] }
 0x19f   : > { %v2166_v56 = vpop.f32.mrb[76].mxu0 }
 0x1a0   : > { %v2398_v49 = vmax.f32 %v2146_v47, 0.0  ;;  %v3013_v52 = vmul.f32 %v2704_v50, %v2397_v45  ;;  %v2168_v58 = vpop.f32.mrb[77].mxu0 }
 0x1a1   : > { %v1765_v51 = vpop.f32.mrb[68].mxu1  ;;  %v2169_v63 = vpop.f32.mrb[78].mxu0 }
 0x1a2   : > { %v3014_v53 = vmul.f32 %v2709_v48, %v2398_v49  ;;  %v1766_v54 = vadd.f32 %v5155_v46, %v1765_v51  ;;  %v1767_v55 = vpop.f32.mrb[69].mxu1  ;;  %v2171_v0 = vpop.f32.mrb[79].mxu0 }
 0x1a3   : > { %v1768_v57 = vpop.f32.mrb[70].mxu1 }
 0x1a4   : > { %v4096_v59 = vpack.c.bf16 %v3014_v53, %v3013_v52  ;;  %v2151_v60 = vadd.f32 %v2150_v15, %v1766_v54  ;;  %v1769_v61 = vadd.f32 %v5155_v46, %v1768_v57  ;;  %v1770_v62 = vpop.f32.mrb[71].mxu1 }
 0x1a6   : > { %4248 = vst [vmem:[%s5171_s12 + $0x80] sm:$0xff] %v4096_v59   ;;  %v2399_v1 = vmax.f32 %v2151_v60, 0.0  ;;  %v2154_v2 = vadd.f32 %v2153_v23, %v1769_v61 }
 0x1a7   : > { %v2174_v10 = vpop.f32.mrb[80].mxu0 }
 0x1a8   : > { %v2400_v4 = vmax.f32 %v2154_v2, 0.0  ;;  %v3015_v7 = vmul.f32 %v2714_v5, %v2399_v1  ;;  %v2176_v13 = vpop.f32.mrb[81].mxu0 }
 0x1a9   : > { %v1773_v6 = vpop.f32.mrb[72].mxu1  ;;  %v2177_v18 = vpop.f32.mrb[82].mxu0 }
 0x1aa   : > { %v3016_v8 = vmul.f32 %v2719_v3, %v2400_v4  ;;  %v1774_v9 = vadd.f32 %v5155_v46, %v1773_v6  ;;  %v1775_v11 = vpop.f32.mrb[73].mxu1  ;;  %v2179_v20 = vpop.f32.mrb[83].mxu0 }
 0x1ab   : > { %v1776_v12 = vpop.f32.mrb[74].mxu1 }
 0x1ac   : > { %v4101_v14 = vpack.c.bf16 %v3016_v8, %v3015_v7  ;;  %v2159_v15 = vadd.f32 %v2158_v36, %v1774_v9  ;;  %v1777_v16 = vadd.f32 %v5155_v46, %v1776_v12  ;;  %v1778_v17 = vpop.f32.mrb[75].mxu1 }
 0x1ae   : > { %4249 = vst [vmem:[%s5171_s12 + $0x88] sm:$0xff] %v4101_v14   ;;  %v2401_v19 = vmax.f32 %v2159_v15, 0.0  ;;  %v2162_v21 = vadd.f32 %v2161_v43, %v1777_v16  ;;  %v2734_v43 = vpop.permute.xlu0 %2733 }
 0x1af   : > { %v2182_v30 = vpop.f32.mrb[84].mxu0 }
 0x1b0   : > { %v2402_v23 = vmax.f32 %v2162_v21, 0.0  ;;  %v3017_v26 = vmul.f32 %v2724_v24, %v2401_v19  ;;  %v2184_v32 = vpop.f32.mrb[85].mxu0 }
 0x1b1   : > { %v1781_v25 = vpop.f32.mrb[76].mxu1  ;;  %v2185_v38 = vpop.f32.mrb[86].mxu0 }
 0x1b2   : > { %v3018_v27 = vmul.f32 %v2729_v22, %v2402_v23  ;;  %v1782_v28 = vadd.f32 %v5155_v46, %v1781_v25  ;;  %v1783_v29 = vpop.f32.mrb[77].mxu1  ;;  %v2187_v39 = vpop.f32.mrb[87].mxu0 }
 0x1b3   : > { %v1784_v31 = vpop.f32.mrb[78].mxu1  ;;  %v2739_v46 = vpop.permute.xlu1 %2738 }
 0x1b4   : > { %v4106_v33 = vpack.c.bf16 %v3018_v27, %v3017_v26  ;;  %v2167_v34 = vadd.f32 %v2166_v56, %v1782_v28  ;;  %v1785_v36 = vadd.f32 %v5300_v35, %v1784_v31  ;;  %v1786_v37 = vpop.f32.mrb[79].mxu1 }
 0x1b6   : > { %4250 = vst [vmem:[%s5171_s12 + $0x90] sm:$0xff] %v4106_v33   ;;  %v2403_v40 = vmax.f32 %v2167_v34, 0.0  ;;  %v2170_v41 = vadd.f32 %v2169_v63, %v1785_v36  ;;  %v2744_v63 = vpop.permute.xlu0 %2743 }
 0x1b7   : > { %v2190_v50 = vpop.f32.mrb[88].mxu0  ;;  %v2749_v61 = vpop.permute.xlu1 %2748 }
 0x1b8   : > { %v2404_v42 = vmax.f32 %v2170_v41, 0.0  ;;  %v3019_v45 = vmul.f32 %v2734_v43, %v2403_v40  ;;  %v2192_v52 = vpop.f32.mrb[89].mxu0 }
 0x1b9   : > { %v1789_v44 = vpop.f32.mrb[80].mxu1  ;;  %v2193_v57 = vpop.f32.mrb[90].mxu0 }
 0x1ba   : > { %v3020_v47 = vmul.f32 %v2739_v46, %v2404_v42  ;;  %v1790_v48 = vadd.f32 %v5300_v35, %v1789_v44  ;;  %v1791_v49 = vpop.f32.mrb[81].mxu1  ;;  %v2195_v58 = vpop.f32.mrb[91].mxu0 }
 0x1bb   : > { %v1792_v51 = vpop.f32.mrb[82].mxu1  ;;  %v2759_v16 = vpop.permute.xlu1 %2758 }
 0x1bc   : > { %v4111_v53 = vpack.c.bf16 %v3020_v47, %v3019_v45  ;;  %v2175_v54 = vadd.f32 %v2174_v10, %v1790_v48  ;;  %v1793_v55 = vadd.f32 %v5300_v35, %v1792_v51  ;;  %v1794_v56 = vpop.f32.mrb[83].mxu1 }
 0x1be   : > { %4251 = vst [vmem:[%s5171_s12 + $0x98] sm:$0xff] %v4111_v53   ;;  %v2405_v59 = vmax.f32 %v2175_v54, 0.0  ;;  %v2178_v60 = vadd.f32 %v2177_v18, %v1793_v55  ;;  %v2754_v18 = vpop.permute.xlu0 %2753 }
 0x1bf   : > { %v2198_v5 = vpop.f32.mrb[92].mxu0  ;;  %v2769_v36 = vpop.permute.xlu1 %2768 }
 0x1c0   : > { %v2406_v62 = vmax.f32 %v2178_v60, 0.0  ;;  %v3021_v1 = vmul.f32 %v2744_v63, %v2405_v59  ;;  %v2200_v7 = vpop.f32.mrb[93].mxu0 }
 0x1c1   : > { %v1797_v0 = vpop.f32.mrb[84].mxu1  ;;  %v2201_v12 = vpop.f32.mrb[94].mxu0 }
 0x1c2   : > { %v3022_v2 = vmul.f32 %v2749_v61, %v2406_v62  ;;  %v1798_v3 = vadd.f32 %v5300_v35, %v1797_v0  ;;  %v1799_v4 = vpop.f32.mrb[85].mxu1  ;;  %v2203_v13 = vpop.f32.mrb[95].mxu0 }
 0x1c3   : > { %v1800_v6 = vpop.f32.mrb[86].mxu1  ;;  %v2779_v55 = vpop.permute.xlu1 %2778 }
 0x1c4   : > { %v4116_v8 = vpack.c.bf16 %v3022_v2, %v3021_v1  ;;  %v2183_v9 = vadd.f32 %v2182_v30, %v1798_v3  ;;  %v1801_v11 = vadd.f32 %v5300_v35, %v1800_v6  ;;  %v1802_v10 = vpop.f32.mrb[87].mxu1 }
 0x1c6   : > { %4252 = vst [vmem:[%s5171_s12 + $0xa0] sm:$0xff] %v4116_v8   ;;  %v2407_v14 = vmax.f32 %v2183_v9, 0.0  ;;  %v2186_v15 = vadd.f32 %v2185_v38, %v1801_v11  ;;  %v2764_v38 = vpop.permute.xlu0 %2763 }
 0x1c7   : > { %v2206_v24 = vpop.f32.mrb[96].mxu0  ;;  %v2789_v11 = vpop.permute.xlu1 %2788 }
 0x1c8   : > { %v2408_v17 = vmax.f32 %v2186_v15, 0.0  ;;  %v3023_v19 = vmul.f32 %v2754_v18, %v2407_v14  ;;  %v2208_v26 = vpop.f32.mrb[97].mxu0 }
 0x1c9   : > { %v1805_v20 = vpop.f32.mrb[88].mxu1  ;;  %v2209_v31 = vpop.f32.mrb[98].mxu0 }
 0x1ca   : > { %v3024_v21 = vmul.f32 %v2759_v16, %v2408_v17  ;;  %v1806_v22 = vadd.f32 %v5300_v35, %v1805_v20  ;;  %v1807_v23 = vpop.f32.mrb[89].mxu1  ;;  %v2211_v32 = vpop.f32.mrb[99].mxu0 }
 0x1cb   : > { %v1808_v25 = vpop.f32.mrb[90].mxu1 }
 0x1cc   : > { %v4121_v27 = vpack.c.bf16 %v3024_v21, %v3023_v19  ;;  %v2191_v28 = vadd.f32 %v2190_v50, %v1806_v22  ;;  %v1809_v29 = vadd.f32 %v5300_v35, %v1808_v25  ;;  %v1810_v30 = vpop.f32.mrb[91].mxu1 }
 0x1ce   : > { %4253 = vst [vmem:[%s5171_s12 + $0xa8] sm:$0xff] %v4121_v27   ;;  %v2409_v33 = vmax.f32 %v2191_v28, 0.0  ;;  %v2194_v34 = vadd.f32 %v2193_v57, %v1809_v29  ;;  %v2774_v57 = vpop.permute.xlu0 %2773  ;;  %v2799_v29 = vpop.permute.xlu1 %2798 }
 0x1cf   : > { %v2214_v43 = vpop.f32.mrb[100].mxu0 }
 0x1d0   : > { %v2410_v37 = vmax.f32 %v2194_v34, 0.0  ;;  %v3025_v40 = vmul.f32 %v2764_v38, %v2409_v33  ;;  %v2216_v45 = vpop.f32.mrb[101].mxu0 }
 0x1d1   : > { %v1813_v39 = vpop.f32.mrb[92].mxu1  ;;  %v2217_v51 = vpop.f32.mrb[102].mxu0 }
 0x1d2   : > { %v3026_v41 = vmul.f32 %v2769_v36, %v2410_v37  ;;  %v1814_v46 = vadd.f32 %v5300_v35, %v1813_v39  ;;  %v1815_v42 = vpop.f32.mrb[93].mxu1  ;;  %v2219_v52 = vpop.f32.mrb[103].mxu0 }
 0x1d3   : > { %v1816_v44 = vpop.f32.mrb[94].mxu1 }
 0x1d4   : > { %v4126_v47 = vpack.c.bf16 %v3026_v41, %v3025_v40  ;;  %v2199_v48 = vadd.f32 %v2198_v5, %v1814_v46  ;;  %v1817_v49 = vadd.f32 %v5300_v35, %v1816_v44  ;;  %v1818_v50 = vpop.f32.mrb[95].mxu1 }
 0x1d6   : > { %4254 = vst [vmem:[%s5171_s12 + $0xb0] sm:$0xff] %v4126_v47   ;;  %v2411_v53 = vmax.f32 %v2199_v48, 0.0  ;;  %v2202_v54 = vadd.f32 %v2201_v12, %v1817_v49  ;;  %v2784_v12 = vpop.permute.xlu0 %2783  ;;  %v2809_v49 = vpop.permute.xlu1 %2808 }
 0x1d7   : > { %v2222_v63 = vpop.f32.mrb[104].mxu0 }
 0x1d8   : > { %v2412_v56 = vmax.f32 %v2202_v54, 0.0  ;;  %v3027_v59 = vmul.f32 %v2774_v57, %v2411_v53  ;;  %v2224_v1 = vpop.f32.mrb[105].mxu0 }
 0x1d9   : > { %v1821_v58 = vpop.f32.mrb[96].mxu1  ;;  %v2225_v6 = vpop.f32.mrb[106].mxu0 }
 0x1da   : > { %v3028_v60 = vmul.f32 %v2779_v55, %v2412_v56  ;;  %v1822_v61 = vadd.f32 %v5300_v35, %v1821_v58  ;;  %v1823_v62 = vpop.f32.mrb[97].mxu1  ;;  %v2227_v7 = vpop.f32.mrb[107].mxu0 }
 0x1db   : > { %v1824_v0 = vpop.f32.mrb[98].mxu1 }
 0x1dc   : > { %v4131_v2 = vpack.c.bf16 %v3028_v60, %v3027_v59  ;;  %v2207_v3 = vadd.f32 %v2206_v24, %v1822_v61  ;;  %v1825_v4 = vadd.f32 %v5300_v35, %v1824_v0  ;;  %v1826_v5 = vpop.f32.mrb[99].mxu1 }
 0x1de   : > { %4255 = vst [vmem:[%s5171_s12 + $0xb8] sm:$0xff] %v4131_v2   ;;  %v2413_v8 = vmax.f32 %v2207_v3, 0.0  ;;  %v2210_v9 = vadd.f32 %v2209_v31, %v1825_v4  ;;  %v2794_v31 = vpop.permute.xlu0 %2793  ;;  %v2819_v4 = vpop.permute.xlu1 %2818 }
 0x1df   : > { %v2230_v18 = vpop.f32.mrb[108].mxu0 }
 0x1e0   : > { %v2414_v10 = vmax.f32 %v2210_v9, 0.0  ;;  %v3029_v14 = vmul.f32 %v2784_v12, %v2413_v8  ;;  %v2232_v19 = vpop.f32.mrb[109].mxu0 }
 0x1e1   : > { %v1829_v13 = vpop.f32.mrb[100].mxu1  ;;  %v2233_v25 = vpop.f32.mrb[110].mxu0 }
 0x1e2   : > { %v3030_v15 = vmul.f32 %v2789_v11, %v2414_v10  ;;  %v1830_v16 = vadd.f32 %v5300_v35, %v1829_v13  ;;  %v1831_v17 = vpop.f32.mrb[101].mxu1  ;;  %v2235_v26 = vpop.f32.mrb[111].mxu0 }
 0x1e3   : > { %v1832_v20 = vpop.f32.mrb[102].mxu1 }
 0x1e4   : > { %v4136_v21 = vpack.c.bf16 %v3030_v15, %v3029_v14  ;;  %v2215_v22 = vadd.f32 %v2214_v43, %v1830_v16  ;;  %v1833_v23 = vadd.f32 %v5300_v35, %v1832_v20  ;;  %v1834_v24 = vpop.f32.mrb[103].mxu1 }
 0x1e6   : > { %4256 = vst [vmem:[%s5171_s12 + $0xc0] sm:$0xff] %v4136_v21   ;;  %v2415_v27 = vmax.f32 %v2215_v22, 0.0  ;;  %v2218_v28 = vadd.f32 %v2217_v51, %v1833_v23  ;;  %v2804_v51 = vpop.permute.xlu0 %2803  ;;  %v2829_v23 = vpop.permute.xlu1 %2828 }
 0x1e7   : > { %v2238_v38 = vpop.f32.mrb[112].mxu0 }
 0x1e8   : > { %v2416_v30 = vmax.f32 %v2218_v28, 0.0  ;;  %v3031_v33 = vmul.f32 %v2794_v31, %v2415_v27  ;;  %v2240_v40 = vpop.f32.mrb[113].mxu0 }
 0x1e9   : > { %v1837_v32 = vpop.f32.mrb[104].mxu1  ;;  %v2241_v44 = vpop.f32.mrb[114].mxu0 }
 0x1ea   : > { %v3032_v34 = vmul.f32 %v2799_v29, %v2416_v30  ;;  %v1838_v36 = vadd.f32 %v5300_v35, %v1837_v32  ;;  %v1839_v37 = vpop.f32.mrb[105].mxu1  ;;  %v2243_v45 = vpop.f32.mrb[115].mxu0 }
 0x1eb   : > { %v1840_v39 = vpop.f32.mrb[106].mxu1 }
 0x1ec   : > { %v4141_v41 = vpack.c.bf16 %v3032_v34, %v3031_v33  ;;  %v2223_v46 = vadd.f32 %v2222_v63, %v1838_v36  ;;  %v1841_v42 = vadd.f32 %v5300_v35, %v1840_v39  ;;  %v1842_v43 = vpop.f32.mrb[107].mxu1 }
 0x1ee   : > { %4257 = vst [vmem:[%s5171_s12 + $0xc8] sm:$0xff] %v4141_v41   ;;  %v2417_v47 = vmax.f32 %v2223_v46, 0.0  ;;  %v2226_v48 = vadd.f32 %v2225_v6, %v1841_v42  ;;  %v2814_v6 = vpop.permute.xlu0 %2813  ;;  %v2839_v42 = vpop.permute.xlu1 %2838 }
 0x1ef   : > { %v2246_v57 = vpop.f32.mrb[116].mxu0 }
 0x1f0   : > { %v2418_v50 = vmax.f32 %v2226_v48, 0.0  ;;  %v3033_v53 = vmul.f32 %v2804_v51, %v2417_v47  ;;  %v2248_v59 = vpop.f32.mrb[117].mxu0 }
 0x1f1   : > { %v1845_v52 = vpop.f32.mrb[108].mxu1  ;;  %v2249_v0 = vpop.f32.mrb[118].mxu0 }
 0x1f2   : > { %v3034_v54 = vmul.f32 %v2809_v49, %v2418_v50  ;;  %v1846_v55 = vadd.f32 %v5300_v35, %v1845_v52  ;;  %v1847_v56 = vpop.f32.mrb[109].mxu1  ;;  %v2251_v1 = vpop.f32.mrb[119].mxu0 }
 0x1f3   : > { %v1848_v58 = vpop.f32.mrb[110].mxu1 }
 0x1f4   : > { %v4146_v60 = vpack.c.bf16 %v3034_v54, %v3033_v53  ;;  %v2231_v61 = vadd.f32 %v2230_v18, %v1846_v55  ;;  %v1849_v62 = vadd.f32 %v5300_v35, %v1848_v58  ;;  %v1850_v63 = vpop.f32.mrb[111].mxu1 }
 0x1f6   : > { %4258 = vst [vmem:[%s5171_s12 + $0xd0] sm:$0xff] %v4146_v60   ;;  %v2419_v2 = vmax.f32 %v2231_v61, 0.0  ;;  %v2234_v3 = vadd.f32 %v2233_v25, %v1849_v62  ;;  %v2824_v25 = vpop.permute.xlu0 %2823  ;;  %v2849_v62 = vpop.permute.xlu1 %2848 }
 0x1f7   : > { %v2254_v12 = vpop.f32.mrb[120].mxu0 }
 0x1f8   : > { %v2420_v5 = vmax.f32 %v2234_v3, 0.0  ;;  %v3035_v8 = vmul.f32 %v2814_v6, %v2419_v2  ;;  %v2256_v14 = vpop.f32.mrb[121].mxu0 }
 0x1f9   : > { %v1853_v7 = vpop.f32.mrb[112].mxu1  ;;  %v2257_v20 = vpop.f32.mrb[122].mxu0 }
 0x1fa   : > { %v3036_v9 = vmul.f32 %v2819_v4, %v2420_v5  ;;  %v1854_v11 = vadd.f32 %v5300_v35, %v1853_v7  ;;  %v1855_v10 = vpop.f32.mrb[113].mxu1  ;;  %v2259_v19 = vpop.f32.mrb[123].mxu0 }
 0x1fb   : > { %v1856_v13 = vpop.f32.mrb[114].mxu1 }
 0x1fc   : > { %v4151_v15 = vpack.c.bf16 %v3036_v9, %v3035_v8  ;;  %v2239_v16 = vadd.f32 %v2238_v38, %v1854_v11  ;;  %v1857_v17 = vadd.f32 %v5300_v35, %v1856_v13  ;;  %v1858_v18 = vpop.f32.mrb[115].mxu1 }
 0x1fe   : > { %4259 = vst [vmem:[%s5171_s12 + $0xd8] sm:$0xff] %v4151_v15   ;;  %v2421_v21 = vmax.f32 %v2239_v16, 0.0  ;;  %v2242_v22 = vadd.f32 %v2241_v44, %v1857_v17  ;;  %v2834_v44 = vpop.permute.xlu0 %2833  ;;  %v2859_v17 = vpop.permute.xlu1 %2858 }
 0x1ff   : > { %v2262_v31 = vpop.f32.mrb[124].mxu0 }
 0x200   : > { %v2422_v24 = vmax.f32 %v2242_v22, 0.0  ;;  %v3037_v27 = vmul.f32 %v2824_v25, %v2421_v21  ;;  %v2264_v33 = vpop.f32.mrb[125].mxu0 }
 0x201   : > { %v1861_v26 = vpop.f32.mrb[116].mxu1  ;;  %v2265_v39 = vpop.f32.mrb[126].mxu0 }
 0x202   : > { %v3038_v28 = vmul.f32 %v2829_v23, %v2422_v24  ;;  %v1862_v29 = vadd.f32 %v5300_v35, %v1861_v26  ;;  %v1863_v30 = vpop.f32.mrb[117].mxu1  ;;  %v2267_v40 = vpop.f32.mrb[127].mxu0 }
 0x203   : > { %v1864_v32 = vpop.f32.mrb[118].mxu1 }
 0x204   : > { %v4156_v34 = vpack.c.bf16 %v3038_v28, %v3037_v27  ;;  %v2247_v36 = vadd.f32 %v2246_v57, %v1862_v29  ;;  %v1865_v37 = vadd.f32 %v5300_v35, %v1864_v32  ;;  %v1866_v38 = vpop.f32.mrb[119].mxu1 }
 0x206   : > { %4260 = vst [vmem:[%s5171_s12 + $0xe0] sm:$0xff] %v4156_v34   ;;  %v2423_v41 = vmax.f32 %v2247_v36, 0.0  ;;  %v2250_v46 = vadd.f32 %v2249_v0, %v1865_v37  ;;  %v2844_v0 = vpop.permute.xlu0 %2843  ;;  %v2869_v37 = vpop.permute.xlu1 %2868 }
 0x207   : > { %v2270_v51 = vpop.f32.mrb[128].mxu0 }
 0x208   : > { %v2424_v43 = vmax.f32 %v2250_v46, 0.0  ;;  %v3039_v47 = vmul.f32 %v2834_v44, %v2423_v41  ;;  %v2272_v53 = vpop.f32.mrb[129].mxu0 }
 0x209   : > { %v1869_v45 = vpop.f32.mrb[120].mxu1  ;;  %v2273_v58 = vpop.f32.mrb[130].mxu0 }
 0x20a   : > { %v3040_v48 = vmul.f32 %v2839_v42, %v2424_v43  ;;  %v1870_v49 = vadd.f32 %v5300_v35, %v1869_v45  ;;  %v1871_v50 = vpop.f32.mrb[121].mxu1  ;;  %v2275_v59 = vpop.f32.mrb[131].mxu0 }
 0x20b   : > { %v1872_v52 = vpop.f32.mrb[122].mxu1 }
 0x20c   : > { %v4161_v54 = vpack.c.bf16 %v3040_v48, %v3039_v47  ;;  %v2255_v55 = vadd.f32 %v2254_v12, %v1870_v49  ;;  %v1873_v56 = vadd.f32 %v5300_v35, %v1872_v52  ;;  %v1874_v57 = vpop.f32.mrb[123].mxu1 }
 0x20e   : > { %4261 = vst [vmem:[%s5171_s12 + $0xe8] sm:$0xff] %v4161_v54   ;;  %v2425_v60 = vmax.f32 %v2255_v55, 0.0  ;;  %v2258_v61 = vadd.f32 %v2257_v20, %v1873_v56  ;;  %v2854_v20 = vpop.permute.xlu0 %2853  ;;  %v2879_v56 = vpop.permute.xlu1 %2878 }
 0x20f   : > { %v2278_v6 = vpop.f32.mrb[132].mxu0 }
 0x210   : > { %v2426_v63 = vmax.f32 %v2258_v61, 0.0  ;;  %v3041_v2 = vmul.f32 %v2844_v0, %v2425_v60  ;;  %v2280_v8 = vpop.f32.mrb[133].mxu0 }
 0x211   : > { %v1877_v1 = vpop.f32.mrb[124].mxu1  ;;  %v2281_v13 = vpop.f32.mrb[134].mxu0 }
 0x212   : > { %v3042_v3 = vmul.f32 %v2849_v62, %v2426_v63  ;;  %v1878_v4 = vadd.f32 %v5300_v35, %v1877_v1  ;;  %v1879_v5 = vpop.f32.mrb[125].mxu1  ;;  %v2283_v14 = vpop.f32.mrb[135].mxu0 }
 0x213   : > { %v1880_v7 = vpop.f32.mrb[126].mxu1 }
 0x214   : > { %v4166_v9 = vpack.c.bf16 %v3042_v3, %v3041_v2  ;;  %v2263_v11 = vadd.f32 %v2262_v31, %v1878_v4  ;;  %v1881_v10 = vadd.f32 %v5300_v35, %v1880_v7  ;;  %v1882_v12 = vpop.f32.mrb[127].mxu1 }
 0x216   : > { %4262 = vst [vmem:[%s5171_s12 + $0xf0] sm:$0xff] %v4166_v9   ;;  %v2427_v15 = vmax.f32 %v2263_v11, 0.0  ;;  %v2266_v16 = vadd.f32 %v2265_v39, %v1881_v10  ;;  %v2864_v39 = vpop.permute.xlu0 %2863  ;;  %v2889_v10 = vpop.permute.xlu1 %2888 }
 0x217   : > { %v2286_v25 = vpop.f32.mrb[136].mxu0 }
 0x218   : > { %v2428_v18 = vmax.f32 %v2266_v16, 0.0  ;;  %v3043_v21 = vmul.f32 %v2854_v20, %v2427_v15  ;;  %v2288_v27 = vpop.f32.mrb[137].mxu0 }
 0x219   : > { %v1885_v19 = vpop.f32.mrb[128].mxu1  ;;  %v2289_v32 = vpop.f32.mrb[138].mxu0 }
 0x21a   : > { %v3044_v22 = vmul.f32 %v2859_v17, %v2428_v18  ;;  %v1886_v23 = vadd.f32 %v5300_v35, %v1885_v19  ;;  %v1887_v24 = vpop.f32.mrb[129].mxu1  ;;  %v2291_v33 = vpop.f32.mrb[139].mxu0 }
 0x21b   : > { %v1888_v26 = vpop.f32.mrb[130].mxu1 }
 0x21c   : > { %v4171_v28 = vpack.c.bf16 %v3044_v22, %v3043_v21  ;;  %v2271_v29 = vadd.f32 %v2270_v51, %v1886_v23  ;;  %v1889_v30 = vadd.f32 %v5300_v35, %v1888_v26  ;;  %v1890_v31 = vpop.f32.mrb[131].mxu1 }
 0x21e   : > { %4263 = vst [vmem:[%s5171_s12 + $0xf8] sm:$0xff] %v4171_v28   ;;  %v2429_v34 = vmax.f32 %v2271_v29, 0.0  ;;  %v2274_v36 = vadd.f32 %v2273_v58, %v1889_v30  ;;  %v2874_v58 = vpop.permute.xlu0 %2873  ;;  %v2899_v30 = vpop.permute.xlu1 %2898 }
 0x21f   : > { %v2294_v44 = vpop.f32.mrb[140].mxu0 }
 0x220   : > { %v2430_v38 = vmax.f32 %v2274_v36, 0.0  ;;  %v3045_v41 = vmul.f32 %v2864_v39, %v2429_v34  ;;  %v2296_v47 = vpop.f32.mrb[141].mxu0 }
 0x221   : > { %v1893_v40 = vpop.f32.mrb[132].mxu1  ;;  %v2297_v52 = vpop.f32.mrb[142].mxu0 }
 0x222   : > { %v3046_v46 = vmul.f32 %v2869_v37, %v2430_v38  ;;  %v1894_v42 = vadd.f32 %v5300_v35, %v1893_v40  ;;  %v1895_v43 = vpop.f32.mrb[133].mxu1  ;;  %v2299_v53 = vpop.f32.mrb[143].mxu0 }
 0x223   : > { %v1896_v45 = vpop.f32.mrb[134].mxu1 }
 0x224   : > { %v4176_v48 = vpack.c.bf16 %v3046_v46, %v3045_v41  ;;  %v2279_v49 = vadd.f32 %v2278_v6, %v1894_v42  ;;  %v1897_v50 = vadd.f32 %v5300_v35, %v1896_v45  ;;  %v1898_v51 = vpop.f32.mrb[135].mxu1 }
 0x226   : > { %4264 = vst [vmem:[%s5171_s12 + $0x100] sm:$0xff] %v4176_v48   ;;  %v2431_v54 = vmax.f32 %v2279_v49, 0.0  ;;  %v2282_v55 = vadd.f32 %v2281_v13, %v1897_v50  ;;  %v2884_v13 = vpop.permute.xlu0 %2883  ;;  %v2909_v50 = vpop.permute.xlu1 %2908 }
 0x227   : > { %v2302_v0 = vpop.f32.mrb[144].mxu0 }
 0x228   : > { %v2432_v57 = vmax.f32 %v2282_v55, 0.0  ;;  %v3047_v60 = vmul.f32 %v2874_v58, %v2431_v54  ;;  %v2304_v2 = vpop.f32.mrb[145].mxu0 }
 0x229   : > { %v1901_v59 = vpop.f32.mrb[136].mxu1  ;;  %v2305_v7 = vpop.f32.mrb[146].mxu0 }
 0x22a   : > { %v3048_v61 = vmul.f32 %v2879_v56, %v2432_v57  ;;  %v1902_v62 = vadd.f32 %v5300_v35, %v1901_v59  ;;  %v1903_v63 = vpop.f32.mrb[137].mxu1  ;;  %v2307_v8 = vpop.f32.mrb[147].mxu0 }
 0x22b   : > { %v1904_v1 = vpop.f32.mrb[138].mxu1 }
 0x22c   : > { %v4181_v3 = vpack.c.bf16 %v3048_v61, %v3047_v60  ;;  %v2287_v4 = vadd.f32 %v2286_v25, %v1902_v62  ;;  %v1905_v5 = vadd.f32 %v5300_v35, %v1904_v1  ;;  %v1906_v6 = vpop.f32.mrb[139].mxu1 }
 0x22e   : > { %4265 = vst [vmem:[%s5171_s12 + $0x108] sm:$0xff] %v4181_v3   ;;  %v2433_v9 = vmax.f32 %v2287_v4, 0.0  ;;  %v2290_v11 = vadd.f32 %v2289_v32, %v1905_v5  ;;  %v2894_v32 = vpop.permute.xlu0 %2893  ;;  %v2919_v5 = vpop.permute.xlu1 %2918 }
 0x22f   : > { %v2310_v20 = vpop.f32.mrb[148].mxu0 }
 0x230   : > { %v2434_v12 = vmax.f32 %v2290_v11, 0.0  ;;  %v3049_v15 = vmul.f32 %v2884_v13, %v2433_v9  ;;  %v2312_v21 = vpop.f32.mrb[149].mxu0 }
 0x231   : > { %v1909_v14 = vpop.f32.mrb[140].mxu1  ;;  %v2313_v26 = vpop.f32.mrb[150].mxu0 }
 0x232   : > { %v3050_v16 = vmul.f32 %v2889_v10, %v2434_v12  ;;  %v1910_v17 = vadd.f32 %v5300_v35, %v1909_v14  ;;  %v1911_v18 = vpop.f32.mrb[141].mxu1  ;;  %v2315_v27 = vpop.f32.mrb[151].mxu0 }
 0x233   : > { %v1912_v19 = vpop.f32.mrb[142].mxu1 }
 0x234   : > { %v4186_v22 = vpack.c.bf16 %v3050_v16, %v3049_v15  ;;  %v2295_v23 = vadd.f32 %v2294_v44, %v1910_v17  ;;  %v1913_v24 = vadd.f32 %v5300_v35, %v1912_v19  ;;  %v1914_v25 = vpop.f32.mrb[143].mxu1 }
 0x236   : > { %4266 = vst [vmem:[%s5171_s12 + $0x110] sm:$0xff] %v4186_v22   ;;  %v2435_v28 = vmax.f32 %v2295_v23, 0.0  ;;  %v2298_v29 = vadd.f32 %v2297_v52, %v1913_v24  ;;  %v2904_v52 = vpop.permute.xlu0 %2903  ;;  %v2929_v24 = vpop.permute.xlu1 %2928 }
 0x237   : > { %v2318_v39 = vpop.f32.mrb[152].mxu0 }
 0x238   : > { %v2436_v31 = vmax.f32 %v2298_v29, 0.0  ;;  %v3051_v34 = vmul.f32 %v2894_v32, %v2435_v28  ;;  %v2320_v41 = vpop.f32.mrb[153].mxu0 }
 0x239   : > { %v1917_v33 = vpop.f32.mrb[144].mxu1  ;;  %v2321_v45 = vpop.f32.mrb[154].mxu0 }
 0x23a   : > { %v3052_v36 = vmul.f32 %v2899_v30, %v2436_v31  ;;  %v1918_v37 = vadd.f32 %v5300_v35, %v1917_v33  ;;  %v1919_v38 = vpop.f32.mrb[145].mxu1  ;;  %v2323_v47 = vpop.f32.mrb[155].mxu0 }
 0x23b   : > { %v1920_v40 = vpop.f32.mrb[146].mxu1 }
 0x23c   : > { %v4191_v46 = vpack.c.bf16 %v3052_v36, %v3051_v34  ;;  %v2303_v42 = vadd.f32 %v2302_v0, %v1918_v37  ;;  %v1921_v43 = vadd.f32 %v5300_v35, %v1920_v40  ;;  %v1922_v44 = vpop.f32.mrb[147].mxu1 }
 0x23e   : > { %4267 = vst [vmem:[%s5171_s12 + $0x118] sm:$0xff] %v4191_v46   ;;  %v2437_v48 = vmax.f32 %v2303_v42, 0.0  ;;  %v2306_v49 = vadd.f32 %v2305_v7, %v1921_v43  ;;  %v2914_v7 = vpop.permute.xlu0 %2913  ;;  %v2939_v43 = vpop.permute.xlu1 %2938 }
 0x23f   : > { %v2326_v58 = vpop.f32.mrb[156].mxu0 }
 0x240   : > { %v2438_v51 = vmax.f32 %v2306_v49, 0.0  ;;  %v3053_v54 = vmul.f32 %v2904_v52, %v2437_v48  ;;  %v2328_v60 = vpop.f32.mrb[157].mxu0 }
 0x241   : > { %v1925_v53 = vpop.f32.mrb[148].mxu1  ;;  %v2329_v1 = vpop.f32.mrb[158].mxu0 }
 0x242   : > { %v3054_v55 = vmul.f32 %v2909_v50, %v2438_v51  ;;  %v1926_v56 = vadd.f32 %v5300_v35, %v1925_v53  ;;  %v1927_v57 = vpop.f32.mrb[149].mxu1  ;;  %v2331_v2 = vpop.f32.mrb[159].mxu0 }
 0x243   : > { %v1928_v59 = vpop.f32.mrb[150].mxu1 }
 0x244   : > { %v4196_v61 = vpack.c.bf16 %v3054_v55, %v3053_v54  ;;  %v2311_v62 = vadd.f32 %v2310_v20, %v1926_v56  ;;  %v1929_v63 = vadd.f32 %v5300_v35, %v1928_v59  ;;  %v1930_v0 = vpop.f32.mrb[151].mxu1 }
 0x246   : > { %4268 = vst [vmem:[%s5171_s12 + $0x120] sm:$0xff] %v4196_v61   ;;  %v2439_v3 = vmax.f32 %v2311_v62, 0.0  ;;  %v2314_v4 = vadd.f32 %v2313_v26, %v1929_v63  ;;  %v2924_v26 = vpop.permute.xlu0 %2923  ;;  %v2949_v63 = vpop.permute.xlu1 %2948 }
 0x247   : > { %v2334_v13 = vpop.f32.mrb[160].mxu0 }
 0x248   : > { %v2440_v6 = vmax.f32 %v2314_v4, 0.0  ;;  %v3055_v9 = vmul.f32 %v2914_v7, %v2439_v3  ;;  %v2336_v15 = vpop.f32.mrb[161].mxu0 }
 0x249   : > { %v1933_v8 = vpop.f32.mrb[152].mxu1  ;;  %v2337_v19 = vpop.f32.mrb[162].mxu0 }
 0x24a   : > { %v3056_v11 = vmul.f32 %v2919_v5, %v2440_v6  ;;  %v1934_v10 = vadd.f32 %v5300_v35, %v1933_v8  ;;  %v1935_v12 = vpop.f32.mrb[153].mxu1  ;;  %v2339_v21 = vpop.f32.mrb[163].mxu0 }
 0x24b   : > { %v1936_v14 = vpop.f32.mrb[154].mxu1 }
 0x24c   : > { %v4201_v16 = vpack.c.bf16 %v3056_v11, %v3055_v9  ;;  %v2319_v17 = vadd.f32 %v2318_v39, %v1934_v10  ;;  %v1937_v18 = vadd.f32 %v5300_v35, %v1936_v14  ;;  %v1938_v20 = vpop.f32.mrb[155].mxu1 }
 0x24e   : > { %4269 = vst [vmem:[%s5171_s12 + $0x128] sm:$0xff] %v4201_v16   ;;  %v2441_v22 = vmax.f32 %v2319_v17, 0.0  ;;  %v2322_v23 = vadd.f32 %v2321_v45, %v1937_v18  ;;  %v2934_v45 = vpop.permute.xlu0 %2933  ;;  %v2959_v18 = vpop.permute.xlu1 %2958 }
 0x24f   : > { %v2342_v32 = vpop.f32.mrb[164].mxu0 }
 0x250   : > { %v2442_v25 = vmax.f32 %v2322_v23, 0.0  ;;  %v3057_v28 = vmul.f32 %v2924_v26, %v2441_v22  ;;  %v2344_v34 = vpop.f32.mrb[165].mxu0 }
 0x251   : > { %v1941_v27 = vpop.f32.mrb[156].mxu1  ;;  %v2345_v40 = vpop.f32.mrb[166].mxu0 }
 0x252   : > { %v3058_v29 = vmul.f32 %v2929_v24, %v2442_v25  ;;  %v1942_v30 = vadd.f32 %v5300_v35, %v1941_v27  ;;  %v1943_v31 = vpop.f32.mrb[157].mxu1  ;;  %v2347_v41 = vpop.f32.mrb[167].mxu0 }
 0x253   : > { %v1944_v33 = vpop.f32.mrb[158].mxu1 }
 0x254   : > { %v4206_v36 = vpack.c.bf16 %v3058_v29, %v3057_v28  ;;  %v2327_v37 = vadd.f32 %v2326_v58, %v1942_v30  ;;  %v1945_v38 = vadd.f32 %v5300_v35, %v1944_v33  ;;  %v1946_v39 = vpop.f32.mrb[159].mxu1  ;;  %v2969_v33 = vpop.permute.xlu1 %2968 }
 0x256   : > { %4270 = vst [vmem:[%s5171_s12 + $0x130] sm:$0xff] %v4206_v36   ;;  %v2443_v46 = vmax.f32 %v2327_v37, 0.0  ;;  %v2330_v42 = vadd.f32 %v2329_v1, %v1945_v38  ;;  %v2944_v1 = vpop.permute.xlu0 %2943 }
 0x257   : > { %v2350_v52 = vpop.f32.mrb[168].mxu0 }
 0x258   : > { %v2444_v44 = vmax.f32 %v2330_v42, 0.0  ;;  %v3059_v48 = vmul.f32 %v2934_v45, %v2443_v46  ;;  %v2352_v54 = vpop.f32.mrb[169].mxu0 }
 0x259   : > { %v1949_v47 = vpop.f32.mrb[160].mxu1  ;;  %v2353_v59 = vpop.f32.mrb[170].mxu0 }
 0x25a   : > { %v3060_v49 = vmul.f32 %v2939_v43, %v2444_v44  ;;  %v1950_v50 = vadd.f32 %v5300_v35, %v1949_v47  ;;  %v1951_v51 = vpop.f32.mrb[161].mxu1  ;;  %v2355_v60 = vpop.f32.mrb[171].mxu0 }
 0x25b   : > { %v1952_v53 = vpop.f32.mrb[162].mxu1 }
 0x25c   : > { %v4211_v55 = vpack.c.bf16 %v3060_v49, %v3059_v48  ;;  %v2335_v56 = vadd.f32 %v2334_v13, %v1950_v50  ;;  %v1953_v57 = vadd.f32 %v5300_v35, %v1952_v53  ;;  %v1954_v58 = vpop.f32.mrb[163].mxu1  ;;  %v2979_v50 = vpop.permute.xlu1 %2978 }
 0x25e   : > { %4271 = vst [vmem:[%s5171_s12 + $0x138] sm:$0xff] %v4211_v55   ;;  %v2445_v61 = vmax.f32 %v2335_v56, 0.0  ;;  %v2338_v62 = vadd.f32 %v2337_v19, %v1953_v57  ;;  %v2954_v19 = vpop.permute.xlu0 %2953 }
 0x25f   : > { %v2358_v7 = vpop.f32.mrb[172].mxu0 }
 0x260   : > { %v2446_v0 = vmax.f32 %v2338_v62, 0.0  ;;  %v3061_v3 = vmul.f32 %v2944_v1, %v2445_v61  ;;  %v2360_v9 = vpop.f32.mrb[173].mxu0 }
 0x261   : > { %v1957_v2 = vpop.f32.mrb[164].mxu1  ;;  %v2361_v14 = vpop.f32.mrb[174].mxu0 }
 0x262   : > { %v3062_v4 = vmul.f32 %v2949_v63, %v2446_v0  ;;  %v1958_v5 = vadd.f32 %v5300_v35, %v1957_v2  ;;  %v1959_v6 = vpop.f32.mrb[165].mxu1  ;;  %v2363_v15 = vpop.f32.mrb[175].mxu0 }
 0x263   : > { %v1960_v8 = vpop.f32.mrb[166].mxu1  ;;  %v2964_v36 = vpop.permute.xlu0 %2963 }
 0x264   : > { %v4216_v11 = vpack.c.bf16 %v3062_v4, %v3061_v3  ;;  %v2343_v10 = vadd.f32 %v2342_v32, %v1958_v5  ;;  %v1961_v12 = vadd.f32 %v5300_v35, %v1960_v8  ;;  %v1962_v13 = vpop.f32.mrb[167].mxu1 }
 0x266   : > { %4272 = vst [vmem:[%s5171_s12 + $0x140] sm:$0xff] %v4216_v11   ;;  %v2447_v16 = vmax.f32 %v2343_v10, 0.0  ;;  %v2346_v17 = vadd.f32 %v2345_v40, %v1961_v12 }
 0x267   : > { %v2974_v51 = vpop.permute.xlu0 %2973 }
 0x268   : > { %v2448_v20 = vmax.f32 %v2346_v17, 0.0  ;;  %v3063_v22 = vmul.f32 %v2954_v19, %v2447_v16 }
 0x269   : > { %v1965_v21 = vpop.f32.mrb[168].mxu1 }
 0x26a   : > { %v3064_v23 = vmul.f32 %v2959_v18, %v2448_v20  ;;  %v1966_v24 = vadd.f32 %v5300_v35, %v1965_v21  ;;  %v1967_v25 = vpop.f32.mrb[169].mxu1 }
 0x26b   : > { %v1968_v26 = vpop.f32.mrb[170].mxu1 }
 0x26c   : > { %v4221_v27 = vpack.c.bf16 %v3064_v23, %v3063_v22  ;;  %v2351_v28 = vadd.f32 %v2350_v52, %v1966_v24  ;;  %v1969_v29 = vadd.f32 %v5300_v35, %v1968_v26  ;;  %v1970_v30 = vpop.f32.mrb[171].mxu1 }
 0x26e   : > { %4273 = vst [vmem:[%s5171_s12 + $0x148] sm:$0xff] %v4221_v27   ;;  %v2449_v31 = vmax.f32 %v2351_v28, 0.0  ;;  %v2354_v32 = vadd.f32 %v2353_v59, %v1969_v29 }
 0x270   : > { %v2450_v34 = vmax.f32 %v2354_v32, 0.0  ;;  %v3065_v38 = vmul.f32 %v2964_v36, %v2449_v31 }
 0x271   : > { %v1973_v37 = vpop.f32.mrb[172].mxu1 }
 0x272   : > { %v3066_v39 = vmul.f32 %v2969_v33, %v2450_v34  ;;  %v1974_v40 = vadd.f32 %v5300_v35, %v1973_v37  ;;  %v1975_v41 = vpop.f32.mrb[173].mxu1 }
 0x273   : > { %v1976_v46 = vpop.f32.mrb[174].mxu1 }
 0x274   : > { %v4226_v42 = vpack.c.bf16 %v3066_v39, %v3065_v38  ;;  %v2359_v43 = vadd.f32 %v2358_v7, %v1974_v40  ;;  %v1977_v44 = vadd.f32 %v5300_v35, %v1976_v46  ;;  %v1978_v45 = vpop.f32.mrb[175].mxu1 }
 0x276   : > { %4274 = vst [vmem:[%s5171_s12 + $0x150] sm:$0xff] %v4226_v42   ;;  %v2451_v47 = vmax.f32 %v2359_v43, 0.0  ;;  %v2362_v48 = vadd.f32 %v2361_v14, %v1977_v44 }
 0x278   : > { %v2452_v49 = vmax.f32 %v2362_v48, 0.0  ;;  %v3067_v52 = vmul.f32 %v2974_v51, %v2451_v47 }
 0x27a   : > { %v3068_v53 = vmul.f32 %v2979_v50, %v2452_v49 }
 0x27c   : > { %v4231_v54 = vpack.c.bf16 %v3068_v53, %v3067_v52 }
 0x27e   : > { %4275 = vst [vmem:[%s5171_s12 + $0x158] sm:$0xff] %v4231_v54  }
 0x27f PF: > { %s14_s15 = sadd.s32 1, %s4761_s15  }
 0x280   : > { %p11_p4 = scmp.ge.s32.totalorder %s14_s15, 4  }
 0x282   :  { %13 = sbr.rel (!%p11_p4) target bundleno = 1 (0x1), region = 69 }

// kernel: sp_middle_fhd_people_forward.8
= control target key start
LH: loop header
LB: loop body
LE: loop exit
PB: predicated region body
PF: predicated region fallthrough
CT: control target
= control target key end

     0   :  { %s7375_s15 = smov 0   ;;  %s9023_s0 = inlined_call_operand.vmem [shape: bf16[1408,864], index: 0, kind: input, shape index: {}]   ;;  %s9024_s1 = inlined_call_operand.vmem [shape: bf16[864,128], index: 1, kind: input, shape index: {}]   ;;  %s9025_s2 = inlined_call_operand.vmem [shape: f32[1,128], index: 2, kind: input, shape index: {}]   ;;  %s9026_s3 = inlined_call_operand.vmem [shape: f32[1408,1], index: 3, kind: input, shape index: {}]   ;;  %s9027_s4 = inlined_call_operand.vmem [shape: bf16[1408,128], index: 4, kind: output, shape index: {}]  }
   0x1 LB: > { %s5443_s16 = sadd.s32 4294967295, %s7347_s15   ;;  %p5447_p0 = scmp.ge.s32.totalorder %s7347_s15, 1  ;;  %s7347_s15 = sphi %s7375_s15, %s14_s15  }
   0x2   : > { %p175_p1 = scmp.lt.s32.totalorder %s7347_s15, 3 }
   0x4   : > { %p176_p2 = pnand %p5447_p0, %p175_p1 }
   0x6   : > { %179 = sbr.rel (%p176_p2) target bundleno = 912 (0x390), region = 36 }
   0xd   : > { %v6845_v0 = vld [vmem:[%s9024_s1] sm:$0xff]   ;;  %v7349_v1 = vmov 0   ;;  %v6847_v3 = vld [vmem:[%s9024_s1 + $0x8] sm:$0xff]   ;;  %v6849_v5 = vld [vmem:[%s9024_s1 + $0x10] sm:$0xff]   ;;  %s207_s9 = smul.u32 88, %s5443_s16  ;;  %vm2558_vm0 = vcmask 785408  }
   0xe   : > { %2691 = vmatprep.subr.bf16.mxu1 %v7349_v1  ;;  %3076 = vmatprep.subr.bf16.mxu0 %v7349_v1  ;;  %v7391_v2 = vld [vmem:[%s9024_s1 + $0x80] sm:$0xff]   ;;  %v7402_v4 = vld [vmem:[%s9024_s1 + $0x88] sm:$0xff]   ;;  %v7414_v6 = vld [vmem:[%s9024_s1 + $0x90] sm:$0xff]  }
   0xf   : > { %2692 = vmatpush1.bf16.msra.mxu1 %v6845_v0  ;;  %6844 = vset.pattern.permute.xlu1 %v7349_v1  ;;  %v6851_v7 = vld [vmem:[%s9024_s1 + $0x18] sm:$0xff]   ;;  %v6853_v9 = vld [vmem:[%s9024_s1 + $0x20] sm:$0xff]   ;;  %v6855_v11 = vld [vmem:[%s9024_s1 + $0x28] sm:$0xff]   ;;  %p208_p3 = scmp.lt.s32.totalorder %s207_s9, 175 }
  0x10   : > { %3077 = vmatpush1.bf16.msra.mxu0 %v7391_v2  ;;  %2693 = vmatprep.subr.bf16.mxu1 %v7349_v1  ;;  %v7425_v8 = vld [vmem:[%s9024_s1 + $0x98] sm:$0xff]   ;;  %v7438_v10 = vld [vmem:[%s9024_s1 + $0xa0] sm:$0xff]   ;;  %v7449_v12 = vld [vmem:[%s9024_s1 + $0xa8] sm:$0xff]  }
  0x11   : > { %3078 = vmatprep.subr.bf16.mxu0 %v7349_v1  ;;  %6843 = vset.pattern.permute.xlu0 %v7349_v1  ;;  %v6857_v13 = vld [vmem:[%s9024_s1 + $0x30] sm:$0xff]   ;;  %s9203_s9 = smov (!%p208_p3, %s207_s9), 175  ;;  %v6859_v15 = vld [vmem:[%s9024_s1 + $0x38] sm:$0xff]   ;;  %v6861_v17 = vld [vmem:[%s9024_s1 + $0x40] sm:$0xff]  }
  0x12   : > { %v7462_v14 = vld [vmem:[%s9024_s1 + $0xb0] sm:$0xff]   ;;  %s6833_s23 = smul.u32 28, %s9203_s9  ;;  %v7474_v16 = vld [vmem:[%s9024_s1 + $0xb8] sm:$0xff]   ;;  %v7490_v18 = vld [vmem:[%s9024_s1 + $0xc0] sm:$0xff]   ;;  %s5449_s25 = sshll.u32 %s9203_s9, 3 }
  0x13   : > { %2694 = vmatpush1.bf16.msra.mxu1 %v6847_v3  ;;  %v6863_v20 = vld [vmem:[%s9024_s1 + $0x48] sm:$0xff]   ;;  %v6865_v23 = vld [vmem:[%s9024_s1 + $0x50] sm:$0xff]   ;;  %v6867_v25 = vld [vmem:[%s9024_s1 + $0x58] sm:$0xff]   ;;  %s7805_s28 = scalar_lea.vmem %s9026_s3, %s5449_s25 }
  0x14   : > { %3079 = vmatpush1.bf16.msra.mxu0 %v7402_v4  ;;  %2695 = vmatprep.subr.bf16.mxu1 %v7349_v1  ;;  %s7483_s30 = scalar_lea.vmem %s9023_s0, %s6833_s23  ;;  %v7503_v22 = vld [vmem:[%s9024_s1 + $0xc8] sm:$0xff]   ;;  %v7514_v24 = vld [vmem:[%s9024_s1 + $0xd0] sm:$0xff]   ;;  %v7525_v26 = vld [vmem:[%s9024_s1 + $0xd8] sm:$0xff]  }
  0x15   : > { %3080 = vmatprep.subr.bf16.mxu0 %v7349_v1  ;;  %v6879_v19 = vld [vmem:[%s7483_s30 + $0x4] ss:$28 sps:$4 sm:$0xff]   ;;  %v6882_v21 = vld [vmem:[%s7483_s30 + $0xc] ss:$28 sps:$4 sm:$0xff]   ;;  %v6873_v31 = vld [vmem:[%s9024_s1 + $0x70] sm:$0xff]  }
  0x16   : > { %2723 = vmatprep.mubr.bf16.mxu1 %v6879_v19  ;;  %3108 = vmatprep.mubr.bf16.mxu0 %v6882_v21  ;;  %v6869_v27 = vld [vmem:[%s9024_s1 + $0x60] sm:$0xff]   ;;  %v6871_v29 = vld [vmem:[%s9024_s1 + $0x68] sm:$0xff]   ;;  %v7558_v32 = vld [vmem:[%s9024_s1 + $0xf0] sm:$0xff]  }
  0x17   : > { %2696 = vmatpush1.bf16.msra.mxu1 %v6849_v5  ;;  %v7536_v28 = vld [vmem:[%s9024_s1 + $0xe0] sm:$0xff]   ;;  %v7547_v30 = vld [vmem:[%s9024_s1 + $0xe8] sm:$0xff]   ;;  %v6875_v33 = vld [vmem:[%s9024_s1 + $0x78] sm:$0xff]  }
  0x18   : > { %3081 = vmatpush1.bf16.msra.mxu0 %v7414_v6  ;;  %2697 = vmatprep.subr.bf16.mxu1 %v7349_v1  ;;  %v7569_v34 = vld [vmem:[%s9024_s1 + $0xf8] sm:$0xff]   ;;  %v6880_v36 = vld [vmem:[%s7483_s30 + $0x8] ss:$28 sps:$4 sm:$0xff]   ;;  %v6890_v43 = vld [vmem:[%s7483_s30 + $0x74] ss:$28 sps:$4 sm:$0xff]  }
  0x19   : > { %3082 = vmatprep.subr.bf16.mxu0 %v7349_v1  ;;  %v6877_v35 = vld [vmem:[%s7483_s30] ss:$28 sps:$4 sm:$0xff]   ;;  %v6896_v40 = vld [vmem:[%s9024_s1 + $0x108] sm:$0xff]   ;;  %v6888_v41 = vld [vmem:[%s7483_s30 + $0x38] ss:$28 sps:$4 sm:$0xff]  }
  0x1a   : > { %v6883_v37 = vld [vmem:[%s9024_s1 + $0x100] sm:$0xff]   ;;  %v6884_v38 = vld [vmem:[%s7483_s30 + $0x3c] ss:$28 sps:$4 sm:$0xff]   ;;  %v6909_v45 = vld [vmem:[%s9024_s1 + $0x110] sm:$0xff]  }
  0x1b   : > { %2698 = vmatpush1.bf16.msra.mxu1 %v6851_v7  ;;  %v6886_v39 = vld [vmem:[%s7483_s30 + $0x44] ss:$28 sps:$4 sm:$0xff]   ;;  %v6892_v44 = vld [vmem:[%s7483_s30 + $0x7c] ss:$28 sps:$4 sm:$0xff]   ;;  %v6894_v47 = vld [vmem:[%s7483_s30 + $0x70] ss:$28 sps:$4 sm:$0xff]  }
  0x1c   : > { %3083 = vmatpush1.bf16.msra.mxu0 %v7425_v8  ;;  %2699 = vmatprep.subr.bf16.mxu1 %v7349_v1  ;;  %v6889_v42 = vld [vmem:[%s7483_s30 + $0x40] ss:$28 sps:$4 sm:$0xff]   ;;  %v6895_v48 = vld [vmem:[%s7483_s30 + $0x78] ss:$28 sps:$4 sm:$0xff]   ;;  %v6897_v49 = vld [vmem:[%s7483_s30 + $0xac] ss:$28 sps:$4 sm:$0xff]  }
  0x1d   : > { %3084 = vmatprep.subr.bf16.mxu0 %v7349_v1  ;;  %v6922_v46 = vld [vmem:[%s9024_s1 + $0x118] sm:$0xff]   ;;  %v6899_v50 = vld [vmem:[%s7483_s30 + $0xb4] ss:$28 sps:$4 sm:$0xff]   ;;  %v6935_v51 = vld [vmem:[%s9024_s1 + $0x120] sm:$0xff]  }
  0x1e   : > { %v6948_v52 = vld [vmem:[%s9024_s1 + $0x128] sm:$0xff]   ;;  %v6903_v55 = vld [vmem:[%s7483_s30 + $0xe4] ss:$28 sps:$4 sm:$0xff]   ;;  %v6961_v57 = vld [vmem:[%s9024_s1 + $0x130] sm:$0xff]  }
  0x1f   : > { %2700 = vmatpush1.bf16.msra.mxu1 %v6853_v9  ;;  %v6901_v53 = vld [vmem:[%s7483_s30 + $0xa8] ss:$28 sps:$4 sm:$0xff]   ;;  %v6902_v54 = vld [vmem:[%s7483_s30 + $0xb0] ss:$28 sps:$4 sm:$0xff]   ;;  %v6974_v58 = vld [vmem:[%s9024_s1 + $0x138] sm:$0xff]  }
  0x20   : > { %3085 = vmatpush1.bf16.msra.mxu0 %v7438_v10  ;;  %2701 = vmatprep.subr.bf16.mxu1 %v7349_v1  ;;  %v6905_v56 = vld [vmem:[%s7483_s30 + $0xec] ss:$28 sps:$4 sm:$0xff]   ;;  %v6907_v59 = vld [vmem:[%s7483_s30 + $0xe0] ss:$28 sps:$4 sm:$0xff]   ;;  %v6914_v0 = vld [vmem:[%s7483_s30 + $0x118] ss:$28 sps:$4 sm:$0xff]  }
  0x21   : > { %3086 = vmatprep.subr.bf16.mxu0 %v7349_v1  ;;  %v6908_v60 = vld [vmem:[%s7483_s30 + $0xe8] ss:$28 sps:$4 sm:$0xff]   ;;  %v6910_v61 = vld [vmem:[%s7483_s30 + $0x11c] ss:$28 sps:$4 sm:$0xff]   ;;  %v6920_v7 = vld [vmem:[%s7483_s30 + $0x150] ss:$28 sps:$4 sm:$0xff]  }
  0x22   : > { %v6912_v62 = vld [vmem:[%s7483_s30 + $0x124] ss:$28 sps:$4 sm:$0xff]   ;;  %v6918_v5 = vld [vmem:[%s7483_s30 + $0x15c] ss:$28 sps:$4 sm:$0xff]   ;;  %v6923_v9 = vld [vmem:[%s7483_s30 + $0x18c] ss:$28 sps:$4 sm:$0xff]  }
  0x23   : > { %2702 = vmatpush1.bf16.msra.mxu1 %v6855_v11  ;;  %v6987_v63 = vld [vmem:[%s9024_s1 + $0x140] sm:$0xff]  }
  0x24   : > { %3087 = vmatpush1.bf16.msra.mxu0 %v7449_v12  ;;  %2703 = vmatprep.subr.bf16.mxu1 %v7349_v1  ;;  %v6915_v3 = vld [vmem:[%s7483_s30 + $0x120] ss:$28 sps:$4 sm:$0xff]   ;;  %v6927_v11 = vld [vmem:[%s7483_s30 + $0x188] ss:$28 sps:$4 sm:$0xff]  }
  0x25   : > { %3088 = vmatprep.subr.bf16.mxu0 %v7349_v1  ;;  %v6938_v19 = vld [vmem:[%s7483_s30 + $0x204] ss:$28 sps:$4 sm:$0xff]  }
  0x26   : > { %v7043_v21 = vld [vmem:[%s9024_s1 + $0x160] sm:$0xff]  }
  0x27   : > { %2704 = vmatpush1.bf16.msra.mxu1 %v6857_v13  ;;  %v6928_v13 = vld [vmem:[%s7483_s30 + $0x190] ss:$28 sps:$4 sm:$0xff]  }
  0x28   : > { %3089 = vmatpush1.bf16.msra.mxu0 %v7462_v14  ;;  %2705 = vmatprep.subr.bf16.mxu1 %v7349_v1 }
  0x29   : > { %3090 = vmatprep.subr.bf16.mxu0 %v7349_v1 }
  0x2b   : > { %2706 = vmatpush1.bf16.msra.mxu1 %v6859_v15  ;;  %v6931_v15 = vld [vmem:[%s7483_s30 + $0x1cc] ss:$28 sps:$4 sm:$0xff]  }
  0x2c   : > { %3091 = vmatpush1.bf16.msra.mxu0 %v7474_v16  ;;  %2707 = vmatprep.subr.bf16.mxu1 %v7349_v1 }
  0x2d   : > { %3092 = vmatprep.subr.bf16.mxu0 %v7349_v1 }
  0x2f   : > { %2708 = vmatpush1.bf16.msra.mxu1 %v6861_v17  ;;  %v6934_v17 = vld [vmem:[%s7483_s30 + $0x1c8] ss:$28 sps:$4 sm:$0xff]  }
  0x30   : > { %3093 = vmatpush1.bf16.msra.mxu0 %v7490_v18  ;;  %2709 = vmatprep.subr.bf16.mxu1 %v7349_v1 }
  0x31   : > { %3094 = vmatprep.subr.bf16.mxu0 %v7349_v1 }
  0x33   : > { %2710 = vmatpush1.bf16.msra.mxu1 %v6863_v20  ;;  %v6940_v20 = vld [vmem:[%s7483_s30 + $0x1f8] ss:$28 sps:$4 sm:$0xff]  }
  0x34   : > { %3095 = vmatpush1.bf16.msra.mxu0 %v7503_v22  ;;  %2711 = vmatprep.subr.bf16.mxu1 %v7349_v1 }
  0x35   : > { %3096 = vmatprep.subr.bf16.mxu0 %v7349_v1 }
  0x37   : > { %2712 = vmatpush1.bf16.msra.mxu1 %v6865_v23  ;;  %v6942_v23 = vld [vmem:[%s7483_s30 + $0x234] ss:$28 sps:$4 sm:$0xff]  }
  0x38   : > { %3097 = vmatpush1.bf16.msra.mxu0 %v7514_v24  ;;  %2713 = vmatprep.subr.bf16.mxu1 %v7349_v1 }
  0x39   : > { %3098 = vmatprep.subr.bf16.mxu0 %v7349_v1 }
  0x3b   : > { %2714 = vmatpush1.bf16.msra.mxu1 %v6867_v25  ;;  %v6946_v25 = vld [vmem:[%s7483_s30 + $0x230] ss:$28 sps:$4 sm:$0xff]  }
  0x3c   : > { %3099 = vmatpush1.bf16.msra.mxu0 %v7525_v26  ;;  %2715 = vmatprep.subr.bf16.mxu1 %v7349_v1 }
  0x3d   : > { %3100 = vmatprep.subr.bf16.mxu0 %v7349_v1 }
  0x3f   : > { %2716 = vmatpush1.bf16.msra.mxu1 %v6869_v27  ;;  %v6949_v27 = vld [vmem:[%s7483_s30 + $0x26c] ss:$28 sps:$4 sm:$0xff]  }
  0x40   : > { %3101 = vmatpush1.bf16.msra.mxu0 %v7536_v28  ;;  %2717 = vmatprep.subr.bf16.mxu1 %v7349_v1 }
  0x41   : > { %3102 = vmatprep.subr.bf16.mxu0 %v7349_v1 }
  0x43   : > { %2718 = vmatpush1.bf16.msra.mxu1 %v6871_v29  ;;  %v6953_v29 = vld [vmem:[%s7483_s30 + $0x268] ss:$28 sps:$4 sm:$0xff]  }
  0x44   : > { %3103 = vmatpush1.bf16.msra.mxu0 %v7547_v30  ;;  %2719 = vmatprep.subr.bf16.mxu1 %v7349_v1 }
  0x45   : > { %3104 = vmatprep.subr.bf16.mxu0 %v7349_v1 }
  0x47   : > { %2720 = vmatpush1.bf16.msra.mxu1 %v6873_v31  ;;  %v6955_v31 = vld [vmem:[%s7483_s30 + $0x2a4] ss:$28 sps:$4 sm:$0xff]  }
  0x48   : > { %3105 = vmatpush1.bf16.msra.mxu0 %v7558_v32  ;;  %2721 = vmatprep.subr.bf16.mxu1 %v7349_v1 }
  0x49   : > { %3106 = vmatprep.subr.bf16.mxu0 %v7349_v1 }
  0x4b   : > { %2722 = vmatpush1.bf16.msra.mxu1 %v6875_v33  ;;  %v7058_v33 = vld [vmem:[%s9024_s1 + $0x168] sm:$0xff]  }
  0x4c   : > { %3107 = vmatpush1.bf16.msra.mxu0 %v7569_v34  ;;  %6449 = vmatprep.subr.bf16.mxu1 %v7349_v1 }
  0x4d   : > { %3461 = vmatprep.subr.bf16.mxu0 %v7349_v1 }
  0x4e   : > { %2724 = vmatmul.mubr.bf16.vlgmr.msra.gmra.mrb[0].mxu1 %v6877_v35  ;;  %v6960_v35 = vld [vmem:[%s7483_s30 + $0x2a8] ss:$28 sps:$4 sm:$0xff]  }
  0x4f   : > { %3109 = vmatmul.mubr.bf16.vlgmr.msra.gmra.mrb[0].mxu0 %v6880_v36  ;;  %6465 = vmatpush1.bf16.msra.mxu1 %v7391_v2  ;;  %v7000_v2 = vld [vmem:[%s9024_s1 + $0x148] sm:$0xff]   ;;  %v6962_v36 = vld [vmem:[%s7483_s30 + $0x2dc] ss:$28 sps:$4 sm:$0xff]  }
  0x50   : > { %3462 = vmatpush1.bf16.msra.mxu0 %v6883_v37  ;;  %2731 = vmatprep.mubr.bf16.mxu1 %v6884_v38  ;;  %v6964_v37 = vld [vmem:[%s7483_s30 + $0x2e4] ss:$28 sps:$4 sm:$0xff]   ;;  %v6966_v38 = vld [vmem:[%s7483_s30 + $0x2d8] ss:$28 sps:$4 sm:$0xff]  }
  0x51   : > { %3116 = vmatprep.mubr.bf16.mxu0 %v6886_v39  ;;  %3463 = vmatprep.subr.bf16.mxu0 %v7349_v1  ;;  %v6967_v39 = vld [vmem:[%s7483_s30 + $0x2e0] ss:$28 sps:$4 sm:$0xff]  }
  0x52   : > { %6450 = vmatprep.subr.bf16.mxu1 %v7349_v1 }
  0x53   : > { %6466 = vmatpush1.bf16.msra.mxu1 %v7402_v4  ;;  %v6916_v4 = vld [vmem:[%s7483_s30 + $0x154] ss:$28 sps:$4 sm:$0xff]  }
  0x54   : > { %3464 = vmatpush1.bf16.msra.mxu0 %v6896_v40  ;;  %6451 = vmatprep.subr.bf16.mxu1 %v7349_v1  ;;  %v6968_v40 = vld [vmem:[%s7483_s30 + $0x314] ss:$28 sps:$4 sm:$0xff]  }
  0x55   : > { %3465 = vmatprep.subr.bf16.mxu0 %v7349_v1 }
  0x56   : > { %2732 = vmatmul.mubr.bf16.gmra.mrb[4].mxu1 %v6888_v41  ;;  %v6970_v41 = vld [vmem:[%s7483_s30 + $0x31c] ss:$28 sps:$4 sm:$0xff]  }
  0x57   : > { %3117 = vmatmul.mubr.bf16.gmra.mrb[4].mxu0 %v6889_v42  ;;  %2739 = vmatprep.mubr.bf16.mxu1 %v6890_v43  ;;  %v7071_v42 = vld [vmem:[%s9024_s1 + $0x170] sm:$0xff]  }
  0x58   : > { %3124 = vmatprep.mubr.bf16.mxu0 %v6892_v44  ;;  %3466 = vmatpush1.bf16.msra.mxu0 %v6909_v45  ;;  %v6972_v43 = vld [vmem:[%s7483_s30 + $0x310] ss:$28 sps:$4 sm:$0xff]   ;;  %v6973_v44 = vld [vmem:[%s7483_s30 + $0x318] ss:$28 sps:$4 sm:$0xff]  }
  0x59   : > { %6467 = vmatpush1.bf16.msra.mxu1 %v7414_v6  ;;  %3467 = vmatprep.subr.bf16.mxu0 %v7349_v1  ;;  %v7013_v6 = vld [vmem:[%s9024_s1 + $0x150] sm:$0xff]   ;;  %v6975_v45 = vld [vmem:[%s7483_s30 + $0x34c] ss:$28 sps:$4 sm:$0xff]  }
  0x5a   : > { %6452 = vmatprep.subr.bf16.mxu1 %v7349_v1 }
  0x5c   : > { %3468 = vmatpush1.bf16.msra.mxu0 %v6922_v46  ;;  %v6977_v46 = vld [vmem:[%s7483_s30 + $0x354] ss:$28 sps:$4 sm:$0xff]  }
  0x5d   : > { %3469 = vmatprep.subr.bf16.mxu0 %v7349_v1  ;;  %6468 = vmatpush1.bf16.msra.mxu1 %v7425_v8  ;;  %v6921_v8 = vld [vmem:[%s7483_s30 + $0x158] ss:$28 sps:$4 sm:$0xff]  }
  0x5e   : > { %2740 = vmatmul.mubr.bf16.gmra.mrb[8].mxu1 %v6894_v47  ;;  %6453 = vmatprep.subr.bf16.mxu1 %v7349_v1  ;;  %v6979_v47 = vld [vmem:[%s7483_s30 + $0x348] ss:$28 sps:$4 sm:$0xff]  }
  0x5f   : > { %3125 = vmatmul.mubr.bf16.gmra.mrb[8].mxu0 %v6895_v48  ;;  %2747 = vmatprep.mubr.bf16.mxu1 %v6897_v49  ;;  %v6980_v48 = vld [vmem:[%s7483_s30 + $0x350] ss:$28 sps:$4 sm:$0xff]   ;;  %v6981_v49 = vld [vmem:[%s7483_s30 + $0x384] ss:$28 sps:$4 sm:$0xff]  }
  0x60   : > { %3132 = vmatprep.mubr.bf16.mxu0 %v6899_v50  ;;  %3470 = vmatpush1.bf16.msra.mxu0 %v6935_v51  ;;  %v6983_v50 = vld [vmem:[%s7483_s30 + $0x38c] ss:$28 sps:$4 sm:$0xff]   ;;  %v6985_v51 = vld [vmem:[%s7483_s30 + $0x380] ss:$28 sps:$4 sm:$0xff]  }
  0x61   : > { %3471 = vmatprep.subr.bf16.mxu0 %v7349_v1  ;;  %6469 = vmatpush1.bf16.msra.mxu1 %v7438_v10  ;;  %v6925_v10 = vld [vmem:[%s7483_s30 + $0x194] ss:$28 sps:$4 sm:$0xff]  }
  0x62   : > { %6454 = vmatprep.subr.bf16.mxu1 %v7349_v1 }
  0x64   : > { %3472 = vmatpush1.bf16.msra.mxu0 %v6948_v52  ;;  %v6986_v52 = vld [vmem:[%s7483_s30 + $0x388] ss:$28 sps:$4 sm:$0xff]  }
  0x65   : > { %3473 = vmatprep.subr.bf16.mxu0 %v7349_v1  ;;  %6470 = vmatpush1.bf16.msra.mxu1 %v7449_v12  ;;  %v7030_v12 = vld [vmem:[%s9024_s1 + $0x158] sm:$0xff]  }
  0x66   : > { %2748 = vmatmul.mubr.bf16.gmra.mrb[12].mxu1 %v6901_v53  ;;  %6455 = vmatprep.subr.bf16.mxu1 %v7349_v1  ;;  %v6988_v53 = vld [vmem:[%s7483_s30 + $0x3bc] ss:$28 sps:$4 sm:$0xff]  }
  0x67   : > { %3133 = vmatmul.mubr.bf16.gmra.mrb[12].mxu0 %v6902_v54  ;;  %2755 = vmatprep.mubr.bf16.mxu1 %v6903_v55  ;;  %v6990_v54 = vld [vmem:[%s7483_s30 + $0x3c4] ss:$28 sps:$4 sm:$0xff]   ;;  %v6992_v55 = vld [vmem:[%s7483_s30 + $0x3b8] ss:$28 sps:$4 sm:$0xff]  }
  0x68   : > { %3140 = vmatprep.mubr.bf16.mxu0 %v6905_v56  ;;  %3474 = vmatpush1.bf16.msra.mxu0 %v6961_v57  ;;  %v6993_v56 = vld [vmem:[%s7483_s30 + $0x3c0] ss:$28 sps:$4 sm:$0xff]   ;;  %v6994_v57 = vld [vmem:[%s7483_s30 + $0x3f4] ss:$28 sps:$4 sm:$0xff]  }
  0x69   : > { %3475 = vmatprep.subr.bf16.mxu0 %v7349_v1  ;;  %6471 = vmatpush1.bf16.msra.mxu1 %v7462_v14  ;;  %v6929_v14 = vld [vmem:[%s7483_s30 + $0x1c4] ss:$28 sps:$4 sm:$0xff]  }
  0x6a   : > { %6456 = vmatprep.subr.bf16.mxu1 %v7349_v1 }
  0x6c   : > { %3476 = vmatpush1.bf16.msra.mxu0 %v6974_v58  ;;  %v6996_v58 = vld [vmem:[%s7483_s30 + $0x3fc] ss:$28 sps:$4 sm:$0xff]  }
  0x6d   : > { %3477 = vmatprep.subr.bf16.mxu0 %v7349_v1  ;;  %6472 = vmatpush1.bf16.msra.mxu1 %v7474_v16  ;;  %v6933_v16 = vld [vmem:[%s7483_s30 + $0x1c0] ss:$28 sps:$4 sm:$0xff]  }
  0x6e   : > { %2756 = vmatmul.mubr.bf16.gmra.mrb[16].mxu1 %v6907_v59  ;;  %6457 = vmatprep.subr.bf16.mxu1 %v7349_v1  ;;  %v6998_v59 = vld [vmem:[%s7483_s30 + $0x3f0] ss:$28 sps:$4 sm:$0xff]  }
  0x6f   : > { %3141 = vmatmul.mubr.bf16.gmra.mrb[16].mxu0 %v6908_v60  ;;  %2763 = vmatprep.mubr.bf16.mxu1 %v6910_v61  ;;  %v6999_v60 = vld [vmem:[%s7483_s30 + $0x3f8] ss:$28 sps:$4 sm:$0xff]   ;;  %v7001_v61 = vld [vmem:[%s7483_s30 + $0x42c] ss:$28 sps:$4 sm:$0xff]  }
  0x70   : > { %3148 = vmatprep.mubr.bf16.mxu0 %v6912_v62  ;;  %3478 = vmatpush1.bf16.msra.mxu0 %v6987_v63  ;;  %v7003_v62 = vld [vmem:[%s7483_s30 + $0x434] ss:$28 sps:$4 sm:$0xff]   ;;  %v7005_v63 = vld [vmem:[%s7483_s30 + $0x428] ss:$28 sps:$4 sm:$0xff]  }
  0x71   : > { %3479 = vmatprep.subr.bf16.mxu0 %v7349_v1  ;;  %6473 = vmatpush1.bf16.msra.mxu1 %v7490_v18  ;;  %v6936_v18 = vld [vmem:[%s7483_s30 + $0x1fc] ss:$28 sps:$4 sm:$0xff]  }
  0x72   : > { %6458 = vmatprep.subr.bf16.mxu1 %v7349_v1 }
  0x74   : > { %3480 = vmatpush1.bf16.msra.mxu0 %v7000_v2  ;;  %v7007_v2 = vld [vmem:[%s7483_s30 + $0x464] ss:$28 sps:$4 sm:$0xff]  }
  0x75   : > { %3481 = vmatprep.subr.bf16.mxu0 %v7349_v1  ;;  %6474 = vmatpush1.bf16.msra.mxu1 %v7503_v22  ;;  %v6941_v22 = vld [vmem:[%s7483_s30 + $0x200] ss:$28 sps:$4 sm:$0xff]  }
  0x76   : > { %2764 = vmatmul.mubr.bf16.gmra.mrb[20].mxu1 %v6914_v0  ;;  %6459 = vmatprep.subr.bf16.mxu1 %v7349_v1  ;;  %v7006_v0 = vld [vmem:[%s7483_s30 + $0x430] ss:$28 sps:$4 sm:$0xff]  }
  0x77   : > { %3149 = vmatmul.mubr.bf16.gmra.mrb[20].mxu0 %v6915_v3  ;;  %2771 = vmatprep.mubr.bf16.mxu1 %v6916_v4  ;;  %v7009_v3 = vld [vmem:[%s7483_s30 + $0x46c] ss:$28 sps:$4 sm:$0xff]   ;;  %v7011_v4 = vld [vmem:[%s7483_s30 + $0x460] ss:$28 sps:$4 sm:$0xff]  }
  0x78   : > { %3156 = vmatprep.mubr.bf16.mxu0 %v6918_v5  ;;  %3482 = vmatpush1.bf16.msra.mxu0 %v7013_v6  ;;  %v7012_v5 = vld [vmem:[%s7483_s30 + $0x468] ss:$28 sps:$4 sm:$0xff]   ;;  %v7014_v6 = vld [vmem:[%s7483_s30 + $0x49c] ss:$28 sps:$4 sm:$0xff]  }
  0x79   : > { %3483 = vmatprep.subr.bf16.mxu0 %v7349_v1  ;;  %6475 = vmatpush1.bf16.msra.mxu1 %v7514_v24  ;;  %v6944_v24 = vld [vmem:[%s7483_s30 + $0x23c] ss:$28 sps:$4 sm:$0xff]  }
  0x7a   : > { %6460 = vmatprep.subr.bf16.mxu1 %v7349_v1 }
  0x7c   : > { %3484 = vmatpush1.bf16.msra.mxu0 %v7030_v12  ;;  %v7024_v12 = vld [vmem:[%s7483_s30 + $0x4d0] ss:$28 sps:$4 sm:$0xff]  }
  0x7d   : > { %6476 = vmatpush1.bf16.msra.mxu1 %v7525_v26  ;;  %3485 = vmatprep.subr.bf16.mxu0 %v7349_v1  ;;  %v6947_v26 = vld [vmem:[%s7483_s30 + $0x238] ss:$28 sps:$4 sm:$0xff]  }
  0x7e   : > { %2772 = vmatmul.mubr.bf16.gmra.mrb[24].mxu1 %v6920_v7  ;;  %6461 = vmatprep.subr.bf16.mxu1 %v7349_v1  ;;  %v7016_v7 = vld [vmem:[%s7483_s30 + $0x4a4] ss:$28 sps:$4 sm:$0xff]  }
  0x7f   : > { %3157 = vmatmul.mubr.bf16.gmra.mrb[24].mxu0 %v6921_v8  ;;  %2779 = vmatprep.mubr.bf16.mxu1 %v6923_v9  ;;  %v7018_v8 = vld [vmem:[%s7483_s30 + $0x498] ss:$28 sps:$4 sm:$0xff]   ;;  %v7019_v9 = vld [vmem:[%s7483_s30 + $0x4a0] ss:$28 sps:$4 sm:$0xff]  }
  0x80   : > { %3164 = vmatprep.mubr.bf16.mxu0 %v6925_v10  ;;  %3486 = vmatpush1.bf16.msra.mxu0 %v7043_v21  ;;  %v7020_v10 = vld [vmem:[%s7483_s30 + $0x4d4] ss:$28 sps:$4 sm:$0xff]   ;;  %v7038_v21 = vld [vmem:[%s7483_s30 + $0x548] ss:$28 sps:$4 sm:$0xff]  }
  0x81   : > { %6477 = vmatpush1.bf16.msra.mxu1 %v7536_v28  ;;  %3487 = vmatprep.subr.bf16.mxu0 %v7349_v1  ;;  %v6951_v28 = vld [vmem:[%s7483_s30 + $0x274] ss:$28 sps:$4 sm:$0xff]  }
  0x82   : > { %6462 = vmatprep.subr.bf16.mxu1 %v7349_v1 }
  0x84   : > { %3488 = vmatpush1.bf16.msra.mxu0 %v7058_v33 }
  0x85   : > { %6478 = vmatpush1.bf16.msra.mxu1 %v7547_v30  ;;  %v6954_v30 = vld [vmem:[%s7483_s30 + $0x270] ss:$28 sps:$4 sm:$0xff]   ;;  %3489 = vmatprep.subr.bf16.mxu0 %v7349_v1 }
  0x86   : > { %2780 = vmatmul.mubr.bf16.gmra.mrb[28].mxu1 %v6927_v11  ;;  %6463 = vmatprep.subr.bf16.mxu1 %v7349_v1  ;;  %v7022_v11 = vld [vmem:[%s7483_s30 + $0x4dc] ss:$28 sps:$4 sm:$0xff]  }
  0x87   : > { %3165 = vmatmul.mubr.bf16.gmra.mrb[28].mxu0 %v6928_v13  ;;  %2787 = vmatprep.mubr.bf16.mxu1 %v6929_v14  ;;  %v7025_v13 = vld [vmem:[%s7483_s30 + $0x4d8] ss:$28 sps:$4 sm:$0xff]   ;;  %v7026_v14 = vld [vmem:[%s7483_s30 + $0x50c] ss:$28 sps:$4 sm:$0xff]  }
  0x88   : > { %3172 = vmatprep.mubr.bf16.mxu0 %v6931_v15  ;;  %3490 = vmatpush1.bf16.msra.mxu0 %v7071_v42  ;;  %v7028_v15 = vld [vmem:[%s7483_s30 + $0x514] ss:$28 sps:$4 sm:$0xff]   ;;  %v7063_v42 = vld [vmem:[%s7483_s30 + $0x620] ss:$28 sps:$4 sm:$0xff]  }
  0x89   : > { %6479 = vmatpush1.bf16.msra.mxu1 %v7558_v32  ;;  %v6957_v32 = vld [vmem:[%s7483_s30 + $0x2ac] ss:$28 sps:$4 sm:$0xff]   ;;  %3491 = vmatprep.subr.bf16.mxu0 %v7349_v1 }
  0x8a   : > { %6464 = vmatprep.subr.bf16.mxu1 %v7349_v1  ;;  %v7084_v1 = vld [vmem:[%s9024_s1 + $0x178] sm:$0xff]  }
  0x8c   : > { %3492 = vmatpush1.bf16.msra.mxu0 %v7084_v1  ;;  %v7069_v1 = vld [vmem:[%s7483_s30 + $0x658] ss:$28 sps:$4 sm:$0xff]  }
  0x8d   : > { %6480 = vmatpush1.bf16.msra.mxu1 %v7569_v34  ;;  %v6959_v34 = vld [vmem:[%s7483_s30 + $0x2a0] ss:$28 sps:$4 sm:$0xff]  }
  0x8e   : > { %2788 = vmatmul.mubr.bf16.gmra.mrb[32].mxu1 %v6933_v16  ;;  %v7031_v16 = vld [vmem:[%s7483_s30 + $0x508] ss:$28 sps:$4 sm:$0xff]  }
  0x8f   : > { %3173 = vmatmul.mubr.bf16.gmra.mrb[32].mxu0 %v6934_v17  ;;  %2795 = vmatprep.mubr.bf16.mxu1 %v6936_v18  ;;  %v7032_v17 = vld [vmem:[%s7483_s30 + $0x510] ss:$28 sps:$4 sm:$0xff]   ;;  %v7033_v18 = vld [vmem:[%s7483_s30 + $0x544] ss:$28 sps:$4 sm:$0xff]  }
  0x90   : > { %3180 = vmatprep.mubr.bf16.mxu0 %v6938_v19  ;;  %v7035_v19 = vld [vmem:[%s7483_s30 + $0x54c] ss:$28 sps:$4 sm:$0xff]  }
  0x96   : > { %2796 = vmatmul.mubr.bf16.gmra.mrb[36].mxu1 %v6940_v20  ;;  %v7037_v20 = vld [vmem:[%s7483_s30 + $0x540] ss:$28 sps:$4 sm:$0xff]  }
  0x97   : > { %3181 = vmatmul.mubr.bf16.gmra.mrb[36].mxu0 %v6941_v22  ;;  %2803 = vmatprep.mubr.bf16.mxu1 %v6942_v23  ;;  %v7039_v22 = vld [vmem:[%s7483_s30 + $0x57c] ss:$28 sps:$4 sm:$0xff]   ;;  %v7041_v23 = vld [vmem:[%s7483_s30 + $0x584] ss:$28 sps:$4 sm:$0xff]  }
  0x98   : > { %3188 = vmatprep.mubr.bf16.mxu0 %v6944_v24  ;;  %v7044_v24 = vld [vmem:[%s7483_s30 + $0x578] ss:$28 sps:$4 sm:$0xff]  }
  0x9e   : > { %2804 = vmatmul.mubr.bf16.gmra.mrb[40].mxu1 %v6946_v25  ;;  %v7045_v25 = vld [vmem:[%s7483_s30 + $0x580] ss:$28 sps:$4 sm:$0xff]  }
  0x9f   : > { %3189 = vmatmul.mubr.bf16.gmra.mrb[40].mxu0 %v6947_v26  ;;  %2811 = vmatprep.mubr.bf16.mxu1 %v6949_v27  ;;  %v7046_v26 = vld [vmem:[%s7483_s30 + $0x5b4] ss:$28 sps:$4 sm:$0xff]   ;;  %v7048_v27 = vld [vmem:[%s7483_s30 + $0x5bc] ss:$28 sps:$4 sm:$0xff]  }
  0xa0   : > { %3196 = vmatprep.mubr.bf16.mxu0 %v6951_v28  ;;  %v7050_v28 = vld [vmem:[%s7483_s30 + $0x5b0] ss:$28 sps:$4 sm:$0xff]  }
  0xa6   : > { %2812 = vmatmul.mubr.bf16.gmra.mrb[44].mxu1 %v6953_v29  ;;  %v7051_v29 = vld [vmem:[%s7483_s30 + $0x5b8] ss:$28 sps:$4 sm:$0xff]  }
  0xa7   : > { %3197 = vmatmul.mubr.bf16.gmra.mrb[44].mxu0 %v6954_v30  ;;  %2819 = vmatprep.mubr.bf16.mxu1 %v6955_v31  ;;  %v7052_v30 = vld [vmem:[%s7483_s30 + $0x5ec] ss:$28 sps:$4 sm:$0xff]   ;;  %v7054_v31 = vld [vmem:[%s7483_s30 + $0x5f4] ss:$28 sps:$4 sm:$0xff]  }
  0xa8   : > { %3204 = vmatprep.mubr.bf16.mxu0 %v6957_v32 }
  0xae   : > { %2820 = vmatmul.mubr.bf16.gmra.mrb[48].mxu1 %v6959_v34  ;;  %v7056_v34 = vld [vmem:[%s7483_s30 + $0x5e8] ss:$28 sps:$4 sm:$0xff]  }
  0xaf   : > { %3205 = vmatmul.mubr.bf16.gmra.mrb[48].mxu0 %v6960_v35  ;;  %2827 = vmatprep.mubr.bf16.mxu1 %v6962_v36  ;;  %v7057_v36 = vld [vmem:[%s7483_s30 + $0x5f0] ss:$28 sps:$4 sm:$0xff]  }
  0xb0   : > { %3212 = vmatprep.mubr.bf16.mxu0 %v6964_v37  ;;  %v7059_v37 = vld [vmem:[%s7483_s30 + $0x624] ss:$28 sps:$4 sm:$0xff]  }
  0xb6   : > { %2828 = vmatmul.mubr.bf16.gmra.mrb[52].mxu1 %v6966_v38 }
  0xb7   : > { %3213 = vmatmul.mubr.bf16.gmra.mrb[52].mxu0 %v6967_v39  ;;  %2835 = vmatprep.mubr.bf16.mxu1 %v6968_v40  ;;  %v7061_v39 = vld [vmem:[%s7483_s30 + $0x62c] ss:$28 sps:$4 sm:$0xff]  }
  0xb8   : > { %3220 = vmatprep.mubr.bf16.mxu0 %v6970_v41 }
  0xbe   : > { %2836 = vmatmul.mubr.bf16.gmra.mrb[56].mxu1 %v6972_v43 }
  0xbf   : > { %3221 = vmatmul.mubr.bf16.gmra.mrb[56].mxu0 %v6973_v44  ;;  %2843 = vmatprep.mubr.bf16.mxu1 %v6975_v45  ;;  %v7064_v44 = vld [vmem:[%s7483_s30 + $0x628] ss:$28 sps:$4 sm:$0xff]   ;;  %v7065_v45 = vld [vmem:[%s7483_s30 + $0x65c] ss:$28 sps:$4 sm:$0xff]  }
  0xc0   : > { %3228 = vmatprep.mubr.bf16.mxu0 %v6977_v46 }
  0xc6   : > { %2844 = vmatmul.mubr.bf16.gmra.mrb[60].mxu1 %v6979_v47  ;;  %v7067_v47 = vld [vmem:[%s7483_s30 + $0x664] ss:$28 sps:$4 sm:$0xff]  }
  0xc7   : > { %3229 = vmatmul.mubr.bf16.gmra.mrb[60].mxu0 %v6980_v48  ;;  %2851 = vmatprep.mubr.bf16.mxu1 %v6981_v49  ;;  %v7796_v48 = vld [vmem:[%s9024_s1 + $0x180] sm:$0xff]  }
  0xc8   : > { %3236 = vmatprep.mubr.bf16.mxu0 %v6983_v50  ;;  %6349 = vmatprep.subr.bf16.mxu1 %v7796_v48 }
  0xce   : > { %2852 = vmatmul.mubr.bf16.gmra.mrb[64].mxu1 %v6985_v51  ;;  %v4321_v51 = vld [vmem:[%s7805_s28 + $0x10] sm:$0xff] }
  0xcf   : > { %3237 = vmatmul.mubr.bf16.gmra.mrb[64].mxu0 %v6986_v52  ;;  %2859 = vmatprep.mubr.bf16.mxu1 %v6988_v53  ;;  %v4319_v52 = vld [vmem:[%s7805_s28] sm:$0xff] }
  0xd0   : > { %3244 = vmatprep.mubr.bf16.mxu0 %v6990_v54  ;;  %v7070_v54 = vld [vmem:[%s7483_s30 + $0x660] ss:$28 sps:$4 sm:$0xff]   ;;  %4419 = vperm.xlu1 %6844, %v4321_v51  }
  0xd1   : > { %4409 = vperm.xlu0 %6843, %v4319_v52   ;;  %v7101_v52 = vld [vmem:[%s7483_s30 + $0x770] ss:$28 sps:$4 sm:$0xff]  }
  0xd6   : > { %2860 = vmatmul.mubr.bf16.gmra.mrb[68].mxu1 %v6992_v55  ;;  %v7072_v55 = vld [vmem:[%s7483_s30 + $0x694] ss:$28 sps:$4 sm:$0xff]  }
  0xd7   : > { %3245 = vmatmul.mubr.bf16.gmra.mrb[68].mxu0 %v6993_v56  ;;  %2867 = vmatprep.mubr.bf16.mxu1 %v6994_v57  ;;  %v7074_v57 = vld [vmem:[%s7483_s30 + $0x69c] ss:$28 sps:$4 sm:$0xff]  }
  0xd8   : > { %3252 = vmatprep.mubr.bf16.mxu0 %v6996_v58  ;;  %v4322_v58 = vld [vmem:[%s7805_s28 + $0x18] sm:$0xff] }
  0xd9   : > { %4424 = vperm.xlu1 %6844, %v4322_v58   ;;  %v7103_v58 = vld [vmem:[%s7483_s30 + $0x7ac] ss:$28 sps:$4 sm:$0xff]  }
  0xde   : > { %2868 = vmatmul.mubr.bf16.gmra.mrb[72].mxu1 %v6998_v59  ;;  %v4320_v59 = vld [vmem:[%s7805_s28 + $0x8] sm:$0xff] }
  0xdf   : > { %3253 = vmatmul.mubr.bf16.gmra.mrb[72].mxu0 %v6999_v60  ;;  %2875 = vmatprep.mubr.bf16.mxu1 %v7001_v61 }
  0xe0   : > { %3260 = vmatprep.mubr.bf16.mxu0 %v7003_v62  ;;  %4414 = vperm.xlu0 %6843, %v4320_v59   ;;  %v7076_v62 = vld [vmem:[%s7483_s30 + $0x690] ss:$28 sps:$4 sm:$0xff]  }
  0xe6   : > { %2876 = vmatmul.mubr.bf16.gmra.mrb[76].mxu1 %v7005_v63  ;;  %v4324_v63 = vld [vmem:[%s7805_s28 + $0x28] sm:$0xff] }
  0xe7   : > { %3261 = vmatmul.mubr.bf16.gmra.mrb[76].mxu0 %v7006_v0  ;;  %2883 = vmatprep.mubr.bf16.mxu1 %v7007_v2  ;;  %v4323_v0 = vld [vmem:[%s7805_s28 + $0x20] sm:$0xff] }
  0xe8   : > { %3268 = vmatprep.mubr.bf16.mxu0 %v7009_v3  ;;  %v7077_v3 = vld [vmem:[%s7483_s30 + $0x698] ss:$28 sps:$4 sm:$0xff]   ;;  %4434 = vperm.xlu1 %6844, %v4324_v63  }
  0xe9   : > { %4429 = vperm.xlu0 %6843, %v4323_v0   ;;  %v4341_v63 = vld [vmem:[%s7805_s28 + $0xb0] sm:$0xff] }
  0xee   : > { %2884 = vmatmul.mubr.bf16.gmra.mrb[80].mxu1 %v7011_v4  ;;  %v7078_v4 = vld [vmem:[%s7483_s30 + $0x6cc] ss:$28 sps:$4 sm:$0xff]  }
  0xef   : > { %3269 = vmatmul.mubr.bf16.gmra.mrb[80].mxu0 %v7012_v5  ;;  %2891 = vmatprep.mubr.bf16.mxu1 %v7014_v6  ;;  %v7080_v6 = vld [vmem:[%s7483_s30 + $0x6d4] ss:$28 sps:$4 sm:$0xff]  }
  0xf0   : > { %3276 = vmatprep.mubr.bf16.mxu0 %v7016_v7  ;;  %v4326_v7 = vld [vmem:[%s7805_s28 + $0x38] sm:$0xff] }
  0xf1   : > { %4444 = vperm.xlu1 %6844, %v4326_v7  }
  0xf6   : > { %2892 = vmatmul.mubr.bf16.gmra.mrb[84].mxu1 %v7018_v8  ;;  %v4325_v8 = vld [vmem:[%s7805_s28 + $0x30] sm:$0xff] }
  0xf7   : > { %3277 = vmatmul.mubr.bf16.gmra.mrb[84].mxu0 %v7019_v9  ;;  %2899 = vmatprep.mubr.bf16.mxu1 %v7020_v10 }
  0xf8   : > { %3284 = vmatprep.mubr.bf16.mxu0 %v7022_v11  ;;  %4439 = vperm.xlu0 %6843, %v4325_v8   ;;  %v7082_v11 = vld [vmem:[%s7483_s30 + $0x6c8] ss:$28 sps:$4 sm:$0xff]   ;;  %v7108_v8 = vld [vmem:[%s7483_s30 + $0x80] ss:$28 sps:$4 sm:$0xff]  }
  0xfe   : > { %2900 = vmatmul.mubr.bf16.gmra.mrb[88].mxu1 %v7024_v12  ;;  %v4328_v12 = vld [vmem:[%s7805_s28 + $0x48] sm:$0xff] }
  0xff   : > { %3285 = vmatmul.mubr.bf16.gmra.mrb[88].mxu0 %v7025_v13  ;;  %2907 = vmatprep.mubr.bf16.mxu1 %v7026_v14  ;;  %v4327_v13 = vld [vmem:[%s7805_s28 + $0x40] sm:$0xff] }
 0x100   : > { %3292 = vmatprep.mubr.bf16.mxu0 %v7028_v15  ;;  %v7083_v15 = vld [vmem:[%s7483_s30 + $0x6d0] ss:$28 sps:$4 sm:$0xff]   ;;  %4454 = vperm.xlu1 %6844, %v4328_v12   ;;  %v7111_v12 = vld [vmem:[%s7483_s30 + $0xbc] ss:$28 sps:$4 sm:$0xff]  }
 0x101   : > { %4449 = vperm.xlu0 %6843, %v4327_v13   ;;  %v4346_v13 = vld [vmem:[%s7805_s28 + $0xd8] sm:$0xff] }
 0x106   : > { %2908 = vmatmul.mubr.bf16.gmra.mrb[92].mxu1 %v7031_v16  ;;  %v7085_v16 = vld [vmem:[%s7483_s30 + $0x704] ss:$28 sps:$4 sm:$0xff]  }
 0x107   : > { %3293 = vmatmul.mubr.bf16.gmra.mrb[92].mxu0 %v7032_v17  ;;  %2915 = vmatprep.mubr.bf16.mxu1 %v7033_v18  ;;  %v7087_v18 = vld [vmem:[%s7483_s30 + $0x70c] ss:$28 sps:$4 sm:$0xff]  }
 0x108   : > { %3300 = vmatprep.mubr.bf16.mxu0 %v7035_v19  ;;  %v4330_v19 = vld [vmem:[%s7805_s28 + $0x58] sm:$0xff] }
 0x109   : > { %4464 = vperm.xlu1 %6844, %v4330_v19   ;;  %v4348_v19 = vld [vmem:[%s7805_s28 + $0xe8] sm:$0xff] }
 0x10e   : > { %2916 = vmatmul.mubr.bf16.gmra.mrb[96].mxu1 %v7037_v20  ;;  %v4329_v20 = vld [vmem:[%s7805_s28 + $0x50] sm:$0xff] }
 0x10f   : > { %3301 = vmatmul.mubr.bf16.gmra.mrb[96].mxu0 %v7038_v21  ;;  %2923 = vmatprep.mubr.bf16.mxu1 %v7039_v22 }
 0x110   : > { %3308 = vmatprep.mubr.bf16.mxu0 %v7041_v23  ;;  %4459 = vperm.xlu0 %6843, %v4329_v20   ;;  %v7089_v23 = vld [vmem:[%s7483_s30 + $0x700] ss:$28 sps:$4 sm:$0xff]  }
 0x111   : > { %v4347_v20 = vld [vmem:[%s7805_s28 + $0xe0] sm:$0xff] }
 0x116   : > { %2924 = vmatmul.mubr.bf16.gmra.mrb[100].mxu1 %v7044_v24  ;;  %v4332_v24 = vld [vmem:[%s7805_s28 + $0x68] sm:$0xff] }
 0x117   : > { %3309 = vmatmul.mubr.bf16.gmra.mrb[100].mxu0 %v7045_v25  ;;  %2931 = vmatprep.mubr.bf16.mxu1 %v7046_v26  ;;  %v4331_v25 = vld [vmem:[%s7805_s28 + $0x60] sm:$0xff] }
 0x118   : > { %3316 = vmatprep.mubr.bf16.mxu0 %v7048_v27  ;;  %v7090_v27 = vld [vmem:[%s7483_s30 + $0x708] ss:$28 sps:$4 sm:$0xff]   ;;  %4474 = vperm.xlu1 %6844, %v4332_v24   ;;  %v7115_v24 = vld [vmem:[%s7483_s30 + $0x81c] ss:$28 sps:$4 sm:$0xff]  }
 0x119   : > { %4469 = vperm.xlu0 %6843, %v4331_v25  }
 0x11e   : > { %2932 = vmatmul.mubr.bf16.gmra.mrb[104].mxu1 %v7050_v28  ;;  %v7091_v28 = vld [vmem:[%s7483_s30 + $0x73c] ss:$28 sps:$4 sm:$0xff]  }
 0x11f   : > { %3317 = vmatmul.mubr.bf16.gmra.mrb[104].mxu0 %v7051_v29  ;;  %2939 = vmatprep.mubr.bf16.mxu1 %v7052_v30  ;;  %v7095_v30 = vld [vmem:[%s7483_s30 + $0x14] ss:$28 sps:$4 sm:$0xff]  }
 0x120   : > { %3324 = vmatprep.mubr.bf16.mxu0 %v7054_v31  ;;  %v4334_v31 = vld [vmem:[%s7805_s28 + $0x78] sm:$0xff] }
 0x121   : > { %v7777_v32 = vpop.f32.mrb[0].mxu1  ;;  %4484 = vperm.xlu1 %6844, %v4334_v31  }
 0x122   : > { %v2727_v33 = vpop.f32.mrb[1].mxu1 }
 0x123   : > { %v7780_v35 = vpop.f32.mrb[2].mxu1  ;;  %v4333_v33 = vld [vmem:[%s7805_s28 + $0x70] sm:$0xff] }
 0x124   : > { %v2730_v38 = vpop.f32.mrb[3].mxu1  ;;  %4479 = vperm.xlu0 %6843, %v4333_v33   ;;  %v7119_v33 = vld [vmem:[%s7483_s30 + $0x818] ss:$28 sps:$4 sm:$0xff]  }
 0x125   : > { %v4336_v38 = vld [vmem:[%s7805_s28 + $0x88] sm:$0xff] }
 0x126   : > { %2940 = vmatmul.mubr.bf16.gmra.mrb[108].mxu1 %v7056_v34  ;;  %4494 = vperm.xlu1 %6844, %v4336_v38  }
 0x127   : > { %3325 = vmatmul.mubr.bf16.gmra.mrb[108].mxu0 %v7057_v36  ;;  %2947 = vmatprep.mubr.bf16.mxu1 %v7059_v37  ;;  %v7096_v37 = vld [vmem:[%s7483_s30 + $0x738] ss:$28 sps:$4 sm:$0xff]  }
 0x128   : > { %3332 = vmatprep.mubr.bf16.mxu0 %v7061_v39  ;;  %v4335_v39 = vld [vmem:[%s7805_s28 + $0x80] sm:$0xff] }
 0x129   : > { %v7785_v40 = vpop.f32.mrb[4].mxu1  ;;  %4489 = vperm.xlu0 %6843, %v4335_v39   ;;  %v7120_v39 = vld [vmem:[%s7483_s30 + $0xf0] ss:$28 sps:$4 sm:$0xff]  }
 0x12a   : > { %v2735_v41 = vpop.f32.mrb[5].mxu1 }
 0x12b   : > { %v7788_v43 = vpop.f32.mrb[6].mxu1 }
 0x12c   : > { %v2738_v46 = vpop.f32.mrb[7].mxu1 }
 0x12d   : > { %v7099_v46 = vld [vmem:[%s7483_s30 + $0x4c] ss:$28 sps:$4 sm:$0xff]  }
 0x12e   : > { %2948 = vmatmul.mubr.bf16.gmra.mrb[112].mxu1 %v7063_v42  ;;  %v7093_v42 = vld [vmem:[%s7483_s30 + $0x10] ss:$28 sps:$4 sm:$0xff]  }
 0x12f   : > { %3333 = vmatmul.mubr.bf16.gmra.mrb[112].mxu0 %v7064_v44  ;;  %2955 = vmatprep.mubr.bf16.mxu1 %v7065_v45  ;;  %v7097_v44 = vld [vmem:[%s7483_s30 + $0x774] ss:$28 sps:$4 sm:$0xff]  }
 0x130   : > { %3340 = vmatprep.mubr.bf16.mxu0 %v7067_v47  ;;  %v4338_v47 = vld [vmem:[%s7805_s28 + $0x98] sm:$0xff] }
 0x131   : > { %v7799_v49 = vpop.f32.mrb[8].mxu1  ;;  %4504 = vperm.xlu1 %6844, %v4338_v47   ;;  %v4353_v47 = vld [vmem:[%s7805_s28 + $0x110] sm:$0xff] }
 0x132   : > { %v2743_v50 = vpop.f32.mrb[9].mxu1 }
 0x133   : > { %v7810_v53 = vpop.f32.mrb[10].mxu1  ;;  %v4337_v50 = vld [vmem:[%s7805_s28 + $0x90] sm:$0xff] }
 0x134   : > { %v2746_v56 = vpop.f32.mrb[11].mxu1  ;;  %4499 = vperm.xlu0 %6843, %v4337_v50  }
 0x136   : > { %2956 = vmatmul.mubr.bf16.gmra.mrb[116].mxu1 %v7069_v1 }
 0x137   : > { %3341 = vmatmul.mubr.bf16.gmra.mrb[116].mxu0 %v7070_v54  ;;  %2963 = vmatprep.mubr.bf16.mxu1 %v7072_v55  ;;  %v4340_v54 = vld [vmem:[%s7805_s28 + $0xa8] sm:$0xff]  ;;  %v4339_v55 = vld [vmem:[%s7805_s28 + $0xa0] sm:$0xff] }
 0x138   : > { %3348 = vmatprep.mubr.bf16.mxu0 %v7074_v57  ;;  %v7102_v57 = vld [vmem:[%s7483_s30 + $0x48] ss:$28 sps:$4 sm:$0xff]   ;;  %4514 = vperm.xlu1 %6844, %v4340_v54  }
 0x139   : > { %v7817_v60 = vpop.f32.mrb[12].mxu1  ;;  %4509 = vperm.xlu0 %6843, %v4339_v55   ;;  %v4356_v54 = vld [vmem:[%s7805_s28 + $0x128] sm:$0xff]  ;;  %v4355_v55 = vld [vmem:[%s7805_s28 + $0x120] sm:$0xff] }
 0x13a   : > { %v2751_v61 = vpop.f32.mrb[13].mxu1 }
 0x13b   : > { %v7822_v2 = vpop.f32.mrb[14].mxu1  ;;  %v7105_v61 = vld [vmem:[%s7483_s30 + $0x84] ss:$28 sps:$4 sm:$0xff]  }
 0x13c   : > { %v2754_v5 = vpop.f32.mrb[15].mxu1 }
 0x13d   : > { %4519 = vperm.xlu0 %6843, %v4341_v63   ;;  %v4344_v5 = vld [vmem:[%s7805_s28 + $0xc8] sm:$0xff]  ;;  %v4358_v63 = vld [vmem:[%s7805_s28 + $0x138] sm:$0xff] }
 0x13e   : > { %2964 = vmatmul.mubr.bf16.gmra.mrb[120].mxu1 %v7076_v62  ;;  %v4342_v62 = vld [vmem:[%s7805_s28 + $0xb8] sm:$0xff] }
 0x13f   : > { %3349 = vmatmul.mubr.bf16.gmra.mrb[120].mxu0 %v7077_v3  ;;  %2971 = vmatprep.mubr.bf16.mxu1 %v7078_v4  ;;  %v7107_v4 = vld [vmem:[%s7483_s30 + $0x7a8] ss:$28 sps:$4 sm:$0xff]  }
 0x140   : > { %3356 = vmatprep.mubr.bf16.mxu0 %v7080_v6  ;;  %4524 = vperm.xlu1 %6844, %v4342_v62   ;;  %v4343_v6 = vld [vmem:[%s7805_s28 + $0xc0] sm:$0xff] }
 0x141   : > { %v7829_v9 = vpop.f32.mrb[16].mxu1  ;;  %4529 = vperm.xlu0 %6843, %v4343_v6   ;;  %v7129_v62 = vld [vmem:[%s7483_s30 + $0x164] ss:$28 sps:$4 sm:$0xff]  }
 0x142   : > { %v2759_v10 = vpop.f32.mrb[17].mxu1  ;;  %v7131_v6 = vld [vmem:[%s7483_s30 + $0x888] ss:$28 sps:$4 sm:$0xff]  }
 0x143   : > { %v7834_v14 = vpop.f32.mrb[18].mxu1  ;;  %v7109_v10 = vld [vmem:[%s7483_s30 + $0x7e4] ss:$28 sps:$4 sm:$0xff]  }
 0x144   : > { %v2762_v17 = vpop.f32.mrb[19].mxu1  ;;  %4534 = vperm.xlu1 %6844, %v4344_v5  }
 0x146   : > { %2972 = vmatmul.mubr.bf16.gmra.mrb[124].mxu1 %v7082_v11 }
 0x147   : > { %3357 = vmatmul.mubr.bf16.gmra.mrb[124].mxu0 %v7083_v15  ;;  %2979 = vmatprep.mubr.bf16.mxu1 %v7085_v16  ;;  %v4345_v15 = vld [vmem:[%s7805_s28 + $0xd0] sm:$0xff] }
 0x148   : > { %3364 = vmatprep.mubr.bf16.mxu0 %v7087_v18  ;;  %4544 = vperm.xlu1 %6844, %v4346_v13   ;;  %v7113_v18 = vld [vmem:[%s7483_s30 + $0x7e0] ss:$28 sps:$4 sm:$0xff]  }
 0x149   : > { %v7841_v21 = vpop.f32.mrb[20].mxu1  ;;  %4539 = vperm.xlu0 %6843, %v4345_v15   ;;  %v7133_v13 = vld [vmem:[%s7483_s30 + $0x8c4] ss:$28 sps:$4 sm:$0xff]  }
 0x14a   : > { %v2767_v22 = vpop.f32.mrb[21].mxu1 }
 0x14b   : > { %v7846_v26 = vpop.f32.mrb[22].mxu1 }
 0x14c   : > { %v2770_v29 = vpop.f32.mrb[23].mxu1  ;;  %4554 = vperm.xlu1 %6844, %v4348_v19   ;;  %v4361_v19 = vld [vmem:[%s7805_s28 + $0x150] sm:$0xff] }
 0x14d   : > { %4549 = vperm.xlu0 %6843, %v4347_v20   ;;  %v4349_v29 = vld [vmem:[%s7805_s28 + $0xf0] sm:$0xff] }
 0x14e   : > { %2980 = vmatmul.mubr.bf16.gmra.mrb[128].mxu1 %v7089_v23  ;;  %v7114_v23 = vld [vmem:[%s7483_s30 + $0xb8] ss:$28 sps:$4 sm:$0xff]  }
 0x14f   : > { %3365 = vmatmul.mubr.bf16.gmra.mrb[128].mxu0 %v7090_v27  ;;  %2987 = vmatprep.mubr.bf16.mxu1 %v7091_v28  ;;  %v7117_v27 = vld [vmem:[%s7483_s30 + $0xf4] ss:$28 sps:$4 sm:$0xff]   ;;  %v4350_v28 = vld [vmem:[%s7805_s28 + $0xf8] sm:$0xff] }
 0x150   : > { %3493 = vmatprep.mubr.bf16.mxu0 %v7095_v30  ;;  %4564 = vperm.xlu1 %6844, %v4350_v28  }
 0x151   : > { %v7853_v34 = vpop.f32.mrb[24].mxu1  ;;  %4559 = vperm.xlu0 %6843, %v4349_v29   ;;  %v7138_v29 = vld [vmem:[%s7483_s30 + $0x198] ss:$28 sps:$4 sm:$0xff]  }
 0x152   : > { %v2775_v36 = vpop.f32.mrb[25].mxu1 }
 0x153   : > { %v7858_v41 = vpop.f32.mrb[26].mxu1  ;;  %v4352_v36 = vld [vmem:[%s7805_s28 + $0x108] sm:$0xff] }
 0x154   : > { %v2778_v45 = vpop.f32.mrb[27].mxu1  ;;  %4574 = vperm.xlu1 %6844, %v4352_v36   ;;  %v7141_v36 = vld [vmem:[%s7483_s30 + $0x1d4] ss:$28 sps:$4 sm:$0xff]  }
 0x155   : > { %v7123_v45 = vld [vmem:[%s7483_s30 + $0x12c] ss:$28 sps:$4 sm:$0xff]  }
 0x156   : > { %2988 = vmatmul.mubr.bf16.gmra.mrb[132].mxu1 %v7096_v37  ;;  %v4351_v37 = vld [vmem:[%s7805_s28 + $0x100] sm:$0xff] }
 0x157   : > { %3494 = vmatmul.mubr.bf16.vlgmr.msra.gmra.mrb[0].mxu0 %v7093_v42  ;;  %2995 = vmatprep.mubr.bf16.mxu1 %v7097_v44  ;;  %v7121_v42 = vld [vmem:[%s7483_s30 + $0x854] ss:$28 sps:$4 sm:$0xff]  }
 0x158   : > { %3501 = vmatprep.mubr.bf16.mxu0 %v7099_v46  ;;  %4569 = vperm.xlu0 %6843, %v4351_v37   ;;  %v4354_v46 = vld [vmem:[%s7805_s28 + $0x118] sm:$0xff] }
 0x159   : > { %v7865_v1 = vpop.f32.mrb[28].mxu1  ;;  %4584 = vperm.xlu1 %6844, %v4354_v46   ;;  %v4366_v37 = vld [vmem:[%s7805_s28 + $0x178] sm:$0xff]  ;;  %v4368_v46 = vld [vmem:[%s7805_s28 + $0x188] sm:$0xff] }
 0x15a   : > { %v2783_v51 = vpop.f32.mrb[29].mxu1 }
 0x15b   : > { %v7870_v56 = vpop.f32.mrb[30].mxu1 }
 0x15c   : > { %v2786_v59 = vpop.f32.mrb[31].mxu1  ;;  %4579 = vperm.xlu0 %6843, %v4353_v47   ;;  %v4367_v47 = vld [vmem:[%s7805_s28 + $0x180] sm:$0xff] }
 0x15d   : > { %v7127_v59 = vld [vmem:[%s7483_s30 + $0x88c] ss:$28 sps:$4 sm:$0xff]   ;;  %4594 = vperm.xlu1 %6844, %v4356_v54   ;;  %v7145_v54 = vld [vmem:[%s7483_s30 + $0x934] ss:$28 sps:$4 sm:$0xff]  }
 0x15e   : > { %2996 = vmatmul.mubr.bf16.gmra.mrb[136].mxu1 %v7101_v52  ;;  %v7125_v52 = vld [vmem:[%s7483_s30 + $0x850] ss:$28 sps:$4 sm:$0xff]  }
 0x15f   : > { %3502 = vmatmul.mubr.bf16.gmra.mrb[4].mxu0 %v7102_v57  ;;  %3003 = vmatprep.mubr.bf16.mxu1 %v7103_v58  ;;  %v7126_v58 = vld [vmem:[%s7483_s30 + $0x128] ss:$28 sps:$4 sm:$0xff]  }
 0x160   : > { %3509 = vmatprep.mubr.bf16.mxu0 %v7105_v61  ;;  %4589 = vperm.xlu0 %6843, %v4355_v55  }
 0x161   : > { %v7877_v0 = vpop.f32.mrb[32].mxu1  ;;  %4604 = vperm.xlu1 %6844, %v4358_v63  }
 0x162   : > { %v2791_v3 = vpop.f32.mrb[33].mxu1 }
 0x163   : > { %v7882_v7 = vpop.f32.mrb[34].mxu1  ;;  %v4357_v3 = vld [vmem:[%s7805_s28 + $0x130] sm:$0xff] }
 0x164   : > { %v2794_v11 = vpop.f32.mrb[35].mxu1  ;;  %4599 = vperm.xlu0 %6843, %v4357_v3   ;;  %v7149_v3 = vld [vmem:[%s7483_s30 + $0x930] ss:$28 sps:$4 sm:$0xff]  }
 0x166   : > { %3004 = vmatmul.mubr.bf16.gmra.mrb[140].mxu1 %v7107_v4 }
 0x167   : > { %3510 = vmatmul.mubr.bf16.gmra.mrb[8].mxu0 %v7108_v8  ;;  %3011 = vmatprep.mubr.bf16.mxu1 %v7109_v10  ;;  %v4360_v8 = vld [vmem:[%s7805_s28 + $0x148] sm:$0xff]  ;;  %v4359_v10 = vld [vmem:[%s7805_s28 + $0x140] sm:$0xff] }
 0x168   : > { %3517 = vmatprep.mubr.bf16.mxu0 %v7111_v12  ;;  %v7132_v12 = vld [vmem:[%s7483_s30 + $0x160] ss:$28 sps:$4 sm:$0xff]   ;;  %4614 = vperm.xlu1 %6844, %v4360_v8  }
 0x169   : > { %v7889_v16 = vpop.f32.mrb[36].mxu1  ;;  %4609 = vperm.xlu0 %6843, %v4359_v10   ;;  %v7150_v10 = vld [vmem:[%s7483_s30 + $0x208] ss:$28 sps:$4 sm:$0xff]  }
 0x16a   : > { %v2799_v17 = vpop.f32.mrb[37].mxu1 }
 0x16b   : > { %v7894_v22 = vpop.f32.mrb[38].mxu1  ;;  %v7135_v17 = vld [vmem:[%s7483_s30 + $0x19c] ss:$28 sps:$4 sm:$0xff]  }
 0x16c   : > { %v2802_v25 = vpop.f32.mrb[39].mxu1 }
 0x16d   : > { %4619 = vperm.xlu0 %6843, %v4361_v19   ;;  %v4364_v25 = vld [vmem:[%s7805_s28 + $0x168] sm:$0xff] }
 0x16e   : > { %3012 = vmatmul.mubr.bf16.gmra.mrb[144].mxu1 %v7113_v18  ;;  %v4362_v18 = vld [vmem:[%s7805_s28 + $0x158] sm:$0xff] }
 0x16f   : > { %3518 = vmatmul.mubr.bf16.gmra.mrb[12].mxu0 %v7114_v23  ;;  %3019 = vmatprep.mubr.bf16.mxu1 %v7115_v24  ;;  %v7137_v24 = vld [vmem:[%s7483_s30 + $0x8c0] ss:$28 sps:$4 sm:$0xff]  }
 0x170   : > { %3525 = vmatprep.mubr.bf16.mxu0 %v7117_v27  ;;  %4624 = vperm.xlu1 %6844, %v4362_v18   ;;  %v4363_v27 = vld [vmem:[%s7805_s28 + $0x160] sm:$0xff]  ;;  %v4373_v18 = vld [vmem:[%s7805_s28 + $0x1b0] sm:$0xff] }
 0x171   : > { %v7901_v30 = vpop.f32.mrb[40].mxu1  ;;  %4629 = vperm.xlu0 %6843, %v4363_v27   ;;  %v4375_v27 = vld [vmem:[%s7805_s28 + $0x1c0] sm:$0xff] }
 0x172   : > { %v2807_v31 = vpop.f32.mrb[41].mxu1 }
 0x173   : > { %v7906_v38 = vpop.f32.mrb[42].mxu1  ;;  %v7139_v31 = vld [vmem:[%s7483_s30 + $0x8fc] ss:$28 sps:$4 sm:$0xff]  }
 0x174   : > { %v2810_v44 = vpop.f32.mrb[43].mxu1  ;;  %4634 = vperm.xlu1 %6844, %v4364_v25   ;;  %v4376_v25 = vld [vmem:[%s7805_s28 + $0x1c8] sm:$0xff] }
 0x176   : > { %3020 = vmatmul.mubr.bf16.gmra.mrb[148].mxu1 %v7119_v33 }
 0x177   : > { %3526 = vmatmul.mubr.bf16.gmra.mrb[16].mxu0 %v7120_v39  ;;  %3027 = vmatprep.mubr.bf16.mxu1 %v7121_v42  ;;  %v4365_v39 = vld [vmem:[%s7805_s28 + $0x170] sm:$0xff] }
 0x178   : > { %3533 = vmatprep.mubr.bf16.mxu0 %v7123_v45  ;;  %4644 = vperm.xlu1 %6844, %v4366_v37   ;;  %v7143_v45 = vld [vmem:[%s7483_s30 + $0x8f8] ss:$28 sps:$4 sm:$0xff]  }
 0x179   : > { %v7913_v50 = vpop.f32.mrb[44].mxu1  ;;  %4639 = vperm.xlu0 %6843, %v4365_v39   ;;  %v7160_v37 = vld [vmem:[%s7483_s30 + $0x27c] ss:$28 sps:$4 sm:$0xff]  }
 0x17a   : > { %v2815_v51 = vpop.f32.mrb[45].mxu1  ;;  %v4378_v39 = vld [vmem:[%s7805_s28 + $0x1d8] sm:$0xff] }
 0x17b   : > { %v7918_v57 = vpop.f32.mrb[46].mxu1 }
 0x17c   : > { %v2818_v61 = vpop.f32.mrb[47].mxu1  ;;  %4654 = vperm.xlu1 %6844, %v4368_v46  }
 0x17d   : > { %4649 = vperm.xlu0 %6843, %v4367_v47   ;;  %v4369_v61 = vld [vmem:[%s7805_s28 + $0x190] sm:$0xff]  ;;  %v7157_v47 = vld [vmem:[%s7483_s30 + $0x740] ss:$28 sps:$4 sm:$0xff]  }
 0x17e   : > { %3028 = vmatmul.mubr.bf16.gmra.mrb[152].mxu1 %v7125_v52  ;;  %v7144_v52 = vld [vmem:[%s7483_s30 + $0x1d0] ss:$28 sps:$4 sm:$0xff]  }
 0x17f   : > { %3534 = vmatmul.mubr.bf16.gmra.mrb[20].mxu0 %v7126_v58  ;;  %3035 = vmatprep.mubr.bf16.mxu1 %v7127_v59  ;;  %v7147_v58 = vld [vmem:[%s7483_s30 + $0x20c] ss:$28 sps:$4 sm:$0xff]   ;;  %v4370_v59 = vld [vmem:[%s7805_s28 + $0x198] sm:$0xff] }
 0x180   : > { %3541 = vmatprep.mubr.bf16.mxu0 %v7129_v62  ;;  %4664 = vperm.xlu1 %6844, %v4370_v59  }
 0x181   : > { %v7925_v4 = vpop.f32.mrb[48].mxu1  ;;  %4659 = vperm.xlu0 %6843, %v4369_v61   ;;  %v7164_v61 = vld [vmem:[%s7483_s30 + $0x77c] ss:$28 sps:$4 sm:$0xff]  }
 0x182   : > { %v2823_v5 = vpop.f32.mrb[49].mxu1 }
 0x183   : > { %v7930_v11 = vpop.f32.mrb[50].mxu1  ;;  %v4372_v5 = vld [vmem:[%s7805_s28 + $0x1a8] sm:$0xff] }
 0x184   : > { %v2826_v15 = vpop.f32.mrb[51].mxu1  ;;  %4674 = vperm.xlu1 %6844, %v4372_v5   ;;  %v4382_v5 = vld [vmem:[%s7805_s28 + $0x1f8] sm:$0xff] }
 0x185   : > { %v7153_v15 = vld [vmem:[%s7483_s30 + $0x244] ss:$28 sps:$4 sm:$0xff]  }
 0x186   : > { %3036 = vmatmul.mubr.bf16.gmra.mrb[156].mxu1 %v7131_v6  ;;  %v4371_v6 = vld [vmem:[%s7805_s28 + $0x1a0] sm:$0xff] }
 0x187   : > { %3542 = vmatmul.mubr.bf16.gmra.mrb[24].mxu0 %v7132_v12  ;;  %3043 = vmatprep.mubr.bf16.mxu1 %v7133_v13  ;;  %v7151_v12 = vld [vmem:[%s7483_s30 + $0x96c] ss:$28 sps:$4 sm:$0xff]  }
 0x188   : > { %3549 = vmatprep.mubr.bf16.mxu0 %v7135_v17  ;;  %4669 = vperm.xlu0 %6843, %v4371_v6   ;;  %v4374_v17 = vld [vmem:[%s7805_s28 + $0x1b8] sm:$0xff]  ;;  %v4381_v6 = vld [vmem:[%s7805_s28 + $0x1f0] sm:$0xff] }
 0x189   : > { %v7937_v20 = vpop.f32.mrb[52].mxu1  ;;  %4684 = vperm.xlu1 %6844, %v4374_v17   ;;  %v4384_v17 = vld [vmem:[%s7805_s28 + $0x208] sm:$0xff] }
 0x18a   : > { %v2831_v23 = vpop.f32.mrb[53].mxu1 }
 0x18b   : > { %v7942_v28 = vpop.f32.mrb[54].mxu1 }
 0x18c   : > { %v2834_v33 = vpop.f32.mrb[55].mxu1  ;;  %4679 = vperm.xlu0 %6843, %v4373_v18   ;;  %v7169_v18 = vld [vmem:[%s7483_s30 + $0x2b0] ss:$28 sps:$4 sm:$0xff]  }
 0x18d   : > { %v7159_v33 = vld [vmem:[%s7483_s30 + $0x744] ss:$28 sps:$4 sm:$0xff]   ;;  %4694 = vperm.xlu1 %6844, %v4376_v25  }
 0x18e   : > { %3044 = vmatmul.mubr.bf16.gmra.mrb[160].mxu1 %v7137_v24  ;;  %v7155_v24 = vld [vmem:[%s7483_s30 + $0x968] ss:$28 sps:$4 sm:$0xff]  }
 0x18f   : > { %3550 = vmatmul.mubr.bf16.gmra.mrb[28].mxu0 %v7138_v29  ;;  %3051 = vmatprep.mubr.bf16.mxu1 %v7139_v31  ;;  %v7156_v31 = vld [vmem:[%s7483_s30 + $0x240] ss:$28 sps:$4 sm:$0xff]  }
 0x190   : > { %3557 = vmatprep.mubr.bf16.mxu0 %v7141_v36  ;;  %4689 = vperm.xlu0 %6843, %v4375_v27   ;;  %v7172_v27 = vld [vmem:[%s7483_s30 + $0x2ec] ss:$28 sps:$4 sm:$0xff]  }
 0x191   : > { %v7949_v42 = vpop.f32.mrb[56].mxu1  ;;  %4704 = vperm.xlu1 %6844, %v4378_v39   ;;  %v7209_v39 = vld [vmem:[%s9024_s1 + $0x1a0] sm:$0xff]  }
 0x192   : > { %v2839_v44 = vpop.f32.mrb[57].mxu1 }
 0x193   : > { %v7954_v51 = vpop.f32.mrb[58].mxu1  ;;  %v4377_v44 = vld [vmem:[%s7805_s28 + $0x1d0] sm:$0xff] }
 0x194   : > { %v2842_v55 = vpop.f32.mrb[59].mxu1  ;;  %4699 = vperm.xlu0 %6843, %v4377_v44  }
 0x196   : > { %3052 = vmatmul.mubr.bf16.gmra.mrb[164].mxu1 %v7143_v45 }
 0x197   : > { %3558 = vmatmul.mubr.bf16.gmra.mrb[32].mxu0 %v7144_v52  ;;  %3059 = vmatprep.mubr.bf16.mxu1 %v7145_v54  ;;  %v4380_v52 = vld [vmem:[%s7805_s28 + $0x1e8] sm:$0xff]  ;;  %v4379_v54 = vld [vmem:[%s7805_s28 + $0x1e0] sm:$0xff] }
 0x198   : > { %3565 = vmatprep.mubr.bf16.mxu0 %v7147_v58  ;;  %v7162_v58 = vld [vmem:[%s7483_s30 + $0x278] ss:$28 sps:$4 sm:$0xff]   ;;  %4714 = vperm.xlu1 %6844, %v4380_v52  }
 0x199   : > { %v7961_v62 = vpop.f32.mrb[60].mxu1  ;;  %4709 = vperm.xlu0 %6843, %v4379_v54   ;;  %v7175_v54 = vld [vmem:[%s7483_s30 + $0x2e8] ss:$28 sps:$4 sm:$0xff]  }
 0x19a   : > { %v2847_v63 = vpop.f32.mrb[61].mxu1 }
 0x19b   : > { %v7966_v8 = vpop.f32.mrb[62].mxu1  ;;  %v7166_v63 = vld [vmem:[%s7483_s30 + $0x2b4] ss:$28 sps:$4 sm:$0xff]  }
 0x19c   : > { %v2850_v13 = vpop.f32.mrb[63].mxu1  ;;  %4724 = vperm.xlu1 %6844, %v4382_v5   ;;  %v4390_v5 = vld [vmem:[%s7805_s28 + $0x238] sm:$0xff] }
 0x19d   : > { %4719 = vperm.xlu0 %6843, %v4381_v6   ;;  %v4389_v6 = vld [vmem:[%s7805_s28 + $0x230] sm:$0xff] }
 0x19e   : > { %3060 = vmatmul.mubr.bf16.gmra.mrb[168].mxu1 %v7149_v3  ;;  %v7176_v3 = vld [vmem:[%s9024_s1 + $0x188] sm:$0xff]  }
 0x19f   : > { %3566 = vmatmul.mubr.bf16.gmra.mrb[36].mxu0 %v7150_v10  ;;  %3067 = vmatprep.mubr.bf16.mxu1 %v7151_v12  ;;  %v7187_v10 = vld [vmem:[%s9024_s1 + $0x190] sm:$0xff]  }
 0x1a0   : > { %3573 = vmatprep.mubr.bf16.mxu0 %v7153_v15  ;;  %v7168_v15 = vld [vmem:[%s7483_s30 + $0x778] ss:$28 sps:$4 sm:$0xff]   ;;  %4734 = vperm.xlu1 %6844, %v4384_v17   ;;  %v4392_v17 = vld [vmem:[%s7805_s28 + $0x248] sm:$0xff] }
 0x1a1   : > { %v7973_v19 = vpop.f32.mrb[64].mxu1 }
 0x1a2   : > { %v2855_v23 = vpop.f32.mrb[65].mxu1 }
 0x1a3   : > { %v7978_v29 = vpop.f32.mrb[66].mxu1  ;;  %v7170_v23 = vld [vmem:[%s7483_s30 + $0x7b4] ss:$28 sps:$4 sm:$0xff]  }
 0x1a4   : > { %v2858_v36 = vpop.f32.mrb[67].mxu1 }
 0x1a5   : > { %v4385_v36 = vld [vmem:[%s7805_s28 + $0x210] sm:$0xff] }
 0x1a6   : > { %3068 = vmatmul.mubr.bf16.gmra.mrb[172].mxu1 %v7155_v24  ;;  %v4383_v24 = vld [vmem:[%s7805_s28 + $0x200] sm:$0xff] }
 0x1a7   : > { %3574 = vmatmul.mubr.bf16.gmra.mrb[40].mxu0 %v7156_v31  ;;  %3372 = vmatprep.mubr.bf16.mxu1 %v7159_v33  ;;  %v7196_v31 = vld [vmem:[%s9024_s1 + $0x198] sm:$0xff]  }
 0x1a8   : > { %3581 = vmatprep.mubr.bf16.mxu0 %v7160_v37  ;;  %4729 = vperm.xlu0 %6843, %v4383_v24   ;;  %v4386_v33 = vld [vmem:[%s7805_s28 + $0x218] sm:$0xff]  ;;  %v7183_v24 = vld [vmem:[%s7483_s30 + $0x824] ss:$28 sps:$4 sm:$0xff]  }
 0x1a9   : > { %v7985_v45 = vpop.f32.mrb[68].mxu1  ;;  %4744 = vperm.xlu1 %6844, %v4386_v33   ;;  %v4394_v33 = vld [vmem:[%s7805_s28 + $0x258] sm:$0xff] }
 0x1aa   : > { %v2863_v46 = vpop.f32.mrb[69].mxu1 }
 0x1ab   : > { %v7990_v55 = vpop.f32.mrb[70].mxu1  ;;  %v7174_v46 = vld [vmem:[%s7483_s30 + $0x7b0] ss:$28 sps:$4 sm:$0xff]  }
 0x1ac   : > { %v2866_v59 = vpop.f32.mrb[71].mxu1  ;;  %4739 = vperm.xlu0 %6843, %v4385_v36   ;;  %v4393_v36 = vld [vmem:[%s7805_s28 + $0x250] sm:$0xff] }
 0x1ad   : > { %v4387_v59 = vld [vmem:[%s7805_s28 + $0x220] sm:$0xff] }
 0x1ae   : > { %3373 = vmatmul.mubr.bf16.vlgmr.msra.gmra.mrb[132].mxu1 %v7157_v47  ;;  %v4388_v47 = vld [vmem:[%s7805_s28 + $0x228] sm:$0xff] }
 0x1af   : > { %3582 = vmatmul.mubr.bf16.gmra.mrb[44].mxu0 %v7162_v58  ;;  %6350 = vmatpush3.bf16.msra.mxu1 %v7796_v48  ;;  %v7177_v58 = vld [vmem:[%s7483_s30 + $0x7ec] ss:$28 sps:$4 sm:$0xff]  }
 0x1b0   : > { %3380 = vmatprep.mubr.bf16.mxu1 %v7164_v61  ;;  %3589 = vmatprep.mubr.bf16.mxu0 %v7166_v63  ;;  %v7179_v63 = vld [vmem:[%s7483_s30 + $0x324] ss:$28 sps:$4 sm:$0xff]  }
 0x1b1   : > { %v8004_v12 = vpop.f32.mrb[72].mxu1  ;;  %6351 = vmatprep.subr.bf16.mxu1 %v7176_v3  ;;  %4754 = vperm.xlu1 %6844, %v4388_v47   ;;  %v4396_v47 = vld [vmem:[%s7805_s28 + $0x268] sm:$0xff] }
 0x1b2   : > { %v2871_v13 = vpop.f32.mrb[73].mxu1  ;;  %4749 = vperm.xlu0 %6843, %v4387_v59   ;;  %v7190_v59 = vld [vmem:[%s7483_s30 + $0x85c] ss:$28 sps:$4 sm:$0xff]  }
 0x1b3   : > { %v8008_v48 = vpop.f32.mrb[74].mxu1  ;;  %6352 = vmatpush3.bf16.msra.mxu1 %v7176_v3  ;;  %v7222_v3 = vld [vmem:[%s9024_s1 + $0x1a8] sm:$0xff]  }
 0x1b4   : > { %v2874_v25 = vpop.f32.mrb[75].mxu1  ;;  %6353 = vmatprep.subr.bf16.mxu1 %v7187_v10 }
 0x1b5   : > { %4764 = vperm.xlu1 %6844, %v4390_v5   ;;  %v4391_v25 = vld [vmem:[%s7805_s28 + $0x240] sm:$0xff]  ;;  %v4398_v5 = vld [vmem:[%s7805_s28 + $0x278] sm:$0xff] }
 0x1b6   : > { %3381 = vmatmul.mubr.bf16.gmra.mrb[136].mxu1 %v7168_v15  ;;  %v7181_v15 = vld [vmem:[%s7483_s30 + $0x7e8] ss:$28 sps:$4 sm:$0xff]   ;;  %4759 = vperm.xlu0 %6843, %v4389_v6   ;;  %v4397_v6 = vld [vmem:[%s7805_s28 + $0x270] sm:$0xff] }
 0x1b7   : > { %3590 = vmatmul.mubr.bf16.gmra.mrb[48].mxu0 %v7169_v18  ;;  %3388 = vmatprep.mubr.bf16.mxu1 %v7170_v23  ;;  %v7182_v23 = vld [vmem:[%s7483_s30 + $0x320] ss:$28 sps:$4 sm:$0xff]  }
 0x1b8   : > { %3597 = vmatprep.mubr.bf16.mxu0 %v7172_v27  ;;  %6354 = vmatpush3.bf16.msra.mxu1 %v7187_v10 }
 0x1b9   : > { %v8019_v37 = vpop.f32.mrb[76].mxu1  ;;  %6355 = vmatprep.subr.bf16.mxu1 %v7196_v31  ;;  %4774 = vperm.xlu1 %6844, %v4392_v17   ;;  %v7194_v17 = vld [vmem:[%s7483_s30 + $0x858] ss:$28 sps:$4 sm:$0xff]  }
 0x1ba   : > { %v2879_v44 = vpop.f32.mrb[77].mxu1  ;;  %4769 = vperm.xlu0 %6843, %v4391_v25   ;;  %v7195_v25 = vld [vmem:[%s7483_s30 + $0x390] ss:$28 sps:$4 sm:$0xff]  }
 0x1bb   : > { %v8026_v52 = vpop.f32.mrb[78].mxu1 }
 0x1bc   : > { %v2882_v61 = vpop.f32.mrb[79].mxu1  ;;  %6356 = vmatpush3.bf16.msra.mxu1 %v7196_v31  ;;  %v7185_v31 = vld [vmem:[%s7483_s30 + $0x35c] ss:$28 sps:$4 sm:$0xff]  }
 0x1bd   : > { %6357 = vmatprep.subr.bf16.mxu1 %v7209_v39  ;;  %4784 = vperm.xlu1 %6844, %v4394_v33   ;;  %v4395_v61 = vld [vmem:[%s7805_s28 + $0x260] sm:$0xff] }
 0x1be   : > { %3389 = vmatmul.mubr.bf16.gmra.mrb[140].mxu1 %v7174_v46  ;;  %v7188_v46 = vld [vmem:[%s7483_s30 + $0x820] ss:$28 sps:$4 sm:$0xff]   ;;  %4779 = vperm.xlu0 %6843, %v4393_v36   ;;  %v7199_v36 = vld [vmem:[%s7483_s30 + $0x3cc] ss:$28 sps:$4 sm:$0xff]  }
 0x1bf   : > { %3598 = vmatmul.mubr.bf16.gmra.mrb[52].mxu0 %v7175_v54  ;;  %3396 = vmatprep.mubr.bf16.mxu1 %v7177_v58  ;;  %v7189_v58 = vld [vmem:[%s7483_s30 + $0x358] ss:$28 sps:$4 sm:$0xff]  }
 0x1c0   : > { %3605 = vmatprep.mubr.bf16.mxu0 %v7179_v63  ;;  %6358 = vmatpush3.bf16.msra.mxu1 %v7209_v39 }
 0x1c1   : > { %v8037_v10 = vpop.f32.mrb[80].mxu1  ;;  %6359 = vmatprep.subr.bf16.mxu1 %v7222_v3  ;;  %4794 = vperm.xlu1 %6844, %v4396_v47  }
 0x1c2   : > { %v2887_v13 = vpop.f32.mrb[81].mxu1  ;;  %4789 = vperm.xlu0 %6843, %v4395_v61   ;;  %v4404_v61 = vld [vmem:[%s7805_s28 + $0x2a8] sm:$0xff] }
 0x1c3   : > { %v8041_v18 = vpop.f32.mrb[82].mxu1 }
 0x1c4   : > { %v2890_v27 = vpop.f32.mrb[83].mxu1  ;;  %6360 = vmatpush3.bf16.msra.mxu1 %v7222_v3  ;;  %v7192_v3 = vld [vmem:[%s7483_s30 + $0x394] ss:$28 sps:$4 sm:$0xff]  }
 0x1c5   : > { %4804 = vperm.xlu1 %6844, %v4398_v5   ;;  %v7197_v27 = vld [vmem:[%s7483_s30 + $0x894] ss:$28 sps:$4 sm:$0xff]   ;;  %v7203_v5 = vld [vmem:[%s7483_s30 + $0x8cc] ss:$28 sps:$4 sm:$0xff]  }
 0x1c6   : > { %3397 = vmatmul.mubr.bf16.gmra.mrb[144].mxu1 %v7181_v15  ;;  %4799 = vperm.xlu0 %6843, %v4397_v6   ;;  %v4403_v6 = vld [vmem:[%s7805_s28 + $0x2a0] sm:$0xff] }
 0x1c7   : > { %3606 = vmatmul.mubr.bf16.gmra.mrb[56].mxu0 %v7182_v23  ;;  %3404 = vmatprep.mubr.bf16.mxu1 %v7183_v24  ;;  %v4400_v23 = vld [vmem:[%s7805_s28 + $0x288] sm:$0xff] }
 0x1c8   : > { %3613 = vmatprep.mubr.bf16.mxu0 %v7185_v31  ;;  %v4399_v31 = vld [vmem:[%s7805_s28 + $0x280] sm:$0xff] }
 0x1c9   : > { %v8049_v39 = vpop.f32.mrb[84].mxu1  ;;  %4814 = vperm.xlu1 %6844, %v4400_v23   ;;  %v4406_v23 = vld [vmem:[%s7805_s28 + $0x2b8] sm:$0xff] }
 0x1ca   : > { %v2895_v44 = vpop.f32.mrb[85].mxu1  ;;  %4809 = vperm.xlu0 %6843, %v4399_v31  }
 0x1cb   : > { %v8053_v54 = vpop.f32.mrb[86].mxu1  ;;  %v4402_v44 = vld [vmem:[%s7805_s28 + $0x298] sm:$0xff] }
 0x1cc   : > { %v2898_v63 = vpop.f32.mrb[87].mxu1 }
 0x1cd   : > { %4824 = vperm.xlu1 %6844, %v4402_v44   ;;  %v7208_v44 = vld [vmem:[%s7483_s30 + $0x400] ss:$28 sps:$4 sm:$0xff]  }
 0x1ce   : > { %3405 = vmatmul.mubr.bf16.gmra.mrb[148].mxu1 %v7188_v46  ;;  %v4401_v46 = vld [vmem:[%s7805_s28 + $0x290] sm:$0xff] }
 0x1cf   : > { %3614 = vmatmul.mubr.bf16.gmra.mrb[60].mxu0 %v7189_v58  ;;  %3412 = vmatprep.mubr.bf16.mxu1 %v7190_v59  ;;  %v7201_v59 = vld [vmem:[%s7483_s30 + $0x890] ss:$28 sps:$4 sm:$0xff]  }
 0x1d0   : > { %3621 = vmatprep.mubr.bf16.mxu0 %v7192_v3  ;;  %4819 = vperm.xlu0 %6843, %v4401_v46   ;;  %v7202_v3 = vld [vmem:[%s7483_s30 + $0x3c8] ss:$28 sps:$4 sm:$0xff]  }
 0x1d1   : > { %v8061_v13 = vpop.f32.mrb[88].mxu1  ;;  %4834 = vperm.xlu1 %6844, %v4404_v61   ;;  %v7210_v46 = vld [vmem:[%s7483_s30 + $0x904] ss:$28 sps:$4 sm:$0xff]  }
 0x1d2   : > { %v2903_v15 = vpop.f32.mrb[89].mxu1 }
 0x1d3   : > { %v8065_v24 = vpop.f32.mrb[90].mxu1 }
 0x1d4   : > { %v2906_v33 = vpop.f32.mrb[91].mxu1  ;;  %4829 = vperm.xlu0 %6843, %v4403_v6  }
 0x1d5   : > { %4844 = vperm.xlu1 %6844, %v4406_v23   ;;  %v7207_v33 = vld [vmem:[%s7483_s30 + $0x8c8] ss:$28 sps:$4 sm:$0xff]  }
 0x1d6   : > { %3413 = vmatmul.mubr.bf16.gmra.mrb[152].mxu1 %v7194_v17  ;;  %v7205_v17 = vld [vmem:[%s7483_s30 + $0x404] ss:$28 sps:$4 sm:$0xff]  }
 0x1d7   : > { %3622 = vmatmul.mubr.bf16.gmra.mrb[64].mxu0 %v7195_v25  ;;  %3420 = vmatprep.mubr.bf16.mxu1 %v7197_v27  ;;  %v4405_v25 = vld [vmem:[%s7805_s28 + $0x2b0] sm:$0xff] }
 0x1d8   : > { %3629 = vmatprep.mubr.bf16.mxu0 %v7199_v36  ;;  %4839 = vperm.xlu0 %6843, %v4405_v25   ;;  %v7218_v25 = vld [vmem:[%s7483_s30 + $0x474] ss:$28 sps:$4 sm:$0xff]  }
 0x1d9   : > { %v8073_v47 = vpop.f32.mrb[92].mxu1 }
 0x1da   : > { %v2911_v58 = vpop.f32.mrb[93].mxu1 }
 0x1db   : > { %v8077_v63 = vpop.f32.mrb[94].mxu1 }
 0x1dc   : > { %v2914_v15 = vpop.f32.mrb[95].mxu1 }
 0x1dd   : > { %v7215_v15 = vld [vmem:[%s7483_s30 + $0x438] ss:$28 sps:$4 sm:$0xff]  }
 0x1de   : > { %3421 = vmatmul.mubr.bf16.gmra.mrb[156].mxu1 %v7201_v59  ;;  %v7212_v59 = vld [vmem:[%s7483_s30 + $0x43c] ss:$28 sps:$4 sm:$0xff]  }
 0x1df   : > { %3630 = vmatmul.mubr.bf16.gmra.mrb[68].mxu0 %v7202_v3  ;;  %3428 = vmatprep.mubr.bf16.mxu1 %v7203_v5  ;;  %v7214_v5 = vld [vmem:[%s7483_s30 + $0x900] ss:$28 sps:$4 sm:$0xff]  }
 0x1e0   : > { %3637 = vmatprep.mubr.bf16.mxu0 %v7205_v17  ;;  %v7216_v17 = vld [vmem:[%s7483_s30 + $0x93c] ss:$28 sps:$4 sm:$0xff]  }
 0x1e1   : > { %v8085_v27 = vpop.f32.mrb[96].mxu1 }
 0x1e2   : > { %9028 = vst [vmem:[#allocation2_spill] sm:$0xff] %v8085_v27  ;;  %v2919_v31 = vpop.f32.mrb[97].mxu1 }
 0x1e3   : > { %v8088_v36 = vpop.f32.mrb[98].mxu1 }
 0x1e4   : > { %9029 = vst [vmem:[#allocation3_spill] sm:$0xff] %v8088_v36  ;;  %v2922_v58 = vpop.f32.mrb[99].mxu1 }
 0x1e5   : > { %v7221_v58 = vld [vmem:[%s7483_s30 + $0x470] ss:$28 sps:$4 sm:$0xff]  }
 0x1e6   : > { %3429 = vmatmul.mubr.bf16.gmra.mrb[160].mxu1 %v7207_v33 }
 0x1e7   : > { %3638 = vmatmul.mubr.bf16.gmra.mrb[72].mxu0 %v7208_v44  ;;  %3436 = vmatprep.mubr.bf16.mxu1 %v7210_v46  ;;  %v7220_v44 = vld [vmem:[%s7483_s30 + $0x938] ss:$28 sps:$4 sm:$0xff]  }
 0x1e8   : > { %3645 = vmatprep.mubr.bf16.mxu0 %v7212_v59  ;;  %v7223_v59 = vld [vmem:[%s7483_s30 + $0x974] ss:$28 sps:$4 sm:$0xff]  }
 0x1e9   : > { %v8093_v61 = vpop.f32.mrb[100].mxu1 }
 0x1ea   : > { %9030 = vst [vmem:[#allocation4_spill] sm:$0xff] %v8093_v61  ;;  %v2927_v3 = vpop.f32.mrb[101].mxu1  ;;  %v8224_v61 = vpop.permute.xlu1 %4419 }
 0x1eb   : > { %v8096_v6 = vpop.f32.mrb[102].mxu1 }
 0x1ec   : > { %9031 = vst [vmem:[#allocation5_spill] sm:$0xff] %v8096_v6  ;;  %v2930_v23 = vpop.f32.mrb[103].mxu1  ;;  %v7225_v6 = vld [vmem:[%s7483_s30 + $0x4ac] ss:$28 sps:$4 sm:$0xff]  }
 0x1ee   : > { %3437 = vmatmul.mubr.bf16.gmra.mrb[164].mxu1 %v7214_v5 }
 0x1ef   : > { %3646 = vmatmul.mubr.bf16.gmra.mrb[76].mxu0 %v7215_v15  ;;  %3444 = vmatprep.mubr.bf16.mxu1 %v7216_v17  ;;  %v7227_v17 = vld [vmem:[%s7483_s30 + $0x970] ss:$28 sps:$4 sm:$0xff]  }
 0x1f0   : > { %3653 = vmatprep.mubr.bf16.mxu0 %v7218_v25  ;;  %v7228_v25 = vld [vmem:[%s7483_s30 + $0x4a8] ss:$28 sps:$4 sm:$0xff]  }
 0x1f1   : > { %v8101_v31 = vpop.f32.mrb[104].mxu1 }
 0x1f2   : > { %9032 = vst [vmem:[#allocation6_spill] sm:$0xff] %v8101_v31  ;;  %v2935_v33 = vpop.f32.mrb[105].mxu1  ;;  %v7229_v31 = vld [vmem:[%s7483_s30 + $0x4e4] ss:$28 sps:$4 sm:$0xff]  }
 0x1f3   : > { %v8104_v46 = vpop.f32.mrb[106].mxu1  ;;  %v7231_v33 = vld [vmem:[%s7483_s30 + $0x18] ss:$28 sps:$4 sm:$0xff]  }
 0x1f4   : > { %9033 = vst [vmem:[#allocation7_spill] sm:$0xff] %v8104_v46  ;;  %v2938_v3 = vpop.f32.mrb[107].mxu1 }
 0x1f5   : > { %v7232_v3 = vld [vmem:[%s7483_s30 + $0x4e0] ss:$28 sps:$4 sm:$0xff]  }
 0x1f6   : > { %3445 = vmatmul.mubr.bf16.gmra.mrb[168].mxu1 %v7220_v44 }
 0x1f7   : > { %3654 = vmatmul.mubr.bf16.gmra.mrb[80].mxu0 %v7221_v58  ;;  %3452 = vmatprep.mubr.bf16.mxu1 %v7223_v59  ;;  %v7233_v58 = vld [vmem:[%s7483_s30 + $0x50] ss:$28 sps:$4 sm:$0xff]  }
 0x1f8   : > { %3661 = vmatprep.mubr.bf16.mxu0 %v7225_v6 }
 0x1f9   : > { %v8109_v5 = vpop.f32.mrb[108].mxu1 }
 0x1fa   : > { %9034 = vst [vmem:[#allocation8_spill] sm:$0xff] %v8109_v5  ;;  %v2943_v15 = vpop.f32.mrb[109].mxu1  ;;  %v7261_v5 = vld [vmem:[%s7483_s30 + $0x2b8] ss:$28 sps:$4 sm:$0xff]  }
 0x1fb   : > { %v8112_v23 = vpop.f32.mrb[110].mxu1  ;;  %v7236_v15 = vld [vmem:[%s7483_s30 + $0x88] ss:$28 sps:$4 sm:$0xff]  }
 0x1fc   : > { %9035 = vst [vmem:[#allocation9_spill] sm:$0xff] %v8112_v23  ;;  %v2946_v46 = vpop.f32.mrb[111].mxu1  ;;  %v7234_v23 = vld [vmem:[%s7483_s30 + $0x51c] ss:$28 sps:$4 sm:$0xff]  }
 0x1fe   : > { %3453 = vmatmul.mubr.bf16.gmra.mrb[172].mxu1 %v7227_v17 }
 0x1ff   : > { %3662 = vmatmul.mubr.bf16.gmra.mrb[84].mxu0 %v7228_v25  ;;  %6361 = vmatprep.mubr.msk.bf16.mxu1 %vm2558_vm0, %v7231_v33  ;;  %v7238_v25 = vld [vmem:[%s7483_s30 + $0xc0] ss:$28 sps:$4 sm:$0xff]  }
 0x200   : > { %3669 = vmatprep.mubr.bf16.mxu0 %v7229_v31 }
 0x201   : > { %v8118_v6 = vpop.f32.mrb[112].mxu1 }
 0x202   : > { %9036 = vst [vmem:[#allocation10_spill] sm:$0xff] %v8118_v6  ;;  %v2951_v44 = vpop.f32.mrb[113].mxu1  ;;  %v7239_v6 = vld [vmem:[%s7483_s30 + $0x554] ss:$28 sps:$4 sm:$0xff]  }
 0x203   : > { %v8121_v59 = vpop.f32.mrb[114].mxu1  ;;  %v7237_v44 = vld [vmem:[%s7483_s30 + $0x518] ss:$28 sps:$4 sm:$0xff]  }
 0x204   : > { %9037 = vst [vmem:[#allocation11_spill] sm:$0xff] %v8121_v59  ;;  %v2954_v46 = vpop.f32.mrb[115].mxu1  ;;  %v7241_v59 = vld [vmem:[%s7483_s30 + $0xf8] ss:$28 sps:$4 sm:$0xff]  }
 0x206   : > { %6362 = vmatmul.mubr.msk.bf16.vlgmr.msra.gmra.mrb[176].mxu1 %vm2558_vm0, %v7233_v58 }
 0x207   : > { %3670 = vmatmul.mubr.bf16.gmra.mrb[88].mxu0 %v7232_v3  ;;  %6365 = vmatprep.mubr.msk.bf16.mxu1 %vm2558_vm0, %v7236_v15  ;;  %v7243_v3 = vld [vmem:[%s7483_s30 + $0x130] ss:$28 sps:$4 sm:$0xff]  }
 0x208   : > { %3677 = vmatprep.mubr.bf16.mxu0 %v7234_v23 }
 0x209   : > { %v8128_v31 = vpop.f32.mrb[116].mxu1 }
 0x20a   : > { %9038 = vst [vmem:[#allocation12_spill] sm:$0xff] %v8128_v31  ;;  %v2959_v17 = vpop.f32.mrb[117].mxu1  ;;  %v7244_v31 = vld [vmem:[%s7483_s30 + $0x58c] ss:$28 sps:$4 sm:$0xff]  }
 0x20b   : > { %v8131_v33 = vpop.f32.mrb[118].mxu1  ;;  %v7242_v17 = vld [vmem:[%s7483_s30 + $0x550] ss:$28 sps:$4 sm:$0xff]  }
 0x20c   : > { %9039 = vst [vmem:[#allocation13_spill] sm:$0xff] %v8131_v33  ;;  %v2962_v46 = vpop.f32.mrb[119].mxu1  ;;  %v7246_v33 = vld [vmem:[%s7483_s30 + $0x168] ss:$28 sps:$4 sm:$0xff]  }
 0x20e   : > { %6366 = vmatmul.mubr.msk.bf16.gmra.mrb[180].mxu1 %vm2558_vm0, %v7238_v25  ;;  %v7248_v25 = vld [vmem:[%s7483_s30 + $0x1a0] ss:$28 sps:$4 sm:$0xff]  }
 0x20f   : > { %3678 = vmatmul.mubr.bf16.gmra.mrb[92].mxu0 %v7237_v44  ;;  %6369 = vmatprep.mubr.msk.bf16.mxu1 %vm2558_vm0, %v7241_v59 }
 0x210   : > { %3685 = vmatprep.mubr.bf16.mxu0 %v7239_v6 }
 0x211   : > { %v8138_v23 = vpop.f32.mrb[120].mxu1 }
 0x212   : > { %9040 = vst [vmem:[#allocation14_spill] sm:$0xff] %v8138_v23  ;;  %v2967_v58 = vpop.f32.mrb[121].mxu1  ;;  %v7249_v23 = vld [vmem:[%s7483_s30 + $0x5c4] ss:$28 sps:$4 sm:$0xff]  }
 0x213   : > { %v8141_v15 = vpop.f32.mrb[122].mxu1  ;;  %v7247_v58 = vld [vmem:[%s7483_s30 + $0x588] ss:$28 sps:$4 sm:$0xff]  }
 0x214   : > { %9041 = vst [vmem:[#allocation15_spill] sm:$0xff] %v8141_v15  ;;  %v2970_v46 = vpop.f32.mrb[123].mxu1  ;;  %v7251_v15 = vld [vmem:[%s7483_s30 + $0x1d8] ss:$28 sps:$4 sm:$0xff]  }
 0x216   : > { %6370 = vmatmul.mubr.msk.bf16.gmra.mrb[184].mxu1 %vm2558_vm0, %v7243_v3  ;;  %v7253_v3 = vld [vmem:[%s7483_s30 + $0x210] ss:$28 sps:$4 sm:$0xff]  }
 0x217   : > { %3686 = vmatmul.mubr.bf16.gmra.mrb[96].mxu0 %v7242_v17  ;;  %6373 = vmatprep.mubr.msk.bf16.mxu1 %vm2558_vm0, %v7246_v33 }
 0x218   : > { %3693 = vmatprep.mubr.bf16.mxu0 %v7244_v31 }
 0x219   : > { %v8148_v6 = vpop.f32.mrb[124].mxu1 }
 0x21a   : > { %9042 = vst [vmem:[#allocation16_spill] sm:$0xff] %v8148_v6  ;;  %v2975_v59 = vpop.f32.mrb[125].mxu1 }
 0x21b   : > { %v8151_v44 = vpop.f32.mrb[126].mxu1  ;;  %v7252_v59 = vld [vmem:[%s7483_s30 + $0x5c0] ss:$28 sps:$4 sm:$0xff]  }
 0x21c   : > { %9043 = vst [vmem:[#allocation17_spill] sm:$0xff] %v8151_v44  ;;  %v2978_v46 = vpop.f32.mrb[127].mxu1  ;;  %v7256_v44 = vld [vmem:[%s7483_s30 + $0x248] ss:$28 sps:$4 sm:$0xff]  }
 0x21d   : > { %v7254_v46 = vld [vmem:[%s7483_s30 + $0x5fc] ss:$28 sps:$4 sm:$0xff]  }
 0x21e   : > { %6374 = vmatmul.mubr.msk.bf16.gmra.mrb[188].mxu1 %vm2558_vm0, %v7248_v25  ;;  %v8169_v25 = vld [vmem:[%s9025_s2] ss:$0 sm:$0xff] }
 0x21f   : > { %3694 = vmatmul.mubr.bf16.gmra.mrb[100].mxu0 %v7247_v58  ;;  %6377 = vmatprep.mubr.msk.bf16.mxu1 %vm2558_vm0, %v7251_v15  ;;  %v7258_v58 = vld [vmem:[%s7483_s30 + $0x280] ss:$28 sps:$4 sm:$0xff]   ;;  %v2761_v36 = vadd.f32 %v8169_v25, %v7834_v14 }
 0x220   : > { %3701 = vmatprep.mubr.bf16.mxu0 %v7249_v23  ;;  %v2726_v23 = vadd.f32 %v8169_v25, %v7777_v32  ;;  %v2734_v32 = vadd.f32 %v8169_v25, %v7785_v40  ;;  %v2742_v40 = vadd.f32 %v8169_v25, %v7799_v49  ;;  %v2750_v49 = vadd.f32 %v8169_v25, %v7817_v60 }
 0x221   : > { %v8158_v31 = vpop.f32.mrb[128].mxu1 }
 0x222   : > { %9044 = vst [vmem:[#allocation18_spill] sm:$0xff] %v8158_v31  ;;  %v2983_v33 = vpop.f32.mrb[129].mxu1  ;;  %v7257_v31 = vld [vmem:[%s7483_s30 + $0x5f8] ss:$28 sps:$4 sm:$0xff]  }
 0x223   : > { %v8161_v17 = vpop.f32.mrb[130].mxu1 }
 0x224   : > { %9045 = vst [vmem:[#allocation19_spill] sm:$0xff] %v8161_v17  ;;  %v2986_v6 = vpop.f32.mrb[131].mxu1  ;;  %v2729_v17 = vadd.f32 %v8169_v25, %v7780_v35 }
 0x226   : > { %6378 = vmatmul.mubr.msk.bf16.gmra.mrb[192].mxu1 %vm2558_vm0, %v7253_v3 }
 0x227   : > { %3702 = vmatmul.mubr.bf16.gmra.mrb[104].mxu0 %v7252_v59  ;;  %6381 = vmatprep.mubr.msk.bf16.mxu1 %vm2558_vm0, %v7256_v44  ;;  %v7259_v59 = vld [vmem:[%s7483_s30 + $0x634] ss:$28 sps:$4 sm:$0xff]  }
 0x228   : > { %3709 = vmatprep.mubr.bf16.mxu0 %v7254_v46 }
 0x22a   : > { %v3495_v15 = vpop.f32.mrb[0].mxu0 }
 0x22b   : > { %v8176_v6 = vadd.f32 %v3495_v15, %v2726_v23  ;;  %v3497_v33 = vpop.f32.mrb[1].mxu0  ;;  %v7263_v23 = vld [vmem:[%s7483_s30 + $0x2f0] ss:$28 sps:$4 sm:$0xff]  }
 0x22c   : > { %v3498_v3 = vpop.f32.mrb[2].mxu0 }
 0x22d   : > { %v8183_v44 = vadd.f32 %v3498_v3, %v2729_v17  ;;  %v3500_v46 = vpop.f32.mrb[3].mxu0  ;;  %v2737_v17 = vadd.f32 %v8169_v25, %v7788_v43  ;;  %v7262_v3 = vld [vmem:[%s7483_s30 + $0x630] ss:$28 sps:$4 sm:$0xff]  }
 0x22e   : > { %6382 = vmatmul.mubr.msk.bf16.gmra.mrb[196].mxu1 %vm2558_vm0, %v7258_v58  ;;  %v7266_v46 = vld [vmem:[%s7483_s30 + $0x328] ss:$28 sps:$4 sm:$0xff]  }
 0x22f   : > { %3710 = vmatmul.mubr.bf16.gmra.mrb[108].mxu0 %v7257_v31  ;;  %6385 = vmatprep.mubr.msk.bf16.mxu1 %vm2558_vm0, %v7261_v5  ;;  %v7264_v58 = vld [vmem:[%s7483_s30 + $0x66c] ss:$28 sps:$4 sm:$0xff]  }
 0x230   : > { %3717 = vmatprep.mubr.bf16.mxu0 %v7259_v59 }
 0x232   : > { %v3503_v35 = vpop.f32.mrb[4].mxu0 }
 0x233   : > { %v8190_v15 = vadd.f32 %v3503_v35, %v2734_v32  ;;  %v3505_v33 = vpop.f32.mrb[5].mxu0  ;;  %v7268_v32 = vld [vmem:[%s7483_s30 + $0x360] ss:$28 sps:$4 sm:$0xff]   ;;  %v2745_v35 = vadd.f32 %v8169_v25, %v7810_v53 }
 0x234   : > { %v3506_v31 = vpop.f32.mrb[6].mxu0 }
 0x235   : > { %v8197_v5 = vadd.f32 %v3506_v31, %v2737_v17  ;;  %v3508_v59 = vpop.f32.mrb[7].mxu0  ;;  %v7267_v31 = vld [vmem:[%s7483_s30 + $0x668] ss:$28 sps:$4 sm:$0xff]  }
 0x236   : > { %6386 = vmatmul.mubr.msk.bf16.gmra.mrb[200].mxu1 %vm2558_vm0, %v7263_v23  ;;  %v7271_v59 = vld [vmem:[%s7483_s30 + $0x398] ss:$28 sps:$4 sm:$0xff]  }
 0x237   : > { %3718 = vmatmul.mubr.bf16.gmra.mrb[112].mxu0 %v7262_v3  ;;  %6389 = vmatprep.mubr.msk.bf16.mxu1 %vm2558_vm0, %v7266_v46  ;;  %v7269_v3 = vld [vmem:[%s7483_s30 + $0x6a4] ss:$28 sps:$4 sm:$0xff]  }
 0x238   : > { %3725 = vmatprep.mubr.bf16.mxu0 %v7264_v58 }
 0x23a   : > { %v3511_v43 = vpop.f32.mrb[8].mxu0 }
 0x23b   : > { %v8206_v33 = vadd.f32 %v3511_v43, %v2742_v40  ;;  %v3513_v17 = vpop.f32.mrb[9].mxu0  ;;  %v7273_v40 = vld [vmem:[%s7483_s30 + $0x3d0] ss:$28 sps:$4 sm:$0xff]   ;;  %v2753_v43 = vadd.f32 %v8169_v25, %v7822_v2  ;;  %v2758_v2 = vadd.f32 %v8169_v25, %v7829_v9 }
 0x23c   : > { %v3514_v23 = vpop.f32.mrb[10].mxu0 }
 0x23d   : > { %v8211_v46 = vadd.f32 %v3514_v23, %v2745_v35  ;;  %v3516_v58 = vpop.f32.mrb[11].mxu0  ;;  %v7272_v23 = vld [vmem:[%s7483_s30 + $0x6a0] ss:$28 sps:$4 sm:$0xff]  }
 0x23e   : > { %6390 = vmatmul.mubr.msk.bf16.gmra.mrb[204].mxu1 %vm2558_vm0, %v7268_v32  ;;  %v7276_v58 = vld [vmem:[%s7483_s30 + $0x408] ss:$28 sps:$4 sm:$0xff]  }
 0x23f   : > { %3726 = vmatmul.mubr.bf16.gmra.mrb[116].mxu0 %v7267_v31  ;;  %6393 = vmatprep.mubr.msk.bf16.mxu1 %vm2558_vm0, %v7271_v59  ;;  %v7274_v31 = vld [vmem:[%s7483_s30 + $0x6dc] ss:$28 sps:$4 sm:$0xff]   ;;  %v8227_v59 = vpop.permute.xlu0 %4409 }
 0x240   : > { %3733 = vmatprep.mubr.bf16.mxu0 %v7269_v3 }
 0x242   : > { %v3519_v53 = vpop.f32.mrb[12].mxu0 }
 0x243   : > { %v8220_v17 = vadd.f32 %v3519_v53, %v2750_v49  ;;  %v3521_v35 = vpop.f32.mrb[13].mxu0  ;;  %v8235_v49 = vpop.permute.xlu1 %4424 }
 0x244   : > { %v3522_v32 = vpop.f32.mrb[14].mxu0  ;;  %v7278_v35 = vld [vmem:[%s7483_s30 + $0x440] ss:$28 sps:$4 sm:$0xff]  }
 0x245   : > { %v8229_v60 = vadd.f32 %v3522_v32, %v2753_v43  ;;  %v3524_v3 = vpop.f32.mrb[15].mxu0  ;;  %v8240_v43 = vpop.permute.xlu0 %4414 }
 0x246   : > { %6394 = vmatmul.mubr.msk.bf16.gmra.mrb[208].mxu1 %vm2558_vm0, %v7273_v40  ;;  %v7281_v3 = vld [vmem:[%s7483_s30 + $0x478] ss:$28 sps:$4 sm:$0xff]  }
 0x247   : > { %3734 = vmatmul.mubr.bf16.gmra.mrb[120].mxu0 %v7272_v23  ;;  %6397 = vmatprep.mubr.msk.bf16.mxu1 %vm2558_vm0, %v7276_v58  ;;  %v7277_v23 = vld [vmem:[%s7483_s30 + $0x6d8] ss:$28 sps:$4 sm:$0xff]   ;;  %v8251_v14 = vpop.permute.xlu1 %4434 }
 0x248   : > { %3741 = vmatprep.mubr.bf16.mxu0 %v7274_v31  ;;  %v7279_v31 = vld [vmem:[%s7483_s30 + $0x714] ss:$28 sps:$4 sm:$0xff]   ;;  %9048 = vst [vmem:[#allocation22_spill] sm:$0xff] %v8251_v14 }
 0x24a   : > { %v3527_v53 = vpop.f32.mrb[16].mxu0 }
 0x24b   : > { %v8242_v32 = vadd.f32 %v3527_v53, %v2758_v2  ;;  %v3529_v40 = vpop.f32.mrb[17].mxu0  ;;  %v2766_v2 = vadd.f32 %v8169_v25, %v7841_v21  ;;  %v8255_v53 = vpop.permute.xlu0 %4429 }
 0x24c   : > { %v3530_v58 = vpop.f32.mrb[18].mxu0  ;;  %9049 = vst [vmem:[#allocation23_spill] sm:$0xff] %v8255_v53  ;;  %v8267_v14 = vpop.permute.xlu1 %4444 }
 0x24d   : > { %9046 = vst [vmem:[#allocation20_spill] sm:$0xff] %v8242_v32  ;;  %v8247_v9 = vadd.f32 %v3530_v58, %v2761_v36  ;;  %v3532_v27 = vpop.f32.mrb[19].mxu0  ;;  %v7283_v32 = vld [vmem:[%s7483_s30 + $0x4b0] ss:$28 sps:$4 sm:$0xff]   ;;  %v2769_v36 = vadd.f32 %v8169_v25, %v7846_v26  ;;  %v7286_v58 = vld [vmem:[%s7483_s30 + $0x4e8] ss:$28 sps:$4 sm:$0xff]   ;;  %v2774_v26 = vadd.f32 %v8169_v25, %v7853_v34 }
 0x24e   : > { %6398 = vmatmul.mubr.msk.bf16.gmra.mrb[212].mxu1 %vm2558_vm0, %v7278_v35 }
 0x24f   : > { %9047 = vst [vmem:[#allocation21_spill] sm:$0xff] %v8247_v9  ;;  %3742 = vmatmul.mubr.bf16.gmra.mrb[124].mxu0 %v7277_v23  ;;  %6401 = vmatprep.mubr.msk.bf16.mxu1 %vm2558_vm0, %v7281_v3  ;;  %v7282_v23 = vld [vmem:[%s7483_s30 + $0x710] ss:$28 sps:$4 sm:$0xff]   ;;  %v8270_v53 = vpop.permute.xlu0 %4439 }
 0x250   : > { %3749 = vmatprep.mubr.bf16.mxu0 %v7279_v31  ;;  %v7284_v9 = vld [vmem:[%s7483_s30 + $0x74c] ss:$28 sps:$4 sm:$0xff]  }
 0x252   : > { %v3535_v40 = vpop.f32.mrb[20].mxu0 }
 0x253   : > { %v8260_v27 = vadd.f32 %v3535_v40, %v2766_v2  ;;  %v3537_v35 = vpop.f32.mrb[21].mxu0  ;;  %v7288_v40 = vld [vmem:[%s7483_s30 + $0x520] ss:$28 sps:$4 sm:$0xff]  }
 0x254   : > { %v3538_v3 = vpop.f32.mrb[22].mxu0 }
 0x255   : > { %9050 = vst [vmem:[#allocation24_spill] sm:$0xff] %v8260_v27  ;;  %v8265_v31 = vadd.f32 %v3538_v3, %v2769_v36  ;;  %v3540_v21 = vpop.f32.mrb[23].mxu0  ;;  %v2777_v36 = vadd.f32 %v8169_v25, %v7858_v41  ;;  %v7289_v27 = vld [vmem:[%s7483_s30 + $0x784] ss:$28 sps:$4 sm:$0xff]   ;;  %v2782_v41 = vadd.f32 %v8169_v25, %v7865_v1 }
 0x256   : > { %6402 = vmatmul.mubr.msk.bf16.gmra.mrb[216].mxu1 %vm2558_vm0, %v7283_v32  ;;  %v7287_v21 = vld [vmem:[%s7483_s30 + $0x748] ss:$28 sps:$4 sm:$0xff]   ;;  %v7291_v32 = vld [vmem:[%s7483_s30 + $0x558] ss:$28 sps:$4 sm:$0xff]  }
 0x257   : > { %9051 = vst [vmem:[#allocation25_spill] sm:$0xff] %v8265_v31  ;;  %3750 = vmatmul.mubr.bf16.gmra.mrb[128].mxu0 %v7282_v23  ;;  %6405 = vmatprep.mubr.msk.bf16.mxu1 %vm2558_vm0, %v7286_v58  ;;  %v8282_v31 = vpop.permute.xlu1 %4454 }
 0x258   : > { %3757 = vmatprep.mubr.bf16.mxu0 %v7284_v9  ;;  %v8285_v9 = vpop.permute.xlu0 %4449 }
 0x25a   : > { %v3543_v2 = vpop.f32.mrb[24].mxu0 }
 0x25b   : > { %v8278_v35 = vadd.f32 %v3543_v2, %v2774_v26  ;;  %v3545_v3 = vpop.f32.mrb[25].mxu0  ;;  %v8293_v26 = vpop.permute.xlu1 %4464 }
 0x25c   : > { %v3546_v23 = vpop.f32.mrb[26].mxu0  ;;  %v7293_v3 = vld [vmem:[%s7483_s30 + $0x590] ss:$28 sps:$4 sm:$0xff]  }
 0x25d   : > { %9052 = vst [vmem:[#allocation26_spill] sm:$0xff] %v8278_v35  ;;  %v8287_v34 = vadd.f32 %v3546_v23, %v2777_v36  ;;  %v3548_v58 = vpop.f32.mrb[27].mxu0  ;;  %v2785_v35 = vadd.f32 %v8169_v25, %v7870_v56  ;;  %v8298_v36 = vpop.permute.xlu0 %4459 }
 0x25e   : > { %6406 = vmatmul.mubr.msk.bf16.gmra.mrb[220].mxu1 %vm2558_vm0, %v7288_v40  ;;  %v7296_v58 = vld [vmem:[%s7483_s30 + $0x5c8] ss:$28 sps:$4 sm:$0xff]  }
 0x25f   : > { %9053 = vst [vmem:[#allocation27_spill] sm:$0xff] %v8287_v34  ;;  %3758 = vmatmul.mubr.bf16.gmra.mrb[132].mxu0 %v7287_v21  ;;  %6409 = vmatprep.mubr.msk.bf16.mxu1 %vm2558_vm0, %v7291_v32  ;;  %v7292_v21 = vld [vmem:[%s7483_s30 + $0x780] ss:$28 sps:$4 sm:$0xff]   ;;  %v8309_v56 = vpop.permute.xlu1 %4474 }
 0x260   : > { %3765 = vmatprep.mubr.bf16.mxu0 %v7289_v27  ;;  %v7294_v27 = vld [vmem:[%s7483_s30 + $0x7bc] ss:$28 sps:$4 sm:$0xff]   ;;  %9056 = vst [vmem:[#allocation30_spill] sm:$0xff] %v8309_v56  ;;  %v7299_v56 = vld [vmem:[%s7483_s30 + $0x7f4] ss:$28 sps:$4 sm:$0xff]  }
 0x262   : > { %v3551_v2 = vpop.f32.mrb[28].mxu0 }
 0x263   : > { %v8300_v23 = vadd.f32 %v3551_v2, %v2782_v41  ;;  %v3553_v40 = vpop.f32.mrb[29].mxu0  ;;  %v2790_v41 = vadd.f32 %v8169_v25, %v7877_v0  ;;  %v8313_v2 = vpop.permute.xlu0 %4469 }
 0x264   : > { %v3554_v32 = vpop.f32.mrb[30].mxu0  ;;  %9057 = vst [vmem:[#allocation31_spill] sm:$0xff] %v8313_v2 }
 0x265   : > { %9054 = vst [vmem:[#allocation28_spill] sm:$0xff] %v8300_v23  ;;  %v8305_v1 = vadd.f32 %v3554_v32, %v2785_v35  ;;  %v3556_v34 = vpop.f32.mrb[31].mxu0  ;;  %v7298_v23 = vld [vmem:[%s7483_s30 + $0x600] ss:$28 sps:$4 sm:$0xff]   ;;  %v2793_v35 = vadd.f32 %v8169_v25, %v7882_v7  ;;  %v7301_v32 = vld [vmem:[%s7483_s30 + $0x638] ss:$28 sps:$4 sm:$0xff]   ;;  %v2798_v7 = vadd.f32 %v8169_v25, %v7889_v16 }
 0x266   : > { %6410 = vmatmul.mubr.msk.bf16.gmra.mrb[224].mxu1 %vm2558_vm0, %v7293_v3 }
 0x267   : > { %9055 = vst [vmem:[#allocation29_spill] sm:$0xff] %v8305_v1  ;;  %3766 = vmatmul.mubr.bf16.gmra.mrb[136].mxu0 %v7292_v21  ;;  %6413 = vmatprep.mubr.msk.bf16.mxu1 %vm2558_vm0, %v7296_v58  ;;  %v7297_v21 = vld [vmem:[%s7483_s30 + $0x7b8] ss:$28 sps:$4 sm:$0xff]   ;;  %v8325_v1 = vpop.permute.xlu1 %4484  ;;  %v8328_v2 = vpop.permute.xlu0 %4479 }
 0x268   : > { %3773 = vmatprep.mubr.bf16.mxu0 %v7294_v27 }
 0x26a   : > { %v3559_v40 = vpop.f32.mrb[32].mxu0 }
 0x26b   : > { %v8318_v34 = vadd.f32 %v3559_v40, %v2790_v41  ;;  %v3561_v3 = vpop.f32.mrb[33].mxu0  ;;  %v7303_v40 = vld [vmem:[%s7483_s30 + $0x670] ss:$28 sps:$4 sm:$0xff]  }
 0x26c   : > { %v3562_v58 = vpop.f32.mrb[34].mxu0 }
 0x26d   : > { %9058 = vst [vmem:[#allocation32_spill] sm:$0xff] %v8318_v34  ;;  %v8323_v27 = vadd.f32 %v3562_v58, %v2793_v35  ;;  %v3564_v0 = vpop.f32.mrb[35].mxu0  ;;  %v2801_v35 = vadd.f32 %v8169_v25, %v7894_v22  ;;  %v7304_v34 = vld [vmem:[%s7483_s30 + $0x82c] ss:$28 sps:$4 sm:$0xff]   ;;  %v2806_v22 = vadd.f32 %v8169_v25, %v7901_v30 }
 0x26e   : > { %6414 = vmatmul.mubr.msk.bf16.gmra.mrb[228].mxu1 %vm2558_vm0, %v7298_v23  ;;  %v7302_v0 = vld [vmem:[%s7483_s30 + $0x7f0] ss:$28 sps:$4 sm:$0xff]   ;;  %v7306_v23 = vld [vmem:[%s7483_s30 + $0x6a8] ss:$28 sps:$4 sm:$0xff]  }
 0x26f   : > { %9059 = vst [vmem:[#allocation33_spill] sm:$0xff] %v8323_v27  ;;  %3774 = vmatmul.mubr.bf16.gmra.mrb[140].mxu0 %v7297_v21  ;;  %6417 = vmatprep.mubr.msk.bf16.mxu1 %vm2558_vm0, %v7301_v32  ;;  %v8340_v27 = vpop.permute.xlu1 %4494 }
 0x270   : > { %3781 = vmatprep.mubr.bf16.mxu0 %v7299_v56  ;;  %9060 = vst [vmem:[#allocation34_spill] sm:$0xff] %v8340_v27  ;;  %v8343_v56 = vpop.permute.xlu0 %4489  ;;  %v2809_v27 = vadd.f32 %v8169_v25, %v7906_v38 }
 0x271   : > { %9061 = vst [vmem:[#allocation35_spill] sm:$0xff] %v8343_v56 }
 0x272   : > { %v3567_v41 = vpop.f32.mrb[36].mxu0 }
 0x273   : > { %v8336_v3 = vadd.f32 %v3567_v41, %v2798_v7  ;;  %v3569_v58 = vpop.f32.mrb[37].mxu0  ;;  %v8351_v7 = vpop.permute.xlu1 %4504 }
 0x274   : > { %v3570_v21 = vpop.f32.mrb[38].mxu0  ;;  %9062 = vst [vmem:[#allocation36_spill] sm:$0xff] %v8351_v7  ;;  %v7308_v58 = vld [vmem:[%s7483_s30 + $0x6e0] ss:$28 sps:$4 sm:$0xff]  }
 0x275   : > { %v8345_v16 = vadd.f32 %v3570_v21, %v2801_v35  ;;  %v3572_v32 = vpop.f32.mrb[39].mxu0  ;;  %v8356_v35 = vpop.permute.xlu0 %4499  ;;  %v7314_v7 = vld [vmem:[%s7483_s30 + $0x89c] ss:$28 sps:$4 sm:$0xff]  }
 0x276   : > { %6418 = vmatmul.mubr.msk.bf16.gmra.mrb[232].mxu1 %vm2558_vm0, %v7303_v40  ;;  %v7307_v40 = vld [vmem:[%s7483_s30 + $0x828] ss:$28 sps:$4 sm:$0xff]  }
 0x277   : > { %3782 = vmatmul.mubr.bf16.gmra.mrb[144].mxu0 %v7302_v0  ;;  %6421 = vmatprep.mubr.msk.bf16.mxu1 %vm2558_vm0, %v7306_v23  ;;  %v7311_v0 = vld [vmem:[%s7483_s30 + $0x718] ss:$28 sps:$4 sm:$0xff]   ;;  %v8367_v38 = vpop.permute.xlu1 %4514 }
 0x278   : > { %3789 = vmatprep.mubr.bf16.mxu0 %v7304_v34  ;;  %v7309_v34 = vld [vmem:[%s7483_s30 + $0x864] ss:$28 sps:$4 sm:$0xff]   ;;  %9065 = vst [vmem:[#allocation39_spill] sm:$0xff] %v8367_v38 }
 0x279   : > { %v7312_v38 = vld [vmem:[%s7483_s30 + $0x860] ss:$28 sps:$4 sm:$0xff]  }
 0x27a   : > { %v3575_v41 = vpop.f32.mrb[40].mxu0 }
 0x27b   : > { %v8358_v21 = vadd.f32 %v3575_v41, %v2806_v22  ;;  %v3577_v32 = vpop.f32.mrb[41].mxu0  ;;  %v2814_v22 = vadd.f32 %v8169_v25, %v7913_v50  ;;  %v8371_v41 = vpop.permute.xlu0 %4509 }
 0x27c   : > { %v3578_v23 = vpop.f32.mrb[42].mxu0  ;;  %9066 = vst [vmem:[#allocation40_spill] sm:$0xff] %v8371_v41 }
 0x27d   : > { %9063 = vst [vmem:[#allocation37_spill] sm:$0xff] %v8358_v21  ;;  %v8363_v56 = vadd.f32 %v3578_v23, %v2809_v27  ;;  %v3580_v30 = vpop.f32.mrb[43].mxu0 }
 0x27e   : > { %6422 = vmatmul.mubr.msk.bf16.gmra.mrb[236].mxu1 %vm2558_vm0, %v7308_v58  ;;  %v7313_v30 = vld [vmem:[%s7483_s30 + $0x750] ss:$28 sps:$4 sm:$0xff]   ;;  %v2817_v58 = vadd.f32 %v8169_v25, %v7918_v57  ;;  %v8389_v57 = vpop.permute.xlu1 %4524 }
 0x27f   : > { %9064 = vst [vmem:[#allocation38_spill] sm:$0xff] %v8363_v56  ;;  %3790 = vmatmul.mubr.bf16.gmra.mrb[148].mxu0 %v7307_v40  ;;  %6425 = vmatprep.mubr.msk.bf16.mxu1 %vm2558_vm0, %v7311_v0  ;;  %9069 = vst [vmem:[#allocation43_spill] sm:$0xff] %v8389_v57  ;;  %v7319_v57 = vld [vmem:[%s7483_s30 + $0x8d4] ss:$28 sps:$4 sm:$0xff]  }
 0x280   : > { %3797 = vmatprep.mubr.bf16.mxu0 %v7309_v34  ;;  %v7316_v34 = vld [vmem:[%s7483_s30 + $0x788] ss:$28 sps:$4 sm:$0xff]  }
 0x281   : > { %v8373_v32 = vpop.f32.mrb[132].mxu1 }
 0x282   : > { %9067 = vst [vmem:[#allocation41_spill] sm:$0xff] %v8373_v32  ;;  %v3583_v27 = vpop.f32.mrb[44].mxu0  ;;  %v3376_v23 = vpop.f32.mrb[133].mxu1 }
 0x283   : > { %v8378_v40 = vadd.f32 %v3583_v27, %v2814_v22  ;;  %v3585_v0 = vpop.f32.mrb[45].mxu0  ;;  %v8380_v56 = vpop.f32.mrb[134].mxu1  ;;  %v2822_v22 = vadd.f32 %v8169_v25, %v7925_v4 }
 0x284   : > { %9068 = vst [vmem:[#allocation42_spill] sm:$0xff] %v8380_v56  ;;  %v3586_v21 = vpop.f32.mrb[46].mxu0  ;;  %v3379_v50 = vpop.f32.mrb[135].mxu1 }
 0x285   : > { %v8385_v41 = vadd.f32 %v3586_v21, %v2817_v58  ;;  %v3588_v32 = vpop.f32.mrb[47].mxu0  ;;  %v8393_v27 = vpop.permute.xlu0 %4519  ;;  %v7318_v58 = vld [vmem:[%s7483_s30 + $0x7c0] ss:$28 sps:$4 sm:$0xff]   ;;  %v7317_v50 = vld [vmem:[%s7483_s30 + $0x898] ss:$28 sps:$4 sm:$0xff]  }
 0x286   : > { %6426 = vmatmul.mubr.msk.bf16.gmra.mrb[240].mxu1 %vm2558_vm0, %v7313_v30  ;;  %9070 = vst [vmem:[#allocation44_spill] sm:$0xff] %v8393_v27  ;;  %v2825_v30 = vadd.f32 %v8169_v25, %v7930_v11  ;;  %v8411_v11 = vpop.permute.xlu1 %4534 }
 0x287   : > { %3798 = vmatmul.mubr.bf16.gmra.mrb[152].mxu0 %v7312_v38  ;;  %6429 = vmatprep.mubr.msk.bf16.mxu1 %vm2558_vm0, %v7316_v34  ;;  %9073 = vst [vmem:[#allocation47_spill] sm:$0xff] %v8411_v11  ;;  %v7324_v11 = vld [vmem:[%s7483_s30 + $0x90c] ss:$28 sps:$4 sm:$0xff]  }
 0x288   : > { %3805 = vmatprep.mubr.bf16.mxu0 %v7314_v7  ;;  %v7321_v7 = vld [vmem:[%s7483_s30 + $0x7f8] ss:$28 sps:$4 sm:$0xff]  }
 0x289   : > { %v8395_v23 = vpop.f32.mrb[136].mxu1 }
 0x28a   : > { %9071 = vst [vmem:[#allocation45_spill] sm:$0xff] %v8395_v23  ;;  %v3591_v21 = vpop.f32.mrb[48].mxu0  ;;  %v3384_v32 = vpop.f32.mrb[137].mxu1 }
 0x28b   : > { %v8400_v38 = vadd.f32 %v3591_v21, %v2822_v22  ;;  %v3593_v0 = vpop.f32.mrb[49].mxu0  ;;  %v8402_v34 = vpop.f32.mrb[138].mxu1  ;;  %v2830_v22 = vadd.f32 %v8169_v25, %v7937_v20 }
 0x28c   : > { %9072 = vst [vmem:[#allocation46_spill] sm:$0xff] %v8402_v34  ;;  %v3594_v56 = vpop.f32.mrb[50].mxu0  ;;  %v3387_v4 = vpop.f32.mrb[139].mxu1 }
 0x28d   : > { %v8407_v27 = vadd.f32 %v3594_v56, %v2825_v30  ;;  %v3596_v23 = vpop.f32.mrb[51].mxu0  ;;  %v8415_v21 = vpop.permute.xlu0 %4529  ;;  %v7323_v30 = vld [vmem:[%s7483_s30 + $0x830] ss:$28 sps:$4 sm:$0xff]  }
 0x28e   : > { %6430 = vmatmul.mubr.msk.bf16.gmra.mrb[244].mxu1 %vm2558_vm0, %v7318_v58  ;;  %9074 = vst [vmem:[#allocation48_spill] sm:$0xff] %v8415_v21  ;;  %v2833_v58 = vadd.f32 %v8169_v25, %v7942_v28  ;;  %v7322_v4 = vld [vmem:[%s7483_s30 + $0x8d0] ss:$28 sps:$4 sm:$0xff]   ;;  %v8433_v28 = vpop.permute.xlu1 %4544 }
 0x28f   : > { %3806 = vmatmul.mubr.bf16.gmra.mrb[156].mxu0 %v7317_v50  ;;  %6433 = vmatprep.mubr.msk.bf16.mxu1 %vm2558_vm0, %v7321_v7  ;;  %9077 = vst [vmem:[#allocation51_spill] sm:$0xff] %v8433_v28  ;;  %v7329_v28 = vld [vmem:[%s7483_s30 + $0x944] ss:$28 sps:$4 sm:$0xff]  }
 0x290   : > { %3813 = vmatprep.mubr.bf16.mxu0 %v7319_v57  ;;  %v7326_v57 = vld [vmem:[%s7483_s30 + $0x868] ss:$28 sps:$4 sm:$0xff]  }
 0x291   : > { %v8417_v32 = vpop.f32.mrb[140].mxu1 }
 0x292   : > { %9075 = vst [vmem:[#allocation49_spill] sm:$0xff] %v8417_v32  ;;  %v3599_v56 = vpop.f32.mrb[52].mxu0  ;;  %v3392_v23 = vpop.f32.mrb[141].mxu1 }
 0x293   : > { %v8422_v0 = vadd.f32 %v3599_v56, %v2830_v22  ;;  %v3601_v50 = vpop.f32.mrb[53].mxu0  ;;  %v8424_v7 = vpop.f32.mrb[142].mxu1  ;;  %v2838_v22 = vadd.f32 %v8169_v25, %v7949_v42 }
 0x294   : > { %9076 = vst [vmem:[#allocation50_spill] sm:$0xff] %v8424_v7  ;;  %v3602_v34 = vpop.f32.mrb[54].mxu0  ;;  %v3395_v20 = vpop.f32.mrb[143].mxu1 }
 0x295   : > { %v8429_v21 = vadd.f32 %v3602_v34, %v2833_v58  ;;  %v3604_v32 = vpop.f32.mrb[55].mxu0  ;;  %v8437_v56 = vpop.permute.xlu0 %4539  ;;  %v7328_v58 = vld [vmem:[%s7483_s30 + $0x8a0] ss:$28 sps:$4 sm:$0xff]   ;;  %v7327_v20 = vld [vmem:[%s7483_s30 + $0x908] ss:$28 sps:$4 sm:$0xff]  }
 0x296   : > { %6434 = vmatmul.mubr.msk.bf16.gmra.mrb[248].mxu1 %vm2558_vm0, %v7323_v30  ;;  %9078 = vst [vmem:[#allocation52_spill] sm:$0xff] %v8437_v56  ;;  %v2841_v30 = vadd.f32 %v8169_v25, %v7954_v51  ;;  %v8455_v51 = vpop.permute.xlu1 %4554 }
 0x297   : > { %3814 = vmatmul.mubr.bf16.gmra.mrb[160].mxu0 %v7322_v4  ;;  %6437 = vmatprep.mubr.msk.bf16.mxu1 %vm2558_vm0, %v7326_v57  ;;  %9081 = vst [vmem:[#allocation55_spill] sm:$0xff] %v8455_v51  ;;  %v7334_v51 = vld [vmem:[%s7483_s30 + $0x97c] ss:$28 sps:$4 sm:$0xff]  }
 0x298   : > { %3821 = vmatprep.mubr.bf16.mxu0 %v7324_v11  ;;  %v7331_v11 = vld [vmem:[%s7483_s30 + $0x8d8] ss:$28 sps:$4 sm:$0xff]  }
 0x299   : > { %v8439_v23 = vpop.f32.mrb[144].mxu1 }
 0x29a   : > { %9079 = vst [vmem:[#allocation53_spill] sm:$0xff] %v8439_v23  ;;  %v3607_v34 = vpop.f32.mrb[56].mxu0  ;;  %v3400_v32 = vpop.f32.mrb[145].mxu1 }
 0x29b   : > { %v8444_v50 = vadd.f32 %v3607_v34, %v2838_v22  ;;  %v3609_v4 = vpop.f32.mrb[57].mxu0  ;;  %v8446_v57 = vpop.f32.mrb[146].mxu1  ;;  %v2846_v22 = vadd.f32 %v8169_v25, %v7961_v62 }
 0x29c   : > { %9080 = vst [vmem:[#allocation54_spill] sm:$0xff] %v8446_v57  ;;  %v3610_v7 = vpop.f32.mrb[58].mxu0  ;;  %v3403_v42 = vpop.f32.mrb[147].mxu1 }
 0x29d   : > { %v8451_v56 = vadd.f32 %v3610_v7, %v2841_v30  ;;  %v3612_v23 = vpop.f32.mrb[59].mxu0  ;;  %v8459_v34 = vpop.permute.xlu0 %4549  ;;  %v7333_v30 = vld [vmem:[%s7483_s30 + $0x910] ss:$28 sps:$4 sm:$0xff]   ;;  %v7332_v42 = vld [vmem:[%s7483_s30 + $0x940] ss:$28 sps:$4 sm:$0xff]  }
 0x29e   : > { %6438 = vmatmul.mubr.msk.bf16.gmra.mrb[252].mxu1 %vm2558_vm0, %v7328_v58  ;;  %9082 = vst [vmem:[#allocation56_spill] sm:$0xff] %v8459_v34  ;;  %v2849_v58 = vadd.f32 %v8169_v25, %v7966_v8  ;;  %v8477_v8 = vpop.permute.xlu1 %4564 }
 0x29f   : > { %3822 = vmatmul.mubr.bf16.gmra.mrb[164].mxu0 %v7327_v20  ;;  %6441 = vmatprep.mubr.msk.bf16.mxu1 %vm2558_vm0, %v7331_v11  ;;  %9085 = vst [vmem:[#allocation59_spill] sm:$0xff] %v8477_v8 }
 0x2a0   : > { %3829 = vmatprep.mubr.bf16.mxu0 %v7329_v28  ;;  %v7336_v28 = vld [vmem:[%s7483_s30 + $0x948] ss:$28 sps:$4 sm:$0xff]  }
 0x2a1   : > { %v8461_v32 = vpop.f32.mrb[148].mxu1 }
 0x2a2   : > { %9083 = vst [vmem:[#allocation57_spill] sm:$0xff] %v8461_v32  ;;  %v3615_v7 = vpop.f32.mrb[60].mxu0  ;;  %v3408_v23 = vpop.f32.mrb[149].mxu1 }
 0x2a3   : > { %v8466_v4 = vadd.f32 %v3615_v7, %v2846_v22  ;;  %v3617_v20 = vpop.f32.mrb[61].mxu0  ;;  %v8468_v11 = vpop.f32.mrb[150].mxu1  ;;  %v2854_v22 = vadd.f32 %v8169_v25, %v7973_v19 }
 0x2a4   : > { %9084 = vst [vmem:[#allocation58_spill] sm:$0xff] %v8468_v11  ;;  %v3618_v57 = vpop.f32.mrb[62].mxu0  ;;  %v3411_v62 = vpop.f32.mrb[151].mxu1 }
 0x2a5   : > { %v8473_v34 = vadd.f32 %v3618_v57, %v2849_v58  ;;  %v3620_v32 = vpop.f32.mrb[63].mxu0  ;;  %v8481_v7 = vpop.permute.xlu0 %4559  ;;  %v7338_v58 = vld [vmem:[%s7483_s30 + $0x980] ss:$28 sps:$4 sm:$0xff]   ;;  %v7337_v62 = vld [vmem:[%s7483_s30 + $0x978] ss:$28 sps:$4 sm:$0xff]   ;;  %s5450_s30 = sshll.u32 %s9203_s9, 2 }
 0x2a6   : > { %6442 = vmatmul.mubr.msk.bf16.gmra.mrb[0].mxu1 %vm2558_vm0, %v7333_v30  ;;  %v2857_v32 = vadd.f32 %v8169_v25, %v7978_v29  ;;  %s8605_s20 = scalar_lea.vmem %s9027_s4, %s5450_s30 }
 0x2a7   : > { %3830 = vmatmul.mubr.bf16.gmra.mrb[168].mxu0 %v7332_v42  ;;  %6445 = vmatprep.mubr.msk.bf16.mxu1 %vm2558_vm0, %v7336_v28 }
 0x2a8   : > { %3837 = vmatprep.mubr.bf16.mxu0 %v7334_v51 }
 0x2a9   : > { %v8483_v23 = vpop.f32.mrb[152].mxu1  ;;  %v8500_v29 = vpop.permute.xlu0 %4569 }
 0x2aa   : > { %9086 = vst [vmem:[#allocation60_spill] sm:$0xff] %v8483_v23  ;;  %v3623_v20 = vpop.f32.mrb[64].mxu0  ;;  %v3416_v57 = vpop.f32.mrb[153].mxu1  ;;  %9089 = vst [vmem:[#allocation63_spill] sm:$0xff] %v8500_v29 }
 0x2ab   : > { %v8488_v30 = vadd.f32 %v3623_v20, %v2854_v22  ;;  %v3625_v42 = vpop.f32.mrb[65].mxu0  ;;  %v8490_v28 = vpop.f32.mrb[154].mxu1  ;;  %v2862_v57 = vadd.f32 %v8169_v25, %v7985_v45 }
 0x2ac   : > { %9087 = vst [vmem:[#allocation61_spill] sm:$0xff] %v8490_v28  ;;  %v3626_v51 = vpop.f32.mrb[66].mxu0  ;;  %v3419_v11 = vpop.f32.mrb[155].mxu1 }
 0x2ad   : > { %v8493_v8 = vadd.f32 %v3626_v51, %v2857_v32  ;;  %v3628_v19 = vpop.f32.mrb[67].mxu0  ;;  %v8496_v23 = vpop.permute.xlu1 %4574  ;;  %v2865_v11 = vadd.f32 %v8169_v25, %v7990_v55 }
 0x2ae   : > { %6446 = vmatmul.mubr.msk.bf16.gmra.mrb[4].mxu1 %vm2558_vm0, %v7338_v58  ;;  %9088 = vst [vmem:[#allocation62_spill] sm:$0xff] %v8496_v23  ;;  %v8516_v29 = vpop.permute.xlu0 %4579 }
 0x2af   : > { %3838 = vmatmul.mubr.bf16.gmra.mrb[172].mxu0 %v7337_v62  ;;  %9093 = vst [vmem:[#allocation67_spill] sm:$0xff] %v8516_v29 }
 0x2b1   : > { %v8502_v22 = vpop.f32.mrb[156].mxu1  ;;  %v8512_v45 = vpop.permute.xlu1 %4584 }
 0x2b2   : > { %9090 = vst [vmem:[#allocation64_spill] sm:$0xff] %v8502_v22  ;;  %v3631_v20 = vpop.f32.mrb[68].mxu0  ;;  %v3424_v42 = vpop.f32.mrb[157].mxu1  ;;  %9092 = vst [vmem:[#allocation66_spill] sm:$0xff] %v8512_v45  ;;  %v2870_v22 = vadd.f32 %v8169_v25, %v8004_v12 }
 0x2b3   : > { %v8506_v32 = vadd.f32 %v3631_v20, %v2862_v57  ;;  %v3633_v51 = vpop.f32.mrb[69].mxu0  ;;  %v8508_v19 = vpop.f32.mrb[158].mxu1  ;;  %v2873_v20 = vadd.f32 %v8169_v25, %v8008_v48 }
 0x2b4   : > { %9091 = vst [vmem:[#allocation65_spill] sm:$0xff] %v8508_v19  ;;  %v3634_v58 = vpop.f32.mrb[70].mxu0  ;;  %v3427_v62 = vpop.f32.mrb[159].mxu1 }
 0x2b5   : > { %v8510_v28 = vadd.f32 %v3634_v58, %v2865_v11  ;;  %v3636_v23 = vpop.f32.mrb[71].mxu0  ;;  %v8528_v12 = vpop.permute.xlu1 %4594 }
 0x2b6   : > { %9096 = vst [vmem:[#allocation70_spill] sm:$0xff] %v8528_v12  ;;  %v8532_v29 = vpop.permute.xlu0 %4589 }
 0x2b7   : > { %9097 = vst [vmem:[#allocation71_spill] sm:$0xff] %v8532_v29 }
 0x2b9   : > { %v8518_v42 = vpop.f32.mrb[160].mxu1 }
 0x2ba   : > { %9094 = vst [vmem:[#allocation68_spill] sm:$0xff] %v8518_v42  ;;  %v3639_v55 = vpop.f32.mrb[72].mxu0  ;;  %v3432_v57 = vpop.f32.mrb[161].mxu1  ;;  %v2878_v42 = vadd.f32 %v8169_v25, %v8019_v37 }
 0x2bb   : > { %v8522_v51 = vadd.f32 %v3639_v55, %v2870_v22  ;;  %v3641_v62 = vpop.f32.mrb[73].mxu0  ;;  %v8524_v11 = vpop.f32.mrb[162].mxu1  ;;  %v2881_v55 = vadd.f32 %v8169_v25, %v8026_v52 }
 0x2bc   : > { %9095 = vst [vmem:[#allocation69_spill] sm:$0xff] %v8524_v11  ;;  %v3642_v23 = vpop.f32.mrb[74].mxu0  ;;  %v3435_v58 = vpop.f32.mrb[163].mxu1 }
 0x2bd   : > { %v8526_v19 = vadd.f32 %v3642_v23, %v2873_v20  ;;  %v3644_v45 = vpop.f32.mrb[75].mxu0  ;;  %v8544_v37 = vpop.permute.xlu1 %4604 }
 0x2be   : > { %9100 = vst [vmem:[#allocation74_spill] sm:$0xff] %v8544_v37  ;;  %v8548_v29 = vpop.permute.xlu0 %4599 }
 0x2bf   : > { %9101 = vst [vmem:[#allocation75_spill] sm:$0xff] %v8548_v29 }
 0x2c1   : > { %v8534_v57 = vpop.f32.mrb[164].mxu1 }
 0x2c2   : > { %9098 = vst [vmem:[#allocation72_spill] sm:$0xff] %v8534_v57  ;;  %v3647_v48 = vpop.f32.mrb[76].mxu0  ;;  %v3440_v22 = vpop.f32.mrb[165].mxu1  ;;  %v2886_v57 = vadd.f32 %v8169_v25, %v8037_v10 }
 0x2c3   : > { %v8538_v62 = vadd.f32 %v3647_v48, %v2878_v42  ;;  %v3649_v58 = vpop.f32.mrb[77].mxu0  ;;  %v8540_v20 = vpop.f32.mrb[166].mxu1  ;;  %v2889_v48 = vadd.f32 %v8169_v25, %v8041_v18 }
 0x2c4   : > { %9099 = vst [vmem:[#allocation73_spill] sm:$0xff] %v8540_v20  ;;  %v3650_v45 = vpop.f32.mrb[78].mxu0  ;;  %v3443_v23 = vpop.f32.mrb[167].mxu1 }
 0x2c5   : > { %v8542_v11 = vadd.f32 %v3650_v45, %v2881_v55  ;;  %v3652_v12 = vpop.f32.mrb[79].mxu0  ;;  %v8560_v10 = vpop.permute.xlu1 %4614 }
 0x2c6   : > { %9106 = vst [vmem:[#allocation80_spill] sm:$0xff] %v8560_v10  ;;  %v8564_v29 = vpop.permute.xlu0 %4609 }
 0x2c7   : > { %9107 = vst [vmem:[#allocation81_spill] sm:$0xff] %v8564_v29 }
 0x2c9   : > { %v8550_v22 = vpop.f32.mrb[168].mxu1 }
 0x2ca   : > { %9102 = vst [vmem:[#allocation76_spill] sm:$0xff] %v8550_v22  ;;  %v3655_v52 = vpop.f32.mrb[80].mxu0  ;;  %v3448_v42 = vpop.f32.mrb[169].mxu1  ;;  %v2894_v22 = vadd.f32 %v8169_v25, %v8049_v39 }
 0x2cb   : > { %v8554_v58 = vadd.f32 %v3655_v52, %v2886_v57  ;;  %v3657_v23 = vpop.f32.mrb[81].mxu0  ;;  %v8556_v55 = vpop.f32.mrb[170].mxu1  ;;  %v2897_v52 = vadd.f32 %v8169_v25, %v8053_v54 }
 0x2cc   : > { %9104 = vst [vmem:[#allocation78_spill] sm:$0xff] %v8556_v55  ;;  %v3658_v12 = vpop.f32.mrb[82].mxu0  ;;  %v3451_v45 = vpop.f32.mrb[171].mxu1 }
 0x2cd   : > { %9103 = vst [vmem:[#allocation77_spill] sm:$0xff] %v8554_v58  ;;  %v8558_v20 = vadd.f32 %v3658_v12, %v2889_v48  ;;  %v3660_v37 = vpop.f32.mrb[83].mxu0  ;;  %v8576_v39 = vpop.permute.xlu1 %4624 }
 0x2ce   : > { %9111 = vst [vmem:[#allocation85_spill] sm:$0xff] %v8576_v39  ;;  %v8580_v29 = vpop.permute.xlu0 %4619 }
 0x2cf   : > { %9105 = vst [vmem:[#allocation79_spill] sm:$0xff] %v8558_v20  ;;  %9112 = vst [vmem:[#allocation86_spill] sm:$0xff] %v8580_v29 }
 0x2d1   : > { %v8566_v42 = vpop.f32.mrb[172].mxu1 }
 0x2d2   : > { %9108 = vst [vmem:[#allocation82_spill] sm:$0xff] %v8566_v42  ;;  %v3663_v18 = vpop.f32.mrb[84].mxu0  ;;  %v3456_v57 = vpop.f32.mrb[173].mxu1  ;;  %v2902_v42 = vadd.f32 %v8169_v25, %v8061_v13 }
 0x2d3   : > { %v8570_v23 = vadd.f32 %v3663_v18, %v2894_v22  ;;  %v3665_v45 = vpop.f32.mrb[85].mxu0  ;;  %v8572_v48 = vpop.f32.mrb[174].mxu1  ;;  %v2905_v18 = vadd.f32 %v8169_v25, %v8065_v24 }
 0x2d4   : > { %9109 = vst [vmem:[#allocation83_spill] sm:$0xff] %v8572_v48  ;;  %v3666_v37 = vpop.f32.mrb[86].mxu0  ;;  %v3459_v12 = vpop.f32.mrb[175].mxu1 }
 0x2d5   : > { %v8574_v55 = vadd.f32 %v3666_v37, %v2897_v52  ;;  %v3668_v10 = vpop.f32.mrb[87].mxu0 }
 0x2d7   : > { %9110 = vst [vmem:[#allocation84_spill] sm:$0xff] %v8574_v55 }
 0x2d9   : > { %v6363_v57 = vpop.f32.mrb[176].mxu1 }
 0x2da   : > { %v3671_v20 = vpop.f32.mrb[88].mxu0  ;;  %v3889_v54 = vadd.f32 %v8190_v15, %v6363_v57  ;;  %v3880_v22 = vpop.f32.mrb[177].mxu1 }
 0x2db   : > { %v8585_v45 = vadd.f32 %v3671_v20, %v2902_v42  ;;  %v3673_v52 = vpop.f32.mrb[89].mxu0  ;;  %v3881_v10 = vadd.f32 %v8176_v6, %v3880_v22  ;;  %v6364_v37 = vpop.f32.mrb[178].mxu1 }
 0x2dc   : > { %v4233_v12 = vmax.f32 %v3889_v54, 0.0  ;;  %v3674_v48 = vpop.f32.mrb[90].mxu0  ;;  %v3892_v13 = vadd.f32 %v8197_v5, %v6364_v37  ;;  %v3883_v39 = vpop.f32.mrb[179].mxu1  ;;  %v2910_v54 = vadd.f32 %v8169_v25, %v8073_v47  ;;  %v2913_v47 = vadd.f32 %v8169_v25, %v8077_v63 }
 0x2dd   : > { %v4231_v29 = vmax.f32 %v3881_v10, 0.0  ;;  %v8589_v55 = vadd.f32 %v3674_v48, %v2905_v18  ;;  %v3676_v58 = vpop.f32.mrb[91].mxu0  ;;  %v3884_v15 = vadd.f32 %v8183_v44, %v3883_v39  ;;  %v8593_v20 = vpop.permute.xlu1 %4634 }
 0x2de   : > { %v4234_v57 = vmax.f32 %v3892_v13, 0.0  ;;  %v4849_v42 = vmul.f32 %v8224_v61, %v4233_v12  ;;  %v8599_v5 = vpop.permute.xlu0 %4629 }
 0x2df   : > { %v4232_v24 = vmax.f32 %v3884_v15, 0.0  ;;  %v4847_v48 = vmul.f32 %v8227_v59, %v4231_v29 }
 0x2e0   : > { %v4850_v6 = vmul.f32 %v8235_v49, %v4234_v57 }
 0x2e1   : > { %v4848_v44 = vmul.f32 %v8240_v43, %v4232_v24  ;;  %v6367_v58 = vpop.f32.mrb[180].mxu1 }
 0x2e2   : > { %v6044_v61 = vpack.c.bf16 %v4850_v6, %v4849_v42  ;;  %v3679_v39 = vpop.f32.mrb[92].mxu0  ;;  %v3905_v49 = vadd.f32 %v8220_v17, %v6367_v58  ;;  %v3896_v22 = vpop.f32.mrb[181].mxu1  ;;  %v9114_v58 = vld [vmem:[#allocation23_spill] sm:$0xff] }
 0x2e3   : > { %v6039_v18 = vpack.c.bf16 %v4848_v44, %v4847_v48  ;;  %v8611_v59 = vadd.f32 %v3679_v39, %v2910_v54  ;;  %v3681_v29 = vpop.f32.mrb[93].mxu0  ;;  %v3897_v52 = vadd.f32 %v8206_v33, %v3896_v22  ;;  %v6368_v10 = vpop.f32.mrb[182].mxu1  ;;  %v9113_v48 = vld [vmem:[#allocation2_spill] sm:$0xff] }
 0x2e4   : > { %6256 = vst [vmem:[%s8605_s20 + $0x8] sm:$0xff] %v6044_v61   ;;  %v4237_v37 = vmax.f32 %v3905_v49, 0.0  ;;  %v3682_v43 = vpop.f32.mrb[94].mxu0  ;;  %v3908_v12 = vadd.f32 %v8229_v60, %v6368_v10  ;;  %v3899_v13 = vpop.f32.mrb[183].mxu1  ;;  %v2918_v60 = vadd.f32 %v8169_v25, %v9113_v48  ;;  %v9115_v39 = vld [vmem:[#allocation22_spill] sm:$0xff] }
 0x2e5   : > { %6040 = vst [vmem:[%s8605_s20] sm:$0xff] %v6039_v18   ;;  %v4235_v15 = vmax.f32 %v3897_v52, 0.0  ;;  %v8617_v17 = vadd.f32 %v3682_v43, %v2913_v47  ;;  %v3684_v57 = vpop.f32.mrb[95].mxu0  ;;  %v3900_v63 = vadd.f32 %v8211_v46, %v3899_v13  ;;  %v8620_v6 = vpop.permute.xlu1 %4644  ;;  %v9116_v18 = vld [vmem:[#allocation24_spill] sm:$0xff] }
 0x2e6   : > { %v4238_v24 = vmax.f32 %v3908_v12, 0.0  ;;  %v4853_v33 = vmul.f32 %v8270_v53, %v4237_v37  ;;  %v8626_v44 = vpop.permute.xlu0 %4639  ;;  %v9117_v53 = vld [vmem:[#allocation3_spill] sm:$0xff]  ;;  %v9118_v12 = vld [vmem:[#allocation20_spill] sm:$0xff] }
 0x2e7   : > { %v4236_v42 = vmax.f32 %v3900_v63, 0.0  ;;  %v4851_v61 = vmul.f32 %v9114_v58, %v4235_v15 }
 0x2e8   : > { %v4854_v54 = vmul.f32 %v8267_v14, %v4238_v24  ;;  %v2921_v14 = vadd.f32 %v8169_v25, %v9117_v53  ;;  %v9119_v24 = vld [vmem:[#allocation25_spill] sm:$0xff] }
 0x2e9   : > { %v4852_v49 = vmul.f32 %v9115_v39, %v4236_v42  ;;  %v6371_v22 = vpop.f32.mrb[184].mxu1  ;;  %v9120_v39 = vld [vmem:[#allocation21_spill] sm:$0xff] }
 0x2ea   : > { %v6054_v46 = vpack.c.bf16 %v4854_v54, %v4853_v33  ;;  %v3687_v47 = vpop.f32.mrb[96].mxu0  ;;  %v3921_v29 = vadd.f32 %v9116_v18, %v6371_v22  ;;  %v3912_v52 = vpop.f32.mrb[185].mxu1  ;;  %v9121_v18 = vld [vmem:[#allocation4_spill] sm:$0xff] }
 0x2eb   : > { %v6049_v10 = vpack.c.bf16 %v4852_v49, %v4851_v61  ;;  %v8633_v37 = vadd.f32 %v3687_v47, %v2918_v60  ;;  %v3689_v43 = vpop.f32.mrb[97].mxu0  ;;  %v3913_v13 = vadd.f32 %v9118_v12, %v3912_v52  ;;  %v6372_v57 = vpop.f32.mrb[186].mxu1 }
 0x2ec   : > { %6258 = vst [vmem:[%s8605_s20 + $0x18] sm:$0xff] %v6054_v46   ;;  %v4241_v15 = vmax.f32 %v3921_v29, 0.0  ;;  %v3690_v63 = vpop.f32.mrb[98].mxu0  ;;  %v3924_v42 = vadd.f32 %v9119_v24, %v6372_v57  ;;  %v3915_v33 = vpop.f32.mrb[187].mxu1  ;;  %v2926_v29 = vadd.f32 %v8169_v25, %v9121_v18  ;;  %v9126_v18 = vld [vmem:[#allocation27_spill] sm:$0xff] }
 0x2ed   : > { %6257 = vst [vmem:[%s8605_s20 + $0x10] sm:$0xff] %v6049_v10   ;;  %v4239_v54 = vmax.f32 %v3913_v13, 0.0  ;;  %v8639_v48 = vadd.f32 %v3690_v63, %v2921_v14  ;;  %v3692_v58 = vpop.f32.mrb[99].mxu0  ;;  %v3916_v22 = vadd.f32 %v9120_v39, %v3915_v33  ;;  %v8642_v49 = vpop.permute.xlu1 %4654  ;;  %v9122_v13 = vld [vmem:[#allocation28_spill] sm:$0xff]  ;;  %v9124_v33 = vld [vmem:[#allocation26_spill] sm:$0xff] }
 0x2ee   : > { %v4242_v61 = vmax.f32 %v3924_v42, 0.0  ;;  %v4857_v47 = vmul.f32 %v8298_v36, %v4241_v15  ;;  %v8648_v52 = vpop.permute.xlu0 %4649  ;;  %v9123_v36 = vld [vmem:[#allocation5_spill] sm:$0xff] }
 0x2ef   : > { %v4240_v60 = vmax.f32 %v3916_v22, 0.0  ;;  %v4855_v53 = vmul.f32 %v8285_v9, %v4239_v54  ;;  %v9125_v54 = vld [vmem:[#allocation29_spill] sm:$0xff] }
 0x2f0   : > { %v4858_v46 = vmul.f32 %v8293_v26, %v4242_v61  ;;  %v2929_v26 = vadd.f32 %v8169_v25, %v9123_v36  ;;  %v9128_v36 = vld [vmem:[#allocation31_spill] sm:$0xff] }
 0x2f1   : > { %v4856_v14 = vmul.f32 %v8282_v31, %v4240_v60  ;;  %v6375_v10 = vpop.f32.mrb[188].mxu1 }
 0x2f2   : > { %v6064_v43 = vpack.c.bf16 %v4858_v46, %v4857_v47  ;;  %v3695_v12 = vpop.f32.mrb[100].mxu0  ;;  %v3937_v57 = vadd.f32 %v9122_v13, %v6375_v10  ;;  %v3928_v63 = vpop.f32.mrb[189].mxu1  ;;  %v9127_v13 = vld [vmem:[#allocation6_spill] sm:$0xff] }
 0x2f3   : > { %v6059_v15 = vpack.c.bf16 %v4856_v14, %v4855_v53  ;;  %v8655_v24 = vadd.f32 %v3695_v12, %v2926_v29  ;;  %v3697_v42 = vpop.f32.mrb[101].mxu0  ;;  %v3929_v58 = vadd.f32 %v9124_v33, %v3928_v63  ;;  %v6376_v39 = vpop.f32.mrb[190].mxu1  ;;  %v8671_v12 = vld [vmem:[%s9025_s2] ss:$0 sm:$0xff] }
 0x2f4   : > { %6260 = vst [vmem:[%s8605_s20 + $0x28] sm:$0xff] %v6064_v43   ;;  %v4245_v9 = vmax.f32 %v3937_v57, 0.0  ;;  %v3698_v31 = vpop.f32.mrb[102].mxu0  ;;  %v3940_v22 = vadd.f32 %v9125_v54, %v6376_v39  ;;  %v3931_v61 = vpop.f32.mrb[191].mxu1  ;;  %v2934_v57 = vadd.f32 %v8671_v12, %v9127_v13 }
 0x2f5   : > { %6259 = vst [vmem:[%s8605_s20 + $0x20] sm:$0xff] %v6059_v15   ;;  %v4243_v60 = vmax.f32 %v3929_v58, 0.0  ;;  %v8661_v47 = vadd.f32 %v3698_v31, %v2929_v26  ;;  %v3700_v46 = vpop.f32.mrb[103].mxu0  ;;  %v3932_v25 = vadd.f32 %v9126_v18, %v3931_v61  ;;  %v8664_v14 = vpop.permute.xlu1 %4664  ;;  %v9129_v15 = vld [vmem:[#allocation30_spill] sm:$0xff] }
 0x2f6   : > { %v4246_v53 = vmax.f32 %v3940_v22, 0.0  ;;  %v4861_v10 = vmul.f32 %v8328_v2, %v4245_v9  ;;  %v8675_v63 = vpop.permute.xlu0 %4659  ;;  %v9130_v9 = vld [vmem:[#allocation7_spill] sm:$0xff]  ;;  %v9131_v46 = vld [vmem:[#allocation32_spill] sm:$0xff] }
 0x2f7   : > { %v4244_v29 = vmax.f32 %v3932_v25, 0.0  ;;  %v4859_v26 = vmul.f32 %v9128_v36, %v4243_v60  ;;  %v2937_v31 = vadd.f32 %v8671_v12, %v9130_v9  ;;  %v9132_v36 = vld [vmem:[#allocation33_spill] sm:$0xff]  ;;  %v9135_v9 = vld [vmem:[#allocation35_spill] sm:$0xff] }
 0x2f8   : > { %v4862_v43 = vmul.f32 %v8325_v1, %v4246_v53 }
 0x2f9   : > { %v4860_v42 = vmul.f32 %v9129_v15, %v4244_v29  ;;  %v6379_v33 = vpop.f32.mrb[192].mxu1 }
 0x2fa   : > { %v6074_v2 = vpack.c.bf16 %v4862_v43, %v4861_v10  ;;  %v3703_v58 = vpop.f32.mrb[104].mxu0  ;;  %v3953_v1 = vadd.f32 %v8336_v3, %v6379_v33  ;;  %v3944_v39 = vpop.f32.mrb[193].mxu1 }
 0x2fb   : > { %v6069_v54 = vpack.c.bf16 %v4860_v42, %v4859_v26  ;;  %v8682_v22 = vadd.f32 %v3703_v58, %v2934_v57  ;;  %v3705_v61 = vpop.f32.mrb[105].mxu0  ;;  %v3945_v18 = vadd.f32 %v9131_v46, %v3944_v39  ;;  %v6380_v25 = vpop.f32.mrb[194].mxu1  ;;  %v9133_v58 = vld [vmem:[#allocation36_spill] sm:$0xff] }
 0x2fc   : > { %6262 = vst [vmem:[%s8605_s20 + $0x38] sm:$0xff] %v6074_v2   ;;  %v4249_v60 = vmax.f32 %v3953_v1, 0.0  ;;  %v3706_v53 = vpop.f32.mrb[106].mxu0  ;;  %v3956_v29 = vadd.f32 %v8345_v16, %v6380_v25  ;;  %v3947_v10 = vpop.f32.mrb[195].mxu1  ;;  %v9134_v1 = vld [vmem:[#allocation8_spill] sm:$0xff] }
 0x2fd   : > { %6261 = vst [vmem:[%s8605_s20 + $0x30] sm:$0xff] %v6069_v54   ;;  %v4247_v43 = vmax.f32 %v3945_v18, 0.0  ;;  %v8688_v3 = vadd.f32 %v3706_v53, %v2937_v31  ;;  %v3708_v13 = vpop.f32.mrb[107].mxu0  ;;  %v3948_v15 = vadd.f32 %v9132_v36, %v3947_v10  ;;  %v8691_v42 = vpop.permute.xlu1 %4674  ;;  %v2942_v16 = vadd.f32 %v8671_v12, %v9134_v1  ;;  %v9136_v54 = vld [vmem:[#allocation34_spill] sm:$0xff] }
 0x2fe   : > { %v4250_v26 = vmax.f32 %v3956_v29, 0.0  ;;  %v4865_v33 = vmul.f32 %v8356_v35, %v4249_v60  ;;  %v8697_v39 = vpop.permute.xlu0 %4669  ;;  %v9137_v35 = vld [vmem:[#allocation9_spill] sm:$0xff] }
 0x2ff   : > { %v4248_v57 = vmax.f32 %v3948_v15, 0.0  ;;  %v4863_v31 = vmul.f32 %v9135_v9, %v4247_v43  ;;  %v2945_v60 = vadd.f32 %v8671_v12, %v9137_v35  ;;  %v9138_v15 = vld [vmem:[#allocation37_spill] sm:$0xff]  ;;  %v9141_v35 = vld [vmem:[#allocation43_spill] sm:$0xff] }
 0x300   : > { %v4866_v2 = vmul.f32 %v9133_v58, %v4250_v26 }
 0x301   : > { %v4864_v61 = vmul.f32 %v9136_v54, %v4248_v57  ;;  %v6383_v46 = vpop.f32.mrb[196].mxu1  ;;  %v9139_v54 = vld [vmem:[#allocation38_spill] sm:$0xff] }
 0x302   : > { %v6084_v18 = vpack.c.bf16 %v4866_v2, %v4865_v33  ;;  %v3711_v25 = vpop.f32.mrb[108].mxu0  ;;  %v3969_v53 = vadd.f32 %v8378_v40, %v6383_v46  ;;  %v3960_v29 = vpop.f32.mrb[197].mxu1 }
 0x303   : > { %v6079_v10 = vpack.c.bf16 %v4864_v61, %v4863_v31  ;;  %v8704_v13 = vadd.f32 %v3711_v25, %v2942_v16  ;;  %v3713_v36 = vpop.f32.mrb[109].mxu0  ;;  %v3961_v26 = vadd.f32 %v9138_v15, %v3960_v29  ;;  %v6384_v58 = vpop.f32.mrb[198].mxu1  ;;  %v9140_v25 = vld [vmem:[#allocation44_spill] sm:$0xff]  ;;  %v9144_v15 = vld [vmem:[#allocation39_spill] sm:$0xff] }
 0x304   : > { %6264 = vst [vmem:[%s8605_s20 + $0x48] sm:$0xff] %v6084_v18   ;;  %v4253_v43 = vmax.f32 %v3969_v53, 0.0  ;;  %v3714_v57 = vpop.f32.mrb[110].mxu0  ;;  %v3972_v1 = vadd.f32 %v8385_v41, %v6384_v58  ;;  %v3963_v33 = vpop.f32.mrb[199].mxu1  ;;  %v9142_v53 = vld [vmem:[#allocation10_spill] sm:$0xff] }
 0x305   : > { %6263 = vst [vmem:[%s8605_s20 + $0x40] sm:$0xff] %v6079_v10   ;;  %v4251_v2 = vmax.f32 %v3961_v26, 0.0  ;;  %v8710_v40 = vadd.f32 %v3714_v57, %v2945_v60  ;;  %v3716_v9 = vpop.f32.mrb[111].mxu0  ;;  %v3964_v46 = vadd.f32 %v9139_v54, %v3963_v33  ;;  %v8713_v61 = vpop.permute.xlu1 %4684  ;;  %v2950_v41 = vadd.f32 %v8671_v12, %v9142_v53  ;;  %v9143_v10 = vld [vmem:[#allocation40_spill] sm:$0xff] }
 0x306   : > { %v4254_v31 = vmax.f32 %v3972_v1, 0.0  ;;  %v4869_v29 = vmul.f32 %v9140_v25, %v4253_v43  ;;  %v8719_v36 = vpop.permute.xlu0 %4679  ;;  %v9145_v43 = vld [vmem:[#allocation11_spill] sm:$0xff] }
 0x307   : > { %v4252_v16 = vmax.f32 %v3964_v46, 0.0  ;;  %v4867_v60 = vmul.f32 %v9143_v10, %v4251_v2  ;;  %v2953_v54 = vadd.f32 %v8671_v12, %v9145_v43 }
 0x308   : > { %v4870_v18 = vmul.f32 %v9141_v35, %v4254_v31 }
 0x309   : > { %v4868_v26 = vmul.f32 %v9144_v15, %v4252_v16  ;;  %v6387_v58 = vpop.f32.mrb[200].mxu1 }
 0x30a   : > { %v6094_v57 = vpack.c.bf16 %v4870_v18, %v4869_v29  ;;  %v3719_v1 = vpop.f32.mrb[112].mxu0  ;;  %v3985_v33 = vadd.f32 %v8422_v0, %v6387_v58  ;;  %v3976_v9 = vpop.f32.mrb[201].mxu1 }
 0x30b   : > { %v6089_v46 = vpack.c.bf16 %v4868_v26, %v4867_v60  ;;  %v8726_v31 = vadd.f32 %v3719_v1, %v2950_v41  ;;  %v3721_v25 = vpop.f32.mrb[113].mxu0  ;;  %v3977_v35 = vadd.f32 %v8400_v38, %v3976_v9  ;;  %v6388_v53 = vpop.f32.mrb[202].mxu1  ;;  %v9146_v1 = vld [vmem:[#allocation52_spill] sm:$0xff]  ;;  %v9147_v9 = vld [vmem:[#allocation51_spill] sm:$0xff] }
 0x30c   : > { %6266 = vst [vmem:[%s8605_s20 + $0x58] sm:$0xff] %v6094_v57   ;;  %v4257_v2 = vmax.f32 %v3985_v33, 0.0  ;;  %v3722_v16 = vpop.f32.mrb[114].mxu0  ;;  %v3988_v10 = vadd.f32 %v8429_v21, %v6388_v53  ;;  %v3979_v29 = vpop.f32.mrb[203].mxu1  ;;  %v9148_v33 = vld [vmem:[#allocation12_spill] sm:$0xff]  ;;  %v9150_v25 = vld [vmem:[#allocation47_spill] sm:$0xff] }
 0x30d   : > { %6265 = vst [vmem:[%s8605_s20 + $0x50] sm:$0xff] %v6089_v46   ;;  %v4255_v18 = vmax.f32 %v3977_v35, 0.0  ;;  %v8732_v0 = vadd.f32 %v3722_v16, %v2953_v54  ;;  %v3724_v15 = vpop.f32.mrb[115].mxu0  ;;  %v3980_v58 = vadd.f32 %v8407_v27, %v3979_v29  ;;  %v8735_v26 = vpop.permute.xlu1 %4694  ;;  %v2958_v21 = vadd.f32 %v8671_v12, %v9148_v33  ;;  %v9149_v46 = vld [vmem:[#allocation48_spill] sm:$0xff] }
 0x30e   : > { %v4258_v60 = vmax.f32 %v3988_v10, 0.0  ;;  %v4873_v38 = vmul.f32 %v9146_v1, %v4257_v2  ;;  %v8741_v43 = vpop.permute.xlu0 %4689  ;;  %v9151_v2 = vld [vmem:[#allocation13_spill] sm:$0xff] }
 0x30f   : > { %v4256_v41 = vmax.f32 %v3980_v58, 0.0  ;;  %v4871_v54 = vmul.f32 %v9149_v46, %v4255_v18  ;;  %v2961_v15 = vadd.f32 %v8671_v12, %v9151_v2  ;;  %v9154_v2 = vld [vmem:[#allocation56_spill] sm:$0xff] }
 0x310   : > { %v4874_v57 = vmul.f32 %v9147_v9, %v4258_v60 }
 0x311   : > { %v4872_v35 = vmul.f32 %v9150_v25, %v4256_v41  ;;  %v6391_v53 = vpop.f32.mrb[204].mxu1 }
 0x312   : > { %v6104_v27 = vpack.c.bf16 %v4874_v57, %v4873_v38  ;;  %v3727_v16 = vpop.f32.mrb[116].mxu0  ;;  %v4001_v10 = vadd.f32 %v8466_v4, %v6391_v53  ;;  %v3992_v29 = vpop.f32.mrb[205].mxu1 }
 0x313   : > { %v6099_v58 = vpack.c.bf16 %v4872_v35, %v4871_v54  ;;  %v8748_v60 = vadd.f32 %v3727_v16, %v2958_v21  ;;  %v3729_v1 = vpop.f32.mrb[117].mxu0  ;;  %v3993_v9 = vadd.f32 %v8444_v50, %v3992_v29  ;;  %v6392_v33 = vpop.f32.mrb[206].mxu1  ;;  %v9152_v16 = vld [vmem:[#allocation59_spill] sm:$0xff] }
 0x314   : > { %6268 = vst [vmem:[%s8605_s20 + $0x68] sm:$0xff] %v6104_v27   ;;  %v4261_v18 = vmax.f32 %v4001_v10, 0.0  ;;  %v3730_v41 = vpop.f32.mrb[118].mxu0  ;;  %v4004_v46 = vadd.f32 %v8473_v34, %v6392_v33  ;;  %v3995_v38 = vpop.f32.mrb[207].mxu1  ;;  %v9153_v10 = vld [vmem:[#allocation14_spill] sm:$0xff] }
 0x315   : > { %6267 = vst [vmem:[%s8605_s20 + $0x60] sm:$0xff] %v6099_v58   ;;  %v4259_v57 = vmax.f32 %v3993_v9, 0.0  ;;  %v8754_v4 = vadd.f32 %v3730_v41, %v2961_v15  ;;  %v3732_v25 = vpop.f32.mrb[119].mxu0  ;;  %v3996_v53 = vadd.f32 %v8451_v56, %v3995_v38  ;;  %v8757_v35 = vpop.permute.xlu1 %4704  ;;  %v2966_v34 = vadd.f32 %v8671_v12, %v9153_v10  ;;  %v9155_v58 = vld [vmem:[#allocation55_spill] sm:$0xff] }
 0x316   : > { %v4262_v54 = vmax.f32 %v4004_v46, 0.0  ;;  %v4877_v50 = vmul.f32 %v8481_v7, %v4261_v18  ;;  %v8763_v29 = vpop.permute.xlu0 %4699  ;;  %v9156_v7 = vld [vmem:[#allocation15_spill] sm:$0xff] }
 0x317   : > { %v4260_v21 = vmax.f32 %v3996_v53, 0.0  ;;  %v4875_v15 = vmul.f32 %v9154_v2, %v4259_v57  ;;  %v2969_v18 = vadd.f32 %v8671_v12, %v9156_v7  ;;  %v9161_v7 = vld [vmem:[#allocation63_spill] sm:$0xff] }
 0x318   : > { %v4878_v27 = vmul.f32 %v9152_v16, %v4262_v54 }
 0x319   : > { %v4876_v1 = vmul.f32 %v9155_v58, %v4260_v21  ;;  %v6395_v9 = vpop.f32.mrb[208].mxu1 }
 0x31a   : > { %v6114_v56 = vpack.c.bf16 %v4878_v27, %v4877_v50  ;;  %v3735_v33 = vpop.f32.mrb[120].mxu0  ;;  %v4017_v41 = vadd.f32 %v8506_v32, %v6395_v9  ;;  %v4008_v46 = vpop.f32.mrb[209].mxu1  ;;  %v9158_v9 = vld [vmem:[#allocation67_spill] sm:$0xff] }
 0x31b   : > { %v6109_v38 = vpack.c.bf16 %v4876_v1, %v4875_v15  ;;  %v8770_v25 = vadd.f32 %v3735_v33, %v2966_v34  ;;  %v3737_v53 = vpop.f32.mrb[121].mxu0  ;;  %v4009_v54 = vadd.f32 %v8488_v30, %v4008_v46  ;;  %v6396_v16 = vpop.f32.mrb[210].mxu1  ;;  %v9159_v33 = vld [vmem:[#allocation66_spill] sm:$0xff] }
 0x31c   : > { %6270 = vst [vmem:[%s8605_s20 + $0x78] sm:$0xff] %v6114_v56   ;;  %v4265_v57 = vmax.f32 %v4017_v41, 0.0  ;;  %v3738_v21 = vpop.f32.mrb[122].mxu0  ;;  %v4020_v10 = vadd.f32 %v8510_v28, %v6396_v16  ;;  %v4011_v50 = vpop.f32.mrb[211].mxu1  ;;  %v9160_v41 = vld [vmem:[#allocation16_spill] sm:$0xff] }
 0x31d   : > { %6269 = vst [vmem:[%s8605_s20 + $0x70] sm:$0xff] %v6109_v38   ;;  %v4263_v27 = vmax.f32 %v4009_v54, 0.0  ;;  %v8776_v32 = vadd.f32 %v3738_v21, %v2969_v18  ;;  %v3740_v2 = vpop.f32.mrb[123].mxu0  ;;  %v4012_v58 = vadd.f32 %v8493_v8, %v4011_v50  ;;  %v8779_v1 = vpop.permute.xlu1 %4714  ;;  %v2974_v28 = vadd.f32 %v8671_v12, %v9160_v41  ;;  %v9162_v38 = vld [vmem:[#allocation62_spill] sm:$0xff] }
 0x31e   : > { %v4266_v15 = vmax.f32 %v4020_v10, 0.0  ;;  %9157 = vst [vmem:[#allocation2_spill] sm:$0xff] %v8779_v1  ;;  %v4881_v30 = vmul.f32 %v9158_v9, %v4265_v57  ;;  %v8785_v46 = vpop.permute.xlu0 %4709  ;;  %v9163_v57 = vld [vmem:[#allocation17_spill] sm:$0xff]  ;;  %v9172_v1 = vld [vmem:[#allocation79_spill] sm:$0xff] }
 0x31f   : > { %v4264_v34 = vmax.f32 %v4012_v58, 0.0  ;;  %v4879_v18 = vmul.f32 %v9161_v7, %v4263_v27  ;;  %v2977_v50 = vadd.f32 %v8671_v12, %v9163_v57  ;;  %v9167_v57 = vld [vmem:[#allocation71_spill] sm:$0xff] }
 0x320   : > { %v4882_v56 = vmul.f32 %v9159_v33, %v4266_v15 }
 0x321   : > { %v4880_v53 = vmul.f32 %v9162_v38, %v4264_v34  ;;  %v6399_v54 = vpop.f32.mrb[212].mxu1 }
 0x322   : > { %v6124_v8 = vpack.c.bf16 %v4882_v56, %v4881_v30  ;;  %v3743_v16 = vpop.f32.mrb[124].mxu0  ;;  %v4033_v21 = vadd.f32 %v8538_v62, %v6399_v54  ;;  %v4024_v10 = vpop.f32.mrb[213].mxu1  ;;  %v9164_v54 = vld [vmem:[#allocation75_spill] sm:$0xff] }
 0x323   : > { %v6119_v2 = vpack.c.bf16 %v4880_v53, %v4879_v18  ;;  %v8792_v58 = vadd.f32 %v3743_v16, %v2974_v28  ;;  %v3745_v15 = vpop.f32.mrb[125].mxu0  ;;  %v4025_v9 = vadd.f32 %v8522_v51, %v4024_v10  ;;  %v6400_v33 = vpop.f32.mrb[214].mxu1  ;;  %v9165_v16 = vld [vmem:[#allocation74_spill] sm:$0xff] }
 0x324   : > { %6272 = vst [vmem:[%s8605_s20 + $0x88] sm:$0xff] %v6124_v8   ;;  %v4269_v27 = vmax.f32 %v4033_v21, 0.0  ;;  %v3746_v34 = vpop.f32.mrb[126].mxu0  ;;  %v4036_v41 = vadd.f32 %v8542_v11, %v6400_v33  ;;  %v4027_v30 = vpop.f32.mrb[215].mxu1  ;;  %v9166_v21 = vld [vmem:[#allocation18_spill] sm:$0xff] }
 0x325   : > { %6271 = vst [vmem:[%s8605_s20 + $0x80] sm:$0xff] %v6119_v2   ;;  %v4267_v56 = vmax.f32 %v4025_v9, 0.0  ;;  %v8798_v62 = vadd.f32 %v3746_v34, %v2977_v50  ;;  %v3748_v7 = vpop.f32.mrb[127].mxu0  ;;  %v4028_v38 = vadd.f32 %v8526_v19, %v4027_v30  ;;  %v8801_v53 = vpop.permute.xlu1 %4724  ;;  %v2982_v11 = vadd.f32 %v8671_v12, %v9166_v21  ;;  %v9168_v2 = vld [vmem:[#allocation70_spill] sm:$0xff] }
 0x326   : > { %v4270_v18 = vmax.f32 %v4036_v41, 0.0  ;;  %v4885_v51 = vmul.f32 %v9164_v54, %v4269_v27  ;;  %v8807_v10 = vpop.permute.xlu0 %4719  ;;  %v9169_v27 = vld [vmem:[#allocation19_spill] sm:$0xff]  ;;  %v9170_v54 = vld [vmem:[#allocation77_spill] sm:$0xff] }
 0x327   : > { %v4268_v28 = vmax.f32 %v4028_v38, 0.0  ;;  %v4883_v50 = vmul.f32 %v9167_v57, %v4267_v56  ;;  %v2985_v30 = vadd.f32 %v8671_v12, %v9169_v27  ;;  %v9171_v57 = vld [vmem:[#allocation84_spill] sm:$0xff] }
 0x328   : > { %v4886_v8 = vmul.f32 %v9165_v16, %v4270_v18 }
 0x329   : > { %v4884_v15 = vmul.f32 %v9168_v2, %v4268_v28  ;;  %v6403_v9 = vpop.f32.mrb[216].mxu1 }
 0x32a   : > { %v6134_v19 = vpack.c.bf16 %v4886_v8, %v4885_v51  ;;  %v3751_v33 = vpop.f32.mrb[128].mxu0  ;;  %v4049_v34 = vadd.f32 %v8570_v23, %v6403_v9  ;;  %v4040_v41 = vpop.f32.mrb[217].mxu1 }
 0x32b   : > { %v6129_v7 = vpack.c.bf16 %v4884_v15, %v4883_v50  ;;  %v8814_v38 = vadd.f32 %v3751_v33, %v2982_v11  ;;  %v3753_v18 = vpop.f32.mrb[129].mxu0  ;;  %v4041_v16 = vadd.f32 %v9170_v54, %v4040_v41  ;;  %v6404_v21 = vpop.f32.mrb[218].mxu1  ;;  %v9174_v33 = vld [vmem:[#allocation86_spill] sm:$0xff] }
 0x32c   : > { %6274 = vst [vmem:[%s8605_s20 + $0x98] sm:$0xff] %v6134_v19   ;;  %v4273_v56 = vmax.f32 %v4049_v34, 0.0  ;;  %v3754_v28 = vpop.f32.mrb[130].mxu0  ;;  %v4052_v2 = vadd.f32 %v9171_v57, %v6404_v21  ;;  %v4043_v51 = vpop.f32.mrb[219].mxu1  ;;  %v9175_v18 = vld [vmem:[#allocation85_spill] sm:$0xff] }
 0x32d   : > { %6273 = vst [vmem:[%s8605_s20 + $0x90] sm:$0xff] %v6129_v7   ;;  %v4271_v8 = vmax.f32 %v4041_v16, 0.0  ;;  %v8820_v23 = vadd.f32 %v3754_v28, %v2985_v30  ;;  %v3756_v9 = vpop.f32.mrb[131].mxu0  ;;  %v4044_v27 = vadd.f32 %v9172_v1, %v4043_v51  ;;  %v8823_v15 = vpop.permute.xlu1 %4734  ;;  %v9176_v34 = vld [vmem:[#allocation41_spill] sm:$0xff]  ;;  %v9178_v16 = vld [vmem:[#allocation80_spill] sm:$0xff] }
 0x32e   : > { %v4274_v50 = vmax.f32 %v4052_v2, 0.0  ;;  %9173 = vst [vmem:[#allocation23_spill] sm:$0xff] %v8823_v15  ;;  %v4889_v41 = vmul.f32 %v9174_v33, %v4273_v56  ;;  %v6613_v54 = vadd.f32 %v8671_v12, %v9176_v34  ;;  %v8829_v21 = vpop.permute.xlu0 %4729  ;;  %v9177_v7 = vld [vmem:[#allocation81_spill] sm:$0xff]  ;;  %v9179_v56 = vld [vmem:[#allocation42_spill] sm:$0xff] }
 0x32f   : > { %v4272_v11 = vmax.f32 %v4044_v27, 0.0  ;;  %v4887_v30 = vmul.f32 %v9177_v7, %v4271_v8  ;;  %v6615_v27 = vadd.f32 %v8671_v12, %v9179_v56 }
 0x330   : > { %v4890_v19 = vmul.f32 %v9175_v18, %v4274_v50 }
 0x331   : > { %v4888_v28 = vmul.f32 %v9178_v16, %v4272_v11  ;;  %v6407_v57 = vpop.f32.mrb[220].mxu1 }
 0x332   : > { %v6144_v1 = vpack.c.bf16 %v4890_v19, %v4889_v41  ;;  %v3759_v2 = vpop.f32.mrb[132].mxu0  ;;  %v4065_v51 = vadd.f32 %v8611_v59, %v6407_v57  ;;  %v4056_v9 = vpop.f32.mrb[221].mxu1 }
 0x333   : > { %v6139_v50 = vpack.c.bf16 %v4888_v28, %v4887_v30  ;;  %v8836_v33 = vadd.f32 %v6613_v54, %v3759_v2  ;;  %v3761_v18 = vpop.f32.mrb[133].mxu0  ;;  %v4057_v34 = vadd.f32 %v8585_v45, %v4056_v9  ;;  %v6408_v15 = vpop.f32.mrb[222].mxu1  ;;  %v9180_v2 = vld [vmem:[#allocation45_spill] sm:$0xff] }
 0x334   : > { %6276 = vst [vmem:[%s8605_s20 + $0xa8] sm:$0xff] %v6144_v1   ;;  %v4277_v8 = vmax.f32 %v4065_v51, 0.0  ;;  %v3762_v11 = vpop.f32.mrb[134].mxu0  ;;  %v4068_v7 = vadd.f32 %v8617_v17, %v6408_v15  ;;  %v4059_v41 = vpop.f32.mrb[223].mxu1  ;;  %v6617_v17 = vadd.f32 %v8671_v12, %v9180_v2 }
 0x335   : > { %6275 = vst [vmem:[%s8605_s20 + $0xa0] sm:$0xff] %v6139_v50   ;;  %v4275_v19 = vmax.f32 %v4057_v34, 0.0  ;;  %v8842_v59 = vadd.f32 %v6615_v27, %v3762_v11  ;;  %v3764_v16 = vpop.f32.mrb[135].mxu0  ;;  %v4060_v57 = vadd.f32 %v8589_v55, %v4059_v41  ;;  %v8845_v28 = vpop.permute.xlu1 %4744 }
 0x336   : > { %v4278_v30 = vmax.f32 %v4068_v7, 0.0  ;;  %v4893_v45 = vmul.f32 %v8626_v44, %v4277_v8  ;;  %v8851_v15 = vpop.permute.xlu0 %4739  ;;  %v9181_v44 = vld [vmem:[#allocation46_spill] sm:$0xff] }
 0x337   : > { %v4276_v54 = vmax.f32 %v4060_v57, 0.0  ;;  %v4891_v51 = vmul.f32 %v8599_v5, %v4275_v19 }
 0x338   : > { %v4894_v1 = vmul.f32 %v8620_v6, %v4278_v30  ;;  %v6619_v6 = vadd.f32 %v8671_v12, %v9181_v44 }
 0x339   : > { %v4892_v9 = vmul.f32 %v8593_v20, %v4276_v54  ;;  %v6411_v56 = vpop.f32.mrb[224].mxu1  ;;  %v8867_v2 = vpop.permute.xlu1 %4754 }
 0x33a   : > { %v6154_v55 = vpack.c.bf16 %v4894_v1, %v4893_v45  ;;  %v3767_v27 = vpop.f32.mrb[136].mxu0  ;;  %v4081_v50 = vadd.f32 %v8655_v24, %v6411_v56  ;;  %v4072_v18 = vpop.f32.mrb[225].mxu1 }
 0x33b   : > { %v6149_v34 = vpack.c.bf16 %v4892_v9, %v4891_v51  ;;  %v8858_v8 = vadd.f32 %v6617_v17, %v3767_v27  ;;  %v3769_v11 = vpop.f32.mrb[137].mxu0  ;;  %v4073_v7 = vadd.f32 %v8633_v37, %v4072_v18  ;;  %v6412_v41 = vpop.f32.mrb[226].mxu1  ;;  %v9182_v51 = vld [vmem:[#allocation49_spill] sm:$0xff] }
 0x33c   : > { %6278 = vst [vmem:[%s8605_s20 + $0xb8] sm:$0xff] %v6154_v55   ;;  %v4281_v5 = vmax.f32 %v4081_v50, 0.0  ;;  %v3770_v20 = vpop.f32.mrb[138].mxu0  ;;  %v4084_v19 = vadd.f32 %v8661_v47, %v6412_v41  ;;  %v4075_v16 = vpop.f32.mrb[227].mxu1  ;;  %v6621_v47 = vadd.f32 %v8671_v12, %v9182_v51 }
 0x33d   : > { %6277 = vst [vmem:[%s8605_s20 + $0xb0] sm:$0xff] %v6149_v34   ;;  %v4279_v57 = vmax.f32 %v4073_v7, 0.0  ;;  %v8864_v24 = vadd.f32 %v6619_v6, %v3770_v20  ;;  %v3772_v30 = vpop.f32.mrb[139].mxu0  ;;  %v4076_v54 = vadd.f32 %v8639_v48, %v4075_v16  ;;  %v8873_v9 = vpop.permute.xlu0 %4749 }
 0x33e   : > { %v4282_v45 = vmax.f32 %v4084_v19, 0.0  ;;  %v4897_v37 = vmul.f32 %v8675_v63, %v4281_v5  ;;  %v9183_v63 = vld [vmem:[#allocation50_spill] sm:$0xff] }
 0x33f   : > { %v4280_v1 = vmax.f32 %v4076_v54, 0.0  ;;  %v4895_v56 = vmul.f32 %v8648_v52, %v4279_v57 }
 0x340   : > { %v4898_v17 = vmul.f32 %v8664_v14, %v4282_v45  ;;  %v6623_v14 = vadd.f32 %v8671_v12, %v9183_v63  ;;  %v8889_v45 = vpop.permute.xlu1 %4764 }
 0x341   : > { %v4896_v55 = vmul.f32 %v8642_v49, %v4280_v1  ;;  %v6415_v27 = vpop.f32.mrb[228].mxu1 }
 0x342   : > { %v6164_v48 = vpack.c.bf16 %v4898_v17, %v4897_v37  ;;  %v3775_v50 = vpop.f32.mrb[140].mxu0  ;;  %v4097_v18 = vadd.f32 %v8704_v13, %v6415_v27  ;;  %v4088_v44 = vpop.f32.mrb[229].mxu1  ;;  %v9184_v37 = vld [vmem:[#allocation53_spill] sm:$0xff] }
 0x343   : > { %v6159_v6 = vpack.c.bf16 %v4896_v55, %v4895_v56  ;;  %v8880_v34 = vadd.f32 %v6621_v47, %v3775_v50  ;;  %v3777_v11 = vpop.f32.mrb[141].mxu0  ;;  %v4089_v7 = vadd.f32 %v8682_v22, %v4088_v44  ;;  %v6416_v41 = vpop.f32.mrb[230].mxu1 }
 0x344   : > { %6280 = vst [vmem:[%s8605_s20 + $0xc8] sm:$0xff] %v6164_v48   ;;  %v4285_v52 = vmax.f32 %v4097_v18, 0.0  ;;  %v3778_v49 = vpop.f32.mrb[142].mxu0  ;;  %v4100_v5 = vadd.f32 %v8710_v40, %v6416_v41  ;;  %v4091_v20 = vpop.f32.mrb[231].mxu1  ;;  %v6625_v40 = vadd.f32 %v8671_v12, %v9184_v37 }
 0x345   : > { %6279 = vst [vmem:[%s8605_s20 + $0xc0] sm:$0xff] %v6159_v6   ;;  %v4283_v19 = vmax.f32 %v4089_v7, 0.0  ;;  %v8886_v13 = vadd.f32 %v6623_v14, %v3778_v49  ;;  %v3780_v16 = vpop.f32.mrb[143].mxu0  ;;  %v4092_v57 = vadd.f32 %v8688_v3, %v4091_v20  ;;  %v8895_v17 = vpop.permute.xlu0 %4759 }
 0x346   : > { %v4286_v30 = vmax.f32 %v4100_v5, 0.0  ;;  %v4901_v22 = vmul.f32 %v8719_v36, %v4285_v52  ;;  %v9185_v36 = vld [vmem:[#allocation54_spill] sm:$0xff]  ;;  %v8911_v20 = vpop.permute.xlu1 %4774  ;;  %v9186_v16 = vld [vmem:[#allocation57_spill] sm:$0xff] }
 0x347   : > { %v4284_v54 = vmax.f32 %v4092_v57, 0.0  ;;  %v4899_v51 = vmul.f32 %v8697_v39, %v4283_v19 }
 0x348   : > { %v4902_v1 = vmul.f32 %v8713_v61, %v4286_v30  ;;  %v6627_v61 = vadd.f32 %v8671_v12, %v9185_v36 }
 0x349   : > { %v4900_v47 = vmul.f32 %v8691_v42, %v4284_v54  ;;  %v6419_v56 = vpop.f32.mrb[232].mxu1  ;;  %v8917_v57 = vpop.permute.xlu0 %4769 }
 0x34a   : > { %v6174_v3 = vpack.c.bf16 %v4902_v1, %v4901_v22  ;;  %v3783_v55 = vpop.f32.mrb[144].mxu0  ;;  %v4113_v27 = vadd.f32 %v8748_v60, %v6419_v56  ;;  %v4104_v48 = vpop.f32.mrb[233].mxu1 }
 0x34b   : > { %v6169_v50 = vpack.c.bf16 %v4900_v47, %v4899_v51  ;;  %v8902_v18 = vadd.f32 %v6625_v40, %v3783_v55  ;;  %v3785_v44 = vpop.f32.mrb[145].mxu0  ;;  %v4105_v63 = vadd.f32 %v8726_v31, %v4104_v48  ;;  %v6420_v14 = vpop.f32.mrb[234].mxu1 }
 0x34c   : > { %6282 = vst [vmem:[%s8605_s20 + $0xd8] sm:$0xff] %v6174_v3   ;;  %v4289_v39 = vmax.f32 %v4113_v27, 0.0  ;;  %v3786_v42 = vpop.f32.mrb[146].mxu0  ;;  %v4116_v6 = vadd.f32 %v8754_v4, %v6420_v14  ;;  %v4107_v11 = vpop.f32.mrb[235].mxu1  ;;  %v6629_v4 = vadd.f32 %v8671_v12, %v9186_v16 }
 0x34d   : > { %6281 = vst [vmem:[%s8605_s20 + $0xd0] sm:$0xff] %v6169_v50   ;;  %v4287_v7 = vmax.f32 %v4105_v63, 0.0  ;;  %v8908_v60 = vadd.f32 %v6627_v61, %v3786_v42  ;;  %v3788_v41 = vpop.f32.mrb[147].mxu0  ;;  %v4108_v52 = vadd.f32 %v8732_v0, %v4107_v11  ;;  %v8933_v14 = vpop.permute.xlu1 %4784  ;;  %v9188_v42 = vld [vmem:[#allocation60_spill] sm:$0xff] }
 0x34e   : > { %v4290_v49 = vmax.f32 %v4116_v6, 0.0  ;;  %v4905_v31 = vmul.f32 %v8763_v29, %v4289_v39  ;;  %v9187_v29 = vld [vmem:[#allocation58_spill] sm:$0xff]  ;;  %v8939_v6 = vpop.permute.xlu0 %4779 }
 0x34f   : > { %v4288_v5 = vmax.f32 %v4108_v52, 0.0  ;;  %v4903_v30 = vmul.f32 %v8741_v43, %v4287_v7  ;;  %v9189_v7 = vld [vmem:[#allocation2_spill] sm:$0xff] }
 0x350   : > { %v4906_v19 = vmul.f32 %v8757_v35, %v4290_v49  ;;  %v6631_v35 = vadd.f32 %v8671_v12, %v9187_v29 }
 0x351   : > { %v4904_v54 = vmul.f32 %v8735_v26, %v4288_v5  ;;  %v6423_v22 = vpop.f32.mrb[236].mxu1 }
 0x352   : > { %v6184_v0 = vpack.c.bf16 %v4906_v19, %v4905_v31  ;;  %v3791_v1 = vpop.f32.mrb[148].mxu0  ;;  %v4129_v37 = vadd.f32 %v8792_v58, %v6423_v22  ;;  %v4120_v40 = vpop.f32.mrb[237].mxu1 }
 0x353   : > { %v6179_v51 = vpack.c.bf16 %v4904_v54, %v4903_v30  ;;  %v8924_v47 = vadd.f32 %v6629_v4, %v3791_v1  ;;  %v3793_v56 = vpop.f32.mrb[149].mxu0  ;;  %v4121_v3 = vadd.f32 %v8770_v25, %v4120_v40  ;;  %v6424_v55 = vpop.f32.mrb[238].mxu1 }
 0x354   : > { %6284 = vst [vmem:[%s8605_s20 + $0xe8] sm:$0xff] %v6184_v0   ;;  %v4293_v43 = vmax.f32 %v4129_v37, 0.0  ;;  %v3794_v26 = vpop.f32.mrb[150].mxu0  ;;  %v4132_v27 = vadd.f32 %v8798_v62, %v6424_v55  ;;  %v4123_v48 = vpop.f32.mrb[239].mxu1  ;;  %v6633_v62 = vadd.f32 %v8671_v12, %v9188_v42  ;;  %v9191_v55 = vld [vmem:[#allocation64_spill] sm:$0xff] }
 0x355   : > { %6283 = vst [vmem:[%s8605_s20 + $0xe0] sm:$0xff] %v6179_v51   ;;  %v4291_v36 = vmax.f32 %v4121_v3, 0.0  ;;  %v8930_v58 = vadd.f32 %v6631_v35, %v3794_v26  ;;  %v3796_v61 = vpop.f32.mrb[151].mxu0  ;;  %v4124_v50 = vadd.f32 %v8776_v32, %v4123_v48  ;;  %v8955_v56 = vpop.permute.xlu1 %4794 }
 0x356   : > { %v4294_v44 = vmax.f32 %v4132_v27, 0.0  ;;  %v4909_v25 = vmul.f32 %v8807_v10, %v4293_v43  ;;  %v9190_v10 = vld [vmem:[#allocation61_spill] sm:$0xff]  ;;  %v8961_v43 = vpop.permute.xlu0 %4789  ;;  %v9192_v27 = vld [vmem:[#allocation23_spill] sm:$0xff] }
 0x357   : > { %v4292_v63 = vmax.f32 %v4124_v50, 0.0  ;;  %v4907_v11 = vmul.f32 %v8785_v46, %v4291_v36 }
 0x358   : > { %v4910_v39 = vmul.f32 %v8801_v53, %v4294_v44  ;;  %v6635_v53 = vadd.f32 %v8671_v12, %v9190_v10 }
 0x359   : > { %v4908_v41 = vmul.f32 %v9189_v7, %v4292_v63  ;;  %v6427_v52 = vpop.f32.mrb[240].mxu1  ;;  %v4805_v10 = vpop.permute.xlu1 %4804 }
 0x35a   : > { %v6194_v32 = vpack.c.bf16 %v4910_v39, %v4909_v25  ;;  %v3799_v49 = vpop.f32.mrb[152].mxu0  ;;  %v4145_v5 = vadd.f32 %v8836_v33, %v6427_v52  ;;  %v4136_v31 = vpop.f32.mrb[241].mxu1 }
 0x35b   : > { %v6189_v19 = vpack.c.bf16 %v4908_v41, %v4907_v11  ;;  %v8946_v16 = vadd.f32 %v6633_v62, %v3799_v49  ;;  %v3801_v4 = vpop.f32.mrb[153].mxu0  ;;  %v4137_v30 = vadd.f32 %v8814_v38, %v4136_v31  ;;  %v6428_v54 = vpop.f32.mrb[242].mxu1 }
 0x35c   : > { %6286 = vst [vmem:[%s8605_s20 + $0xf8] sm:$0xff] %v6194_v32   ;;  %v4297_v46 = vmax.f32 %v4145_v5, 0.0  ;;  %v3802_v22 = vpop.f32.mrb[154].mxu0  ;;  %v4148_v0 = vadd.f32 %v8842_v59, %v6428_v54  ;;  %v4139_v1 = vpop.f32.mrb[243].mxu1  ;;  %v6637_v59 = vadd.f32 %v8671_v12, %v9191_v55 }
 0x35d   : > { %6285 = vst [vmem:[%s8605_s20 + $0xf0] sm:$0xff] %v6189_v19   ;;  %v4295_v37 = vmax.f32 %v4137_v30, 0.0  ;;  %v8952_v33 = vadd.f32 %v6635_v53, %v3802_v22  ;;  %v3804_v40 = vpop.f32.mrb[155].mxu0  ;;  %v4140_v29 = vadd.f32 %v8820_v23, %v4139_v1  ;;  %v9194_v19 = vld [vmem:[#allocation68_spill] sm:$0xff]  ;;  %v4800_v30 = vpop.permute.xlu0 %4799 }
 0x35e   : > { %v4298_v35 = vmax.f32 %v4148_v0, 0.0  ;;  %v4913_v38 = vmul.f32 %v8851_v15, %v4297_v46  ;;  %v9193_v15 = vld [vmem:[#allocation65_spill] sm:$0xff]  ;;  %v6641_v4 = vadd.f32 %v8671_v12, %v9194_v19 }
 0x35f   : > { %v4296_v51 = vmax.f32 %v4140_v29, 0.0  ;;  %v4911_v26 = vmul.f32 %v8829_v21, %v4295_v37  ;;  %v9195_v37 = vld [vmem:[#allocation69_spill] sm:$0xff] }
 0x360   : > { %v4914_v3 = vmul.f32 %v8845_v28, %v4298_v35  ;;  %v6639_v28 = vadd.f32 %v8671_v12, %v9193_v15 }
 0x361   : > { %v4912_v48 = vmul.f32 %v9192_v27, %v4296_v51  ;;  %v6431_v36 = vpop.f32.mrb[244].mxu1 }
 0x362   : > { %v6204_v23 = vpack.c.bf16 %v4914_v3, %v4913_v38  ;;  %v3807_v61 = vpop.f32.mrb[156].mxu0  ;;  %v4161_v50 = vadd.f32 %v8880_v34, %v6431_v36  ;;  %v4152_v44 = vpop.f32.mrb[245].mxu1 }
 0x363   : > { %v6199_v63 = vpack.c.bf16 %v4912_v48, %v4911_v26  ;;  %v6638_v25 = vadd.f32 %v6637_v59, %v3807_v61  ;;  %v3809_v39 = vpop.f32.mrb[157].mxu0  ;;  %v4153_v42 = vadd.f32 %v8858_v8, %v4152_v44  ;;  %v6432_v62 = vpop.f32.mrb[246].mxu1  ;;  %v9196_v61 = vld [vmem:[#allocation72_spill] sm:$0xff] }
 0x364   : > { %6288 = vst [vmem:[%s8605_s20 + $0x108] sm:$0xff] %v6204_v23   ;;  %v4301_v21 = vmax.f32 %v4161_v50, 0.0  ;;  %v3810_v11 = vpop.f32.mrb[158].mxu0  ;;  %v4164_v7 = vadd.f32 %v8886_v13, %v6432_v62  ;;  %v4155_v41 = vpop.f32.mrb[247].mxu1  ;;  %v6645_v50 = vadd.f32 %v8671_v12, %v9196_v61  ;;  %v9197_v62 = vld [vmem:[#allocation73_spill] sm:$0xff]  ;;  %v9200_v61 = vld [vmem:[#allocation82_spill] sm:$0xff] }
 0x365   : > { %6287 = vst [vmem:[%s8605_s20 + $0x100] sm:$0xff] %v6199_v63   ;;  %v4299_v52 = vmax.f32 %v4153_v42, 0.0  ;;  %v6640_v32 = vadd.f32 %v6639_v28, %v3810_v11  ;;  %v3812_v34 = vpop.f32.mrb[159].mxu0  ;;  %v4156_v49 = vadd.f32 %v8864_v24, %v4155_v41  ;;  %v8987_v36 = vpop.permute.xlu1 %4814 }
 0x366   : > { %v4302_v5 = vmax.f32 %v4164_v7, 0.0  ;;  %v4917_v53 = vmul.f32 %v8895_v17, %v4301_v21  ;;  %v6643_v17 = vadd.f32 %v8671_v12, %v9195_v37 }
 0x367   : > { %v4300_v31 = vmax.f32 %v4156_v49, 0.0  ;;  %v4915_v13 = vmul.f32 %v8873_v9, %v4299_v52 }
 0x368   : > { %v4918_v8 = vmul.f32 %v8889_v45, %v4302_v5 }
 0x369   : > { %v4916_v54 = vmul.f32 %v8867_v2, %v4300_v31  ;;  %v6435_v46 = vpop.f32.mrb[248].mxu1  ;;  %v4825_v19 = vpop.permute.xlu1 %4824 }
 0x36a   : > { %v6214_v22 = vpack.c.bf16 %v4918_v8, %v4917_v53  ;;  %v3815_v24 = vpop.f32.mrb[160].mxu0  ;;  %v4177_v0 = vadd.f32 %v8924_v47, %v6435_v46  ;;  %v4168_v1 = vpop.f32.mrb[249].mxu1 }
 0x36b   : > { %v6209_v45 = vpack.c.bf16 %v4916_v54, %v4915_v13  ;;  %v6642_v40 = vadd.f32 %v6641_v4, %v3815_v24  ;;  %v3817_v29 = vpop.f32.mrb[161].mxu0  ;;  %v4169_v35 = vadd.f32 %v8902_v18, %v4168_v1  ;;  %v6436_v51 = vpop.f32.mrb[250].mxu1  ;;  %v9198_v54 = vld [vmem:[#allocation76_spill] sm:$0xff] }
 0x36c   : > { %6290 = vst [vmem:[%s8605_s20 + $0x118] sm:$0xff] %v6214_v22   ;;  %v4305_v9 = vmax.f32 %v4177_v0, 0.0  ;;  %v3818_v38 = vpop.f32.mrb[162].mxu0  ;;  %v4180_v2 = vadd.f32 %v8930_v58, %v6436_v51  ;;  %v4171_v3 = vpop.f32.mrb[251].mxu1 }
 0x36d   : > { %6289 = vst [vmem:[%s8605_s20 + $0x110] sm:$0xff] %v6209_v45   ;;  %v4303_v55 = vmax.f32 %v4169_v35, 0.0  ;;  %v6644_v59 = vadd.f32 %v6643_v17, %v3818_v38  ;;  %v3820_v47 = vpop.f32.mrb[163].mxu0  ;;  %v4172_v26 = vadd.f32 %v8908_v60, %v4171_v3  ;;  %v4810_v58 = vpop.permute.xlu0 %4809  ;;  %v9199_v17 = vld [vmem:[#allocation78_spill] sm:$0xff] }
 0x36e   : > { %v4306_v27 = vmax.f32 %v4180_v2, 0.0  ;;  %v4921_v23 = vmul.f32 %v8939_v6, %v4305_v9  ;;  %v6647_v6 = vadd.f32 %v8671_v12, %v9197_v62  ;;  %v6651_v45 = vadd.f32 %v8671_v12, %v9199_v17 }
 0x36f   : > { %v4304_v48 = vmax.f32 %v4172_v26, 0.0  ;;  %v4919_v44 = vmul.f32 %v8917_v57, %v4303_v55 }
 0x370   : > { %v4922_v18 = vmul.f32 %v8933_v14, %v4306_v27 }
 0x371   : > { %v4920_v15 = vmul.f32 %v8911_v20, %v4304_v48  ;;  %v6439_v28 = vpop.f32.mrb[252].mxu1  ;;  %v4820_v46 = vpop.permute.xlu0 %4819 }
 0x372   : > { %v6224_v60 = vpack.c.bf16 %v4922_v18, %v4921_v23  ;;  %v3823_v63 = vpop.f32.mrb[164].mxu0  ;;  %v4193_v39 = vadd.f32 %v6638_v25, %v6439_v28  ;;  %v4184_v42 = vpop.f32.mrb[253].mxu1 }
 0x373   : > { %v6219_v21 = vpack.c.bf16 %v4920_v15, %v4919_v44  ;;  %v6646_v14 = vadd.f32 %v6645_v50, %v3823_v63  ;;  %v3825_v11 = vpop.f32.mrb[165].mxu0  ;;  %v4185_v7 = vadd.f32 %v8946_v16, %v4184_v42  ;;  %v6440_v41 = vpop.f32.mrb[254].mxu1  ;;  %v6649_v16 = vadd.f32 %v8671_v12, %v9198_v54  ;;  %v9201_v42 = vld [vmem:[#allocation83_spill] sm:$0xff] }
 0x374   : > { %6292 = vst [vmem:[%s8605_s20 + $0x128] sm:$0xff] %v6224_v60   ;;  %v4309_v52 = vmax.f32 %v4193_v39, 0.0  ;;  %v3826_v57 = vpop.f32.mrb[166].mxu0  ;;  %v4196_v34 = vadd.f32 %v6640_v32, %v6440_v41  ;;  %v4187_v20 = vpop.f32.mrb[255].mxu1 }
 0x375   : > { %6291 = vst [vmem:[%s8605_s20 + $0x120] sm:$0xff] %v6219_v21   ;;  %v4307_v49 = vmax.f32 %v4185_v7, 0.0  ;;  %v6648_v5 = vadd.f32 %v6647_v6, %v3826_v57  ;;  %v3828_v31 = vpop.f32.mrb[167].mxu0  ;;  %v4188_v25 = vadd.f32 %v8952_v33, %v4187_v20  ;;  %v4835_v48 = vpop.permute.xlu1 %4834 }
 0x376   : > { %v4310_v53 = vmax.f32 %v4196_v34, 0.0  ;;  %v4925_v4 = vmul.f32 %v4800_v30, %v4309_v52  ;;  %v4830_v50 = vpop.permute.xlu0 %4829 }
 0x377   : > { %v4308_v8 = vmax.f32 %v4188_v25, 0.0  ;;  %v4923_v22 = vmul.f32 %v8961_v43, %v4307_v49 }
 0x378   : > { %v4926_v13 = vmul.f32 %v4805_v10, %v4310_v53 }
 0x379   : > { %v4924_v32 = vmul.f32 %v8955_v56, %v4308_v8  ;;  %v6443_v24 = vpop.f32.mrb[0].mxu1  ;;  %v4845_v8 = vpop.permute.xlu1 %4844 }
 0x37a   : > { %v6234_v0 = vpack.c.bf16 %v4926_v13, %v4925_v4  ;;  %v3831_v1 = vpop.f32.mrb[168].mxu0  ;;  %v4209_v37 = vadd.f32 %v6646_v14, %v6443_v24  ;;  %v4200_v33 = vpop.f32.mrb[1].mxu1 }
 0x37b   : > { %v6229_v30 = vpack.c.bf16 %v4924_v32, %v4923_v22  ;;  %v6650_v10 = vadd.f32 %v6649_v16, %v3831_v1  ;;  %v3833_v29 = vpop.f32.mrb[169].mxu0  ;;  %v4201_v35 = vadd.f32 %v6642_v40, %v4200_v33  ;;  %v6444_v51 = vpop.f32.mrb[2].mxu1  ;;  %v6653_v40 = vadd.f32 %v8671_v12, %v9200_v61 }
 0x37c   : > { %6294 = vst [vmem:[%s8605_s20 + $0x138] sm:$0xff] %v6234_v0   ;;  %v4313_v9 = vmax.f32 %v4209_v37, 0.0  ;;  %v3834_v38 = vpop.f32.mrb[170].mxu0  ;;  %v4212_v43 = vadd.f32 %v6648_v5, %v6444_v51  ;;  %v4203_v2 = vpop.f32.mrb[3].mxu1 }
 0x37d   : > { %6293 = vst [vmem:[%s8605_s20 + $0x130] sm:$0xff] %v6229_v30   ;;  %v4311_v56 = vmax.f32 %v4201_v35, 0.0  ;;  %v6652_v3 = vadd.f32 %v6651_v45, %v3834_v38  ;;  %v3836_v55 = vpop.f32.mrb[171].mxu0  ;;  %v4204_v47 = vadd.f32 %v6644_v59, %v4203_v2  ;;  %v7340_v59 = vld [vmem:[%s9025_s2] ss:$0 sm:$0xff] }
 0x37e   : > { %v4314_v26 = vmax.f32 %v4212_v43, 0.0  ;;  %v4929_v23 = vmul.f32 %v4820_v46, %v4313_v9  ;;  %v6655_v62 = vadd.f32 %v7340_v59, %v9201_v42 }
 0x37f   : > { %v4312_v27 = vmax.f32 %v4204_v47, 0.0  ;;  %v4927_v44 = vmul.f32 %v4810_v58, %v4311_v56 }
 0x380   : > { %v4930_v18 = vmul.f32 %v4825_v19, %v4314_v26  ;;  %v4840_v19 = vpop.permute.xlu0 %4839 }
 0x381   : > { %v4928_v15 = vmul.f32 %v8987_v36, %v4312_v27  ;;  %v6447_v28 = vpop.f32.mrb[4].mxu1 }
 0x382   : > { %v6244_v60 = vpack.c.bf16 %v4930_v18, %v4929_v23  ;;  %v3839_v63 = vpop.f32.mrb[172].mxu0  ;;  %v4216_v39 = vpop.f32.mrb[5].mxu1 }
 0x383   : > { %v6239_v6 = vpack.c.bf16 %v4928_v15, %v4927_v44  ;;  %v6654_v21 = vadd.f32 %v6653_v40, %v3839_v63  ;;  %v3841_v14 = vpop.f32.mrb[173].mxu0  ;;  %v4217_v11 = vadd.f32 %v6650_v10, %v4216_v39  ;;  %v6448_v12 = vpop.f32.mrb[6].mxu1 }
 0x384   : > { %6296 = vst [vmem:[%s8605_s20 + $0x148] sm:$0xff] %v6244_v60   ;;  %v3842_v58 = vpop.f32.mrb[174].mxu0  ;;  %v4219_v7 = vpop.f32.mrb[7].mxu1 }
 0x385   : > { %6295 = vst [vmem:[%s8605_s20 + $0x140] sm:$0xff] %v6239_v6   ;;  %v4225_v36 = vadd.f32 %v6654_v21, %v6447_v28  ;;  %v4315_v41 = vmax.f32 %v4217_v11, 0.0  ;;  %v6656_v52 = vadd.f32 %v6655_v62, %v3842_v58  ;;  %v3844_v57 = vpop.f32.mrb[175].mxu0  ;;  %v4220_v34 = vadd.f32 %v6652_v3, %v4219_v7 }
 0x387   : > { %v4317_v20 = vmax.f32 %v4225_v36, 0.0  ;;  %v4228_v49 = vadd.f32 %v6656_v52, %v6448_v12  ;;  %v4316_v5 = vmax.f32 %v4220_v34, 0.0  ;;  %v4931_v31 = vmul.f32 %v4830_v50, %v4315_v41 }
 0x389   : > { %v4318_v25 = vmax.f32 %v4228_v49, 0.0  ;;  %v4932_v53 = vmul.f32 %v4835_v48, %v4316_v5  ;;  %v4933_v4 = vmul.f32 %v4840_v19, %v4317_v20 }
 0x38b   : > { %v4934_v13 = vmul.f32 %v4845_v8, %v4318_v25  ;;  %v6249_v54 = vpack.c.bf16 %v4932_v53, %v4931_v31 }
 0x38d   : > { %v6254_v16 = vpack.c.bf16 %v4934_v13, %v4933_v4  ;;  %6297 = vst [vmem:[%s8605_s20 + $0x150] sm:$0xff] %v6249_v54  }
 0x38f   : > { %6298 = vst [vmem:[%s8605_s20 + $0x158] sm:$0xff] %v6254_v16  }
 0x390 PF: > { %s14_s15 = sadd.s32 1, %s7347_s15  }
 0x391   : > { %p11_p4 = scmp.ge.s32.totalorder %s14_s15, 4  }
 0x393   :  { %13 = sbr.rel (!%p11_p4) target bundleno = 1 (0x1), region = 69 }

</bundles_post_ra>
